<compile_context>
chip_gen: v7x
topology: tpu7x:2x2x1
jax: 0.10.0
libtpu: 0.0.40
codegen_flags: <defaults>
</compile_context>

<pallas_src>
import numpy as np

import jax
import jax.numpy as jnp
from jax.experimental import pallas as pl
from jax.experimental.pallas import tpu as pltpu


LANE = 128
C_ENC = 16          # encoder channel count
EPS = 1e-5


def _pad_up(v, m):
    return ((v + m - 1) // m) * m


# ---------------------------------------------------------------------------
# Static geometry: 0/1 tap-selection matrices, taps concatenated along lanes,
# each tap block padded to `blk` lanes.  Every column has at most one nonzero,
# so bf16 storage and the post-gather bf16 cast are exact.
# ---------------------------------------------------------------------------

def _conv_sel(h, w, k, s, p, blk, out_index=None, in_index=None, in_lanes=None):
    """Forward Conv2d gather:  S[in_lane, t*blk + out_col] = 1."""
    oh = (h + 2 * p - k) // s + 1
    ow = (w + 2 * p - k) // s + 1
    n_in = in_lanes if in_lanes is not None else h * w
    sel = np.zeros((n_in, k * k * blk), np.float32)
    for a in range(oh):
        for b in range(ow):
            col = out_index(a, b) if out_index is not None else a * ow + b
            for i in range(k):
                hi = s * a + i - p
                if hi < 0 or hi >= h:
                    continue
                for j in range(k):
                    wi = s * b + j - p
                    if wi < 0 or wi >= w:
                        continue
                    lane = in_index(hi, wi) if in_index is not None else hi * w + wi
                    sel[lane, (i * k + j) * blk + col] = 1.0
    return sel, oh, ow


def _convT_sel(h, w, k, s, p, blk, in_index=None, in_lanes=None):
    """ConvTranspose2d gather (input dilation folded into the index math)."""
    oh = (h - 1) * s - 2 * p + k
    ow = (w - 1) * s - 2 * p + k
    q = k - 1 - p
    n_in = in_lanes if in_lanes is not None else h * w
    sel = np.zeros((n_in, k * k * blk), np.float32)
    for a in range(oh):
        for b in range(ow):
            col = a * ow + b
            for i in range(k):
                u = a + i - q
                if u < 0 or u % s != 0 or u // s >= h:
                    continue
                for j in range(k):
                    v = b + j - q
                    if v < 0 or v % s != 0 or v // s >= w:
                        continue
                    lane = (in_index(u // s, v // s) if in_index is not None
                            else (u // s) * w + (v // s))
                    sel[lane, (i * k + j) * blk + col] = 1.0
    return sel, oh, ow


# ---------------------------------------------------------------------------
# Parameter packing (one-time, outside the jit-hot path)
# ---------------------------------------------------------------------------

def _pack_mix(w_taps, n, ci_layout):
    """Per-tap channel mix (T, Co, Ci) -> (N*Co, T*N*ci_layout) for batch-major rows.

    Column (t, m, ci) multiplies im2col row (tap t, batch m, in-channel ci); entries
    for ci >= Ci are zero (used for the input-channel padding / 16->8 bridge).
    TODO(synk): O(batch^2) storage -- add a batch grid axis before scaling batch.
    """
    t, co, ci = w_taps.shape
    eye = np.eye(n, dtype=np.float32)
    blocks = []
    for tt in range(t):
        wt = np.zeros((co, ci_layout), np.float32)
        wt[:, :ci] = w_taps[tt]
        blocks.append(np.kron(eye, wt))                     # (n*Co, n*ci_layout)
    return np.concatenate(blocks, axis=1)                   # (n*Co, T*n*ci_layout)


_ARG_ORDER = ["s1", "w1", "b1", "g1", "be1",
              "s2", "w2", "b2", "g2", "be2",
              "s3", "w3", "b3",
              "s4", "w4", "b4",
              "s5", "w5", "b5"]


def pack_params(p, n):
    bf16 = jnp.bfloat16
    out = {}

    # conv1 output lanes permuted so the 4 taps of each 2x2 stride-2 pool window are
    # contiguous 25-lane blocks -> pool1 is 3 VPU maximums of contiguous slices.
    def pool_perm(oh, ow):
        return (2 * (oh % 2) + (ow % 2)) * 25 + (oh // 2) * 5 + (ow // 2)

    s1, _, _ = _conv_sel(28, 28, 3, 3, 1, LANE, out_index=pool_perm)        # (784, 9*128)
    s2, _, _ = _conv_sel(5, 5, 3, 2, 1, LANE)                               # (25, 9*128)
    # pool2 (2x2, stride 1 on 3x3) leaves its outputs on lanes {0,1,3,4} of a 5-lane
    # vector; dec1's gather reads exactly those lanes (lane 2 row is all-zero).
    s3, _, _ = _convT_sel(2, 2, 3, 2, 0, LANE,
                          in_index=lambda hi, wi: 3 * hi + wi, in_lanes=5)  # (5, 9*128)
    s4, _, _ = _convT_sel(5, 5, 5, 3, 1, 2 * LANE)                          # (25, 25*256)
    s5, _, _ = _convT_sel(15, 15, 2, 2, 1, _pad_up(784, LANE))              # (225, 4*896)
    out["s1"] = jnp.asarray(s1, bf16)
    out["s2"] = jnp.asarray(s2, bf16)
    out["s3"] = jnp.asarray(s3, bf16)
    out["s4"] = jnp.asarray(s4, bf16)
    out["s5"] = jnp.asarray(s5, bf16)

    def conv_taps(w):                    # Conv2d (Co,Ci,k,k) -> (k*k, Co, Ci)
        w = np.asarray(w, np.float32)
        k = w.shape[-1]
        return w.transpose(2, 3, 0, 1).reshape(k * k, w.shape[0], w.shape[1])

    def convT_taps(w):                   # ConvTranspose2d (Ci,Co,k,k) -> flipped fwd taps
        w = np.asarray(w, np.float32)
        k = w.shape[-1]
        return np.flip(w, (2, 3)).transpose(2, 3, 1, 0).reshape(k * k, w.shape[1], w.shape[0])

    out["w1"] = jnp.asarray(_pack_mix(conv_taps(p["conv1_w"]), n, 8), bf16)   # (16n, 9*8n)
    out["w2"] = jnp.asarray(_pack_mix(conv_taps(p["conv2_w"]), n, 16), bf16)  # (16n, 9*16n)
    # 16 -> 8 channel bridge folded into zeroed weight columns (ci >= 8).
    out["w3"] = jnp.asarray(_pack_mix(convT_taps(p["dec1_w"]), n, 16), bf16)  # (16n, 9*16n)
    out["w4"] = jnp.asarray(_pack_mix(convT_taps(p["dec2_w"]), n, 16), bf16)  # (8n, 25*16n)
    out["w5"] = jnp.asarray(_pack_mix(convT_taps(p["dec3_w"]), n, 8), bf16)   # (n, 4*8n)

    def bias_col(b):                     # (Co,) -> (N*Co, 1), batch-major rows
        return jnp.asarray(np.tile(np.asarray(b, np.float32), n)[:, None], jnp.float32)

    def chan_col(v):                     # per-channel (C,) -> (C, 1)
        return jnp.asarray(np.asarray(v, np.float32)[:, None], jnp.float32)

    out["b1"] = bias_col(p["conv1_b"])
    out["b2"] = bias_col(p["conv2_b"])
    out["b3"] = bias_col(p["dec1_b"])
    out["b4"] = bias_col(p["dec2_b"])
    out["b5"] = bias_col(p["dec3_b"])
    out["g1"], out["be1"] = chan_col(p["bn1_g"]), chan_col(p["bn1_b"])
    out["g2"], out["be2"] = chan_col(p["bn2_g"]), chan_col(p["bn2_b"])
    return out


# ---------------------------------------------------------------------------
# Fused Pallas kernel
# ---------------------------------------------------------------------------

def _conv_block(x_bf, s_ref, w_ref, taps, blk, width):
    """One (transposed) conv layer: single lane-dense gather matmul, aligned
    lanes->sublanes im2col restack (VMEM copies only), single mix matmul."""
    g = jnp.dot(x_bf, s_ref[...], preferred_element_type=jnp.float32)   # (CiN, taps*blk)
    gb = g.astype(jnp.bfloat16)          # exact: each element is one gathered bf16 value
    cols = jnp.concatenate([gb[:, t * blk:(t + 1) * blk] for t in range(taps)],
                           axis=0)                                       # (taps*CiN, blk)
    y = jnp.dot(w_ref[...], cols, preferred_element_type=jnp.float32)   # (CoN, blk)
    return y[:, :width]


def _batchnorm(y, g_ref, b_ref, n, c, eps=EPS):
    """Train-mode BatchNorm2d on batch-major rows (b*C + c) -- VPU/XLU only."""
    width = y.shape[1]
    inv_cnt = 1.0 / float(n * width)
    tot = jnp.zeros((c, 1), jnp.float32)
    for i in range(n):
        tot = tot + jnp.sum(y[i * c:(i + 1) * c, :], axis=1, keepdims=True)
    mean = tot * inv_cnt
    sq = jnp.zeros((c, 1), jnp.float32)
    for i in range(n):
        d = y[i * c:(i + 1) * c, :] - mean
        sq = sq + jnp.sum(d * d, axis=1, keepdims=True)
    var = sq * inv_cnt
    scale = g_ref[...] * jax.lax.rsqrt(var + eps)
    shift = b_ref[...] - mean * scale
    return jnp.concatenate([y[i * c:(i + 1) * c, :] * scale + shift for i in range(n)],
                           axis=0)


def _autoencoder_kernel(x_ref,
                        s1_ref, w1_ref, b1_ref, g1_ref, be1_ref,
                        s2_ref, w2_ref, b2_ref, g2_ref, be2_ref,
                        s3_ref, w3_ref, b3_ref,
                        s4_ref, w4_ref, b4_ref,
                        s5_ref, w5_ref, b5_ref,
                        o_ref):
    n = o_ref.shape[0]
    x = x_ref[...].astype(jnp.bfloat16)                                   # (8n, 784)

    # ---------------- encoder ----------------
    # Conv2d(1,16,3,s=3,p=1) + ReLU + BN + MaxPool(2,2)
    y = _conv_block(x, s1_ref, w1_ref, 9, LANE, 100) + b1_ref[...]        # (16n, 100)
    y = jnp.maximum(y, 0.0)
    y = _batchnorm(y, g1_ref, be1_ref, n, C_ENC)
    y = jnp.maximum(jnp.maximum(y[:, 0:25], y[:, 25:50]),
                    jnp.maximum(y[:, 50:75], y[:, 75:100]))               # (16n, 25)

    # Conv2d(16,16,3,s=2,p=1) + ReLU + BN + MaxPool(2,1)
    y = _conv_block(y.astype(jnp.bfloat16), s2_ref, w2_ref, 9, LANE, 9) + b2_ref[...]
    y = jnp.maximum(y, 0.0)
    y = _batchnorm(y, g2_ref, be2_ref, n, C_ENC)                          # (16n, 9)
    y = jnp.maximum(jnp.maximum(y[:, 0:5], y[:, 1:6]),
                    jnp.maximum(y[:, 3:8], y[:, 4:9]))                    # (16n, 5)

    # ---------------- decoder (16->8 bridge folded into w3) ----------------
    y = jnp.maximum(_conv_block(y.astype(jnp.bfloat16), s3_ref, w3_ref, 9, LANE, 25)
                    + b3_ref[...], 0.0)                                   # (16n, 25)
    y = jnp.maximum(_conv_block(y.astype(jnp.bfloat16), s4_ref, w4_ref, 25, 2 * LANE, 225)
                    + b4_ref[...], 0.0)                                   # (8n, 225)
    y = _conv_block(y.astype(jnp.bfloat16), s5_ref, w5_ref, 4, 896, 784) + b5_ref[...]
    o_ref[...] = jnp.tanh(y)                                              # (n, 784)


def autoencoder_forward(packed, x):
    n = x.shape[0]
    x2 = x.reshape(n, 28 * 28)
    # batch-major channel layout (row = b*8 + c); pad the single input channel to 8 so
    # every im2col sublane block is a whole bf16 (16,128) tile at n=2.
    xp = jnp.pad(x2[:, None, :], ((0, 0), (0, 7), (0, 0))).reshape(n * 8, 28 * 28)
    args = [xp] + [packed[k] for k in _ARG_ORDER]
    out = pl.pallas_call(
        _autoencoder_kernel,
        out_shape=jax.ShapeDtypeStruct((n, 28 * 28), jnp.float32),
        in_specs=[pl.BlockSpec(memory_space=pltpu.MemorySpace.VMEM)] * len(args),
        out_specs=pl.BlockSpec(memory_space=pltpu.MemorySpace.VMEM),
        compiler_params=pltpu.CompilerParams(
            # ~6 MiB actually used at n=2 (3.8 MiB constants + intermediates);
            # explicit budget so O(batch^2) growth fails loudly.
            vmem_limit_bytes=32 * 1024 * 1024),
    )(*args)
    return out.reshape(n, 1, 28, 28)


# ---------------------------------------------------------------------------
# Parameter init (PyTorch default-style uniform init), pure-JAX reference
# ---------------------------------------------------------------------------

def init_params(key):
    def uconv(k, shape, fan_in):
        bound = 1.0 / jnp.sqrt(float(fan_in))
        return jax.random.uniform(k, shape, jnp.float32, -bound, bound)

    ks = jax.random.split(key, 10)
    p = {}
    p["conv1_w"] = uconv(ks[0], (16, 1, 3, 3), 1 * 9)
    p["conv1_b"] = uconv(ks[1], (16,), 1 * 9)
    p["bn1_g"] = jnp.ones((16,), jnp.float32)
    p["bn1_b"] = jnp.zeros((16,), jnp.float32)
    p["conv2_w"] = uconv(ks[2], (16, 16, 3, 3), 16 * 9)
    p["conv2_b"] = uconv(ks[3], (16,), 16 * 9)
    p["bn2_g"] = jnp.ones((16,), jnp.float32)
    p["bn2_b"] = jnp.zeros((16,), jnp.float32)
    p["dec1_w"] = uconv(ks[4], (8, 16, 3, 3), 8 * 9)
    p["dec1_b"] = uconv(ks[5], (16,), 8 * 9)
    p["dec2_w"] = uconv(ks[6], (16, 8, 5, 5), 16 * 25)
    p["dec2_b"] = uconv(ks[7], (8,), 16 * 25)
    p["dec3_w"] = uconv(ks[8], (8, 1, 2, 2), 8 * 4)
    p["dec3_b"] = uconv(ks[9], (1,), 8 * 4)
    return p


def _ref_forward(p, x):
    """Pure-JAX/XLA reference (same bf16 operand rounding as the kernel, f32 accumulate)."""
    bf, f32 = jnp.bfloat16, jnp.float32

    def conv(x, w, b, s, pad):
        y = jax.lax.conv_general_dilated(
            x.astype(bf), w.astype(bf), (s, s), [(pad, pad), (pad, pad)],
            dimension_numbers=("NCHW", "OIHW", "NCHW"), preferred_element_type=f32)
        return y + b.reshape(1, -1, 1, 1)

    def convT(x, w, b, s, pad):
        k = w.shape[-1]
        q = k - 1 - pad
        w_eq = jnp.flip(w, axis=(2, 3)).transpose(1, 0, 2, 3)
        y = jax.lax.conv_general_dilated(
            x.astype(bf), w_eq.astype(bf), (1, 1), [(q, q), (q, q)], lhs_dilation=(s, s),
            dimension_numbers=("NCHW", "OIHW", "NCHW"), preferred_element_type=f32)
        return y + b.reshape(1, -1, 1, 1)

    def bn(x, g, b, eps=EPS):
        m = jnp.mean(x, axis=(0, 2, 3), keepdims=True)
        v = jnp.mean(jnp.square(x - m), axis=(0, 2, 3), keepdims=True)
        return g.reshape(1, -1, 1, 1) * (x - m) * jax.lax.rsqrt(v + eps) + b.reshape(1, -1, 1, 1)

    def pool(x, k, s):
        return jax.lax.reduce_window(x, -jnp.inf, jax.lax.max,
                                     (1, 1, k, k), (1, 1, s, s), "VALID")

    y = jnp.maximum(conv(x, p["conv1_w"], p["conv1_b"], 3, 1), 0.0)
    y = pool(bn(y, p["bn1_g"], p["bn1_b"]), 2, 2)
    y = jnp.maximum(conv(y, p["conv2_w"], p["conv2_b"], 2, 1), 0.0)
    y = pool(bn(y, p["bn2_g"], p["bn2_b"]), 2, 1)
    y = y[:, :8]
    y = jnp.maximum(convT(y, p["dec1_w"], p["dec1_b"], 2, 0), 0.0)
    y = jnp.maximum(convT(y, p["dec2_w"], p["dec2_b"], 3, 1), 0.0)
    y = jnp.tanh(convT(y, p["dec3_w"], p["dec3_b"], 2, 1))
    return y


# ---------------------------------------------------------------------------
# main
# ---------------------------------------------------------------------------

if __name__ == "__main__":
    key = jax.random.PRNGKey(0)
    k_param, k_x = jax.random.split(key)
    params = init_params(k_param)
    x = jax.random.normal(k_x, (2, 1, 28, 28), jnp.float32)     # MNIST-sized, batch=2

    packed = pack_params(params, n=x.shape[0])                  # one-time weight prep

    fwd = jax.jit(autoencoder_forward)
    y = jax.block_until_ready(fwd(packed, x))

    assert y.shape == (2, 1, 28, 28), y.shape
    assert bool(jnp.all(jnp.isfinite(y)))
    assert bool(jnp.all(jnp.abs(y) <= 1.0 + 1e-3))              # tanh output range

    # Cross-check against the pure-JAX/XLA reference (same bf16 operand rounding);
    # residual differences are f32 accumulation-order / rsqrt-approx noise only.
    y_ref = jax.block_until_ready(jax.jit(_ref_forward)(params, x))
    err = float(jnp.max(jnp.abs(y - y_ref)))
    assert err < 2e-2, f"mismatch vs reference: max abs err = {err}"

    print("KERNEL_OK")
</pallas_src>

<mosaic_0001>
module attributes {stable_mosaic.version = 11 : i64} {
  func.func @_autoencoder_kernel(%arg0: memref<16x784xf32, #tpu.memory_space<vmem>>, %arg1: memref<784x1152xbf16, #tpu.memory_space<vmem>>, %arg2: memref<32x144xbf16, #tpu.memory_space<vmem>>, %arg3: memref<32x1xf32, #tpu.memory_space<vmem>>, %arg4: memref<16x1xf32, #tpu.memory_space<vmem>>, %arg5: memref<16x1xf32, #tpu.memory_space<vmem>>, %arg6: memref<25x1152xbf16, #tpu.memory_space<vmem>>, %arg7: memref<32x288xbf16, #tpu.memory_space<vmem>>, %arg8: memref<32x1xf32, #tpu.memory_space<vmem>>, %arg9: memref<16x1xf32, #tpu.memory_space<vmem>>, %arg10: memref<16x1xf32, #tpu.memory_space<vmem>>, %arg11: memref<5x1152xbf16, #tpu.memory_space<vmem>>, %arg12: memref<32x288xbf16, #tpu.memory_space<vmem>>, %arg13: memref<32x1xf32, #tpu.memory_space<vmem>>, %arg14: memref<25x6400xbf16, #tpu.memory_space<vmem>>, %arg15: memref<16x800xbf16, #tpu.memory_space<vmem>>, %arg16: memref<16x1xf32, #tpu.memory_space<vmem>>, %arg17: memref<225x3584xbf16, #tpu.memory_space<vmem>>, %arg18: memref<2x64xbf16, #tpu.memory_space<vmem>>, %arg19: memref<2x1xf32, #tpu.memory_space<vmem>>, %arg20: memref<2x784xf32, #tpu.memory_space<vmem>>) attributes {dimension_semantics = [], scalar_prefetch = 0 : i64, scratch_operands = 0 : i64, tpu.core_type = #tpu.core_type<tc>} {
    %c0 = arith.constant 0 : index
    %c0_0 = arith.constant 0 : index
    %0 = vector.load %arg0[%c0, %c0_0] : memref<16x784xf32, #tpu.memory_space<vmem>>, vector<16x784xf32>
    %1 = arith.truncf %0 : vector<16x784xf32> to vector<16x784xbf16>
    %c0_1 = arith.constant 0 : index
    %c0_2 = arith.constant 0 : index
    %2 = vector.load %arg1[%c0_1, %c0_2] : memref<784x1152xbf16, #tpu.memory_space<vmem>>, vector<784x1152xbf16>
    %cst = arith.constant dense<0.000000e+00> : vector<16x1152xf32>
    %3 = tpu.matmul %1, %2, %cst {dimension_numbers = #tpu.dot_dimension_numbers<[1], [0], [0], [1], [0, 0, 1, 1], [], []>} : vector<16x784xbf16>, vector<784x1152xbf16>, vector<16x1152xf32> -> vector<16x1152xf32>
    %4 = arith.truncf %3 : vector<16x1152xf32> to vector<16x1152xbf16>
    %5 = vector.extract_strided_slice %4 {offsets = [0, 0], sizes = [16, 128], strides = [1, 1]} : vector<16x1152xbf16> to vector<16x128xbf16>
    %6 = vector.extract_strided_slice %4 {offsets = [0, 128], sizes = [16, 128], strides = [1, 1]} : vector<16x1152xbf16> to vector<16x128xbf16>
    %7 = vector.extract_strided_slice %4 {offsets = [0, 256], sizes = [16, 128], strides = [1, 1]} : vector<16x1152xbf16> to vector<16x128xbf16>
    %8 = vector.extract_strided_slice %4 {offsets = [0, 384], sizes = [16, 128], strides = [1, 1]} : vector<16x1152xbf16> to vector<16x128xbf16>
    %9 = vector.extract_strided_slice %4 {offsets = [0, 512], sizes = [16, 128], strides = [1, 1]} : vector<16x1152xbf16> to vector<16x128xbf16>
    %10 = vector.extract_strided_slice %4 {offsets = [0, 640], sizes = [16, 128], strides = [1, 1]} : vector<16x1152xbf16> to vector<16x128xbf16>
    %11 = vector.extract_strided_slice %4 {offsets = [0, 768], sizes = [16, 128], strides = [1, 1]} : vector<16x1152xbf16> to vector<16x128xbf16>
    %12 = vector.extract_strided_slice %4 {offsets = [0, 896], sizes = [16, 128], strides = [1, 1]} : vector<16x1152xbf16> to vector<16x128xbf16>
    %13 = vector.extract_strided_slice %4 {offsets = [0, 1024], sizes = [16, 128], strides = [1, 1]} : vector<16x1152xbf16> to vector<16x128xbf16>
    %14 = tpu.concatenate %5, %6, %7, %8, %9, %10, %11, %12, %13 in 0 : vector<16x128xbf16>, vector<16x128xbf16>, vector<16x128xbf16>, vector<16x128xbf16>, vector<16x128xbf16>, vector<16x128xbf16>, vector<16x128xbf16>, vector<16x128xbf16>, vector<16x128xbf16> -> vector<144x128xbf16>
    %c0_3 = arith.constant 0 : index
    %c0_4 = arith.constant 0 : index
    %15 = vector.load %arg2[%c0_3, %c0_4] : memref<32x144xbf16, #tpu.memory_space<vmem>>, vector<32x144xbf16>
    %cst_5 = arith.constant dense<0.000000e+00> : vector<32x128xf32>
    %16 = tpu.matmul %15, %14, %cst_5 {dimension_numbers = #tpu.dot_dimension_numbers<[1], [0], [0], [1], [0, 0, 1, 1], [], []>} : vector<32x144xbf16>, vector<144x128xbf16>, vector<32x128xf32> -> vector<32x128xf32>
    %17 = vector.extract_strided_slice %16 {offsets = [0, 0], sizes = [32, 100], strides = [1, 1]} : vector<32x128xf32> to vector<32x100xf32>
    %c0_6 = arith.constant 0 : index
    %c0_7 = arith.constant 0 : index
    %18 = vector.load %arg3[%c0_6, %c0_7] : memref<32x1xf32, #tpu.memory_space<vmem>>, vector<32x1xf32>
    %19 = vector.broadcast %18 : vector<32x1xf32> to vector<32x100xf32>
    %20 = arith.addf %17, %19 : vector<32x100xf32>
    %cst_8 = arith.constant 0.000000e+00 : f32
    %21 = vector.broadcast %cst_8 : f32 to vector<32x100xf32>
    %22 = arith.maximumf %20, %21 : vector<32x100xf32>
    %cst_9 = arith.constant 0.000000e+00 : f32
    %23 = vector.broadcast %cst_9 : f32 to vector<16x1xf32>
    %24 = vector.extract_strided_slice %22 {offsets = [0, 0], sizes = [16, 100], strides = [1, 1]} : vector<32x100xf32> to vector<16x100xf32>
    %cst_10 = arith.constant dense<0.000000e+00> : vector<16xf32>
    %25 = vector.multi_reduction <add>, %24, %cst_10 [1] : vector<16x100xf32> to vector<16xf32>
    %26 = vector.shape_cast %25 : vector<16xf32> to vector<16x1xf32>
    %27 = arith.addf %23, %26 : vector<16x1xf32>
    %28 = vector.extract_strided_slice %22 {offsets = [16, 0], sizes = [16, 100], strides = [1, 1]} : vector<32x100xf32> to vector<16x100xf32>
    %cst_11 = arith.constant dense<0.000000e+00> : vector<16xf32>
    %29 = vector.multi_reduction <add>, %28, %cst_11 [1] : vector<16x100xf32> to vector<16xf32>
    %30 = vector.shape_cast %29 : vector<16xf32> to vector<16x1xf32>
    %31 = arith.addf %27, %30 : vector<16x1xf32>
    %cst_12 = arith.constant 5.000000e-03 : f32
    %32 = vector.broadcast %cst_12 : f32 to vector<16x1xf32>
    %33 = arith.mulf %31, %32 : vector<16x1xf32>
    %cst_13 = arith.constant 0.000000e+00 : f32
    %34 = vector.broadcast %cst_13 : f32 to vector<16x1xf32>
    %35 = vector.extract_strided_slice %22 {offsets = [0, 0], sizes = [16, 100], strides = [1, 1]} : vector<32x100xf32> to vector<16x100xf32>
    %36 = vector.broadcast %33 : vector<16x1xf32> to vector<16x100xf32>
    %37 = arith.subf %35, %36 : vector<16x100xf32>
    %38 = arith.mulf %37, %37 : vector<16x100xf32>
    %cst_14 = arith.constant dense<0.000000e+00> : vector<16xf32>
    %39 = vector.multi_reduction <add>, %38, %cst_14 [1] : vector<16x100xf32> to vector<16xf32>
    %40 = vector.shape_cast %39 : vector<16xf32> to vector<16x1xf32>
    %41 = arith.addf %34, %40 : vector<16x1xf32>
    %42 = vector.extract_strided_slice %22 {offsets = [16, 0], sizes = [16, 100], strides = [1, 1]} : vector<32x100xf32> to vector<16x100xf32>
    %43 = vector.broadcast %33 : vector<16x1xf32> to vector<16x100xf32>
    %44 = arith.subf %42, %43 : vector<16x100xf32>
    %45 = arith.mulf %44, %44 : vector<16x100xf32>
    %cst_15 = arith.constant dense<0.000000e+00> : vector<16xf32>
    %46 = vector.multi_reduction <add>, %45, %cst_15 [1] : vector<16x100xf32> to vector<16xf32>
    %47 = vector.shape_cast %46 : vector<16xf32> to vector<16x1xf32>
    %48 = arith.addf %41, %47 : vector<16x1xf32>
    %cst_16 = arith.constant 5.000000e-03 : f32
    %49 = vector.broadcast %cst_16 : f32 to vector<16x1xf32>
    %50 = arith.mulf %48, %49 : vector<16x1xf32>
    %c0_17 = arith.constant 0 : index
    %c0_18 = arith.constant 0 : index
    %51 = vector.load %arg4[%c0_17, %c0_18] : memref<16x1xf32, #tpu.memory_space<vmem>>, vector<16x1xf32>
    %cst_19 = arith.constant 9.99999974E-6 : f32
    %52 = vector.broadcast %cst_19 : f32 to vector<16x1xf32>
    %53 = arith.addf %50, %52 : vector<16x1xf32>
    %54 = math.rsqrt %53 : vector<16x1xf32>
    %55 = arith.mulf %51, %54 : vector<16x1xf32>
    %c0_20 = arith.constant 0 : index
    %c0_21 = arith.constant 0 : index
    %56 = vector.load %arg5[%c0_20, %c0_21] : memref<16x1xf32, #tpu.memory_space<vmem>>, vector<16x1xf32>
    %57 = arith.mulf %33, %55 : vector<16x1xf32>
    %58 = arith.subf %56, %57 : vector<16x1xf32>
    %59 = vector.extract_strided_slice %22 {offsets = [0, 0], sizes = [16, 100], strides = [1, 1]} : vector<32x100xf32> to vector<16x100xf32>
    %60 = vector.broadcast %55 : vector<16x1xf32> to vector<16x100xf32>
    %61 = arith.mulf %59, %60 : vector<16x100xf32>
    %62 = vector.broadcast %58 : vector<16x1xf32> to vector<16x100xf32>
    %63 = arith.addf %61, %62 : vector<16x100xf32>
    %64 = vector.extract_strided_slice %22 {offsets = [16, 0], sizes = [16, 100], strides = [1, 1]} : vector<32x100xf32> to vector<16x100xf32>
    %65 = vector.broadcast %55 : vector<16x1xf32> to vector<16x100xf32>
    %66 = arith.mulf %64, %65 : vector<16x100xf32>
    %67 = vector.broadcast %58 : vector<16x1xf32> to vector<16x100xf32>
    %68 = arith.addf %66, %67 : vector<16x100xf32>
    %69 = tpu.concatenate %63, %68 in 0 : vector<16x100xf32>, vector<16x100xf32> -> vector<32x100xf32>
    %70 = vector.extract_strided_slice %69 {offsets = [0, 0], sizes = [32, 25], strides = [1, 1]} : vector<32x100xf32> to vector<32x25xf32>
    %71 = vector.extract_strided_slice %69 {offsets = [0, 25], sizes = [32, 25], strides = [1, 1]} : vector<32x100xf32> to vector<32x25xf32>
    %72 = arith.maximumf %70, %71 : vector<32x25xf32>
    %73 = vector.extract_strided_slice %69 {offsets = [0, 50], sizes = [32, 25], strides = [1, 1]} : vector<32x100xf32> to vector<32x25xf32>
    %74 = vector.extract_strided_slice %69 {offsets = [0, 75], sizes = [32, 25], strides = [1, 1]} : vector<32x100xf32> to vector<32x25xf32>
    %75 = arith.maximumf %73, %74 : vector<32x25xf32>
    %76 = arith.maximumf %72, %75 : vector<32x25xf32>
    %77 = arith.truncf %76 : vector<32x25xf32> to vector<32x25xbf16>
    %c0_22 = arith.constant 0 : index
    %c0_23 = arith.constant 0 : index
    %78 = vector.load %arg6[%c0_22, %c0_23] : memref<25x1152xbf16, #tpu.memory_space<vmem>>, vector<25x1152xbf16>
    %cst_24 = arith.constant dense<0.000000e+00> : vector<32x1152xf32>
    %79 = tpu.matmul %77, %78, %cst_24 {dimension_numbers = #tpu.dot_dimension_numbers<[1], [0], [0], [1], [0, 0, 1, 1], [], []>} : vector<32x25xbf16>, vector<25x1152xbf16>, vector<32x1152xf32> -> vector<32x1152xf32>
    %80 = arith.truncf %79 : vector<32x1152xf32> to vector<32x1152xbf16>
    %81 = vector.extract_strided_slice %80 {offsets = [0, 0], sizes = [32, 128], strides = [1, 1]} : vector<32x1152xbf16> to vector<32x128xbf16>
    %82 = vector.extract_strided_slice %80 {offsets = [0, 128], sizes = [32, 128], strides = [1, 1]} : vector<32x1152xbf16> to vector<32x128xbf16>
    %83 = vector.extract_strided_slice %80 {offsets = [0, 256], sizes = [32, 128], strides = [1, 1]} : vector<32x1152xbf16> to vector<32x128xbf16>
    %84 = vector.extract_strided_slice %80 {offsets = [0, 384], sizes = [32, 128], strides = [1, 1]} : vector<32x1152xbf16> to vector<32x128xbf16>
    %85 = vector.extract_strided_slice %80 {offsets = [0, 512], sizes = [32, 128], strides = [1, 1]} : vector<32x1152xbf16> to vector<32x128xbf16>
    %86 = vector.extract_strided_slice %80 {offsets = [0, 640], sizes = [32, 128], strides = [1, 1]} : vector<32x1152xbf16> to vector<32x128xbf16>
    %87 = vector.extract_strided_slice %80 {offsets = [0, 768], sizes = [32, 128], strides = [1, 1]} : vector<32x1152xbf16> to vector<32x128xbf16>
    %88 = vector.extract_strided_slice %80 {offsets = [0, 896], sizes = [32, 128], strides = [1, 1]} : vector<32x1152xbf16> to vector<32x128xbf16>
    %89 = vector.extract_strided_slice %80 {offsets = [0, 1024], sizes = [32, 128], strides = [1, 1]} : vector<32x1152xbf16> to vector<32x128xbf16>
    %90 = tpu.concatenate %81, %82, %83, %84, %85, %86, %87, %88, %89 in 0 : vector<32x128xbf16>, vector<32x128xbf16>, vector<32x128xbf16>, vector<32x128xbf16>, vector<32x128xbf16>, vector<32x128xbf16>, vector<32x128xbf16>, vector<32x128xbf16>, vector<32x128xbf16> -> vector<288x128xbf16>
    %c0_25 = arith.constant 0 : index
    %c0_26 = arith.constant 0 : index
    %91 = vector.load %arg7[%c0_25, %c0_26] : memref<32x288xbf16, #tpu.memory_space<vmem>>, vector<32x288xbf16>
    %cst_27 = arith.constant dense<0.000000e+00> : vector<32x128xf32>
    %92 = tpu.matmul %91, %90, %cst_27 {dimension_numbers = #tpu.dot_dimension_numbers<[1], [0], [0], [1], [0, 0, 1, 1], [], []>} : vector<32x288xbf16>, vector<288x128xbf16>, vector<32x128xf32> -> vector<32x128xf32>
    %93 = vector.extract_strided_slice %92 {offsets = [0, 0], sizes = [32, 9], strides = [1, 1]} : vector<32x128xf32> to vector<32x9xf32>
    %c0_28 = arith.constant 0 : index
    %c0_29 = arith.constant 0 : index
    %94 = vector.load %arg8[%c0_28, %c0_29] : memref<32x1xf32, #tpu.memory_space<vmem>>, vector<32x1xf32>
    %95 = vector.broadcast %94 : vector<32x1xf32> to vector<32x9xf32>
    %96 = arith.addf %93, %95 : vector<32x9xf32>
    %cst_30 = arith.constant 0.000000e+00 : f32
    %97 = vector.broadcast %cst_30 : f32 to vector<32x9xf32>
    %98 = arith.maximumf %96, %97 : vector<32x9xf32>
    %cst_31 = arith.constant 0.000000e+00 : f32
    %99 = vector.broadcast %cst_31 : f32 to vector<16x1xf32>
    %100 = vector.extract_strided_slice %98 {offsets = [0, 0], sizes = [16, 9], strides = [1, 1]} : vector<32x9xf32> to vector<16x9xf32>
    %cst_32 = arith.constant dense<0.000000e+00> : vector<16xf32>
    %101 = vector.multi_reduction <add>, %100, %cst_32 [1] : vector<16x9xf32> to vector<16xf32>
    %102 = vector.shape_cast %101 : vector<16xf32> to vector<16x1xf32>
    %103 = arith.addf %99, %102 : vector<16x1xf32>
    %104 = vector.extract_strided_slice %98 {offsets = [16, 0], sizes = [16, 9], strides = [1, 1]} : vector<32x9xf32> to vector<16x9xf32>
    %cst_33 = arith.constant dense<0.000000e+00> : vector<16xf32>
    %105 = vector.multi_reduction <add>, %104, %cst_33 [1] : vector<16x9xf32> to vector<16xf32>
    %106 = vector.shape_cast %105 : vector<16xf32> to vector<16x1xf32>
    %107 = arith.addf %103, %106 : vector<16x1xf32>
    %cst_34 = arith.constant 0.055555556 : f32
    %108 = vector.broadcast %cst_34 : f32 to vector<16x1xf32>
    %109 = arith.mulf %107, %108 : vector<16x1xf32>
    %cst_35 = arith.constant 0.000000e+00 : f32
    %110 = vector.broadcast %cst_35 : f32 to vector<16x1xf32>
    %111 = vector.extract_strided_slice %98 {offsets = [0, 0], sizes = [16, 9], strides = [1, 1]} : vector<32x9xf32> to vector<16x9xf32>
    %112 = vector.broadcast %109 : vector<16x1xf32> to vector<16x9xf32>
    %113 = arith.subf %111, %112 : vector<16x9xf32>
    %114 = arith.mulf %113, %113 : vector<16x9xf32>
    %cst_36 = arith.constant dense<0.000000e+00> : vector<16xf32>
    %115 = vector.multi_reduction <add>, %114, %cst_36 [1] : vector<16x9xf32> to vector<16xf32>
    %116 = vector.shape_cast %115 : vector<16xf32> to vector<16x1xf32>
    %117 = arith.addf %110, %116 : vector<16x1xf32>
    %118 = vector.extract_strided_slice %98 {offsets = [16, 0], sizes = [16, 9], strides = [1, 1]} : vector<32x9xf32> to vector<16x9xf32>
    %119 = vector.broadcast %109 : vector<16x1xf32> to vector<16x9xf32>
    %120 = arith.subf %118, %119 : vector<16x9xf32>
    %121 = arith.mulf %120, %120 : vector<16x9xf32>
    %cst_37 = arith.constant dense<0.000000e+00> : vector<16xf32>
    %122 = vector.multi_reduction <add>, %121, %cst_37 [1] : vector<16x9xf32> to vector<16xf32>
    %123 = vector.shape_cast %122 : vector<16xf32> to vector<16x1xf32>
    %124 = arith.addf %117, %123 : vector<16x1xf32>
    %cst_38 = arith.constant 0.055555556 : f32
    %125 = vector.broadcast %cst_38 : f32 to vector<16x1xf32>
    %126 = arith.mulf %124, %125 : vector<16x1xf32>
    %c0_39 = arith.constant 0 : index
    %c0_40 = arith.constant 0 : index
    %127 = vector.load %arg9[%c0_39, %c0_40] : memref<16x1xf32, #tpu.memory_space<vmem>>, vector<16x1xf32>
    %cst_41 = arith.constant 9.99999974E-6 : f32
    %128 = vector.broadcast %cst_41 : f32 to vector<16x1xf32>
    %129 = arith.addf %126, %128 : vector<16x1xf32>
    %130 = math.rsqrt %129 : vector<16x1xf32>
    %131 = arith.mulf %127, %130 : vector<16x1xf32>
    %c0_42 = arith.constant 0 : index
    %c0_43 = arith.constant 0 : index
    %132 = vector.load %arg10[%c0_42, %c0_43] : memref<16x1xf32, #tpu.memory_space<vmem>>, vector<16x1xf32>
    %133 = arith.mulf %109, %131 : vector<16x1xf32>
    %134 = arith.subf %132, %133 : vector<16x1xf32>
    %135 = vector.extract_strided_slice %98 {offsets = [0, 0], sizes = [16, 9], strides = [1, 1]} : vector<32x9xf32> to vector<16x9xf32>
    %136 = vector.broadcast %131 : vector<16x1xf32> to vector<16x9xf32>
    %137 = arith.mulf %135, %136 : vector<16x9xf32>
    %138 = vector.broadcast %134 : vector<16x1xf32> to vector<16x9xf32>
    %139 = arith.addf %137, %138 : vector<16x9xf32>
    %140 = vector.extract_strided_slice %98 {offsets = [16, 0], sizes = [16, 9], strides = [1, 1]} : vector<32x9xf32> to vector<16x9xf32>
    %141 = vector.broadcast %131 : vector<16x1xf32> to vector<16x9xf32>
    %142 = arith.mulf %140, %141 : vector<16x9xf32>
    %143 = vector.broadcast %134 : vector<16x1xf32> to vector<16x9xf32>
    %144 = arith.addf %142, %143 : vector<16x9xf32>
    %145 = tpu.concatenate %139, %144 in 0 : vector<16x9xf32>, vector<16x9xf32> -> vector<32x9xf32>
    %146 = vector.extract_strided_slice %145 {offsets = [0, 0], sizes = [32, 5], strides = [1, 1]} : vector<32x9xf32> to vector<32x5xf32>
    %147 = vector.extract_strided_slice %145 {offsets = [0, 1], sizes = [32, 5], strides = [1, 1]} : vector<32x9xf32> to vector<32x5xf32>
    %148 = arith.maximumf %146, %147 : vector<32x5xf32>
    %149 = vector.extract_strided_slice %145 {offsets = [0, 3], sizes = [32, 5], strides = [1, 1]} : vector<32x9xf32> to vector<32x5xf32>
    %150 = vector.extract_strided_slice %145 {offsets = [0, 4], sizes = [32, 5], strides = [1, 1]} : vector<32x9xf32> to vector<32x5xf32>
    %151 = arith.maximumf %149, %150 : vector<32x5xf32>
    %152 = arith.maximumf %148, %151 : vector<32x5xf32>
    %153 = arith.truncf %152 : vector<32x5xf32> to vector<32x5xbf16>
    %c0_44 = arith.constant 0 : index
    %c0_45 = arith.constant 0 : index
    %154 = vector.load %arg11[%c0_44, %c0_45] : memref<5x1152xbf16, #tpu.memory_space<vmem>>, vector<5x1152xbf16>
    %cst_46 = arith.constant dense<0.000000e+00> : vector<32x1152xf32>
    %155 = tpu.matmul %153, %154, %cst_46 {dimension_numbers = #tpu.dot_dimension_numbers<[1], [0], [0], [1], [0, 0, 1, 1], [], []>} : vector<32x5xbf16>, vector<5x1152xbf16>, vector<32x1152xf32> -> vector<32x1152xf32>
    %156 = arith.truncf %155 : vector<32x1152xf32> to vector<32x1152xbf16>
    %157 = vector.extract_strided_slice %156 {offsets = [0, 0], sizes = [32, 128], strides = [1, 1]} : vector<32x1152xbf16> to vector<32x128xbf16>
    %158 = vector.extract_strided_slice %156 {offsets = [0, 128], sizes = [32, 128], strides = [1, 1]} : vector<32x1152xbf16> to vector<32x128xbf16>
    %159 = vector.extract_strided_slice %156 {offsets = [0, 256], sizes = [32, 128], strides = [1, 1]} : vector<32x1152xbf16> to vector<32x128xbf16>
    %160 = vector.extract_strided_slice %156 {offsets = [0, 384], sizes = [32, 128], strides = [1, 1]} : vector<32x1152xbf16> to vector<32x128xbf16>
    %161 = vector.extract_strided_slice %156 {offsets = [0, 512], sizes = [32, 128], strides = [1, 1]} : vector<32x1152xbf16> to vector<32x128xbf16>
    %162 = vector.extract_strided_slice %156 {offsets = [0, 640], sizes = [32, 128], strides = [1, 1]} : vector<32x1152xbf16> to vector<32x128xbf16>
    %163 = vector.extract_strided_slice %156 {offsets = [0, 768], sizes = [32, 128], strides = [1, 1]} : vector<32x1152xbf16> to vector<32x128xbf16>
    %164 = vector.extract_strided_slice %156 {offsets = [0, 896], sizes = [32, 128], strides = [1, 1]} : vector<32x1152xbf16> to vector<32x128xbf16>
    %165 = vector.extract_strided_slice %156 {offsets = [0, 1024], sizes = [32, 128], strides = [1, 1]} : vector<32x1152xbf16> to vector<32x128xbf16>
    %166 = tpu.concatenate %157, %158, %159, %160, %161, %162, %163, %164, %165 in 0 : vector<32x128xbf16>, vector<32x128xbf16>, vector<32x128xbf16>, vector<32x128xbf16>, vector<32x128xbf16>, vector<32x128xbf16>, vector<32x128xbf16>, vector<32x128xbf16>, vector<32x128xbf16> -> vector<288x128xbf16>
    %c0_47 = arith.constant 0 : index
    %c0_48 = arith.constant 0 : index
    %167 = vector.load %arg12[%c0_47, %c0_48] : memref<32x288xbf16, #tpu.memory_space<vmem>>, vector<32x288xbf16>
    %cst_49 = arith.constant dense<0.000000e+00> : vector<32x128xf32>
    %168 = tpu.matmul %167, %166, %cst_49 {dimension_numbers = #tpu.dot_dimension_numbers<[1], [0], [0], [1], [0, 0, 1, 1], [], []>} : vector<32x288xbf16>, vector<288x128xbf16>, vector<32x128xf32> -> vector<32x128xf32>
    %169 = vector.extract_strided_slice %168 {offsets = [0, 0], sizes = [32, 25], strides = [1, 1]} : vector<32x128xf32> to vector<32x25xf32>
    %c0_50 = arith.constant 0 : index
    %c0_51 = arith.constant 0 : index
    %170 = vector.load %arg13[%c0_50, %c0_51] : memref<32x1xf32, #tpu.memory_space<vmem>>, vector<32x1xf32>
    %171 = vector.broadcast %170 : vector<32x1xf32> to vector<32x25xf32>
    %172 = arith.addf %169, %171 : vector<32x25xf32>
    %cst_52 = arith.constant 0.000000e+00 : f32
    %173 = vector.broadcast %cst_52 : f32 to vector<32x25xf32>
    %174 = arith.maximumf %172, %173 : vector<32x25xf32>
    %175 = arith.truncf %174 : vector<32x25xf32> to vector<32x25xbf16>
    %c0_53 = arith.constant 0 : index
    %c0_54 = arith.constant 0 : index
    %176 = vector.load %arg14[%c0_53, %c0_54] : memref<25x6400xbf16, #tpu.memory_space<vmem>>, vector<25x6400xbf16>
    %cst_55 = arith.constant dense<0.000000e+00> : vector<32x6400xf32>
    %177 = tpu.matmul %175, %176, %cst_55 {dimension_numbers = #tpu.dot_dimension_numbers<[1], [0], [0], [1], [0, 0, 1, 1], [], []>} : vector<32x25xbf16>, vector<25x6400xbf16>, vector<32x6400xf32> -> vector<32x6400xf32>
    %178 = arith.truncf %177 : vector<32x6400xf32> to vector<32x6400xbf16>
    %179 = vector.extract_strided_slice %178 {offsets = [0, 0], sizes = [32, 256], strides = [1, 1]} : vector<32x6400xbf16> to vector<32x256xbf16>
    %180 = vector.extract_strided_slice %178 {offsets = [0, 256], sizes = [32, 256], strides = [1, 1]} : vector<32x6400xbf16> to vector<32x256xbf16>
    %181 = vector.extract_strided_slice %178 {offsets = [0, 512], sizes = [32, 256], strides = [1, 1]} : vector<32x6400xbf16> to vector<32x256xbf16>
    %182 = vector.extract_strided_slice %178 {offsets = [0, 768], sizes = [32, 256], strides = [1, 1]} : vector<32x6400xbf16> to vector<32x256xbf16>
    %183 = vector.extract_strided_slice %178 {offsets = [0, 1024], sizes = [32, 256], strides = [1, 1]} : vector<32x6400xbf16> to vector<32x256xbf16>
    %184 = vector.extract_strided_slice %178 {offsets = [0, 1280], sizes = [32, 256], strides = [1, 1]} : vector<32x6400xbf16> to vector<32x256xbf16>
    %185 = vector.extract_strided_slice %178 {offsets = [0, 1536], sizes = [32, 256], strides = [1, 1]} : vector<32x6400xbf16> to vector<32x256xbf16>
    %186 = vector.extract_strided_slice %178 {offsets = [0, 1792], sizes = [32, 256], strides = [1, 1]} : vector<32x6400xbf16> to vector<32x256xbf16>
    %187 = vector.extract_strided_slice %178 {offsets = [0, 2048], sizes = [32, 256], strides = [1, 1]} : vector<32x6400xbf16> to vector<32x256xbf16>
    %188 = vector.extract_strided_slice %178 {offsets = [0, 2304], sizes = [32, 256], strides = [1, 1]} : vector<32x6400xbf16> to vector<32x256xbf16>
    %189 = vector.extract_strided_slice %178 {offsets = [0, 2560], sizes = [32, 256], strides = [1, 1]} : vector<32x6400xbf16> to vector<32x256xbf16>
    %190 = vector.extract_strided_slice %178 {offsets = [0, 2816], sizes = [32, 256], strides = [1, 1]} : vector<32x6400xbf16> to vector<32x256xbf16>
    %191 = vector.extract_strided_slice %178 {offsets = [0, 3072], sizes = [32, 256], strides = [1, 1]} : vector<32x6400xbf16> to vector<32x256xbf16>
    %192 = vector.extract_strided_slice %178 {offsets = [0, 3328], sizes = [32, 256], strides = [1, 1]} : vector<32x6400xbf16> to vector<32x256xbf16>
    %193 = vector.extract_strided_slice %178 {offsets = [0, 3584], sizes = [32, 256], strides = [1, 1]} : vector<32x6400xbf16> to vector<32x256xbf16>
    %194 = vector.extract_strided_slice %178 {offsets = [0, 3840], sizes = [32, 256], strides = [1, 1]} : vector<32x6400xbf16> to vector<32x256xbf16>
    %195 = vector.extract_strided_slice %178 {offsets = [0, 4096], sizes = [32, 256], strides = [1, 1]} : vector<32x6400xbf16> to vector<32x256xbf16>
    %196 = vector.extract_strided_slice %178 {offsets = [0, 4352], sizes = [32, 256], strides = [1, 1]} : vector<32x6400xbf16> to vector<32x256xbf16>
    %197 = vector.extract_strided_slice %178 {offsets = [0, 4608], sizes = [32, 256], strides = [1, 1]} : vector<32x6400xbf16> to vector<32x256xbf16>
    %198 = vector.extract_strided_slice %178 {offsets = [0, 4864], sizes = [32, 256], strides = [1, 1]} : vector<32x6400xbf16> to vector<32x256xbf16>
    %199 = vector.extract_strided_slice %178 {offsets = [0, 5120], sizes = [32, 256], strides = [1, 1]} : vector<32x6400xbf16> to vector<32x256xbf16>
    %200 = vector.extract_strided_slice %178 {offsets = [0, 5376], sizes = [32, 256], strides = [1, 1]} : vector<32x6400xbf16> to vector<32x256xbf16>
    %201 = vector.extract_strided_slice %178 {offsets = [0, 5632], sizes = [32, 256], strides = [1, 1]} : vector<32x6400xbf16> to vector<32x256xbf16>
    %202 = vector.extract_strided_slice %178 {offsets = [0, 5888], sizes = [32, 256], strides = [1, 1]} : vector<32x6400xbf16> to vector<32x256xbf16>
    %203 = vector.extract_strided_slice %178 {offsets = [0, 6144], sizes = [32, 256], strides = [1, 1]} : vector<32x6400xbf16> to vector<32x256xbf16>
    %204 = tpu.concatenate %179, %180, %181, %182, %183, %184, %185, %186, %187, %188, %189, %190, %191, %192, %193, %194 in 0 : vector<32x256xbf16>, vector<32x256xbf16>, vector<32x256xbf16>, vector<32x256xbf16>, vector<32x256xbf16>, vector<32x256xbf16>, vector<32x256xbf16>, vector<32x256xbf16>, vector<32x256xbf16>, vector<32x256xbf16>, vector<32x256xbf16>, vector<32x256xbf16>, vector<32x256xbf16>, vector<32x256xbf16>, vector<32x256xbf16>, vector<32x256xbf16> -> vector<512x256xbf16>
    %205 = tpu.concatenate %195, %196, %197, %198, %199, %200, %201, %202, %203 in 0 : vector<32x256xbf16>, vector<32x256xbf16>, vector<32x256xbf16>, vector<32x256xbf16>, vector<32x256xbf16>, vector<32x256xbf16>, vector<32x256xbf16>, vector<32x256xbf16>, vector<32x256xbf16> -> vector<288x256xbf16>
    %206 = tpu.concatenate %204, %205 in 0 : vector<512x256xbf16>, vector<288x256xbf16> -> vector<800x256xbf16>
    %c0_56 = arith.constant 0 : index
    %c0_57 = arith.constant 0 : index
    %207 = vector.load %arg15[%c0_56, %c0_57] : memref<16x800xbf16, #tpu.memory_space<vmem>>, vector<16x800xbf16>
    %cst_58 = arith.constant dense<0.000000e+00> : vector<16x256xf32>
    %208 = tpu.matmul %207, %206, %cst_58 {dimension_numbers = #tpu.dot_dimension_numbers<[1], [0], [0], [1], [0, 0, 1, 1], [], []>} : vector<16x800xbf16>, vector<800x256xbf16>, vector<16x256xf32> -> vector<16x256xf32>
    %209 = vector.extract_strided_slice %208 {offsets = [0, 0], sizes = [16, 225], strides = [1, 1]} : vector<16x256xf32> to vector<16x225xf32>
    %c0_59 = arith.constant 0 : index
    %c0_60 = arith.constant 0 : index
    %210 = vector.load %arg16[%c0_59, %c0_60] : memref<16x1xf32, #tpu.memory_space<vmem>>, vector<16x1xf32>
    %211 = vector.broadcast %210 : vector<16x1xf32> to vector<16x225xf32>
    %212 = arith.addf %209, %211 : vector<16x225xf32>
    %cst_61 = arith.constant 0.000000e+00 : f32
    %213 = vector.broadcast %cst_61 : f32 to vector<16x225xf32>
    %214 = arith.maximumf %212, %213 : vector<16x225xf32>
    %215 = arith.truncf %214 : vector<16x225xf32> to vector<16x225xbf16>
    %c0_62 = arith.constant 0 : index
    %c0_63 = arith.constant 0 : index
    %216 = vector.load %arg17[%c0_62, %c0_63] : memref<225x3584xbf16, #tpu.memory_space<vmem>>, vector<225x3584xbf16>
    %cst_64 = arith.constant dense<0.000000e+00> : vector<16x3584xf32>
    %217 = tpu.matmul %215, %216, %cst_64 {dimension_numbers = #tpu.dot_dimension_numbers<[1], [0], [0], [1], [0, 0, 1, 1], [], []>} : vector<16x225xbf16>, vector<225x3584xbf16>, vector<16x3584xf32> -> vector<16x3584xf32>
    %218 = arith.truncf %217 : vector<16x3584xf32> to vector<16x3584xbf16>
    %219 = vector.extract_strided_slice %218 {offsets = [0, 0], sizes = [16, 896], strides = [1, 1]} : vector<16x3584xbf16> to vector<16x896xbf16>
    %220 = vector.extract_strided_slice %218 {offsets = [0, 896], sizes = [16, 896], strides = [1, 1]} : vector<16x3584xbf16> to vector<16x896xbf16>
    %221 = vector.extract_strided_slice %218 {offsets = [0, 1792], sizes = [16, 896], strides = [1, 1]} : vector<16x3584xbf16> to vector<16x896xbf16>
    %222 = vector.extract_strided_slice %218 {offsets = [0, 2688], sizes = [16, 896], strides = [1, 1]} : vector<16x3584xbf16> to vector<16x896xbf16>
    %223 = tpu.concatenate %219, %220, %221, %222 in 0 : vector<16x896xbf16>, vector<16x896xbf16>, vector<16x896xbf16>, vector<16x896xbf16> -> vector<64x896xbf16>
    %c0_65 = arith.constant 0 : index
    %c0_66 = arith.constant 0 : index
    %224 = vector.load %arg18[%c0_65, %c0_66] : memref<2x64xbf16, #tpu.memory_space<vmem>>, vector<2x64xbf16>
    %cst_67 = arith.constant dense<0.000000e+00> : vector<2x896xf32>
    %225 = tpu.matmul %224, %223, %cst_67 {dimension_numbers = #tpu.dot_dimension_numbers<[1], [0], [0], [1], [0, 0, 1, 1], [], []>} : vector<2x64xbf16>, vector<64x896xbf16>, vector<2x896xf32> -> vector<2x896xf32>
    %226 = vector.extract_strided_slice %225 {offsets = [0, 0], sizes = [2, 784], strides = [1, 1]} : vector<2x896xf32> to vector<2x784xf32>
    %c0_68 = arith.constant 0 : index
    %c0_69 = arith.constant 0 : index
    %227 = vector.load %arg19[%c0_68, %c0_69] : memref<2x1xf32, #tpu.memory_space<vmem>>, vector<2x1xf32>
    %228 = vector.broadcast %227 : vector<2x1xf32> to vector<2x784xf32>
    %229 = arith.addf %226, %228 : vector<2x784xf32>
    %230 = math.tanh %229 : vector<2x784xf32>
    %c0_70 = arith.constant 0 : index
    %c0_71 = arith.constant 0 : index
    %231 = vector.load %arg20[%c0_70, %c0_71] : memref<2x784xf32, #tpu.memory_space<vmem>>, vector<2x784xf32>
    tpu.vector_store %arg20[%c0_70, %c0_71], %230 {strides = array<i32>} : memref<2x784xf32, #tpu.memory_space<vmem>>, vector<2x784xf32>,
    return
  }
}

</mosaic_0001>

<bundles_post_ra>
// kernel: autoencoder_forward.1
= control target key start
LH: loop header
LB: loop body
LE: loop exit
PB: predicated region body
PF: predicated region fallthrough
CT: control target
= control target key end

     0   :  { %s15494_s0 = inlined_call_operand.vmem [shape: f32[16,784], index: 0, kind: input, shape index: {}]   ;;  %s15495_s1 = inlined_call_operand.hbm [shape: bf16[784,1152], index: 1, kind: input, shape index: {}]   ;;  %s15496_s2 = inlined_call_operand.hbm [shape: bf16[32,144], index: 2, kind: input, shape index: {}]   ;;  %s15497_s3 = inlined_call_operand.vmem [shape: f32[32,1], index: 3, kind: input, shape index: {}]   ;;  %s15498_s4 = inlined_call_operand.vmem [shape: f32[16,1], index: 4, kind: input, shape index: {}]   ;;  %s15499_s5 = inlined_call_operand.vmem [shape: f32[16,1], index: 5, kind: input, shape index: {}]   ;;  %s15500_s6 = inlined_call_operand.hbm [shape: bf16[25,1152], index: 6, kind: input, shape index: {}]   ;;  %s15501_s7 = inlined_call_operand.hbm [shape: bf16[32,288], index: 7, kind: input, shape index: {}]   ;;  %s15502_s8 = inlined_call_operand.vmem [shape: f32[32,1], index: 8, kind: input, shape index: {}]   ;;  %s15503_s9 = inlined_call_operand.vmem [shape: f32[16,1], index: 9, kind: input, shape index: {}]   ;;  %s15504_s10 = inlined_call_operand.vmem [shape: f32[16,1], index: 10, kind: input, shape index: {}]   ;;  %s15505_s11 = inlined_call_operand.hbm [shape: bf16[5,1152], index: 11, kind: input, shape index: {}]   ;;  %s15506_s12 = inlined_call_operand.hbm [shape: bf16[32,288], index: 12, kind: input, shape index: {}]   ;;  %s15507_s13 = inlined_call_operand.vmem [shape: f32[32,1], index: 13, kind: input, shape index: {}]   ;;  %s15508_s14 = inlined_call_operand.hbm [shape: bf16[25,6400], index: 14, kind: input, shape index: {}]   ;;  %s15509_s15 = inlined_call_operand.hbm [shape: bf16[16,800], index: 15, kind: input, shape index: {}]   ;;  %s15510_s16 = inlined_call_operand.vmem [shape: f32[16,1], index: 16, kind: input, shape index: {}]   ;;  %s15511_s17 = inlined_call_operand.hbm [shape: bf16[225,3584], index: 17, kind: input, shape index: {}]   ;;  %s15512_s18 = inlined_call_operand.hbm [shape: bf16[2,64], index: 18, kind: input, shape index: {}]   ;;  %s15513_s19 = inlined_call_operand.vmem [shape: f32[2,1], index: 19, kind: input, shape index: {}]   ;;  %s15514_s20 = inlined_call_operand.vmem [shape: f32[2,784], index: 20, kind: output, shape index: {}]  }
   0x1   :  { %15521 = sst [smem:[#allocation24_spill]] %s15494_s0 }
   0x2   :  { %15522 = sst [smem:[#allocation25_spill]] %s15495_s1 }
   0x3   :  { %15523 = sst [smem:[#allocation26_spill]] %s15496_s2 }
   0x4   :  { %15524 = sst [smem:[#allocation27_spill]] %s15497_s3 }
   0x5   :  { %15525 = sst [smem:[#allocation28_spill]] %s15498_s4 }
   0x6   :  { %15526 = sst [smem:[#allocation29_spill]] %s15514_s20 }
   0x7   :  { %25 = vsyncpa [#allocation3], 0 }
   0x8   :  { %26 = vsyncpa [#allocation5], 0 }
   0x9   :  { %27 = vsyncpa [#allocation8], 0 }
   0xa   :  { %28 = vsyncpa [#allocation11], 0 }
   0xb   :  { %29 = vsyncpa [#allocation14], 0 }
   0xc   :  { %30 = vsyncpa [#allocation17], 0  ;;  %s14245_s1 = smov [#allocation4]   ;;  %s15527_s2 = sld [smem:[#allocation26_spill]] }
   0xd   :  { %s50_s22 = sshll.u32 %s14245_s1, 4  ;;  %s51_s22 = int_to_ptr.vmem [resolvable:$true] %s50_s22 }
  0x12   :  { %s14013_s25 = scalar_lea.hbm %s15527_s2, 512 }
  0x13   :  { %p14014_p0 = scmp.ne.s32.totalorder %s15527_s2, %s14013_s25  ;;  %p14017_p1 = scmp.lt.u32.totalorder %s14013_s25, %s15527_s2 }
  0x15   :  { %p14019_p2 = pnand %p14017_p1, %p14014_p0 }
  0x17   :  { %14022 = shalt.err (!%p14019_p2)
}
  0x18   :  { %s14023_s4 = scalar_lea.vmem %s51_s22, 512  ;;  %p14028_p4 = scmp.lt.s32.totalorder %s51_s22, %s51_s22 }
  0x19   :  { %p14024_p3 = scmp.ne.s32.totalorder %s51_s22, %s14023_s4  ;;  %p14029_p5 = scmp.lt.s32.totalorder %s14023_s4, %s14023_s4 }
  0x1b   :  { %p14030_p6 = por %p14029_p5, %p14028_p4 }
  0x1d   :  { %p14031_p7 = pnand %p14030_p6, %p14024_p3 }
  0x1f   :  { %14034 = shalt.err (!%p14031_p7)
}
  0x20   :  { %s14246_s29 = smov 128   ;;  %s14247_s30 = smov 8  }
  0x21   :  { %56 = dma.hbm_to_vmem [thread:$0]  %s15527_s2, 512, %s51_s22, [#allocation5], %s14246_s29, %s14246_s29, %s14247_s30  }
  0x22   :  { %s14248_s1 = smov [#allocation7]   ;;  %s14035_s3 = scalar_lea.hbm %s15501_s7, 768 }
  0x23   :  { %s80_s23 = sshll.u32 %s14248_s1, 4  ;;  %p14036_p8 = scmp.ne.s32.totalorder %s15501_s7, %s14035_s3  ;;  %s81_s23 = int_to_ptr.vmem [resolvable:$true] %s80_s23 }
  0x24   :  { %p14039_p9 = scmp.lt.u32.totalorder %s14035_s3, %s15501_s7 }
  0x26   :  { %p14041_p10 = pnand %p14039_p9, %p14036_p8 }
  0x28   :  { %14044 = shalt.err (!%p14041_p10)
}
  0x29   :  { %s14045_s20 = scalar_lea.vmem %s81_s23, 768  ;;  %p14050_p12 = scmp.lt.s32.totalorder %s81_s23, %s81_s23 }
  0x2a   :  { %p14046_p11 = scmp.ne.s32.totalorder %s81_s23, %s14045_s20  ;;  %p14051_p13 = scmp.lt.s32.totalorder %s14045_s20, %s14045_s20 }
  0x2c   :  { %p14052_p0 = por %p14051_p13, %p14050_p12 }
  0x2e   :  { %p14053_p1 = pnand %p14052_p0, %p14046_p11 }
  0x30   :  { %14056 = shalt.err (!%p14053_p1)
}
  0x31   :  { %s14249_s22 = smov 192   ;;  %s14250_s2 = smov 12  }
  0x32   :  { %86 = dma.hbm_to_vmem [thread:$0]  %s15501_s7, 768, %s81_s23, [#allocation8], %s14249_s22, %s14249_s22, %s14250_s2  }
  0x33   :  { %s14251_s0 = smov [#allocation10]   ;;  %s14252_s1 = smov [#allocation13]  }
  0x34   :  { %s108_s21 = sshll.u32 %s14251_s0, 4  ;;  %s134_s24 = sshll.u32 %s14252_s1, 4  ;;  %s109_s21 = int_to_ptr.vmem [resolvable:$true] %s108_s21  ;;  %s14405_s24 = int_to_ptr.vmem [resolvable:$true] %s134_s24 }
  0x35   :  { %s14057_s20 = scalar_lea.hbm %s15506_s12, 768 }
  0x36   :  { %p14058_p2 = scmp.ne.s32.totalorder %s15506_s12, %s14057_s20  ;;  %p14061_p3 = scmp.lt.u32.totalorder %s14057_s20, %s15506_s12 }
  0x38   :  { %p14063_p4 = pnand %p14061_p3, %p14058_p2 }
  0x3a   :  { %14066 = shalt.err (!%p14063_p4)
}
  0x3b   :  { %s14067_s7 = scalar_lea.vmem %s109_s21, 768  ;;  %p14072_p6 = scmp.lt.s32.totalorder %s109_s21, %s109_s21 }
  0x3c   :  { %p14068_p5 = scmp.ne.s32.totalorder %s109_s21, %s14067_s7  ;;  %p14073_p7 = scmp.lt.s32.totalorder %s14067_s7, %s14067_s7 }
  0x3e   :  { %p14074_p8 = por %p14073_p7, %p14072_p6 }
  0x40   :  { %p14075_p9 = pnand %p14074_p8, %p14068_p5 }
  0x42   :  { %14078 = shalt.err (!%p14075_p9)
}
  0x43   :  { %114 = dma.hbm_to_vmem [thread:$0]  %s15506_s12, 768, %s109_s21, [#allocation11], %s14249_s22, %s14249_s22, %s14250_s2  }
  0x44   :  { %s14079_s1 = scalar_lea.hbm %s15509_s15, 896 }
  0x45   :  { %p14080_p10 = scmp.ne.s32.totalorder %s15509_s15, %s14079_s1  ;;  %p14083_p11 = scmp.lt.u32.totalorder %s14079_s1, %s15509_s15 }
  0x47   :  { %p14085_p12 = pnand %p14083_p11, %p14080_p10 }
  0x49   :  { %14088 = shalt.err (!%p14085_p12)
}
  0x4a   :  { %s14089_s27 = scalar_lea.vmem %s14405_s24, 896  ;;  %p14094_p0 = scmp.lt.s32.totalorder %s14405_s24, %s14405_s24 }
  0x4b   :  { %p14090_p13 = scmp.ne.s32.totalorder %s14405_s24, %s14089_s27  ;;  %p14095_p1 = scmp.lt.s32.totalorder %s14089_s27, %s14089_s27 }
  0x4d   :  { %p14096_p2 = por %p14095_p1, %p14094_p0 }
  0x4f   :  { %p14097_p3 = pnand %p14096_p2, %p14090_p13 }
  0x51   :  { %14100 = shalt.err (!%p14097_p3)
}
  0x52   :  { %s14253_s12 = smov 448   ;;  %s14254_s22 = smov 28  }
  0x53   :  { %140 = dma.hbm_to_vmem [thread:$0]  %s15509_s15, 896, %s14405_s24, [#allocation14], %s14253_s12, %s14253_s12, %s14254_s22  }
  0x54   :  { %s14255_s28 = smov [#allocation2]   ;;  %s15528_s29 = sld [smem:[#allocation25_spill]] }
  0x55   :  { %s38_s4 = sshll.u32 %s14255_s28, 4  ;;  %s39_s4 = int_to_ptr.vmem [resolvable:$true] %s38_s4 }
  0x5a   :  { %s14101_s30 = scalar_lea.hbm %s15528_s29, 56448 }
  0x5b   :  { %p14102_p4 = scmp.ne.s32.totalorder %s15528_s29, %s14101_s30  ;;  %p14105_p5 = scmp.lt.u32.totalorder %s14101_s30, %s15528_s29 }
  0x5d   :  { %p14107_p6 = pnand %p14105_p5, %p14102_p4 }
  0x5f   :  { %14110 = shalt.err (!%p14107_p6)
}
  0x60   :  { %s14111_s20 = scalar_lea.vmem %s39_s4, 56448  ;;  %p14116_p8 = scmp.lt.s32.totalorder %s39_s4, %s39_s4 }
  0x61   :  { %p14112_p7 = scmp.ne.s32.totalorder %s39_s4, %s14111_s20  ;;  %p14117_p9 = scmp.lt.s32.totalorder %s14111_s20, %s14111_s20 }
  0x63   :  { %p14118_p10 = por %p14117_p9, %p14116_p8 }
  0x65   :  { %p14119_p11 = pnand %p14118_p10, %p14112_p7 }
  0x67   :  { %14122 = shalt.err (!%p14119_p11)
}
  0x68   :  { %s14256_s15 = smov 576   ;;  %s14257_s24 = smov 36  }
  0x69   :  { %44 = dma.hbm_to_vmem [thread:$0]  %s15528_s29, 56448, %s39_s4, [#allocation3], %s14256_s15, %s14256_s15, %s14257_s24  }
  0x6a   :  { %s14258_s12 = smov [#allocation6]   ;;  %s14259_s2 = smov [#allocation9]  }
  0x6b   :  { %s68_s22 = sshll.u32 %s14258_s12, 4  ;;  %s99_s21 = sshll.u32 %s14259_s2, 4  ;;  %s69_s22 = int_to_ptr.vmem [resolvable:$true] %s68_s22  ;;  %s100_s21 = int_to_ptr.vmem [resolvable:$true] %s99_s21 }
  0x6c   :  { %s14123_s23 = scalar_lea.hbm %s15500_s6, 2304 }
  0x6d   :  { %p14124_p12 = scmp.ne.s32.totalorder %s15500_s6, %s14123_s23  ;;  %p14127_p13 = scmp.lt.u32.totalorder %s14123_s23, %s15500_s6 }
  0x6f   :  { %p14129_p0 = pnand %p14127_p13, %p14124_p12 }
  0x71   :  { %14132 = shalt.err (!%p14129_p0)
}
  0x72   :  { %s14133_s4 = scalar_lea.vmem %s69_s22, 2304  ;;  %p14138_p2 = scmp.lt.s32.totalorder %s69_s22, %s69_s22 }
  0x73   :  { %p14134_p1 = scmp.ne.s32.totalorder %s69_s22, %s14133_s4  ;;  %p14139_p3 = scmp.lt.s32.totalorder %s14133_s4, %s14133_s4 }
  0x75   :  { %p14140_p4 = por %p14139_p3, %p14138_p2 }
  0x77   :  { %p14141_p5 = pnand %p14140_p4, %p14134_p1 }
  0x79   :  { %14144 = shalt.err (!%p14141_p5)
}
  0x7a   :  { %74 = dma.hbm_to_vmem [thread:$0]  %s15500_s6, 2304, %s69_s22, [#allocation5], %s14256_s15, %s14256_s15, %s14257_s24  }
  0x7b   :  { %s14145_s27 = scalar_lea.hbm %s15505_s11, 576 }
  0x7c   :  { %p14146_p6 = scmp.ne.s32.totalorder %s15505_s11, %s14145_s27  ;;  %p14149_p7 = scmp.lt.u32.totalorder %s14145_s27, %s15505_s11 }
  0x7e   :  { %p14151_p8 = pnand %p14149_p7, %p14146_p6 }
  0x80   :  { %14154 = shalt.err (!%p14151_p8)
}
  0x81   :  { %s14155_s23 = scalar_lea.vmem %s100_s21, 576  ;;  %p14160_p10 = scmp.lt.s32.totalorder %s100_s21, %s100_s21 }
  0x82   :  { %p14156_p9 = scmp.ne.s32.totalorder %s100_s21, %s14155_s23  ;;  %p14161_p11 = scmp.lt.s32.totalorder %s14155_s23, %s14155_s23 }
  0x84   :  { %p14162_p12 = por %p14161_p11, %p14160_p10 }
  0x86   :  { %p14163_p13 = pnand %p14162_p12, %p14156_p9 }
  0x88   :  { %14166 = shalt.err (!%p14163_p13)
}
  0x89   :  { %102 = dma.hbm_to_vmem [thread:$0]  %s15505_s11, 576, %s100_s21, [#allocation8]  }
  0x8a   :  { %s14260_s24 = smov [#allocation12]   ;;  %s14167_s1 = scalar_lea.hbm %s15508_s14, 12800 }
  0x8b   :  { %s122_s22 = sshll.u32 %s14260_s24, 4  ;;  %p14168_p0 = scmp.ne.s32.totalorder %s15508_s14, %s14167_s1  ;;  %s123_s22 = int_to_ptr.vmem [resolvable:$true] %s122_s22 }
  0x8c   :  { %p14171_p1 = scmp.lt.u32.totalorder %s14167_s1, %s15508_s14 }
  0x8e   :  { %p14173_p2 = pnand %p14171_p1, %p14168_p0 }
  0x90   :  { %14176 = shalt.err (!%p14173_p2)
}
  0x91   :  { %s14177_s20 = scalar_lea.vmem %s123_s22, 12800  ;;  %p14182_p4 = scmp.lt.s32.totalorder %s123_s22, %s123_s22 }
  0x92   :  { %p14178_p3 = scmp.ne.s32.totalorder %s123_s22, %s14177_s20  ;;  %p14183_p5 = scmp.lt.s32.totalorder %s14177_s20, %s14177_s20 }
  0x94   :  { %p14184_p6 = por %p14183_p5, %p14182_p4 }
  0x96   :  { %p14185_p7 = pnand %p14184_p6, %p14178_p3 }
  0x98   :  { %14188 = shalt.err (!%p14185_p7)
}
  0x99   :  { %s14261_s11 = smov 3200   ;;  %s14262_s21 = smov 200  }
  0x9a   :  { %128 = dma.hbm_to_vmem [thread:$0]  %s15508_s14, 12800, %s123_s22, [#allocation11], %s14261_s11, %s14261_s11, %s14262_s21  }
  0x9b   :  { %s14263_s12 = smov [#allocation15]   ;;  %s14189_s23 = scalar_lea.hbm %s15511_s17, 51968 }
  0x9c   :  { %s148_s2 = sshll.u32 %s14263_s12, 4  ;;  %p14190_p8 = scmp.ne.s32.totalorder %s15511_s17, %s14189_s23  ;;  %s149_s2 = int_to_ptr.vmem [resolvable:$true] %s148_s2 }
  0x9d   :  { %p14193_p9 = scmp.lt.u32.totalorder %s14189_s23, %s15511_s17 }
  0x9f   :  { %p14195_p10 = pnand %p14193_p9, %p14190_p8 }
  0xa1   :  { %14198 = shalt.err (!%p14195_p10)
}
  0xa2   :  { %s14199_s0 = scalar_lea.vmem %s149_s2, 51968  ;;  %p14204_p12 = scmp.lt.s32.totalorder %s149_s2, %s149_s2 }
  0xa3   :  { %p14200_p11 = scmp.ne.s32.totalorder %s149_s2, %s14199_s0  ;;  %p14205_p13 = scmp.lt.s32.totalorder %s14199_s0, %s14199_s0 }
  0xa5   :  { %p14206_p0 = por %p14205_p13, %p14204_p12 }
  0xa7   :  { %p14207_p1 = pnand %p14206_p0, %p14200_p11 }
  0xa9   :  { %14210 = shalt.err (!%p14207_p1)
}
  0xaa   :  { %s14264_s14 = smov 1792   ;;  %s14265_s22 = smov 112  }
  0xab   :  { %154 = dma.hbm_to_vmem [thread:$0]  %s15511_s17, 51968, %s149_s2, [#allocation14], %s14264_s14, %s14264_s14, %s14265_s22  }
  0xac   :  { %s14266_s4 = smov [#allocation16]   ;;  %s14211_s11 = scalar_lea.hbm %s15512_s18, 16 }
  0xad   :  { %s161_s29 = sshll.u32 %s14266_s4, 4  ;;  %p14212_p2 = scmp.ne.s32.totalorder %s15512_s18, %s14211_s11  ;;  %s162_s29 = int_to_ptr.vmem [resolvable:$true] %s161_s29 }
  0xae   :  { %p14215_p3 = scmp.lt.u32.totalorder %s14211_s11, %s15512_s18 }
  0xb0   :  { %p14217_p4 = pnand %p14215_p3, %p14212_p2 }
  0xb2   :  { %14220 = shalt.err (!%p14217_p4)
}
  0xb3   :  { %s14221_s28 = scalar_lea.vmem %s162_s29, 16  ;;  %s14225_s17 = scalar_lea.vmem %s162_s29, 32 }
  0xb4   :  { %p14222_p5 = scmp.ne.s32.totalorder %s162_s29, %s14221_s28  ;;  %p14226_p6 = scmp.lt.s32.totalorder %s162_s29, %s162_s29 }
  0xb5   :  { %p14227_p7 = scmp.lt.s32.totalorder %s14225_s17, %s14221_s28 }
  0xb7   :  { %p14228_p8 = por %p14227_p7, %p14226_p6 }
  0xb9   :  { %p14229_p9 = pnand %p14228_p8, %p14222_p5 }
  0xbb   :  { %14232 = shalt.err (!%p14229_p9)
}
  0xbc   :  { %164 = dma.hbm_to_vmem [thread:$0]  %s15512_s18, 16, %s162_s29, [#allocation17]  }
  0xbd   :  { %14233 = dma.done.wait [#allocation3], 56448  }
  0xbe   :  { %14234 = vsyncadd [#allocation3], 4294910848 }
  0xbf   :  { %14235 = dma.done.wait [#allocation5], 2816  }
  0xc0   :  { %14236 = vsyncadd [#allocation5], 4294964480 }
  0xc1   :  { %14237 = dma.done.wait [#allocation8], 1344  }
  0xc2   :  { %14238 = vsyncadd [#allocation8], 4294965952 }
  0xc3   :  { %14239 = dma.done.wait [#allocation11], 13568  }
  0xc4   :  { %14240 = vsyncadd [#allocation11], 4294953728 }
  0xc5   :  { %14241 = dma.done.wait [#allocation14], 52864  }
  0xc6   :  { %14242 = vsyncadd [#allocation14], 4294914432 }
  0xc7   :  { %14243 = dma.done.wait [#allocation17], 16  }
  0xc8   :  { %14244 = vsyncadd [#allocation17], 4294967280  ;;  %v12521_v0 = vld [vmem:[#allocation2 + $0x4] ss:$36 sps:$4 sm:$0xff]   ;;  %v12523_v1 = vld [vmem:[#allocation2 + $0xc] ss:$36 sps:$4 sm:$0xff]  }
  0xc9   :  { %2967 = vmatprep.subr.bf16.mxu0 %v12521_v0  ;;  %v12525_v2 = vld [vmem:[#allocation2] ss:$36 sps:$4 sm:$0xff]   ;;  %v12526_v3 = vld [vmem:[#allocation2 + $0x8] ss:$36 sps:$4 sm:$0xff]   ;;  %3139 = vmatprep.subr.bf16.mxu1 %v12523_v1  ;;  %v12529_v5 = vld [vmem:[#allocation2 + $0x54] ss:$36 sps:$4 sm:$0xff]  }
  0xca   :  { %v12527_v4 = vld [vmem:[#allocation2 + $0x4c] ss:$36 sps:$4 sm:$0xff]   ;;  %2968 = vmatpush1.bf16.msra.mxu0 %v12525_v2  ;;  %3140 = vmatpush1.bf16.msra.mxu1 %v12526_v3  ;;  %v12533_v8 = vld [vmem:[#allocation2 + $0x94] ss:$36 sps:$4 sm:$0xff]   ;;  %v12535_v9 = vld [vmem:[#allocation2 + $0x9c] ss:$36 sps:$4 sm:$0xff]  }
  0xcb   :  { %v12531_v6 = vld [vmem:[#allocation2 + $0x48] ss:$36 sps:$4 sm:$0xff]   ;;  %2969 = vmatprep.subr.bf16.mxu0 %v12527_v4  ;;  %v12532_v7 = vld [vmem:[#allocation2 + $0x50] ss:$36 sps:$4 sm:$0xff]   ;;  %3141 = vmatprep.subr.bf16.mxu1 %v12529_v5  ;;  %v12538_v11 = vld [vmem:[#allocation2 + $0x98] ss:$36 sps:$4 sm:$0xff]  }
  0xcc   :  { %v12537_v10 = vld [vmem:[#allocation2 + $0x90] ss:$36 sps:$4 sm:$0xff]   ;;  %v12539_v12 = vld [vmem:[#allocation2 + $0xdc] ss:$36 sps:$4 sm:$0xff]   ;;  %v12541_v13 = vld [vmem:[#allocation2 + $0xe4] ss:$36 sps:$4 sm:$0xff]  }
  0xcd   :  { %v12543_v14 = vld [vmem:[#allocation2 + $0xd8] ss:$36 sps:$4 sm:$0xff]   ;;  %v12544_v15 = vld [vmem:[#allocation2 + $0xe0] ss:$36 sps:$4 sm:$0xff]   ;;  %v12547_v17 = vld [vmem:[#allocation2 + $0x12c] ss:$36 sps:$4 sm:$0xff]  }
  0xce   :  { %2970 = vmatpush1.bf16.msra.mxu0 %v12531_v6  ;;  %3142 = vmatpush1.bf16.msra.mxu1 %v12532_v7  ;;  %v12545_v16 = vld [vmem:[#allocation2 + $0x124] ss:$36 sps:$4 sm:$0xff]   ;;  %v12551_v20 = vld [vmem:[#allocation2 + $0x16c] ss:$36 sps:$4 sm:$0xff]   ;;  %v12553_v21 = vld [vmem:[#allocation2 + $0x174] ss:$36 sps:$4 sm:$0xff]  }
  0xcf   :  { %2971 = vmatprep.subr.bf16.mxu0 %v12533_v8  ;;  %3143 = vmatprep.subr.bf16.mxu1 %v12535_v9  ;;  %v12549_v18 = vld [vmem:[#allocation2 + $0x120] ss:$36 sps:$4 sm:$0xff]   ;;  %v12550_v19 = vld [vmem:[#allocation2 + $0x128] ss:$36 sps:$4 sm:$0xff]   ;;  %v12556_v23 = vld [vmem:[#allocation2 + $0x170] ss:$36 sps:$4 sm:$0xff]  }
  0xd0   :  { %v12555_v22 = vld [vmem:[#allocation2 + $0x168] ss:$36 sps:$4 sm:$0xff]   ;;  %v12557_v24 = vld [vmem:[#allocation2 + $0x1b4] ss:$36 sps:$4 sm:$0xff]   ;;  %v12559_v25 = vld [vmem:[#allocation2 + $0x1bc] ss:$36 sps:$4 sm:$0xff]  }
  0xd1   :  { %v12561_v26 = vld [vmem:[#allocation2 + $0x1b0] ss:$36 sps:$4 sm:$0xff]   ;;  %v12562_v27 = vld [vmem:[#allocation2 + $0x1b8] ss:$36 sps:$4 sm:$0xff]   ;;  %v12565_v29 = vld [vmem:[#allocation2 + $0x204] ss:$36 sps:$4 sm:$0xff]  }
  0xd2   :  { %2972 = vmatpush1.bf16.msra.mxu0 %v12537_v10  ;;  %3144 = vmatpush1.bf16.msra.mxu1 %v12538_v11  ;;  %v12563_v28 = vld [vmem:[#allocation2 + $0x1fc] ss:$36 sps:$4 sm:$0xff]   ;;  %v12569_v32 = vld [vmem:[#allocation2 + $0x244] ss:$36 sps:$4 sm:$0xff]   ;;  %v12571_v33 = vld [vmem:[#allocation2 + $0x24c] ss:$36 sps:$4 sm:$0xff]  }
  0xd3   :  { %2973 = vmatprep.subr.bf16.mxu0 %v12539_v12  ;;  %3145 = vmatprep.subr.bf16.mxu1 %v12541_v13  ;;  %v12567_v30 = vld [vmem:[#allocation2 + $0x1f8] ss:$36 sps:$4 sm:$0xff]   ;;  %v12568_v31 = vld [vmem:[#allocation2 + $0x200] ss:$36 sps:$4 sm:$0xff]   ;;  %v12574_v35 = vld [vmem:[#allocation2 + $0x248] ss:$36 sps:$4 sm:$0xff]  }
  0xd4   :  { %v12573_v34 = vld [vmem:[#allocation2 + $0x240] ss:$36 sps:$4 sm:$0xff]   ;;  %v12575_v36 = vld [vmem:[#allocation2 + $0x28c] ss:$36 sps:$4 sm:$0xff]   ;;  %v12577_v37 = vld [vmem:[#allocation2 + $0x294] ss:$36 sps:$4 sm:$0xff]  }
  0xd5   :  { %v12579_v38 = vld [vmem:[#allocation2 + $0x288] ss:$36 sps:$4 sm:$0xff]   ;;  %v12580_v39 = vld [vmem:[#allocation2 + $0x290] ss:$36 sps:$4 sm:$0xff]   ;;  %v12583_v41 = vld [vmem:[#allocation2 + $0x2dc] ss:$36 sps:$4 sm:$0xff]  }
  0xd6   :  { %2974 = vmatpush1.bf16.msra.mxu0 %v12543_v14  ;;  %3146 = vmatpush1.bf16.msra.mxu1 %v12544_v15  ;;  %v12581_v40 = vld [vmem:[#allocation2 + $0x2d4] ss:$36 sps:$4 sm:$0xff]   ;;  %v12587_v44 = vld [vmem:[#allocation2 + $0x31c] ss:$36 sps:$4 sm:$0xff]   ;;  %v12589_v45 = vld [vmem:[#allocation2 + $0x324] ss:$36 sps:$4 sm:$0xff]  }
  0xd7   :  { %2975 = vmatprep.subr.bf16.mxu0 %v12545_v16  ;;  %3147 = vmatprep.subr.bf16.mxu1 %v12547_v17  ;;  %v12585_v42 = vld [vmem:[#allocation2 + $0x2d0] ss:$36 sps:$4 sm:$0xff]   ;;  %v12586_v43 = vld [vmem:[#allocation2 + $0x2d8] ss:$36 sps:$4 sm:$0xff]   ;;  %s15529_s6 = sld [smem:[#allocation24_spill]]  ;;  %vm2963_vm0 = vcmask 130048  }
  0xd8   :  { %v12591_v48 = vld [vmem:[#allocation2 + $0x318] ss:$36 sps:$4 sm:$0xff]   ;;  %v12592_v49 = vld [vmem:[#allocation2 + $0x320] ss:$36 sps:$4 sm:$0xff]   ;;  %v12595_v52 = vld [vmem:[#allocation2 + $0x36c] ss:$36 sps:$4 sm:$0xff]  }
  0xd9   :  { %v12593_v51 = vld [vmem:[#allocation2 + $0x364] ss:$36 sps:$4 sm:$0xff]   ;;  %v12599_v55 = vld [vmem:[#allocation2 + $0x3ac] ss:$36 sps:$4 sm:$0xff]   ;;  %v12601_v56 = vld [vmem:[#allocation2 + $0x3b4] ss:$36 sps:$4 sm:$0xff]  }
  0xda   :  { %2976 = vmatpush1.bf16.msra.mxu0 %v12549_v18  ;;  %3148 = vmatpush1.bf16.msra.mxu1 %v12550_v19  ;;  %v12597_v53 = vld [vmem:[#allocation2 + $0x360] ss:$36 sps:$4 sm:$0xff]   ;;  %v12598_v54 = vld [vmem:[#allocation2 + $0x368] ss:$36 sps:$4 sm:$0xff]   ;;  %v12604_v58 = vld [vmem:[#allocation2 + $0x3b0] ss:$36 sps:$4 sm:$0xff]  }
  0xdb   :  { %2977 = vmatprep.subr.bf16.mxu0 %v12551_v20  ;;  %3149 = vmatprep.subr.bf16.mxu1 %v12553_v21  ;;  %v12603_v57 = vld [vmem:[#allocation2 + $0x3a8] ss:$36 sps:$4 sm:$0xff]   ;;  %v12605_v59 = vld [vmem:[#allocation2 + $0x3f4] ss:$36 sps:$4 sm:$0xff]   ;;  %v12607_v60 = vld [vmem:[#allocation2 + $0x3fc] ss:$36 sps:$4 sm:$0xff]  }
  0xdc   :  { %v12609_v61 = vld [vmem:[#allocation2 + $0x3f0] ss:$36 sps:$4 sm:$0xff]   ;;  %v12610_v62 = vld [vmem:[#allocation2 + $0x3f8] ss:$36 sps:$4 sm:$0xff]   ;;  %v12613_v0 = vld [vmem:[#allocation2 + $0x444] ss:$36 sps:$4 sm:$0xff]  }
  0xdd   :  { %v199_v46 = vld [vmem:[%s15529_s6 + $0x8] sm:$0xff]  ;;  %v206_v47 = vld [vmem:[%s15529_s6 + $0x40] sm:$0xff]  ;;  %v12615_v1 = vld [vmem:[#allocation2 + $0x438] ss:$36 sps:$4 sm:$0xff]   ;;  %vm14269_vm1 = vmmov 0   ;;  %s15530_s14 = sld [smem:[#allocation27_spill]] }
  0xde   :  { %2978 = vmatpush1.bf16.msra.mxu0 %v12555_v22  ;;  %3150 = vmatpush1.bf16.msra.mxu1 %v12556_v23  ;;  %v14514_v50 = vpack.c.bf16 %v206_v47, %v199_v46  ;;  %v12611_v63 = vld [vmem:[#allocation2 + $0x43c] ss:$36 sps:$4 sm:$0xff]   ;;  %v12619_v3 = vld [vmem:[#allocation2 + $0x484] ss:$36 sps:$4 sm:$0xff]   ;;  %v12622_v6 = vld [vmem:[#allocation2 + $0x48c] ss:$36 sps:$4 sm:$0xff]  }
  0xdf   :  { %2979 = vmatprep.subr.bf16.mxu0 %v12557_v24  ;;  %3151 = vmatprep.subr.bf16.mxu1 %v12559_v25  ;;  %v12616_v2 = vld [vmem:[#allocation2 + $0x440] ss:$36 sps:$4 sm:$0xff]   ;;  %v205_v5 = vld [vmem:[%s15529_s6 + $0x38] sm:$0xff]  ;;  %v12620_v8 = vld [vmem:[#allocation2 + $0x488] ss:$36 sps:$4 sm:$0xff]   ;;  %v14267_v24 = vmov 0  }
  0xe0   :  { %2999 = vmatprep.mubr.bf16.mxu0 %v14514_v50  ;;  %3171 = vmatprep.mubr.bf16.mxu1 %v14514_v50  ;;  %v198_v4 = vld [vmem:[%s15529_s6] sm:$0xff]  ;;  %v12625_v10 = vld [vmem:[#allocation2 + $0x4cc] ss:$36 sps:$4 sm:$0xff]   ;;  %v12628_v11 = vld [vmem:[#allocation2 + $0x4d4] ss:$36 sps:$4 sm:$0xff]   ;;  %vm3937_vm2 = vcmask 818176  }
  0xe1   :  { %v12617_v7 = vld [vmem:[#allocation2 + $0x480] ss:$36 sps:$4 sm:$0xff]   ;;  %v14524_v9 = vpack.c.bf16 %v205_v5, %v198_v4  ;;  %v12623_v12 = vld [vmem:[#allocation2 + $0x4c8] ss:$36 sps:$4 sm:$0xff]   ;;  %v12626_v13 = vld [vmem:[#allocation2 + $0x4d0] ss:$36 sps:$4 sm:$0xff]   ;;  %12479 = vset.pattern.permute.xlu0 %v14267_v24  ;;  %12480 = vset.pattern.permute.xlu1 %v14267_v24 }
  0xe2   :  { %2980 = vmatpush1.bf16.msra.mxu0 %v12561_v26  ;;  %3152 = vmatpush1.bf16.msra.mxu1 %v12562_v27  ;;  %v12631_v14 = vld [vmem:[#allocation2 + $0x514] ss:$36 sps:$4 sm:$0xff]   ;;  %v12634_v15 = vld [vmem:[#allocation2 + $0x51c] ss:$36 sps:$4 sm:$0xff]   ;;  %v12640_v19 = vld [vmem:[#allocation2 + $0x564] ss:$36 sps:$4 sm:$0xff]  }
  0xe3   :  { %2981 = vmatprep.subr.bf16.mxu0 %v12563_v28  ;;  %3153 = vmatprep.subr.bf16.mxu1 %v12565_v29  ;;  %v12629_v16 = vld [vmem:[#allocation2 + $0x510] ss:$36 sps:$4 sm:$0xff]   ;;  %v12632_v17 = vld [vmem:[#allocation2 + $0x518] ss:$36 sps:$4 sm:$0xff]   ;;  %v12638_v21 = vld [vmem:[#allocation2 + $0x560] ss:$36 sps:$4 sm:$0xff]  }
  0xe4   :  { %v12637_v18 = vld [vmem:[#allocation2 + $0x55c] ss:$36 sps:$4 sm:$0xff]   ;;  %v12643_v22 = vld [vmem:[#allocation2 + $0x5a4] ss:$36 sps:$4 sm:$0xff]   ;;  %v12646_v23 = vld [vmem:[#allocation2 + $0x5ac] ss:$36 sps:$4 sm:$0xff]  }
  0xe5   :  { %v12635_v20 = vld [vmem:[#allocation2 + $0x558] ss:$36 sps:$4 sm:$0xff]   ;;  %v12641_v25 = vld [vmem:[#allocation2 + $0x5a0] ss:$36 sps:$4 sm:$0xff]   ;;  %v12644_v26 = vld [vmem:[#allocation2 + $0x5a8] ss:$36 sps:$4 sm:$0xff]  }
  0xe6   :  { %2982 = vmatpush1.bf16.msra.mxu0 %v12567_v30  ;;  %3154 = vmatpush1.bf16.msra.mxu1 %v12568_v31  ;;  %v12649_v27 = vld [vmem:[#allocation2 + $0x5ec] ss:$36 sps:$4 sm:$0xff]   ;;  %v12652_v28 = vld [vmem:[#allocation2 + $0x5f4] ss:$36 sps:$4 sm:$0xff]   ;;  %v12706_v4 = vld [vmem:[#allocation2 + $0x87c] ss:$36 sps:$4 sm:$0xff]  }
  0xe7   :  { %2983 = vmatprep.subr.bf16.mxu0 %v12569_v32  ;;  %3155 = vmatprep.subr.bf16.mxu1 %v12571_v33  ;;  %v12647_v29 = vld [vmem:[#allocation2 + $0x5e8] ss:$36 sps:$4 sm:$0xff]   ;;  %v12650_v30 = vld [vmem:[#allocation2 + $0x5f0] ss:$36 sps:$4 sm:$0xff]   ;;  %v12658_v32 = vld [vmem:[#allocation2 + $0x63c] ss:$36 sps:$4 sm:$0xff]  }
  0xe8   :  { %v12655_v31 = vld [vmem:[#allocation2 + $0x634] ss:$36 sps:$4 sm:$0xff]   ;;  %v12673_v46 = vld [vmem:[#allocation2 + $0x70c] ss:$36 sps:$4 sm:$0xff]   ;;  %s15531_s21 = sld [smem:[#allocation28_spill]]  ;;  %vm4176_vm3 = vcmask 1043456  }
  0xe9   :  { %v201_v33 = vld [vmem:[%s15529_s6 + $0x18] sm:$0xff]  ;;  %v12701_v5 = vld [vmem:[#allocation2 + $0x870] ss:$36 sps:$4 sm:$0xff]   ;;  %vm4177_vm4 = vcmask 1044480   ;;  %s14272_s7 = smov 78   ;;  %vm4169_vm5 = vcmask 203776  }
  0xea   :  { %2984 = vmatpush1.bf16.msra.mxu0 %v12573_v34  ;;  %3156 = vmatpush1.bf16.msra.mxu1 %v12574_v35  ;;  %v208_v34 = vld [vmem:[%s15529_s6 + $0x50] sm:$0xff]  ;;  %vm4524_vm6 = vcmask 261120   ;;  %vm4661_vm7 = vcmask 72704   ;;  %vm4825_vm8 = vcmask 1041408   ;;  %vm4826_vm9 = vcmask 1042432  }
  0xeb   :  { %2985 = vmatprep.subr.bf16.mxu0 %v12575_v36  ;;  %3157 = vmatprep.subr.bf16.mxu1 %v12577_v37  ;;  %v12653_v35 = vld [vmem:[#allocation2 + $0x630] ss:$36 sps:$4 sm:$0xff]   ;;  %v12656_v36 = vld [vmem:[#allocation2 + $0x638] ss:$36 sps:$4 sm:$0xff]   ;;  %v14536_v37 = vpack.c.bf16 %v208_v34, %v201_v33  ;;  %v12734_v34 = vld [vmem:[#allocation2 + $0x9e0] ss:$36 sps:$4 sm:$0xff]  }
  0xec   :  { %v12676_v47 = vld [vmem:[#allocation2 + $0x714] ss:$36 sps:$4 sm:$0xff]   ;;  %vm4818_vm10 = vcmask 39936   ;;  %vm10122_vm11 = vcmask 1040384   ;;  %vm10118_vm12 = vcmask 793600   ;;  %vm10840_vm13 = vcmask 523264  }
  0xed   :  { %v12731_v33 = vld [vmem:[#allocation2 + $0x9d8] ss:$36 sps:$4 sm:$0xff]   ;;  %vm11070_vm14 = vcmask 1043458  }
  0xee   :  { %2986 = vmatpush1.bf16.msra.mxu0 %v12579_v38  ;;  %3158 = vmatpush1.bf16.msra.mxu1 %v12580_v39  ;;  %v12661_v38 = vld [vmem:[#allocation2 + $0x67c] ss:$36 sps:$4 sm:$0xff]   ;;  %v12664_v39 = vld [vmem:[#allocation2 + $0x684] ss:$36 sps:$4 sm:$0xff]   ;;  %vm11071_vm15 = vmor %vm11070_vm14, %vm4825_vm8 }
  0xef   :  { %2987 = vmatprep.subr.bf16.mxu0 %v12581_v40  ;;  %3159 = vmatprep.subr.bf16.mxu1 %v12583_v41  ;;  %v12659_v40 = vld [vmem:[#allocation2 + $0x678] ss:$36 sps:$4 sm:$0xff]   ;;  %v12662_v41 = vld [vmem:[#allocation2 + $0x680] ss:$36 sps:$4 sm:$0xff]  }
  0xf2   :  { %2988 = vmatpush1.bf16.msra.mxu0 %v12585_v42  ;;  %3160 = vmatpush1.bf16.msra.mxu1 %v12586_v43  ;;  %v12667_v42 = vld [vmem:[#allocation2 + $0x6c4] ss:$36 sps:$4 sm:$0xff]   ;;  %v12670_v43 = vld [vmem:[#allocation2 + $0x6cc] ss:$36 sps:$4 sm:$0xff]  }
  0xf3   :  { %2989 = vmatprep.subr.bf16.mxu0 %v12587_v44  ;;  %3161 = vmatprep.subr.bf16.mxu1 %v12589_v45  ;;  %v12665_v44 = vld [vmem:[#allocation2 + $0x6c0] ss:$36 sps:$4 sm:$0xff]   ;;  %v12668_v45 = vld [vmem:[#allocation2 + $0x6c8] ss:$36 sps:$4 sm:$0xff]  }
  0xf6   :  { %2990 = vmatpush1.bf16.msra.mxu0 %v12591_v48  ;;  %3162 = vmatpush1.bf16.msra.mxu1 %v12592_v49  ;;  %v12671_v48 = vld [vmem:[#allocation2 + $0x708] ss:$36 sps:$4 sm:$0xff]   ;;  %v12674_v49 = vld [vmem:[#allocation2 + $0x710] ss:$36 sps:$4 sm:$0xff]  }
  0xf7   :  { %2991 = vmatprep.subr.bf16.mxu0 %v12593_v51  ;;  %3163 = vmatprep.subr.bf16.mxu1 %v12595_v52  ;;  %v12679_v51 = vld [vmem:[#allocation2 + $0x754] ss:$36 sps:$4 sm:$0xff]   ;;  %v12682_v52 = vld [vmem:[#allocation2 + $0x75c] ss:$36 sps:$4 sm:$0xff]  }
  0xfa   :  { %2992 = vmatpush1.bf16.msra.mxu0 %v12597_v53  ;;  %3164 = vmatpush1.bf16.msra.mxu1 %v12598_v54  ;;  %v12677_v53 = vld [vmem:[#allocation2 + $0x750] ss:$36 sps:$4 sm:$0xff]   ;;  %v12680_v54 = vld [vmem:[#allocation2 + $0x758] ss:$36 sps:$4 sm:$0xff]  }
  0xfb   :  { %2993 = vmatprep.subr.bf16.mxu0 %v12599_v55  ;;  %3165 = vmatprep.subr.bf16.mxu1 %v12601_v56  ;;  %v12685_v55 = vld [vmem:[#allocation2 + $0x79c] ss:$36 sps:$4 sm:$0xff]   ;;  %v12688_v56 = vld [vmem:[#allocation2 + $0x7a4] ss:$36 sps:$4 sm:$0xff]  }
  0xfe   :  { %2994 = vmatpush1.bf16.msra.mxu0 %v12603_v57  ;;  %3166 = vmatpush1.bf16.msra.mxu1 %v12604_v58  ;;  %v12683_v57 = vld [vmem:[#allocation2 + $0x798] ss:$36 sps:$4 sm:$0xff]   ;;  %v12686_v58 = vld [vmem:[#allocation2 + $0x7a0] ss:$36 sps:$4 sm:$0xff]  }
  0xff   :  { %2995 = vmatprep.subr.bf16.mxu0 %v12605_v59  ;;  %3167 = vmatprep.subr.bf16.mxu1 %v12607_v60  ;;  %v12691_v59 = vld [vmem:[#allocation2 + $0x7e4] ss:$36 sps:$4 sm:$0xff]   ;;  %v12694_v60 = vld [vmem:[#allocation2 + $0x7ec] ss:$36 sps:$4 sm:$0xff]  }
 0x102   :  { %2996 = vmatpush1.bf16.msra.mxu0 %v12609_v61  ;;  %3168 = vmatpush1.bf16.msra.mxu1 %v12610_v62  ;;  %v12689_v61 = vld [vmem:[#allocation2 + $0x7e0] ss:$36 sps:$4 sm:$0xff]   ;;  %v12692_v62 = vld [vmem:[#allocation2 + $0x7e8] ss:$36 sps:$4 sm:$0xff]  }
 0x103   :  { %2997 = vmatprep.subr.bf16.mxu0 %v12611_v63  ;;  %3169 = vmatprep.subr.bf16.mxu1 %v12613_v0  ;;  %v12697_v63 = vld [vmem:[#allocation2 + $0x82c] ss:$36 sps:$4 sm:$0xff]   ;;  %v12700_v0 = vld [vmem:[#allocation2 + $0x834] ss:$36 sps:$4 sm:$0xff]  }
 0x106   :  { %2998 = vmatpush1.bf16.msra.mxu0 %v12615_v1  ;;  %3170 = vmatpush1.bf16.msra.mxu1 %v12616_v2  ;;  %v12695_v1 = vld [vmem:[#allocation2 + $0x828] ss:$36 sps:$4 sm:$0xff]   ;;  %v12698_v2 = vld [vmem:[#allocation2 + $0x830] ss:$36 sps:$4 sm:$0xff]  }
 0x107   :  { %3010 = vmatprep.subr.bf16.mxu0 %v12619_v3  ;;  %3182 = vmatprep.subr.bf16.mxu1 %v12622_v6  ;;  %v12703_v3 = vld [vmem:[#allocation2 + $0x874] ss:$36 sps:$4 sm:$0xff]  }
 0x108   :  { %v12704_v6 = vld [vmem:[#allocation2 + $0x878] ss:$36 sps:$4 sm:$0xff]  }
 0x109   :  { %3000 = vmatmul.mubr.bf16.vlgmr.msra.gmra.mrb[0].mxu0 %v14524_v9  ;;  %3172 = vmatmul.mubr.bf16.vlgmr.msra.gmra.mrb[0].mxu1 %v14524_v9 }
 0x10a   :  { %3011 = vmatpush1.bf16.msra.mxu0 %v12617_v7  ;;  %3183 = vmatpush1.bf16.msra.mxu1 %v12620_v8  ;;  %v12709_v7 = vld [vmem:[#allocation2 + $0x8bc] ss:$36 sps:$4 sm:$0xff]   ;;  %v12712_v8 = vld [vmem:[#allocation2 + $0x8c4] ss:$36 sps:$4 sm:$0xff]  }
 0x10b   :  { %3012 = vmatprep.subr.bf16.mxu0 %v12625_v10  ;;  %3184 = vmatprep.subr.bf16.mxu1 %v12628_v11  ;;  %v12707_v10 = vld [vmem:[#allocation2 + $0x8b8] ss:$36 sps:$4 sm:$0xff]   ;;  %v12710_v11 = vld [vmem:[#allocation2 + $0x8c0] ss:$36 sps:$4 sm:$0xff]  }
 0x10c   :  { %3042 = vmatprep.mubr.bf16.mxu0 %v14536_v37  ;;  %3214 = vmatprep.mubr.bf16.mxu1 %v14536_v37 }
 0x10e   :  { %3013 = vmatpush1.bf16.msra.mxu0 %v12623_v12  ;;  %3185 = vmatpush1.bf16.msra.mxu1 %v12626_v13  ;;  %v12715_v12 = vld [vmem:[#allocation2 + $0x904] ss:$36 sps:$4 sm:$0xff]   ;;  %v200_v13 = vld [vmem:[%s15529_s6 + $0x10] sm:$0xff] }
 0x10f   :  { %3014 = vmatprep.subr.bf16.mxu0 %v12631_v14  ;;  %3186 = vmatprep.subr.bf16.mxu1 %v12634_v15  ;;  %v207_v14 = vld [vmem:[%s15529_s6 + $0x48] sm:$0xff] }
 0x110   :  { %v12718_v15 = vld [vmem:[#allocation2 + $0x90c] ss:$36 sps:$4 sm:$0xff]  }
 0x112   :  { %3015 = vmatpush1.bf16.msra.mxu0 %v12629_v16  ;;  %3187 = vmatpush1.bf16.msra.mxu1 %v12632_v17  ;;  %v12713_v16 = vld [vmem:[#allocation2 + $0x900] ss:$36 sps:$4 sm:$0xff]   ;;  %v12716_v17 = vld [vmem:[#allocation2 + $0x908] ss:$36 sps:$4 sm:$0xff]  }
 0x113   :  { %3016 = vmatprep.subr.bf16.mxu0 %v12637_v18  ;;  %3188 = vmatprep.subr.bf16.mxu1 %v12640_v19  ;;  %v14546_v18 = vpack.c.bf16 %v207_v14, %v200_v13  ;;  %v12721_v19 = vld [vmem:[#allocation2 + $0x94c] ss:$36 sps:$4 sm:$0xff]   ;;  %v12799_v14 = vld [vmem:[#allocation2 + $0xcf4] ss:$36 sps:$4 sm:$0xff]  }
 0x114   :  { %v12794_v13 = vld [vmem:[#allocation2 + $0xcb0] ss:$36 sps:$4 sm:$0xff]  }
 0x116   :  { %3017 = vmatpush1.bf16.msra.mxu0 %v12635_v20  ;;  %3189 = vmatpush1.bf16.msra.mxu1 %v12638_v21  ;;  %v12724_v20 = vld [vmem:[#allocation2 + $0x954] ss:$36 sps:$4 sm:$0xff]   ;;  %v203_v21 = vld [vmem:[%s15529_s6 + $0x28] sm:$0xff] }
 0x117   :  { %3018 = vmatprep.subr.bf16.mxu0 %v12643_v22  ;;  %3190 = vmatprep.subr.bf16.mxu1 %v12646_v23  ;;  %v12719_v22 = vld [vmem:[#allocation2 + $0x948] ss:$36 sps:$4 sm:$0xff]   ;;  %v12722_v23 = vld [vmem:[#allocation2 + $0x950] ss:$36 sps:$4 sm:$0xff]  }
 0x11a   :  { %3019 = vmatpush1.bf16.msra.mxu0 %v12641_v25  ;;  %3191 = vmatpush1.bf16.msra.mxu1 %v12644_v26  ;;  %v210_v25 = vld [vmem:[%s15529_s6 + $0x60] sm:$0xff]  ;;  %v12727_v26 = vld [vmem:[#allocation2 + $0x994] ss:$36 sps:$4 sm:$0xff]  }
 0x11b   :  { %3020 = vmatprep.subr.bf16.mxu0 %v12649_v27  ;;  %3192 = vmatprep.subr.bf16.mxu1 %v12652_v28  ;;  %v14556_v27 = vpack.c.bf16 %v210_v25, %v203_v21  ;;  %v12730_v28 = vld [vmem:[#allocation2 + $0x99c] ss:$36 sps:$4 sm:$0xff]  }
 0x11c   :  { %v12803_v21 = vld [vmem:[#allocation2 + $0xd38] ss:$36 sps:$4 sm:$0xff]  }
 0x11d   :  { %v209_v25 = vld [vmem:[%s15529_s6 + $0x58] sm:$0xff] }
 0x11e   :  { %3021 = vmatpush1.bf16.msra.mxu0 %v12647_v29  ;;  %3193 = vmatpush1.bf16.msra.mxu1 %v12650_v30  ;;  %v12725_v29 = vld [vmem:[#allocation2 + $0x990] ss:$36 sps:$4 sm:$0xff]   ;;  %v12728_v30 = vld [vmem:[#allocation2 + $0x998] ss:$36 sps:$4 sm:$0xff]  }
 0x11f   :  { %3022 = vmatprep.subr.bf16.mxu0 %v12655_v31  ;;  %3194 = vmatprep.subr.bf16.mxu1 %v12658_v32  ;;  %v12733_v31 = vld [vmem:[#allocation2 + $0x9dc] ss:$36 sps:$4 sm:$0xff]   ;;  %v12736_v32 = vld [vmem:[#allocation2 + $0x9e4] ss:$36 sps:$4 sm:$0xff]  }
 0x122   :  { %3023 = vmatpush1.bf16.msra.mxu0 %v12653_v35  ;;  %3195 = vmatpush1.bf16.msra.mxu1 %v12656_v36  ;;  %v12739_v35 = vld [vmem:[#allocation2 + $0xa24] ss:$36 sps:$4 sm:$0xff]   ;;  %v12742_v36 = vld [vmem:[#allocation2 + $0xa2c] ss:$36 sps:$4 sm:$0xff]  }
 0x123   :  { %3024 = vmatprep.subr.bf16.mxu0 %v12661_v38  ;;  %3196 = vmatprep.subr.bf16.mxu1 %v12664_v39  ;;  %v12737_v38 = vld [vmem:[#allocation2 + $0xa20] ss:$36 sps:$4 sm:$0xff]   ;;  %v12740_v39 = vld [vmem:[#allocation2 + $0xa28] ss:$36 sps:$4 sm:$0xff]  }
 0x126   :  { %3025 = vmatpush1.bf16.msra.mxu0 %v12659_v40  ;;  %3197 = vmatpush1.bf16.msra.mxu1 %v12662_v41  ;;  %v12745_v40 = vld [vmem:[#allocation2 + $0xa6c] ss:$36 sps:$4 sm:$0xff]   ;;  %v12748_v41 = vld [vmem:[#allocation2 + $0xa74] ss:$36 sps:$4 sm:$0xff]  }
 0x127   :  { %3026 = vmatprep.subr.bf16.mxu0 %v12667_v42  ;;  %3198 = vmatprep.subr.bf16.mxu1 %v12670_v43  ;;  %v12743_v42 = vld [vmem:[#allocation2 + $0xa68] ss:$36 sps:$4 sm:$0xff]   ;;  %v12746_v43 = vld [vmem:[#allocation2 + $0xa70] ss:$36 sps:$4 sm:$0xff]  }
 0x12a   :  { %3027 = vmatpush1.bf16.msra.mxu0 %v12665_v44  ;;  %3199 = vmatpush1.bf16.msra.mxu1 %v12668_v45  ;;  %v12751_v44 = vld [vmem:[#allocation2 + $0xab4] ss:$36 sps:$4 sm:$0xff]   ;;  %v12754_v45 = vld [vmem:[#allocation2 + $0xabc] ss:$36 sps:$4 sm:$0xff]  }
 0x12b   :  { %3028 = vmatprep.subr.bf16.mxu0 %v12673_v46  ;;  %3200 = vmatprep.subr.bf16.mxu1 %v12676_v47  ;;  %v12749_v46 = vld [vmem:[#allocation2 + $0xab0] ss:$36 sps:$4 sm:$0xff]   ;;  %v12752_v47 = vld [vmem:[#allocation2 + $0xab8] ss:$36 sps:$4 sm:$0xff]  }
 0x12e   :  { %3029 = vmatpush1.bf16.msra.mxu0 %v12671_v48  ;;  %3201 = vmatpush1.bf16.msra.mxu1 %v12674_v49  ;;  %v12757_v48 = vld [vmem:[#allocation2 + $0xafc] ss:$36 sps:$4 sm:$0xff]   ;;  %v12760_v49 = vld [vmem:[#allocation2 + $0xb04] ss:$36 sps:$4 sm:$0xff]  }
 0x12f   :  { %3030 = vmatprep.subr.bf16.mxu0 %v12679_v51  ;;  %3202 = vmatprep.subr.bf16.mxu1 %v12682_v52  ;;  %v12755_v51 = vld [vmem:[#allocation2 + $0xaf8] ss:$36 sps:$4 sm:$0xff]   ;;  %v12758_v52 = vld [vmem:[#allocation2 + $0xb00] ss:$36 sps:$4 sm:$0xff]  }
 0x132   :  { %3031 = vmatpush1.bf16.msra.mxu0 %v12677_v53  ;;  %3203 = vmatpush1.bf16.msra.mxu1 %v12680_v54  ;;  %v12763_v53 = vld [vmem:[#allocation2 + $0xb44] ss:$36 sps:$4 sm:$0xff]   ;;  %v12766_v54 = vld [vmem:[#allocation2 + $0xb4c] ss:$36 sps:$4 sm:$0xff]  }
 0x133   :  { %3032 = vmatprep.subr.bf16.mxu0 %v12685_v55  ;;  %3204 = vmatprep.subr.bf16.mxu1 %v12688_v56  ;;  %v12761_v55 = vld [vmem:[#allocation2 + $0xb40] ss:$36 sps:$4 sm:$0xff]   ;;  %v12764_v56 = vld [vmem:[#allocation2 + $0xb48] ss:$36 sps:$4 sm:$0xff]  }
 0x136   :  { %3033 = vmatpush1.bf16.msra.mxu0 %v12683_v57  ;;  %3205 = vmatpush1.bf16.msra.mxu1 %v12686_v58  ;;  %v12769_v57 = vld [vmem:[#allocation2 + $0xb8c] ss:$36 sps:$4 sm:$0xff]   ;;  %v12772_v58 = vld [vmem:[#allocation2 + $0xb94] ss:$36 sps:$4 sm:$0xff]  }
 0x137   :  { %3034 = vmatprep.subr.bf16.mxu0 %v12691_v59  ;;  %3206 = vmatprep.subr.bf16.mxu1 %v12694_v60  ;;  %v12767_v59 = vld [vmem:[#allocation2 + $0xb88] ss:$36 sps:$4 sm:$0xff]   ;;  %v12770_v60 = vld [vmem:[#allocation2 + $0xb90] ss:$36 sps:$4 sm:$0xff]  }
 0x13a   :  { %3035 = vmatpush1.bf16.msra.mxu0 %v12689_v61  ;;  %3207 = vmatpush1.bf16.msra.mxu1 %v12692_v62  ;;  %v12775_v61 = vld [vmem:[#allocation2 + $0xbd4] ss:$36 sps:$4 sm:$0xff]   ;;  %v12778_v62 = vld [vmem:[#allocation2 + $0xbdc] ss:$36 sps:$4 sm:$0xff]  }
 0x13b   :  { %3036 = vmatprep.subr.bf16.mxu0 %v12697_v63  ;;  %3208 = vmatprep.subr.bf16.mxu1 %v12700_v0  ;;  %v12773_v63 = vld [vmem:[#allocation2 + $0xbd0] ss:$36 sps:$4 sm:$0xff]   ;;  %v12776_v0 = vld [vmem:[#allocation2 + $0xbd8] ss:$36 sps:$4 sm:$0xff]  }
 0x13e   :  { %3037 = vmatpush1.bf16.msra.mxu0 %v12695_v1  ;;  %3209 = vmatpush1.bf16.msra.mxu1 %v12698_v2  ;;  %v12781_v1 = vld [vmem:[#allocation2 + $0xc1c] ss:$36 sps:$4 sm:$0xff]   ;;  %v12784_v2 = vld [vmem:[#allocation2 + $0xc24] ss:$36 sps:$4 sm:$0xff]  }
 0x13f   :  { %3038 = vmatprep.subr.bf16.mxu0 %v12703_v3  ;;  %3210 = vmatprep.subr.bf16.mxu1 %v12706_v4  ;;  %v12779_v3 = vld [vmem:[#allocation2 + $0xc18] ss:$36 sps:$4 sm:$0xff]   ;;  %v12782_v4 = vld [vmem:[#allocation2 + $0xc20] ss:$36 sps:$4 sm:$0xff]  }
 0x142   :  { %3039 = vmatpush1.bf16.msra.mxu0 %v12701_v5  ;;  %3211 = vmatpush1.bf16.msra.mxu1 %v12704_v6  ;;  %v12787_v5 = vld [vmem:[#allocation2 + $0xc64] ss:$36 sps:$4 sm:$0xff]   ;;  %v12790_v6 = vld [vmem:[#allocation2 + $0xc6c] ss:$36 sps:$4 sm:$0xff]  }
 0x143   :  { %3040 = vmatprep.subr.bf16.mxu0 %v12709_v7  ;;  %3212 = vmatprep.subr.bf16.mxu1 %v12712_v8  ;;  %v12785_v7 = vld [vmem:[#allocation2 + $0xc60] ss:$36 sps:$4 sm:$0xff]   ;;  %v12788_v8 = vld [vmem:[#allocation2 + $0xc68] ss:$36 sps:$4 sm:$0xff]  }
 0x146   :  { %3041 = vmatpush1.bf16.msra.mxu0 %v12707_v10  ;;  %3213 = vmatpush1.bf16.msra.mxu1 %v12710_v11  ;;  %v12793_v10 = vld [vmem:[#allocation2 + $0xcac] ss:$36 sps:$4 sm:$0xff]   ;;  %v12796_v11 = vld [vmem:[#allocation2 + $0xcb4] ss:$36 sps:$4 sm:$0xff]  }
 0x147   :  { %3053 = vmatprep.subr.bf16.mxu0 %v12715_v12  ;;  %3225 = vmatprep.subr.bf16.mxu1 %v12718_v15  ;;  %v12791_v12 = vld [vmem:[#allocation2 + $0xca8] ss:$36 sps:$4 sm:$0xff]   ;;  %v12802_v15 = vld [vmem:[#allocation2 + $0xcfc] ss:$36 sps:$4 sm:$0xff]  }
 0x149   :  { %3043 = vmatmul.mubr.bf16.vlgmr.msra.gmra.mrb[0].mxu0 %v14546_v18  ;;  %3215 = vmatmul.mubr.bf16.vlgmr.msra.gmra.mrb[0].mxu1 %v14546_v18 }
 0x14a   :  { %3054 = vmatpush1.bf16.msra.mxu0 %v12713_v16  ;;  %3226 = vmatpush1.bf16.msra.mxu1 %v12716_v17  ;;  %v12797_v16 = vld [vmem:[#allocation2 + $0xcf0] ss:$36 sps:$4 sm:$0xff]   ;;  %v12800_v17 = vld [vmem:[#allocation2 + $0xcf8] ss:$36 sps:$4 sm:$0xff]  }
 0x14b   :  { %3055 = vmatprep.subr.bf16.mxu0 %v12721_v19  ;;  %3227 = vmatprep.subr.bf16.mxu1 %v12724_v20  ;;  %v12805_v19 = vld [vmem:[#allocation2 + $0xd3c] ss:$36 sps:$4 sm:$0xff]   ;;  %v12808_v20 = vld [vmem:[#allocation2 + $0xd44] ss:$36 sps:$4 sm:$0xff]  }
 0x14c   :  { %3085 = vmatprep.mubr.bf16.mxu0 %v14556_v27  ;;  %3257 = vmatprep.mubr.bf16.mxu1 %v14556_v27 }
 0x14e   :  { %3056 = vmatpush1.bf16.msra.mxu0 %v12719_v22  ;;  %3228 = vmatpush1.bf16.msra.mxu1 %v12722_v23  ;;  %v12806_v22 = vld [vmem:[#allocation2 + $0xd40] ss:$36 sps:$4 sm:$0xff]  }
 0x14f   :  { %3057 = vmatprep.subr.bf16.mxu0 %v12727_v26  ;;  %3229 = vmatprep.subr.bf16.mxu1 %v12730_v28  ;;  %v202_v23 = vld [vmem:[%s15529_s6 + $0x20] sm:$0xff] }
 0x150   :  { %v12811_v26 = vld [vmem:[#allocation2 + $0xd84] ss:$36 sps:$4 sm:$0xff]   ;;  %v12814_v28 = vld [vmem:[#allocation2 + $0x1c] ss:$36 sps:$4 sm:$0xff]  }
 0x152   :  { %3058 = vmatpush1.bf16.msra.mxu0 %v12725_v29  ;;  %3230 = vmatpush1.bf16.msra.mxu1 %v12728_v30  ;;  %v14566_v29 = vpack.c.bf16 %v209_v25, %v202_v23  ;;  %v12809_v30 = vld [vmem:[#allocation2 + $0xd80] ss:$36 sps:$4 sm:$0xff]   ;;  %v12884_v23 = vld [vmem:[#allocation2 + $0x298] ss:$36 sps:$4 sm:$0xff]   ;;  %v12887_v25 = vld [vmem:[#allocation2 + $0x408] ss:$36 sps:$4 sm:$0xff]  }
 0x153   :  { %3059 = vmatprep.subr.bf16.mxu0 %v12733_v31  ;;  %3231 = vmatprep.subr.bf16.mxu1 %v12736_v32  ;;  %v12812_v31 = vld [vmem:[#allocation2 + $0x18] ss:$36 sps:$4 sm:$0xff]   ;;  %v12817_v32 = vld [vmem:[#allocation2 + $0x64] ss:$36 sps:$4 sm:$0xff]  }
 0x156   :  { %3060 = vmatpush1.bf16.msra.mxu0 %v12731_v33  ;;  %3232 = vmatpush1.bf16.msra.mxu1 %v12734_v34  ;;  %v12823_v33 = vld [vmem:[#allocation2 + $0xd8c] ss:$36 sps:$4 sm:$0xff]   ;;  %v12815_v34 = vld [vmem:[#allocation2 + $0x60] ss:$36 sps:$4 sm:$0xff]  }
 0x157   :  { %3061 = vmatprep.subr.bf16.mxu0 %v12739_v35  ;;  %3233 = vmatprep.subr.bf16.mxu1 %v12742_v36  ;;  %v12820_v35 = vld [vmem:[#allocation2 + $0xac] ss:$36 sps:$4 sm:$0xff]  }
 0x158   :  { %v12818_v36 = vld [vmem:[#allocation2 + $0xa8] ss:$36 sps:$4 sm:$0xff]  }
 0x15a   :  { %3062 = vmatpush1.bf16.msra.mxu0 %v12737_v38  ;;  %3234 = vmatpush1.bf16.msra.mxu1 %v12740_v39  ;;  %v204_v38 = vld [vmem:[%s15529_s6 + $0x30] sm:$0xff]  ;;  %v211_v39 = vld [vmem:[%s15529_s6 + $0x68] sm:$0xff] }
 0x15b   :  { %3063 = vmatprep.subr.bf16.mxu0 %v12745_v40  ;;  %3235 = vmatprep.subr.bf16.mxu1 %v12748_v41  ;;  %v12826_v40 = vld [vmem:[#allocation2 + $0xf4] ss:$36 sps:$4 sm:$0xff]   ;;  %v14578_v41 = vpack.c.bf16 %v211_v39, %v204_v38  ;;  %v12907_v38 = vld [vmem:[#allocation2 + $0x4e4] ss:$36 sps:$4 sm:$0xff]  }
 0x15c   :  { %v12902_v39 = vld [vmem:[#allocation2 + $0x370] ss:$36 sps:$4 sm:$0xff]  }
 0x15e   :  { %3064 = vmatpush1.bf16.msra.mxu0 %v12743_v42  ;;  %3236 = vmatpush1.bf16.msra.mxu1 %v12746_v43  ;;  %v12821_v42 = vld [vmem:[#allocation2 + $0xd88] ss:$36 sps:$4 sm:$0xff]   ;;  %v12824_v43 = vld [vmem:[#allocation2 + $0xf0] ss:$36 sps:$4 sm:$0xff]  }
 0x15f   :  { %3065 = vmatprep.subr.bf16.mxu0 %v12751_v44  ;;  %3237 = vmatprep.subr.bf16.mxu1 %v12754_v45  ;;  %v12829_v44 = vld [vmem:[#allocation2 + $0x13c] ss:$36 sps:$4 sm:$0xff]   ;;  %v12832_v45 = vld [vmem:[#allocation2 + $0x14] ss:$36 sps:$4 sm:$0xff]  }
 0x162   :  { %3066 = vmatpush1.bf16.msra.mxu0 %v12749_v46  ;;  %3238 = vmatpush1.bf16.msra.mxu1 %v12752_v47  ;;  %v12827_v46 = vld [vmem:[#allocation2 + $0x138] ss:$36 sps:$4 sm:$0xff]   ;;  %v12835_v47 = vld [vmem:[#allocation2 + $0x184] ss:$36 sps:$4 sm:$0xff]  }
 0x163   :  { %3067 = vmatprep.subr.bf16.mxu0 %v12757_v48  ;;  %3239 = vmatprep.subr.bf16.mxu1 %v12760_v49  ;;  %v12830_v48 = vld [vmem:[#allocation2 + $0x10] ss:$36 sps:$4 sm:$0xff]   ;;  %v12833_v49 = vld [vmem:[#allocation2 + $0x180] ss:$36 sps:$4 sm:$0xff]  }
 0x166   :  { %3068 = vmatpush1.bf16.msra.mxu0 %v12755_v51  ;;  %3240 = vmatpush1.bf16.msra.mxu1 %v12758_v52  ;;  %v12838_v51 = vld [vmem:[#allocation2 + $0x5c] ss:$36 sps:$4 sm:$0xff]   ;;  %v12841_v52 = vld [vmem:[#allocation2 + $0x1cc] ss:$36 sps:$4 sm:$0xff]  }
 0x167   :  { %3069 = vmatprep.subr.bf16.mxu0 %v12763_v53  ;;  %3241 = vmatprep.subr.bf16.mxu1 %v12766_v54  ;;  %v12836_v53 = vld [vmem:[#allocation2 + $0x58] ss:$36 sps:$4 sm:$0xff]   ;;  %v12839_v54 = vld [vmem:[#allocation2 + $0x1c8] ss:$36 sps:$4 sm:$0xff]  }
 0x16a   :  { %3070 = vmatpush1.bf16.msra.mxu0 %v12761_v55  ;;  %3242 = vmatpush1.bf16.msra.mxu1 %v12764_v56  ;;  %v12844_v55 = vld [vmem:[#allocation2 + $0xa4] ss:$36 sps:$4 sm:$0xff]   ;;  %v12847_v56 = vld [vmem:[#allocation2 + $0x214] ss:$36 sps:$4 sm:$0xff]  }
 0x16b   :  { %3071 = vmatprep.subr.bf16.mxu0 %v12769_v57  ;;  %3243 = vmatprep.subr.bf16.mxu1 %v12772_v58  ;;  %v12842_v57 = vld [vmem:[#allocation2 + $0xa0] ss:$36 sps:$4 sm:$0xff]   ;;  %v12845_v58 = vld [vmem:[#allocation2 + $0x210] ss:$36 sps:$4 sm:$0xff]  }
 0x16e   :  { %3072 = vmatpush1.bf16.msra.mxu0 %v12767_v59  ;;  %3244 = vmatpush1.bf16.msra.mxu1 %v12770_v60  ;;  %v12850_v59 = vld [vmem:[#allocation2 + $0xec] ss:$36 sps:$4 sm:$0xff]   ;;  %v12853_v60 = vld [vmem:[#allocation2 + $0x25c] ss:$36 sps:$4 sm:$0xff]  }
 0x16f   :  { %3073 = vmatprep.subr.bf16.mxu0 %v12775_v61  ;;  %3245 = vmatprep.subr.bf16.mxu1 %v12778_v62  ;;  %v12848_v61 = vld [vmem:[#allocation2 + $0xe8] ss:$36 sps:$4 sm:$0xff]   ;;  %v12851_v62 = vld [vmem:[#allocation2 + $0x258] ss:$36 sps:$4 sm:$0xff]  }
 0x172   :  { %3074 = vmatpush1.bf16.msra.mxu0 %v12773_v63  ;;  %3246 = vmatpush1.bf16.msra.mxu1 %v12776_v0  ;;  %v12856_v63 = vld [vmem:[#allocation2 + $0x134] ss:$36 sps:$4 sm:$0xff]   ;;  %v12859_v0 = vld [vmem:[#allocation2 + $0x2a4] ss:$36 sps:$4 sm:$0xff]  }
 0x173   :  { %3075 = vmatprep.subr.bf16.mxu0 %v12781_v1  ;;  %3247 = vmatprep.subr.bf16.mxu1 %v12784_v2  ;;  %v12854_v1 = vld [vmem:[#allocation2 + $0x130] ss:$36 sps:$4 sm:$0xff]   ;;  %v12857_v2 = vld [vmem:[#allocation2 + $0x2a0] ss:$36 sps:$4 sm:$0xff]  }
 0x176   :  { %3076 = vmatpush1.bf16.msra.mxu0 %v12779_v3  ;;  %3248 = vmatpush1.bf16.msra.mxu1 %v12782_v4  ;;  %v12862_v3 = vld [vmem:[#allocation2 + $0x17c] ss:$36 sps:$4 sm:$0xff]   ;;  %v12865_v4 = vld [vmem:[#allocation2 + $0x2ec] ss:$36 sps:$4 sm:$0xff]  }
 0x177   :  { %3077 = vmatprep.subr.bf16.mxu0 %v12787_v5  ;;  %3249 = vmatprep.subr.bf16.mxu1 %v12790_v6  ;;  %v12860_v5 = vld [vmem:[#allocation2 + $0x178] ss:$36 sps:$4 sm:$0xff]   ;;  %v12863_v6 = vld [vmem:[#allocation2 + $0x2e8] ss:$36 sps:$4 sm:$0xff]  }
 0x17a   :  { %3078 = vmatpush1.bf16.msra.mxu0 %v12785_v7  ;;  %3250 = vmatpush1.bf16.msra.mxu1 %v12788_v8  ;;  %v12868_v7 = vld [vmem:[#allocation2 + $0x1c4] ss:$36 sps:$4 sm:$0xff]   ;;  %v12871_v8 = vld [vmem:[#allocation2 + $0x334] ss:$36 sps:$4 sm:$0xff]  }
 0x17b   :  { %3079 = vmatprep.subr.bf16.mxu0 %v12793_v10  ;;  %3251 = vmatprep.subr.bf16.mxu1 %v12796_v11  ;;  %v12866_v10 = vld [vmem:[#allocation2 + $0x1c0] ss:$36 sps:$4 sm:$0xff]   ;;  %v12869_v11 = vld [vmem:[#allocation2 + $0x330] ss:$36 sps:$4 sm:$0xff]  }
 0x17e   :  { %3080 = vmatpush1.bf16.msra.mxu0 %v12791_v12  ;;  %3252 = vmatpush1.bf16.msra.mxu1 %v12794_v13  ;;  %v12874_v12 = vld [vmem:[#allocation2 + $0x20c] ss:$36 sps:$4 sm:$0xff]   ;;  %v12877_v13 = vld [vmem:[#allocation2 + $0x37c] ss:$36 sps:$4 sm:$0xff]  }
 0x17f   :  { %3081 = vmatprep.subr.bf16.mxu0 %v12799_v14  ;;  %3253 = vmatprep.subr.bf16.mxu1 %v12802_v15  ;;  %v12872_v14 = vld [vmem:[#allocation2 + $0x208] ss:$36 sps:$4 sm:$0xff]   ;;  %v12875_v15 = vld [vmem:[#allocation2 + $0x378] ss:$36 sps:$4 sm:$0xff]  }
 0x182   :  { %3082 = vmatpush1.bf16.msra.mxu0 %v12797_v16  ;;  %3254 = vmatpush1.bf16.msra.mxu1 %v12800_v17  ;;  %v12880_v16 = vld [vmem:[#allocation2 + $0x254] ss:$36 sps:$4 sm:$0xff]   ;;  %v12883_v17 = vld [vmem:[#allocation2 + $0x3c4] ss:$36 sps:$4 sm:$0xff]  }
 0x183   :  { %3083 = vmatprep.subr.bf16.mxu0 %v12805_v19  ;;  %3255 = vmatprep.subr.bf16.mxu1 %v12808_v20  ;;  %v12878_v19 = vld [vmem:[#allocation2 + $0x250] ss:$36 sps:$4 sm:$0xff]   ;;  %v12881_v20 = vld [vmem:[#allocation2 + $0x3c0] ss:$36 sps:$4 sm:$0xff]  }
 0x186   :  { %3084 = vmatpush1.bf16.msra.mxu0 %v12803_v21  ;;  %3256 = vmatpush1.bf16.msra.mxu1 %v12806_v22  ;;  %v12886_v21 = vld [vmem:[#allocation2 + $0x29c] ss:$36 sps:$4 sm:$0xff]   ;;  %v12889_v22 = vld [vmem:[#allocation2 + $0x40c] ss:$36 sps:$4 sm:$0xff]  }
 0x187   :  { %3096 = vmatprep.subr.bf16.mxu0 %v12811_v26  ;;  %3483 = vmatprep.subr.bf16.mxu1 %v12814_v28  ;;  %v12892_v26 = vld [vmem:[#allocation2 + $0x2e4] ss:$36 sps:$4 sm:$0xff]   ;;  %v12895_v28 = vld [vmem:[#allocation2 + $0x454] ss:$36 sps:$4 sm:$0xff]  }
 0x189   :  { %3086 = vmatmul.mubr.bf16.vlgmr.msra.gmra.mrb[0].mxu0 %v14566_v29  ;;  %3258 = vmatmul.mubr.bf16.vlgmr.msra.gmra.mrb[0].mxu1 %v14566_v29 }
 0x18a   :  { %3097 = vmatpush1.bf16.msra.mxu0 %v12809_v30  ;;  %3484 = vmatpush1.bf16.msra.mxu1 %v12812_v31  ;;  %v12890_v30 = vld [vmem:[#allocation2 + $0x2e0] ss:$36 sps:$4 sm:$0xff]   ;;  %v12893_v31 = vld [vmem:[#allocation2 + $0x450] ss:$36 sps:$4 sm:$0xff]  }
 0x18b   :  { %3485 = vmatprep.subr.bf16.mxu1 %v12817_v32  ;;  %3128 = vmatprep.mubr.bf16.mxu0 %v14267_v24  ;;  %v12898_v32 = vld [vmem:[#allocation2 + $0x32c] ss:$36 sps:$4 sm:$0xff]  }
 0x18c   :  { %3268 = vmatprep.subr.bf16.mxu0 %v12823_v33  ;;  %3515 = vmatprep.mubr.bf16.mxu1 %v14514_v50  ;;  %v12901_v33 = vld [vmem:[#allocation2 + $0x49c] ss:$36 sps:$4 sm:$0xff]  }
 0x18e   :  { %3486 = vmatpush1.bf16.msra.mxu1 %v12815_v34  ;;  %v12896_v34 = vld [vmem:[#allocation2 + $0x328] ss:$36 sps:$4 sm:$0xff]  }
 0x18f   :  { %3487 = vmatprep.subr.bf16.mxu1 %v12820_v35  ;;  %v12899_v35 = vld [vmem:[#allocation2 + $0x498] ss:$36 sps:$4 sm:$0xff]  }
 0x192   :  { %3488 = vmatpush1.bf16.msra.mxu1 %v12818_v36  ;;  %v12904_v36 = vld [vmem:[#allocation2 + $0x374] ss:$36 sps:$4 sm:$0xff]  }
 0x193   :  { %3489 = vmatprep.subr.bf16.mxu1 %v12826_v40  ;;  %v12905_v40 = vld [vmem:[#allocation2 + $0x4e0] ss:$36 sps:$4 sm:$0xff]  }
 0x195   :  { %11526 = vmatmul.mubr.msk.bf16.vlgmr.msra.gmra.mrb[0].mxu0 %vm2963_vm0, %v14578_v41 }
 0x196   :  { %3269 = vmatpush1.bf16.msra.mxu0 %v12821_v42  ;;  %3490 = vmatpush1.bf16.msra.mxu1 %v12824_v43  ;;  %v12910_v42 = vld [vmem:[#allocation2 + $0x3bc] ss:$36 sps:$4 sm:$0xff]   ;;  %v12913_v43 = vld [vmem:[#allocation2 + $0x52c] ss:$36 sps:$4 sm:$0xff]  }
 0x197   :  { %3491 = vmatprep.subr.bf16.mxu1 %v12829_v44  ;;  %3300 = vmatprep.mubr.bf16.mxu0 %v14267_v24  ;;  %v12908_v44 = vld [vmem:[#allocation2 + $0x3b8] ss:$36 sps:$4 sm:$0xff]  }
 0x198   :  { %3311 = vmatprep.subr.bf16.mxu0 %v12832_v45  ;;  %v12911_v45 = vld [vmem:[#allocation2 + $0x528] ss:$36 sps:$4 sm:$0xff]  }
 0x19a   :  { %3492 = vmatpush1.bf16.msra.mxu1 %v12827_v46  ;;  %v12916_v46 = vld [vmem:[#allocation2 + $0x404] ss:$36 sps:$4 sm:$0xff]  }
 0x19b   :  { %3493 = vmatprep.subr.bf16.mxu1 %v12835_v47  ;;  %v12919_v47 = vld [vmem:[#allocation2 + $0x574] ss:$36 sps:$4 sm:$0xff]  }
 0x19d   :  { %11527 = vmatmul.mubr.msk.bf16.vlgmr.msra.gmra.mrb[4].mxu0 %vm2963_vm0, %v14578_v41 }
 0x19e   :  { %3312 = vmatpush1.bf16.msra.mxu0 %v12830_v48  ;;  %3494 = vmatpush1.bf16.msra.mxu1 %v12833_v49  ;;  %v12914_v48 = vld [vmem:[#allocation2 + $0x400] ss:$36 sps:$4 sm:$0xff]   ;;  %v12917_v49 = vld [vmem:[#allocation2 + $0x570] ss:$36 sps:$4 sm:$0xff]  }
 0x19f   :  { %3313 = vmatprep.subr.bf16.mxu0 %v12838_v51  ;;  %3495 = vmatprep.subr.bf16.mxu1 %v12841_v52  ;;  %v12922_v51 = vld [vmem:[#allocation2 + $0x44c] ss:$36 sps:$4 sm:$0xff]   ;;  %v12925_v52 = vld [vmem:[#allocation2 + $0x5bc] ss:$36 sps:$4 sm:$0xff]  }
 0x1a0   :  { %3343 = vmatprep.mubr.bf16.mxu0 %v14514_v50 }
 0x1a2   :  { %3314 = vmatpush1.bf16.msra.mxu0 %v12836_v53  ;;  %3496 = vmatpush1.bf16.msra.mxu1 %v12839_v54  ;;  %v12920_v53 = vld [vmem:[#allocation2 + $0x448] ss:$36 sps:$4 sm:$0xff]   ;;  %v12923_v54 = vld [vmem:[#allocation2 + $0x5b8] ss:$36 sps:$4 sm:$0xff]  }
 0x1a3   :  { %3315 = vmatprep.subr.bf16.mxu0 %v12844_v55  ;;  %3497 = vmatprep.subr.bf16.mxu1 %v12847_v56  ;;  %v12928_v55 = vld [vmem:[#allocation2 + $0x494] ss:$36 sps:$4 sm:$0xff]   ;;  %v12931_v56 = vld [vmem:[#allocation2 + $0x604] ss:$36 sps:$4 sm:$0xff]  }
 0x1a6   :  { %3316 = vmatpush1.bf16.msra.mxu0 %v12842_v57  ;;  %3498 = vmatpush1.bf16.msra.mxu1 %v12845_v58  ;;  %v12926_v57 = vld [vmem:[#allocation2 + $0x490] ss:$36 sps:$4 sm:$0xff]   ;;  %v12929_v58 = vld [vmem:[#allocation2 + $0x600] ss:$36 sps:$4 sm:$0xff]  }
 0x1a7   :  { %3317 = vmatprep.subr.bf16.mxu0 %v12850_v59  ;;  %3499 = vmatprep.subr.bf16.mxu1 %v12853_v60  ;;  %v12934_v59 = vld [vmem:[#allocation2 + $0x4dc] ss:$36 sps:$4 sm:$0xff]   ;;  %v12937_v60 = vld [vmem:[#allocation2 + $0x64c] ss:$36 sps:$4 sm:$0xff]  }
 0x1aa   :  { %3318 = vmatpush1.bf16.msra.mxu0 %v12848_v61  ;;  %3500 = vmatpush1.bf16.msra.mxu1 %v12851_v62  ;;  %v12932_v61 = vld [vmem:[#allocation2 + $0x4d8] ss:$36 sps:$4 sm:$0xff]   ;;  %v12935_v62 = vld [vmem:[#allocation2 + $0x648] ss:$36 sps:$4 sm:$0xff]  }
 0x1ab   :  { %3319 = vmatprep.subr.bf16.mxu0 %v12856_v63  ;;  %3501 = vmatprep.subr.bf16.mxu1 %v12859_v0  ;;  %v12940_v63 = vld [vmem:[#allocation2 + $0x524] ss:$36 sps:$4 sm:$0xff]   ;;  %v12943_v0 = vld [vmem:[#allocation2 + $0x694] ss:$36 sps:$4 sm:$0xff]  }
 0x1ae   :  { %3320 = vmatpush1.bf16.msra.mxu0 %v12854_v1  ;;  %3502 = vmatpush1.bf16.msra.mxu1 %v12857_v2  ;;  %v12938_v1 = vld [vmem:[#allocation2 + $0x520] ss:$36 sps:$4 sm:$0xff]   ;;  %v12941_v2 = vld [vmem:[#allocation2 + $0x690] ss:$36 sps:$4 sm:$0xff]  }
 0x1af   :  { %3321 = vmatprep.subr.bf16.mxu0 %v12862_v3  ;;  %3503 = vmatprep.subr.bf16.mxu1 %v12865_v4  ;;  %v12946_v3 = vld [vmem:[#allocation2 + $0x56c] ss:$36 sps:$4 sm:$0xff]   ;;  %v12949_v4 = vld [vmem:[#allocation2 + $0x6dc] ss:$36 sps:$4 sm:$0xff]  }
 0x1b2   :  { %3322 = vmatpush1.bf16.msra.mxu0 %v12860_v5  ;;  %3504 = vmatpush1.bf16.msra.mxu1 %v12863_v6  ;;  %v12944_v5 = vld [vmem:[#allocation2 + $0x568] ss:$36 sps:$4 sm:$0xff]   ;;  %v12947_v6 = vld [vmem:[#allocation2 + $0x6d8] ss:$36 sps:$4 sm:$0xff]  }
 0x1b3   :  { %3323 = vmatprep.subr.bf16.mxu0 %v12868_v7  ;;  %3505 = vmatprep.subr.bf16.mxu1 %v12871_v8  ;;  %v12952_v7 = vld [vmem:[#allocation2 + $0x5b4] ss:$36 sps:$4 sm:$0xff]   ;;  %v12955_v8 = vld [vmem:[#allocation2 + $0x724] ss:$36 sps:$4 sm:$0xff]  }
 0x1b6   :  { %3324 = vmatpush1.bf16.msra.mxu0 %v12866_v10  ;;  %3506 = vmatpush1.bf16.msra.mxu1 %v12869_v11  ;;  %v12950_v10 = vld [vmem:[#allocation2 + $0x5b0] ss:$36 sps:$4 sm:$0xff]   ;;  %v12953_v11 = vld [vmem:[#allocation2 + $0x720] ss:$36 sps:$4 sm:$0xff]  }
 0x1b7   :  { %3325 = vmatprep.subr.bf16.mxu0 %v12874_v12  ;;  %3507 = vmatprep.subr.bf16.mxu1 %v12877_v13  ;;  %v12958_v12 = vld [vmem:[#allocation2 + $0x5fc] ss:$36 sps:$4 sm:$0xff]   ;;  %v12961_v13 = vld [vmem:[#allocation2 + $0x76c] ss:$36 sps:$4 sm:$0xff]  }
 0x1ba   :  { %3326 = vmatpush1.bf16.msra.mxu0 %v12872_v14  ;;  %3508 = vmatpush1.bf16.msra.mxu1 %v12875_v15  ;;  %v12956_v14 = vld [vmem:[#allocation2 + $0x5f8] ss:$36 sps:$4 sm:$0xff]   ;;  %v12959_v15 = vld [vmem:[#allocation2 + $0x768] ss:$36 sps:$4 sm:$0xff]  }
 0x1bb   :  { %3327 = vmatprep.subr.bf16.mxu0 %v12880_v16  ;;  %3509 = vmatprep.subr.bf16.mxu1 %v12883_v17  ;;  %v12964_v16 = vld [vmem:[#allocation2 + $0x644] ss:$36 sps:$4 sm:$0xff]   ;;  %v12967_v17 = vld [vmem:[#allocation2 + $0x7b4] ss:$36 sps:$4 sm:$0xff]  }
 0x1be   :  { %3328 = vmatpush1.bf16.msra.mxu0 %v12878_v19  ;;  %3510 = vmatpush1.bf16.msra.mxu1 %v12881_v20  ;;  %v12962_v19 = vld [vmem:[#allocation2 + $0x640] ss:$36 sps:$4 sm:$0xff]   ;;  %v12965_v20 = vld [vmem:[#allocation2 + $0x7b0] ss:$36 sps:$4 sm:$0xff]  }
 0x1bf   :  { %3329 = vmatprep.subr.bf16.mxu0 %v12886_v21  ;;  %3511 = vmatprep.subr.bf16.mxu1 %v12889_v22  ;;  %v12970_v21 = vld [vmem:[#allocation2 + $0x68c] ss:$36 sps:$4 sm:$0xff]   ;;  %v12973_v22 = vld [vmem:[#allocation2 + $0x7fc] ss:$36 sps:$4 sm:$0xff]  }
 0x1c2   :  { %3330 = vmatpush1.bf16.msra.mxu0 %v12884_v23  ;;  %3512 = vmatpush1.bf16.msra.mxu1 %v12887_v25  ;;  %v12968_v23 = vld [vmem:[#allocation2 + $0x688] ss:$36 sps:$4 sm:$0xff]   ;;  %v12971_v25 = vld [vmem:[#allocation2 + $0x7f8] ss:$36 sps:$4 sm:$0xff]  }
 0x1c3   :  { %3331 = vmatprep.subr.bf16.mxu0 %v12892_v26  ;;  %3513 = vmatprep.subr.bf16.mxu1 %v12895_v28  ;;  %v12976_v26 = vld [vmem:[#allocation2 + $0x6d4] ss:$36 sps:$4 sm:$0xff]   ;;  %v12979_v28 = vld [vmem:[#allocation2 + $0x844] ss:$36 sps:$4 sm:$0xff]  }
 0x1c6   :  { %3332 = vmatpush1.bf16.msra.mxu0 %v12890_v30  ;;  %3514 = vmatpush1.bf16.msra.mxu1 %v12893_v31  ;;  %v12974_v30 = vld [vmem:[#allocation2 + $0x6d0] ss:$36 sps:$4 sm:$0xff]   ;;  %v12977_v31 = vld [vmem:[#allocation2 + $0x840] ss:$36 sps:$4 sm:$0xff]  }
 0x1c7   :  { %3333 = vmatprep.subr.bf16.mxu0 %v12898_v32  ;;  %3526 = vmatprep.subr.bf16.mxu1 %v12901_v33  ;;  %v12982_v32 = vld [vmem:[#allocation2 + $0x71c] ss:$36 sps:$4 sm:$0xff]   ;;  %v12985_v33 = vld [vmem:[#allocation2 + $0x88c] ss:$36 sps:$4 sm:$0xff]  }
 0x1c9   :  { %3516 = vmatmul.mubr.bf16.vlgmr.msra.gmra.mrb[4].mxu1 %v14524_v9 }
 0x1ca   :  { %3334 = vmatpush1.bf16.msra.mxu0 %v12896_v34  ;;  %3527 = vmatpush1.bf16.msra.mxu1 %v12899_v35  ;;  %v12980_v34 = vld [vmem:[#allocation2 + $0x718] ss:$36 sps:$4 sm:$0xff]   ;;  %v12983_v35 = vld [vmem:[#allocation2 + $0x888] ss:$36 sps:$4 sm:$0xff]  }
 0x1cb   :  { %3335 = vmatprep.subr.bf16.mxu0 %v12904_v36  ;;  %3528 = vmatprep.subr.bf16.mxu1 %v12907_v38  ;;  %v12988_v36 = vld [vmem:[#allocation2 + $0x764] ss:$36 sps:$4 sm:$0xff]   ;;  %v12991_v38 = vld [vmem:[#allocation2 + $0x8d4] ss:$36 sps:$4 sm:$0xff]  }
 0x1cc   :  { %3558 = vmatprep.mubr.bf16.mxu1 %v14536_v37 }
 0x1ce   :  { %3336 = vmatpush1.bf16.msra.mxu0 %v12902_v39  ;;  %3529 = vmatpush1.bf16.msra.mxu1 %v12905_v40  ;;  %v12986_v39 = vld [vmem:[#allocation2 + $0x760] ss:$36 sps:$4 sm:$0xff]   ;;  %v12989_v40 = vld [vmem:[#allocation2 + $0x8d0] ss:$36 sps:$4 sm:$0xff]  }
 0x1cf   :  { %3337 = vmatprep.subr.bf16.mxu0 %v12910_v42  ;;  %3530 = vmatprep.subr.bf16.mxu1 %v12913_v43  ;;  %v12994_v42 = vld [vmem:[#allocation2 + $0x7ac] ss:$36 sps:$4 sm:$0xff]   ;;  %v12997_v43 = vld [vmem:[#allocation2 + $0x91c] ss:$36 sps:$4 sm:$0xff]  }
 0x1d2   :  { %3338 = vmatpush1.bf16.msra.mxu0 %v12908_v44  ;;  %3531 = vmatpush1.bf16.msra.mxu1 %v12911_v45  ;;  %v12992_v44 = vld [vmem:[#allocation2 + $0x7a8] ss:$36 sps:$4 sm:$0xff]   ;;  %v12995_v45 = vld [vmem:[#allocation2 + $0x918] ss:$36 sps:$4 sm:$0xff]  }
 0x1d3   :  { %3339 = vmatprep.subr.bf16.mxu0 %v12916_v46  ;;  %3532 = vmatprep.subr.bf16.mxu1 %v12919_v47  ;;  %v13000_v46 = vld [vmem:[#allocation2 + $0x7f4] ss:$36 sps:$4 sm:$0xff]   ;;  %v13003_v47 = vld [vmem:[#allocation2 + $0x964] ss:$36 sps:$4 sm:$0xff]  }
 0x1d6   :  { %3340 = vmatpush1.bf16.msra.mxu0 %v12914_v48  ;;  %3533 = vmatpush1.bf16.msra.mxu1 %v12917_v49  ;;  %v12998_v48 = vld [vmem:[#allocation2 + $0x7f0] ss:$36 sps:$4 sm:$0xff]   ;;  %v13001_v49 = vld [vmem:[#allocation2 + $0x960] ss:$36 sps:$4 sm:$0xff]  }
 0x1d7   :  { %3341 = vmatprep.subr.bf16.mxu0 %v12922_v51  ;;  %3534 = vmatprep.subr.bf16.mxu1 %v12925_v52  ;;  %v13006_v51 = vld [vmem:[#allocation2 + $0x83c] ss:$36 sps:$4 sm:$0xff]   ;;  %v13009_v52 = vld [vmem:[#allocation2 + $0x9ac] ss:$36 sps:$4 sm:$0xff]  }
 0x1da   :  { %3342 = vmatpush1.bf16.msra.mxu0 %v12920_v53  ;;  %3535 = vmatpush1.bf16.msra.mxu1 %v12923_v54  ;;  %v13004_v53 = vld [vmem:[#allocation2 + $0x838] ss:$36 sps:$4 sm:$0xff]   ;;  %v13007_v54 = vld [vmem:[#allocation2 + $0x9a8] ss:$36 sps:$4 sm:$0xff]  }
 0x1db   :  { %3354 = vmatprep.subr.bf16.mxu0 %v12928_v55  ;;  %3536 = vmatprep.subr.bf16.mxu1 %v12931_v56  ;;  %v13012_v55 = vld [vmem:[#allocation2 + $0x884] ss:$36 sps:$4 sm:$0xff]   ;;  %v13015_v56 = vld [vmem:[#allocation2 + $0x9f4] ss:$36 sps:$4 sm:$0xff]  }
 0x1dd   :  { %3344 = vmatmul.mubr.bf16.vlgmr.msra.gmra.mrb[8].mxu0 %v14524_v9 }
 0x1de   :  { %3355 = vmatpush1.bf16.msra.mxu0 %v12926_v57  ;;  %3537 = vmatpush1.bf16.msra.mxu1 %v12929_v58  ;;  %v13010_v57 = vld [vmem:[#allocation2 + $0x880] ss:$36 sps:$4 sm:$0xff]   ;;  %v13013_v58 = vld [vmem:[#allocation2 + $0x9f0] ss:$36 sps:$4 sm:$0xff]  }
 0x1df   :  { %3356 = vmatprep.subr.bf16.mxu0 %v12934_v59  ;;  %3538 = vmatprep.subr.bf16.mxu1 %v12937_v60  ;;  %v13018_v59 = vld [vmem:[#allocation2 + $0x8cc] ss:$36 sps:$4 sm:$0xff]   ;;  %v13021_v60 = vld [vmem:[#allocation2 + $0xa3c] ss:$36 sps:$4 sm:$0xff]  }
 0x1e0   :  { %3386 = vmatprep.mubr.bf16.mxu0 %v14536_v37 }
 0x1e2   :  { %3357 = vmatpush1.bf16.msra.mxu0 %v12932_v61  ;;  %3539 = vmatpush1.bf16.msra.mxu1 %v12935_v62  ;;  %v13016_v61 = vld [vmem:[#allocation2 + $0x8c8] ss:$36 sps:$4 sm:$0xff]   ;;  %v13019_v62 = vld [vmem:[#allocation2 + $0xa38] ss:$36 sps:$4 sm:$0xff]  }
 0x1e3   :  { %3358 = vmatprep.subr.bf16.mxu0 %v12940_v63  ;;  %3540 = vmatprep.subr.bf16.mxu1 %v12943_v0  ;;  %v13024_v63 = vld [vmem:[#allocation2 + $0x914] ss:$36 sps:$4 sm:$0xff]   ;;  %v13027_v0 = vld [vmem:[#allocation2 + $0xa84] ss:$36 sps:$4 sm:$0xff]  }
 0x1e6   :  { %3359 = vmatpush1.bf16.msra.mxu0 %v12938_v1  ;;  %3541 = vmatpush1.bf16.msra.mxu1 %v12941_v2  ;;  %v13022_v1 = vld [vmem:[#allocation2 + $0x910] ss:$36 sps:$4 sm:$0xff]   ;;  %v13025_v2 = vld [vmem:[#allocation2 + $0xa80] ss:$36 sps:$4 sm:$0xff]  }
 0x1e7   :  { %3360 = vmatprep.subr.bf16.mxu0 %v12946_v3  ;;  %3542 = vmatprep.subr.bf16.mxu1 %v12949_v4  ;;  %v13030_v3 = vld [vmem:[#allocation2 + $0x95c] ss:$36 sps:$4 sm:$0xff]   ;;  %v13033_v4 = vld [vmem:[#allocation2 + $0xacc] ss:$36 sps:$4 sm:$0xff]  }
 0x1ea   :  { %3361 = vmatpush1.bf16.msra.mxu0 %v12944_v5  ;;  %3543 = vmatpush1.bf16.msra.mxu1 %v12947_v6  ;;  %v13028_v5 = vld [vmem:[#allocation2 + $0x958] ss:$36 sps:$4 sm:$0xff]   ;;  %v13031_v6 = vld [vmem:[#allocation2 + $0xac8] ss:$36 sps:$4 sm:$0xff]  }
 0x1eb   :  { %3362 = vmatprep.subr.bf16.mxu0 %v12952_v7  ;;  %3544 = vmatprep.subr.bf16.mxu1 %v12955_v8  ;;  %v13036_v7 = vld [vmem:[#allocation2 + $0x9a4] ss:$36 sps:$4 sm:$0xff]   ;;  %v13039_v8 = vld [vmem:[#allocation2 + $0xb14] ss:$36 sps:$4 sm:$0xff]  }
 0x1ee   :  { %3363 = vmatpush1.bf16.msra.mxu0 %v12950_v10  ;;  %3545 = vmatpush1.bf16.msra.mxu1 %v12953_v11  ;;  %v13034_v10 = vld [vmem:[#allocation2 + $0x9a0] ss:$36 sps:$4 sm:$0xff]   ;;  %v13037_v11 = vld [vmem:[#allocation2 + $0xb10] ss:$36 sps:$4 sm:$0xff]  }
 0x1ef   :  { %3364 = vmatprep.subr.bf16.mxu0 %v12958_v12  ;;  %3546 = vmatprep.subr.bf16.mxu1 %v12961_v13  ;;  %v13042_v12 = vld [vmem:[#allocation2 + $0x9ec] ss:$36 sps:$4 sm:$0xff]   ;;  %v13045_v13 = vld [vmem:[#allocation2 + $0xb5c] ss:$36 sps:$4 sm:$0xff]  }
 0x1f2   :  { %3365 = vmatpush1.bf16.msra.mxu0 %v12956_v14  ;;  %3547 = vmatpush1.bf16.msra.mxu1 %v12959_v15  ;;  %v13040_v14 = vld [vmem:[#allocation2 + $0x9e8] ss:$36 sps:$4 sm:$0xff]   ;;  %v13043_v15 = vld [vmem:[#allocation2 + $0xb58] ss:$36 sps:$4 sm:$0xff]  }
 0x1f3   :  { %3366 = vmatprep.subr.bf16.mxu0 %v12964_v16  ;;  %3548 = vmatprep.subr.bf16.mxu1 %v12967_v17  ;;  %v13048_v16 = vld [vmem:[#allocation2 + $0xa34] ss:$36 sps:$4 sm:$0xff]   ;;  %v13051_v17 = vld [vmem:[#allocation2 + $0xba4] ss:$36 sps:$4 sm:$0xff]  }
 0x1f6   :  { %3367 = vmatpush1.bf16.msra.mxu0 %v12962_v19  ;;  %3549 = vmatpush1.bf16.msra.mxu1 %v12965_v20  ;;  %v13046_v19 = vld [vmem:[#allocation2 + $0xa30] ss:$36 sps:$4 sm:$0xff]   ;;  %v13049_v20 = vld [vmem:[#allocation2 + $0xba0] ss:$36 sps:$4 sm:$0xff]  }
 0x1f7   :  { %3368 = vmatprep.subr.bf16.mxu0 %v12970_v21  ;;  %3550 = vmatprep.subr.bf16.mxu1 %v12973_v22  ;;  %v13054_v21 = vld [vmem:[#allocation2 + $0xa7c] ss:$36 sps:$4 sm:$0xff]   ;;  %v13057_v22 = vld [vmem:[#allocation2 + $0xbec] ss:$36 sps:$4 sm:$0xff]  }
 0x1fa   :  { %3369 = vmatpush1.bf16.msra.mxu0 %v12968_v23  ;;  %3551 = vmatpush1.bf16.msra.mxu1 %v12971_v25  ;;  %v13052_v23 = vld [vmem:[#allocation2 + $0xa78] ss:$36 sps:$4 sm:$0xff]   ;;  %v13055_v25 = vld [vmem:[#allocation2 + $0xbe8] ss:$36 sps:$4 sm:$0xff]  }
 0x1fb   :  { %3370 = vmatprep.subr.bf16.mxu0 %v12976_v26  ;;  %3552 = vmatprep.subr.bf16.mxu1 %v12979_v28  ;;  %v13060_v26 = vld [vmem:[#allocation2 + $0xac4] ss:$36 sps:$4 sm:$0xff]   ;;  %v13063_v28 = vld [vmem:[#allocation2 + $0xc34] ss:$36 sps:$4 sm:$0xff]  }
 0x1fe   :  { %3371 = vmatpush1.bf16.msra.mxu0 %v12974_v30  ;;  %3553 = vmatpush1.bf16.msra.mxu1 %v12977_v31  ;;  %v13058_v30 = vld [vmem:[#allocation2 + $0xac0] ss:$36 sps:$4 sm:$0xff]   ;;  %v13061_v31 = vld [vmem:[#allocation2 + $0xc30] ss:$36 sps:$4 sm:$0xff]  }
 0x1ff   :  { %3372 = vmatprep.subr.bf16.mxu0 %v12982_v32  ;;  %3554 = vmatprep.subr.bf16.mxu1 %v12985_v33  ;;  %v13066_v32 = vld [vmem:[#allocation2 + $0xb0c] ss:$36 sps:$4 sm:$0xff]   ;;  %v13069_v33 = vld [vmem:[#allocation2 + $0xc7c] ss:$36 sps:$4 sm:$0xff]  }
 0x202   :  { %3373 = vmatpush1.bf16.msra.mxu0 %v12980_v34  ;;  %3555 = vmatpush1.bf16.msra.mxu1 %v12983_v35  ;;  %v13064_v34 = vld [vmem:[#allocation2 + $0xb08] ss:$36 sps:$4 sm:$0xff]   ;;  %v13067_v35 = vld [vmem:[#allocation2 + $0xc78] ss:$36 sps:$4 sm:$0xff]  }
 0x203   :  { %3374 = vmatprep.subr.bf16.mxu0 %v12988_v36  ;;  %3556 = vmatprep.subr.bf16.mxu1 %v12991_v38  ;;  %v13072_v36 = vld [vmem:[#allocation2 + $0xb54] ss:$36 sps:$4 sm:$0xff]   ;;  %v13075_v38 = vld [vmem:[#allocation2 + $0xcc4] ss:$36 sps:$4 sm:$0xff]  }
 0x206   :  { %3375 = vmatpush1.bf16.msra.mxu0 %v12986_v39  ;;  %3557 = vmatpush1.bf16.msra.mxu1 %v12989_v40  ;;  %v13070_v39 = vld [vmem:[#allocation2 + $0xb50] ss:$36 sps:$4 sm:$0xff]   ;;  %v13073_v40 = vld [vmem:[#allocation2 + $0xcc0] ss:$36 sps:$4 sm:$0xff]  }
 0x207   :  { %3376 = vmatprep.subr.bf16.mxu0 %v12994_v42  ;;  %3569 = vmatprep.subr.bf16.mxu1 %v12997_v43  ;;  %v13078_v42 = vld [vmem:[#allocation2 + $0xb9c] ss:$36 sps:$4 sm:$0xff]   ;;  %v13081_v43 = vld [vmem:[#allocation2 + $0xd0c] ss:$36 sps:$4 sm:$0xff]  }
 0x209   :  { %3559 = vmatmul.mubr.bf16.vlgmr.msra.gmra.mrb[4].mxu1 %v14546_v18 }
 0x20a   :  { %3377 = vmatpush1.bf16.msra.mxu0 %v12992_v44  ;;  %3570 = vmatpush1.bf16.msra.mxu1 %v12995_v45  ;;  %v13076_v44 = vld [vmem:[#allocation2 + $0xb98] ss:$36 sps:$4 sm:$0xff]   ;;  %v13079_v45 = vld [vmem:[#allocation2 + $0xd08] ss:$36 sps:$4 sm:$0xff]  }
 0x20b   :  { %3378 = vmatprep.subr.bf16.mxu0 %v13000_v46  ;;  %3571 = vmatprep.subr.bf16.mxu1 %v13003_v47  ;;  %v13084_v46 = vld [vmem:[#allocation2 + $0xbe4] ss:$36 sps:$4 sm:$0xff]   ;;  %v13087_v47 = vld [vmem:[#allocation2 + $0xd54] ss:$36 sps:$4 sm:$0xff]  }
 0x20c   :  { %3601 = vmatprep.mubr.bf16.mxu1 %v14556_v27 }
 0x20e   :  { %3379 = vmatpush1.bf16.msra.mxu0 %v12998_v48  ;;  %3572 = vmatpush1.bf16.msra.mxu1 %v13001_v49  ;;  %v13082_v48 = vld [vmem:[#allocation2 + $0xbe0] ss:$36 sps:$4 sm:$0xff]   ;;  %v13085_v49 = vld [vmem:[#allocation2 + $0xd50] ss:$36 sps:$4 sm:$0xff]  }
 0x20f   :  { %3380 = vmatprep.subr.bf16.mxu0 %v13006_v51  ;;  %3573 = vmatprep.subr.bf16.mxu1 %v13009_v52  ;;  %v13090_v51 = vld [vmem:[#allocation2 + $0xc2c] ss:$36 sps:$4 sm:$0xff]   ;;  %v13099_v52 = vld [vmem:[#allocation2 + $0xd9c] ss:$36 sps:$4 sm:$0xff]  }
 0x212   :  { %3381 = vmatpush1.bf16.msra.mxu0 %v13004_v53  ;;  %3574 = vmatpush1.bf16.msra.mxu1 %v13007_v54  ;;  %v13088_v53 = vld [vmem:[#allocation2 + $0xc28] ss:$36 sps:$4 sm:$0xff]   ;;  %v13097_v54 = vld [vmem:[#allocation2 + $0xd98] ss:$36 sps:$4 sm:$0xff]  }
 0x213   :  { %3382 = vmatprep.subr.bf16.mxu0 %v13012_v55  ;;  %3575 = vmatprep.subr.bf16.mxu1 %v13015_v56  ;;  %v13093_v55 = vld [vmem:[#allocation2 + $0xc74] ss:$36 sps:$4 sm:$0xff]   ;;  %v13103_v56 = vld [vmem:[#allocation2 + $0x6e0] ss:$36 sps:$4 sm:$0xff]  }
 0x216   :  { %3383 = vmatpush1.bf16.msra.mxu0 %v13010_v57  ;;  %3576 = vmatpush1.bf16.msra.mxu1 %v13013_v58  ;;  %v13091_v57 = vld [vmem:[#allocation2 + $0xc70] ss:$36 sps:$4 sm:$0xff]   ;;  %v13096_v58 = vld [vmem:[#allocation2 + $0xcbc] ss:$36 sps:$4 sm:$0xff]  }
 0x217   :  { %3384 = vmatprep.subr.bf16.mxu0 %v13018_v59  ;;  %3577 = vmatprep.subr.bf16.mxu1 %v13021_v60  ;;  %v13094_v59 = vld [vmem:[#allocation2 + $0xcb8] ss:$36 sps:$4 sm:$0xff]   ;;  %v13102_v60 = vld [vmem:[#allocation2 + $0xd04] ss:$36 sps:$4 sm:$0xff]  }
 0x21a   :  { %3385 = vmatpush1.bf16.msra.mxu0 %v13016_v61  ;;  %3578 = vmatpush1.bf16.msra.mxu1 %v13019_v62  ;;  %v13100_v61 = vld [vmem:[#allocation2 + $0xd00] ss:$36 sps:$4 sm:$0xff]  }
 0x21b   :  { %3397 = vmatprep.subr.bf16.mxu0 %v13024_v63  ;;  %3579 = vmatprep.subr.bf16.mxu1 %v13027_v0  ;;  %v13104_v62 = vld [vmem:[#allocation2 + $0x4a0] ss:$36 sps:$4 sm:$0xff]   ;;  %v13107_v63 = vld [vmem:[#allocation2 + $0xd4c] ss:$36 sps:$4 sm:$0xff]  }
 0x21c   :  { %v13108_v0 = vld [vmem:[#allocation2 + $0x728] ss:$36 sps:$4 sm:$0xff]  }
 0x21d   :  { %3387 = vmatmul.mubr.bf16.vlgmr.msra.gmra.mrb[8].mxu0 %v14546_v18 }
 0x21e   :  { %3398 = vmatpush1.bf16.msra.mxu0 %v13022_v1  ;;  %3580 = vmatpush1.bf16.msra.mxu1 %v13025_v2  ;;  %v13105_v1 = vld [vmem:[#allocation2 + $0xd48] ss:$36 sps:$4 sm:$0xff]  }
 0x21f   :  { %3399 = vmatprep.subr.bf16.mxu0 %v13030_v3  ;;  %3581 = vmatprep.subr.bf16.mxu1 %v13033_v4  ;;  %v13109_v2 = vld [vmem:[#allocation2 + $0x4e8] ss:$36 sps:$4 sm:$0xff]   ;;  %v13112_v3 = vld [vmem:[#allocation2 + $0xd94] ss:$36 sps:$4 sm:$0xff]  }
 0x220   :  { %3429 = vmatprep.mubr.bf16.mxu0 %v14556_v27  ;;  %v13113_v4 = vld [vmem:[#allocation2 + $0x770] ss:$36 sps:$4 sm:$0xff]  }
 0x222   :  { %3400 = vmatpush1.bf16.msra.mxu0 %v13028_v5  ;;  %3582 = vmatpush1.bf16.msra.mxu1 %v13031_v6  ;;  %v13110_v5 = vld [vmem:[#allocation2 + $0xd90] ss:$36 sps:$4 sm:$0xff]  }
 0x223   :  { %3401 = vmatprep.subr.bf16.mxu0 %v13036_v7  ;;  %3583 = vmatprep.subr.bf16.mxu1 %v13039_v8  ;;  %v13114_v6 = vld [vmem:[#allocation2 + $0x530] ss:$36 sps:$4 sm:$0xff]   ;;  %v13115_v7 = vld [vmem:[#allocation2 + $0x7b8] ss:$36 sps:$4 sm:$0xff]   ;;  %v13119_v8 = vld [vmem:[#allocation2 + $0x260] ss:$36 sps:$4 sm:$0xff]  }
 0x226   :  { %3402 = vmatpush1.bf16.msra.mxu0 %v13034_v10  ;;  %3584 = vmatpush1.bf16.msra.mxu1 %v13037_v11  ;;  %v13116_v11 = vld [vmem:[#allocation2 + $0x578] ss:$36 sps:$4 sm:$0xff]  }
 0x227   :  { %3403 = vmatprep.subr.bf16.mxu0 %v13042_v12  ;;  %3585 = vmatprep.subr.bf16.mxu1 %v13045_v13  ;;  %v13117_v13 = vld [vmem:[#allocation2 + $0x800] ss:$36 sps:$4 sm:$0xff]  }
 0x22a   :  { %3404 = vmatpush1.bf16.msra.mxu0 %v13040_v14  ;;  %3586 = vmatpush1.bf16.msra.mxu1 %v13043_v15 }
 0x22b   :  { %3405 = vmatprep.subr.bf16.mxu0 %v13048_v16  ;;  %3587 = vmatprep.subr.bf16.mxu1 %v13051_v17  ;;  %v13121_v16 = vld [vmem:[#allocation2 + $0x848] ss:$36 sps:$4 sm:$0xff]   ;;  %v13120_v17 = vld [vmem:[#allocation2 + $0x20] ss:$36 sps:$4 sm:$0xff]  }
 0x22e   :  { %3406 = vmatpush1.bf16.msra.mxu0 %v13046_v19  ;;  %3588 = vmatpush1.bf16.msra.mxu1 %v13049_v20  ;;  %v13122_v19 = vld [vmem:[#allocation2 + $0x608] ss:$36 sps:$4 sm:$0xff]  }
 0x22f   :  { %3407 = vmatprep.subr.bf16.mxu0 %v13054_v21  ;;  %3589 = vmatprep.subr.bf16.mxu1 %v13057_v22  ;;  %v13123_v20 = vld [vmem:[#allocation2 + $0x2a8] ss:$36 sps:$4 sm:$0xff]   ;;  %v13125_v21 = vld [vmem:[#allocation2 + $0x890] ss:$36 sps:$4 sm:$0xff]  }
 0x232   :  { %3408 = vmatpush1.bf16.msra.mxu0 %v13052_v23  ;;  %3590 = vmatpush1.bf16.msra.mxu1 %v13055_v25  ;;  %v13124_v23 = vld [vmem:[#allocation2 + $0x68] ss:$36 sps:$4 sm:$0xff]   ;;  %v13126_v25 = vld [vmem:[#allocation2 + $0x650] ss:$36 sps:$4 sm:$0xff]  }
 0x233   :  { %3409 = vmatprep.subr.bf16.mxu0 %v13060_v26  ;;  %3591 = vmatprep.subr.bf16.mxu1 %v13063_v28  ;;  %v13127_v28 = vld [vmem:[#allocation2 + $0x2f0] ss:$36 sps:$4 sm:$0xff]  }
 0x236   :  { %3410 = vmatpush1.bf16.msra.mxu0 %v13058_v30  ;;  %3592 = vmatpush1.bf16.msra.mxu1 %v13061_v31  ;;  %v13129_v30 = vld [vmem:[#allocation2 + $0x8d8] ss:$36 sps:$4 sm:$0xff]  }
 0x237   :  { %3411 = vmatprep.subr.bf16.mxu0 %v13066_v32  ;;  %3593 = vmatprep.subr.bf16.mxu1 %v13069_v33 }
 0x23a   :  { %3412 = vmatpush1.bf16.msra.mxu0 %v13064_v34  ;;  %3594 = vmatpush1.bf16.msra.mxu1 %v13067_v35  ;;  %v13128_v35 = vld [vmem:[#allocation2 + $0xb0] ss:$36 sps:$4 sm:$0xff]  }
 0x23b   :  { %3413 = vmatprep.subr.bf16.mxu0 %v13072_v36  ;;  %3595 = vmatprep.subr.bf16.mxu1 %v13075_v38  ;;  %v13130_v36 = vld [vmem:[#allocation2 + $0x698] ss:$36 sps:$4 sm:$0xff]  }
 0x23c   :  { %v13131_v38 = vld [vmem:[#allocation2 + $0x338] ss:$36 sps:$4 sm:$0xff]  }
 0x23e   :  { %3414 = vmatpush1.bf16.msra.mxu0 %v13070_v39  ;;  %3596 = vmatpush1.bf16.msra.mxu1 %v13073_v40  ;;  %v13132_v40 = vld [vmem:[#allocation2 + $0xf8] ss:$36 sps:$4 sm:$0xff]  }
 0x23f   :  { %3415 = vmatprep.subr.bf16.mxu0 %v13078_v42  ;;  %3597 = vmatprep.subr.bf16.mxu1 %v13081_v43  ;;  %v13135_v42 = vld [vmem:[#allocation2 + $0xda0] ss:$36 sps:$4 sm:$0xff]  }
 0x242   :  { %3416 = vmatpush1.bf16.msra.mxu0 %v13076_v44  ;;  %3598 = vmatpush1.bf16.msra.mxu1 %v13079_v45  ;;  %v13133_v45 = vld [vmem:[#allocation2 + $0x380] ss:$36 sps:$4 sm:$0xff]  }
 0x243   :  { %3417 = vmatprep.subr.bf16.mxu0 %v13084_v46  ;;  %3599 = vmatprep.subr.bf16.mxu1 %v13087_v47 }
 0x246   :  { %3418 = vmatpush1.bf16.msra.mxu0 %v13082_v48  ;;  %3600 = vmatpush1.bf16.msra.mxu1 %v13085_v49 }
 0x247   :  { %3419 = vmatprep.subr.bf16.mxu0 %v13090_v51  ;;  %3612 = vmatprep.subr.bf16.mxu1 %v13099_v52  ;;  %v14268_v51 = vmov 0.0   ;;  %v13134_v52 = vld [vmem:[#allocation2 + $0x140] ss:$36 sps:$4 sm:$0xff]  }
 0x249   :  { %3602 = vmatmul.mubr.bf16.vlgmr.msra.gmra.mrb[4].mxu1 %v14566_v29 }
 0x24a   :  { %3420 = vmatpush1.bf16.msra.mxu0 %v13088_v53  ;;  %3613 = vmatpush1.bf16.msra.mxu1 %v13097_v54  ;;  %v13136_v54 = vld [vmem:[#allocation2 + $0x3c8] ss:$36 sps:$4 sm:$0xff]  }
 0x24b   :  { %3421 = vmatprep.subr.bf16.mxu0 %v13093_v55  ;;  %3644 = vmatprep.mubr.bf16.mxu1 %v14267_v24 }
 0x24c   :  { %12218 = vmatprep.subr.bf16.mxu1 %v13103_v56  ;;  %v13137_v56 = vld [vmem:[#allocation2 + $0x188] ss:$36 sps:$4 sm:$0xff]  }
 0x24e   :  { %3422 = vmatpush1.bf16.msra.mxu0 %v13091_v57  ;;  %v13138_v57 = vld [vmem:[#allocation2 + $0x410] ss:$36 sps:$4 sm:$0xff]  }
 0x24f   :  { %3423 = vmatprep.subr.bf16.mxu0 %v13096_v58  ;;  %v13139_v58 = vld [vmem:[#allocation2 + $0x1d0] ss:$36 sps:$4 sm:$0xff]  }
 0x252   :  { %3424 = vmatpush1.bf16.msra.mxu0 %v13094_v59  ;;  %v13141_v59 = vld [vmem:[#allocation2 + $0x218] ss:$36 sps:$4 sm:$0xff]  }
 0x253   :  { %3425 = vmatprep.subr.bf16.mxu0 %v13102_v60  ;;  %v13142_v60 = vld [vmem:[#allocation2 + $0xb60] ss:$36 sps:$4 sm:$0xff]  }
 0x255   :  { %11529 = vmatmul.mubr.msk.bf16.vlgmr.msra.gmra.mrb[4].mxu1 %vm2963_vm0, %v14578_v41 }
 0x256   :  { %3426 = vmatpush1.bf16.msra.mxu0 %v13100_v61  ;;  %12219 = vmatpush3.bf16.msra.mxu1 %v13104_v62  ;;  %v13143_v61 = vld [vmem:[#allocation2 + $0x920] ss:$36 sps:$4 sm:$0xff]   ;;  %v13144_v62 = vld [vmem:[#allocation2 + $0xba8] ss:$36 sps:$4 sm:$0xff]  }
 0x257   :  { %3427 = vmatprep.subr.bf16.mxu0 %v13107_v63  ;;  %12220 = vmatprep.subr.bf16.mxu1 %v13108_v0  ;;  %v13146_v63 = vld [vmem:[#allocation2 + $0xbf0] ss:$36 sps:$4 sm:$0xff]  }
 0x258   :  { %3728 = vmatprep.mubr.bf16.mxu1 %v14536_v37  ;;  %v13118_v37 = vld [vmem:[#allocation2 + $0x5c0] ss:$36 sps:$4 sm:$0xff]   ;;  %v13147_v0 = vld [vmem:[#allocation2 + $0x9b0] ss:$36 sps:$4 sm:$0xff]  }
 0x25a   :  { %3428 = vmatpush1.bf16.msra.mxu0 %v13105_v1  ;;  %12221 = vmatpush3.bf16.msra.mxu1 %v13109_v2  ;;  %v13148_v1 = vld [vmem:[#allocation2 + $0xc38] ss:$36 sps:$4 sm:$0xff]  }
 0x25b   :  { %3440 = vmatprep.subr.bf16.mxu0 %v13112_v3  ;;  %12222 = vmatprep.subr.bf16.mxu1 %v13113_v4  ;;  %v13149_v2 = vld [vmem:[#allocation2 + $0x9f8] ss:$36 sps:$4 sm:$0xff]   ;;  %v13150_v3 = vld [vmem:[#allocation2 + $0xc80] ss:$36 sps:$4 sm:$0xff]  }
 0x25c   :  { %v3259_v10 = vpop.f32.mrb[0].mxu1  ;;  %v13151_v4 = vld [vmem:[#allocation2 + $0xa40] ss:$36 sps:$4 sm:$0xff]  }
 0x25d   :  { %3430 = vmatmul.mubr.bf16.vlgmr.msra.gmra.mrb[8].mxu0 %v14566_v29  ;;  %v3261_v12 = vpop.f32.mrb[1].mxu1 }
 0x25e   :  { %3441 = vmatpush1.bf16.msra.mxu0 %v13110_v5  ;;  %12223 = vmatpush3.bf16.msra.mxu1 %v13114_v6  ;;  %v3263_v14 = vpop.f32.mrb[2].mxu1  ;;  %v13152_v5 = vld [vmem:[#allocation2 + $0xcc8] ss:$36 sps:$4 sm:$0xff]   ;;  %v13154_v6 = vld [vmem:[#allocation2 + $0xd10] ss:$36 sps:$4 sm:$0xff]  }
 0x25f   :  { %v3265_v15 = vpop.f32.mrb[3].mxu1  ;;  %12224 = vmatprep.subr.bf16.mxu1 %v13115_v7  ;;  %3472 = vmatprep.mubr.bf16.mxu0 %v14267_v24  ;;  %v13155_v7 = vld [vmem:[#allocation2 + $0xad0] ss:$36 sps:$4 sm:$0xff]  }
 0x260   :  { %12196 = vmatprep.subr.bf16.mxu0 %v13119_v8  ;;  %v13157_v8 = vld [vmem:[#allocation2 + $0xb18] ss:$36 sps:$4 sm:$0xff]  }
 0x262   :  { %12225 = vmatpush3.bf16.msra.mxu1 %v13116_v11  ;;  %v3905_v11 = vld [vmem:[%s15530_s14] sm:$0xff] }
 0x263   :  { %12226 = vmatprep.subr.bf16.mxu1 %v13117_v13  ;;  %3911 = vperm.xlu0 %12479, %v3905_v11   ;;  %v3906_v13 = vld [vmem:[%s15530_s14 + $0x8] sm:$0xff] }
 0x266   :  { %12227 = vmatpush3.bf16.msra.mxu1 %v13118_v37 }
 0x267   :  { %12228 = vmatprep.subr.bf16.mxu1 %v13121_v16  ;;  %3916 = vperm.xlu0 %12479, %v3906_v13  }
 0x268   :  { %v3130_v22 = vpop.f32.mrb[0].mxu0 }
 0x269   :  { %11528 = vmatmul.mubr.msk.bf16.vlgmr.msra.gmra.mrb[8].mxu0 %vm2963_vm0, %v14578_v41  ;;  %v3132_v26 = vpop.f32.mrb[1].mxu0 }
 0x26a   :  { %12197 = vmatpush3.bf16.msra.mxu0 %v13120_v17  ;;  %12229 = vmatpush3.bf16.msra.mxu1 %v13122_v19  ;;  %v3134_v31 = vpop.f32.mrb[2].mxu0 }
 0x26b   :  { %v3819_v32 = vpack.c.bf16 %v3134_v31, %v3130_v22  ;;  %v3136_v33 = vpop.f32.mrb[3].mxu0  ;;  %12198 = vmatprep.subr.bf16.mxu0 %v13123_v20  ;;  %12230 = vmatprep.subr.bf16.mxu1 %v13125_v21 }
 0x26c   :  { %v3820_v34 = vpack.c.bf16 %v3136_v33, %v3132_v26  ;;  %3687 = vmatprep.mubr.bf16.mxu0 %v14514_v50 }
 0x26e   :  { %12199 = vmatpush3.bf16.msra.mxu0 %v13124_v23  ;;  %12231 = vmatpush3.bf16.msra.mxu1 %v13126_v25 }
 0x26f   :  { %12200 = vmatprep.subr.bf16.mxu0 %v13127_v28  ;;  %12232 = vmatprep.subr.bf16.mxu1 %v13129_v30 }
 0x270   :  { %v3302_v39 = vpop.f32.mrb[4].mxu0 }
 0x271   :  { %v12388_v43 = vadd.f32 %v3302_v39, %v3259_v10  ;;  %v3304_v44 = vpop.f32.mrb[5].mxu0  ;;  %v13158_v10 = vld [vmem:[#allocation4 + $0x4] ss:$8 sps:$4 sm:$0xff]  }
 0x272   :  { %12201 = vmatpush3.bf16.msra.mxu0 %v13128_v35  ;;  %v12389_v46 = vadd.f32 %v3304_v44, %v3261_v12  ;;  %12233 = vmatpush3.bf16.msra.mxu1 %v13130_v36  ;;  %v3306_v47 = vpop.f32.mrb[6].mxu0  ;;  %v3907_v12 = vld [vmem:[%s15530_s14 + $0x10] sm:$0xff] }
 0x273   :  { %v12390_v48 = vadd.f32 %v3306_v47, %v3263_v14  ;;  %v3308_v49 = vpop.f32.mrb[7].mxu0  ;;  %12202 = vmatprep.subr.bf16.mxu0 %v13131_v38  ;;  %12340 = vmatprep.subr.bf16.mxu1 %v14268_v51 }
 0x274   :  { %v12391_v50 = vadd.f32 %v3308_v49, %v3265_v15  ;;  %3921 = vperm.xlu1 %12480, %v3907_v12  }
 0x275   :  { %v3821_v53 = vpack.c.bf16 %v12390_v48, %v12388_v43  ;;  %3729 = vmatmul.mubr.bf16.vlgmr.msra.gmra.mrb[8].mxu1 %v14546_v18  ;;  %v13140_v18 = vld [vmem:[#allocation2 + $0x458] ss:$36 sps:$4 sm:$0xff]  }
 0x276   :  { %v3822_v55 = vpack.c.bf16 %v12391_v50, %v12389_v46  ;;  %12203 = vmatpush3.bf16.msra.mxu0 %v13132_v40  ;;  %12341 = vmatpush3.bf16.msra.mxu1 %v13135_v42 }
 0x277   :  { %12204 = vmatprep.subr.bf16.mxu0 %v13133_v45  ;;  %12342 = vmatprep.mubr.msk.bf16.mxu1 %vm14269_vm1, %v14268_v51 }
 0x278   :  { %3856 = vmatprep.subr.bf16.mxu1 %v14267_v24 }
 0x27a   :  { %12205 = vmatpush3.bf16.msra.mxu0 %v13134_v52 }
 0x27b   :  { %12206 = vmatprep.subr.bf16.mxu0 %v13136_v54 }
 0x27d   :  { %12343 = vmatmul.mubr.msk.bf16.vlgmr.msra.gmra.mrb[12].mxu1 %vm2963_vm0, %v14578_v41  ;;  %v13145_v41 = vld [vmem:[#allocation2 + $0x968] ss:$36 sps:$4 sm:$0xff]  }
 0x27e   :  { %12207 = vmatpush3.bf16.msra.mxu0 %v13137_v56  ;;  %3857 = vmatpush1.bf16.msra.mxu1 %v3819_v32 }
 0x27f   :  { %12208 = vmatprep.subr.bf16.mxu0 %v13138_v57  ;;  %3858 = vmatprep.subr.bf16.mxu1 %v14267_v24 }
 0x280   :  { %11535 = vmatprep.mubr.msk.bf16.mxu1 %vm2963_vm0, %v13158_v10 }
 0x282   :  { %12209 = vmatpush3.bf16.msra.mxu0 %v13139_v58  ;;  %3859 = vmatpush1.bf16.msra.mxu1 %v3820_v34 }
 0x283   :  { %12210 = vmatprep.subr.bf16.mxu0 %v13140_v18  ;;  %3860 = vmatprep.subr.bf16.mxu1 %v14267_v24 }
 0x286   :  { %12211 = vmatpush3.bf16.msra.mxu0 %v13141_v59  ;;  %3861 = vmatpush1.bf16.msra.mxu1 %v3821_v53 }
 0x287   :  { %12240 = vmatprep.subr.bf16.mxu0 %v13142_v60  ;;  %3862 = vmatprep.subr.bf16.mxu1 %v14267_v24  ;;  %v13160_v60 = vld [vmem:[#allocation4] ss:$8 sps:$4 sm:$0xff]  }
 0x289   :  { %3688 = vmatmul.mubr.bf16.vlgmr.msra.gmra.mrb[12].mxu0 %v14524_v9  ;;  %v13153_v9 = vld [vmem:[#allocation2 + $0xa88] ss:$36 sps:$4 sm:$0xff]  }
 0x28a   :  { %12241 = vmatpush3.bf16.msra.mxu0 %v13143_v61  ;;  %3863 = vmatpush1.bf16.msra.mxu1 %v3822_v55  ;;  %v13161_v61 = vld [vmem:[#allocation4 + $0x14] ss:$8 sps:$4 sm:$0xff]  }
 0x28b   :  { %12242 = vmatprep.subr.bf16.mxu0 %v13144_v62  ;;  %3769 = vmatprep.mubr.bf16.mxu0 %v14556_v27  ;;  %v13156_v27 = vld [vmem:[#allocation2 + $0xd58] ss:$36 sps:$4 sm:$0xff]  }
 0x28c   :  { %3864 = vmatprep.subr.bf16.mxu1 %v14267_v24  ;;  %v13163_v62 = vld [vmem:[#allocation4 + $0x10] ss:$8 sps:$4 sm:$0xff]  }
 0x28e   :  { %12243 = vmatpush3.bf16.msra.mxu0 %v13145_v41 }
 0x28f   :  { %12244 = vmatprep.subr.bf16.mxu0 %v13146_v63 }
 0x292   :  { %12245 = vmatpush3.bf16.msra.mxu0 %v13147_v0 }
 0x293   :  { %12246 = vmatprep.subr.bf16.mxu0 %v13148_v1 }
 0x296   :  { %12247 = vmatpush3.bf16.msra.mxu0 %v13149_v2 }
 0x297   :  { %12248 = vmatprep.subr.bf16.mxu0 %v13150_v3 }
 0x29a   :  { %12249 = vmatpush3.bf16.msra.mxu0 %v13151_v4 }
 0x29b   :  { %12250 = vmatprep.subr.bf16.mxu0 %v13152_v5 }
 0x29e   :  { %12251 = vmatpush3.bf16.msra.mxu0 %v13153_v9 }
 0x29f   :  { %12252 = vmatprep.subr.bf16.mxu0 %v13154_v6 }
 0x2a2   :  { %12253 = vmatpush3.bf16.msra.mxu0 %v13155_v7 }
 0x2a3   :  { %12254 = vmatprep.subr.bf16.mxu0 %v13156_v27 }
 0x2a6   :  { %12255 = vmatpush3.bf16.msra.mxu0 %v13157_v8 }
 0x2a9   :  { %3770 = vmatmul.mubr.bf16.vlgmr.msra.gmra.mrb[16].mxu0 %v14566_v29  ;;  %v3908_v29 = vld [vmem:[%s15530_s14 + $0x18] sm:$0xff] }
 0x2aa   :  { %4239 = vmatprep.mubr.bf16.mxu0 %v14267_v24  ;;  %3926 = vperm.xlu1 %12480, %v3908_v29  }
 0x2e2   :  { %v3912_v41 = vpop.permute.xlu0 %3911 }
 0x2e6   :  { %v3917_v0 = vpop.permute.xlu0 %3916 }
 0x2f3   :  { %v3922_v6 = vpop.permute.xlu1 %3921 }
 0x328   :  { %v3646_v14 = vpop.f32.mrb[4].mxu1 }
 0x329   :  { %v3648_v15 = vpop.f32.mrb[5].mxu1  ;;  %v3927_v13 = vpop.permute.xlu1 %3926 }
 0x32a   :  { %v3650_v37 = vpop.f32.mrb[6].mxu1 }
 0x32b   :  { %v3825_v16 = vpack.c.bf16 %v3650_v37, %v3646_v14  ;;  %v3652_v17 = vpop.f32.mrb[7].mxu1 }
 0x32c   :  { %v3826_v19 = vpack.c.bf16 %v3652_v17, %v3648_v15 }
 0x33c   :  { %v3474_v20 = vpop.f32.mrb[8].mxu0 }
 0x33d   :  { %v3476_v21 = vpop.f32.mrb[9].mxu0 }
 0x33e   :  { %v3478_v22 = vpop.f32.mrb[10].mxu0 }
 0x33f   :  { %v3823_v23 = vpack.c.bf16 %v3478_v22, %v3474_v20  ;;  %v3480_v25 = vpop.f32.mrb[11].mxu0 }
 0x340   :  { %v3824_v26 = vpack.c.bf16 %v3480_v25, %v3476_v21 }
 0x341   :  { %3865 = vmatpush1.bf16.msra.mxu1 %v3823_v23 }
 0x342   :  { %3866 = vmatprep.subr.bf16.mxu1 %v14267_v24 }
 0x345   :  { %3867 = vmatpush1.bf16.msra.mxu1 %v3824_v26 }
 0x346   :  { %3868 = vmatprep.subr.bf16.mxu1 %v14267_v24 }
 0x348   :  { %v12234_v28 = vpop.f32.mrb[8].mxu1 }
 0x349   :  { %3869 = vmatpush1.bf16.msra.mxu1 %v3825_v16  ;;  %v12235_v30 = vpop.f32.mrb[9].mxu1 }
 0x34a   :  { %3870 = vmatprep.subr.bf16.mxu1 %v14267_v24  ;;  %v12236_v31 = vadd.f32 %v12235_v30, %v12234_v28  ;;  %v12237_v32 = vpop.f32.mrb[10].mxu1 }
 0x34b   :  { %v12238_v33 = vpop.f32.mrb[11].mxu1 }
 0x34c   :  { %v12239_v34 = vadd.f32 %v12238_v33, %v12237_v32 }
 0x34d   :  { %3871 = vmatpush1.bf16.msra.mxu1 %v3826_v19 }
 0x34e   :  { %3872 = vmatprep.subr.bf16.mxu1 %v14267_v24 }
 0x350   :  { %v3812_v35 = vpop.f32.mrb[12].mxu1 }
 0x351   :  { %v12344_v36 = vpop.f32.mrb[13].mxu1 }
 0x352   :  { %v3815_v38 = vpop.f32.mrb[14].mxu1 }
 0x353   :  { %v12345_v39 = vpop.f32.mrb[15].mxu1 }
 0x35c   :  { %v12212_v40 = vpop.f32.mrb[12].mxu0 }
 0x35d   :  { %v12213_v42 = vpop.f32.mrb[13].mxu0 }
 0x35e   :  { %v12214_v43 = vadd.f32 %v12213_v42, %v12212_v40  ;;  %v12215_v44 = vpop.f32.mrb[14].mxu0 }
 0x35f   :  { %v12216_v45 = vpop.f32.mrb[15].mxu0 }
 0x360   :  { %v3731_v46 = vadd.f32 %v12236_v31, %v12214_v43  ;;  %v12217_v47 = vadd.f32 %v12216_v45, %v12215_v44 }
 0x362   :  { %v3734_v48 = vadd.f32 %v12239_v34, %v12217_v47 }
 0x37c   :  { %v12256_v49 = vpop.f32.mrb[16].mxu0 }
 0x37d   :  { %v12257_v50 = vpop.f32.mrb[17].mxu0 }
 0x37e   :  { %v12258_v52 = vadd.f32 %v12257_v50, %v12256_v49  ;;  %v12259_v53 = vpop.f32.mrb[18].mxu0 }
 0x37f   :  { %v12260_v54 = vpop.f32.mrb[19].mxu0 }
 0x380   :  { %v3772_v55 = vadd.f32 %v12258_v52, %v3731_v46  ;;  %v12261_v56 = vadd.f32 %v12260_v54, %v12259_v53 }
 0x382   :  { %v3813_v57 = vadd.f32 %v3812_v35, %v3772_v55  ;;  %v3775_v58 = vadd.f32 %v12261_v56, %v3734_v48  ;;  %v3982_v56 = vld [vmem:[%s15531_s21] sm:$0xff] }
 0x384   :  { %v3816_v18 = vadd.f32 %v3815_v38, %v3775_v58 }
 0x386   :  { %v3827_v59 = vpack.c.bf16 %v3816_v18, %v3813_v57  ;;  %v3990_v18 = vld [vmem:[%s15499_s5] sm:$0xff] }
 0x388   :  { %3873 = vmatpush1.bf16.msra.mxu1 %v3827_v59  ;;  %v3983_v59 = vld [vmem:[%s15531_s21 + $0x8] sm:$0xff] }
 0x38b   :  { %3889 = vmatmul.mubr.bf16.vlgmr.msra.gmra.mrb[16].mxu1 %v13160_v60 }
 0x38c   :  { %11536 = vmatprep.mubr.msk.bf16.mxu1 %vm2963_vm0, %v13161_v61  ;;  %vm11072_vm0 = vcmask 128004  }
 0x393   :  { %3897 = vmatmul.mubr.bf16.gmra.mrb[20].mxu1 %v13163_v62 }
 0x394   :  { %4345 = vmatprep.mubr.bf16.mxu1 %v14267_v24 }
 0x45e   :  { %v3890_v63 = vpop.f32.mrb[16].mxu1 }
 0x45f   :  { %v3929_v1 = vadd.f32 %v3912_v41, %v3890_v63  ;;  %v3892_v2 = vpop.f32.mrb[17].mxu1  ;;  %v3991_v63 = vld [vmem:[%s15499_s5 + $0x8] sm:$0xff]  ;;  %s14270_s5 = smov 103  }
 0x460   :  { %v3893_v3 = vpop.f32.mrb[18].mxu1 }
 0x461   :  { %v14638_v4 = vmax.f32 %v3929_v1, 0.0  ;;  %v3930_v5 = vadd.f32 %v3917_v0, %v3893_v3  ;;  %v3895_v9 = vpop.f32.mrb[19].mxu1 }
 0x463   :  { %v14640_v7 = vmax.f32 %v3930_v5, 0.0  ;;  %v3938_v27 = vsel %vm3937_vm2, %v14638_v4, 0.0 }
 0x464   :  { %3939 = vadd.xlane.f32.xlu0 %v3938_v27 }
 0x465   :  { %v3941_v8 = vsel %vm3937_vm2, %v14640_v7, 0.0 }
 0x466   :  { %3942 = vadd.xlane.f32.xlu1 %v3941_v8  ;;  %v3898_v10 = vpop.f32.mrb[20].mxu1 }
 0x467   :  { %v3931_v11 = vadd.f32 %v3922_v6, %v3898_v10  ;;  %v3900_v12 = vpop.f32.mrb[21].mxu1 }
 0x468   :  { %v3901_v29 = vpop.f32.mrb[22].mxu1 }
 0x469   :  { %v14646_v14 = vmax.f32 %v3931_v11, 0.0  ;;  %v3932_v15 = vadd.f32 %v3927_v13, %v3901_v29  ;;  %v3903_v37 = vpop.f32.mrb[23].mxu1 }
 0x46b   :  { %v14648_v16 = vmax.f32 %v3932_v15, 0.0  ;;  %v3946_v17 = vsel %vm3937_vm2, %v14646_v14, 0.0 }
 0x46c   :  { %3947 = vadd.xlane.f32.xlu0 %v3946_v17  ;;  %v13164_v17 = vld [vmem:[#allocation6] ss:$36 sps:$4 sm:$0xff]  }
 0x46d   :  { %v3949_v19 = vsel %vm3937_vm2, %v14648_v16, 0.0 }
 0x470   :  { %3950 = vadd.xlane.f32.xlu0 %v3949_v19  ;;  %v13166_v19 = vld [vmem:[#allocation6 + $0x4] ss:$36 sps:$4 sm:$0xff]  }
 0x471   :  { %4207 = vmatprep.subr.bf16.mxu0 %v13166_v19 }
 0x472   :  { %4208 = vmatpush1.bf16.msra.mxu0 %v13164_v17 }
 0x4f1   :  { %v3940_v20 = vpop.xlane.xlu0 %3939 }
 0x4f3   :  { %v3943_v25 = vpop.xlane.xlu1 %3942 }
 0x4f9   :  { %v3948_v21 = vpop.xlane.xlu0 %3947 }
 0x4fa   :  { %v3952_v22 = vadd.f32 %v3948_v21, %v3940_v20  ;;  %v13167_v20 = vld [vmem:[#allocation6 + $0x10] ss:$36 sps:$4 sm:$0xff]   ;;  %v13170_v21 = vld [vmem:[#allocation6 + $0x48] ss:$36 sps:$4 sm:$0x1f]  }
 0x4fc   :  { %v3954_v23 = vmul.f32 0.005, %v3952_v22 }
 0x4fd   :  { %v3951_v26 = vpop.xlane.xlu0 %3950 }
 0x4fe   :  { %v3953_v28 = vadd.f32 %v3951_v26, %v3943_v25  ;;  %v3956_v30 = vsub.f32 %v14638_v4, %v3954_v23  ;;  %v3968_v31 = vsub.f32 %v14646_v14, %v3954_v23  ;;  %v13173_v25 = vld [vmem:[#allocation6 + $0x58] ss:$36 sps:$4 sm:$0x1f]  }
 0x4ff   :  { %v13175_v26 = vld [vmem:[#allocation6 + $0x5c] ss:$36 sps:$4 sm:$0x1f]  }
 0x500   :  { %v3955_v32 = vmul.f32 0.005, %v3953_v28  ;;  %v3958_v33 = vmul.f32 %v3956_v30, %v3956_v30  ;;  %v3970_v35 = vmul.f32 %v3968_v31, %v3968_v31 }
 0x502   :  { %v3960_v34 = vsel %vm3937_vm2, %v3958_v33, 0.0  ;;  %v3957_v36 = vsub.f32 %v14640_v7, %v3955_v32  ;;  %v3969_v38 = vsub.f32 %v14648_v16, %v3955_v32  ;;  %v3972_v40 = vsel %vm3937_vm2, %v3970_v35, 0.0 }
 0x503   :  { %3961 = vadd.xlane.f32.xlu1 %v3960_v34  ;;  %v13178_v34 = vld [vmem:[#allocation6 + $0xc] ss:$36 sps:$4 sm:$0xff]  }
 0x504   :  { %v3959_v39 = vmul.f32 %v3957_v36, %v3957_v36  ;;  %v3971_v43 = vmul.f32 %v3969_v38, %v3969_v38 }
 0x506   :  { %v3963_v42 = vsel %vm3937_vm2, %v3959_v39, 0.0  ;;  %v3975_v44 = vsel %vm3937_vm2, %v3971_v43, 0.0 }
 0x507   :  { %3973 = vadd.xlane.f32.xlu1 %v3972_v40  ;;  %3964 = vadd.xlane.f32.xlu0 %v3963_v42 }
 0x50b   :  { %3976 = vadd.xlane.f32.xlu0 %v3975_v44 }
 0x590   :  { %v3962_v45 = vpop.xlane.xlu1 %3961 }
 0x594   :  { %v3974_v46 = vpop.xlane.xlu1 %3973  ;;  %v3965_v47 = vpop.xlane.xlu0 %3964 }
 0x595   :  { %v3978_v48 = vadd.f32 %v3974_v46, %v3962_v45 }
 0x597   :  { %v3980_v49 = vmul.f32 0.005, %v3978_v48  ;;  %v4629_v48 = vld [vmem:[%s15502_s8] sm:$0xff] }
 0x598   :  { %v3977_v50 = vpop.xlane.xlu0 %3976 }
 0x599   :  { %v3984_v52 = vadd.f32 1e-05, %v3980_v49  ;;  %v3979_v53 = vadd.f32 %v3977_v50, %v3965_v47  ;;  %v13182_v47 = vld [vmem:[#allocation6 + $0x20] ss:$36 sps:$4 sm:$0xff]   ;;  %v4631_v50 = vld [vmem:[%s15502_s8 + $0x10] sm:$0xff] }
 0x59a   :  { %v4630_v49 = vld [vmem:[%s15502_s8 + $0x8] sm:$0xff] }
 0x59b   :  { %13991 = vrsqrt.f32 %v3984_v52  ;;  %v3981_v54 = vmul.f32 0.005, %v3979_v53  ;;  %v4632_v52 = vld [vmem:[%s15502_s8 + $0x18] sm:$0xff] }
 0x59d   :  { %v3985_v55 = vadd.f32 1e-05, %v3981_v54 }
 0x59f   :  { %13993 = vrsqrt.f32 %v3985_v55 }
 0x5a5   :  { %v13992_v57 = vpop.eup %13991 }
 0x5a6   :  { %v3988_v58 = vmul.f32 %v13992_v57, %v3982_v56  ;;  %v13181_v56 = vld [vmem:[#allocation6 + $0x54] ss:$36 sps:$4 sm:$0x1f]  }
 0x5a8   :  { %3998 = vperm.xlu1 %12480, %v3988_v58   ;;  %v3992_v60 = vmul.f32 %v3988_v58, %v3954_v23 }
 0x5a9   :  { %v13994_v61 = vpop.eup %13993 }
 0x5aa   :  { %v3994_v62 = vsub.f32 %v3990_v18, %v3992_v60  ;;  %v3989_v41 = vmul.f32 %v13994_v61, %v3983_v59  ;;  %v13183_v59 = vld [vmem:[#allocation6 + $0x68] ss:$36 sps:$4 sm:$0x1f]   ;;  %v13179_v61 = vld [vmem:[#allocation6 + $0x50] ss:$36 sps:$4 sm:$0x1f]  }
 0x5ab   :  { %v13176_v60 = vld [vmem:[#allocation6 + $0x8] ss:$36 sps:$4 sm:$0xff]  }
 0x5ac   :  { %4010 = vperm.xlu1 %12480, %v3994_v62   ;;  %4003 = vperm.xlu0 %12479, %v3989_v41   ;;  %v3993_v0 = vmul.f32 %v3989_v41, %v3955_v32 }
 0x5ae   :  { %v3995_v1 = vsub.f32 %v3991_v63, %v3993_v0 }
 0x5b0   :  { %4015 = vperm.xlu1 %12480, %v3995_v1  }
 0x627   :  { %v3999_v2 = vpop.permute.xlu1 %3998 }
 0x628   :  { %v4006_v9 = vmul.f32 %v3999_v2, %v14638_v4  ;;  %v4020_v6 = vmul.f32 %v3999_v2, %v14646_v14  ;;  %v13169_v4 = vld [vmem:[#allocation6 + $0x14] ss:$36 sps:$4 sm:$0xff]   ;;  %v14271_v14 = vmov 65535  }
 0x629   :  { %4313 = vmatprep.subr.bf16.mxu1 %v13169_v4 }
 0x62a   :  { %4314 = vmatpush1.bf16.msra.mxu1 %v13167_v20 }
 0x62b   :  { %v4011_v3 = vpop.permute.xlu1 %4010  ;;  %v4004_v5 = vpop.permute.xlu0 %4003 }
 0x62c   :  { %v4007_v27 = vmul.f32 %v4004_v5, %v14640_v7  ;;  %v4021_v8 = vmul.f32 %v4004_v5, %v14648_v16  ;;  %v4018_v11 = vadd.f32 %v4011_v3, %v4006_v9  ;;  %v4022_v12 = vadd.f32 %v4020_v6, %v4011_v3  ;;  %v13172_v7 = vld [vmem:[#allocation6 + $0x4c] ss:$36 sps:$4 sm:$0x1f]   ;;  %v13186_v9 = vld [vmem:[#allocation6 + $0x1c] ss:$36 sps:$4 sm:$0xff]  }
 0x62d   :  { %v4178_v16 = vsel %vm4176_vm3, 4294967295, %v14271_v14 }
 0x62e   :  { %v14679_v22 = vsel %vm4177_vm4, %v4178_v16, 0 }
 0x62f   :  { %v4016_v10 = vpop.permute.xlu1 %4015  ;;  %v4184_v23 = vand.u32 %v13172_v7, %v14679_v22  ;;  %v4181_v28 = vand.u32 %v13170_v21, %v14679_v22  ;;  %v4196_v30 = vand.u32 %v13175_v26, %v14679_v22  ;;  %v4193_v31 = vand.u32 %v13173_v25, %v14679_v22 }
 0x630   :  { %v4019_v13 = vadd.f32 %v4016_v10, %v4007_v27  ;;  %v4023_v29 = vadd.f32 %v4021_v8, %v4016_v10  ;;  %v4190_v0 = vand.u32 %v13181_v56, %v14679_v22  ;;  %v4205_v1 = vand.u32 %v13183_v59, %v14679_v22  ;;  %v13189_v27 = vld [vmem:[#allocation6 + $0x64] ss:$36 sps:$4 sm:$0x1f]   ;;  %v13184_v8 = vld [vmem:[#allocation6 + $0x18] ss:$36 sps:$4 sm:$0xff]  }
 0x631   :  { %4209 = vmatprep.subr.bf16.mxu0 %v4184_v23  ;;  %4315 = vmatprep.subr.bf16.mxu1 %v4196_v30  ;;  %v4187_v2 = vand.u32 %v13179_v61, %v14679_v22  ;;  %v13187_v10 = vld [vmem:[#allocation6 + $0x60] ss:$36 sps:$4 sm:$0x1f]  }
 0x632   :  { %v12481_v15 = vpack.i.bf16 %v4019_v13, %v4018_v11  ;;  %v12486_v37 = vpack.i.bf16 %v4023_v29, %v4022_v12  ;;  %4210 = vmatpush1.bf16.msra.mxu0 %v4181_v28  ;;  %4316 = vmatpush1.bf16.msra.mxu1 %v4193_v31 }
 0x633   :  { %4260 = vmatprep.subr.bf16.mxu0 %v13178_v34  ;;  %12346 = vmatprep.subr.bf16.mxu1 %v13182_v47 }
 0x634   :  { %12482 = vrot.lane.b32.xlu0 %v12481_v15, %s14270_s5  ;;  %12487 = vrot.lane.b32.xlu1 %v12486_v37, %s14270_s5 }
 0x6a6   :  { %v12483_v32 = vpop.permute.xlu0 %12482  ;;  %v12488_v33 = vpop.permute.xlu1 %12487 }
 0x6a7   :  { %v12485_v35 = vunpack.i.h.bf16 %v12483_v32  ;;  %v12484_v36 = vunpack.i.l.bf16 %v12483_v32  ;;  %v12490_v38 = vunpack.i.h.bf16 %v12488_v33  ;;  %v12489_v39 = vunpack.i.l.bf16 %v12488_v33 }
 0x6a9   :  { %v4041_v40 = vmax.f32 %v4019_v13, %v12485_v35  ;;  %v4040_v42 = vmax.f32 %v4018_v11, %v12484_v36  ;;  %v4043_v43 = vmax.f32 %v4023_v29, %v12490_v38  ;;  %v4042_v44 = vmax.f32 %v4022_v12, %v12489_v39  ;;  %v13192_v13 = vld [vmem:[#allocation7 + $0x4] ss:$12 sps:$4 sm:$0xff]   ;;  %v13193_v29 = vld [vmem:[#allocation7 + $0x8] ss:$12 sps:$4 sm:$0xff]  }
 0x6aa   :  { %v4202_v11 = vand.u32 %v13189_v27, %v14679_v22  ;;  %v4199_v12 = vand.u32 %v13187_v10, %v14679_v22  ;;  %v13190_v10 = vld [vmem:[#allocation7] ss:$12 sps:$4 sm:$0xff]  }
 0x6ab   :  { %v12491_v45 = vpack.i.bf16 %v4041_v40, %v4040_v42  ;;  %v12496_v46 = vpack.i.bf16 %v4043_v43, %v4042_v44 }
 0x6ad   :  { %12492 = vrot.lane.b32.xlu0 %v12491_v45, %s14272_s7  ;;  %12497 = vrot.lane.b32.xlu1 %v12496_v46, %s14272_s7 }
 0x6b1   :  { %4635 = vperm.xlu0 %12479, %v4629_v48   ;;  %4640 = vperm.xlu1 %12480, %v4630_v49  }
 0x6b5   :  { %4645 = vperm.xlu0 %12479, %v4631_v50   ;;  %4650 = vperm.xlu1 %12480, %v4632_v52  }
 0x71f   :  { %v12493_v53 = vpop.permute.xlu0 %12492  ;;  %v12498_v57 = vpop.permute.xlu1 %12497 }
 0x720   :  { %v12495_v54 = vunpack.i.h.bf16 %v12493_v53  ;;  %v12494_v55 = vunpack.i.l.bf16 %v12493_v53  ;;  %v12500_v41 = vunpack.i.h.bf16 %v12498_v57  ;;  %v12499_v63 = vunpack.i.l.bf16 %v12498_v57 }
 0x722   :  { %v4061_v58 = vmax.f32 %v4041_v40, %v12495_v54  ;;  %v4060_v18 = vmax.f32 %v4040_v42, %v12494_v55  ;;  %v4063_v3 = vmax.f32 %v4043_v43, %v12500_v41  ;;  %v4062_v5 = vmax.f32 %v4042_v44, %v12499_v63 }
 0x724   :  { %v4064_v62 = vpack.c.bf16 %v4061_v58, %v4060_v18  ;;  %v4065_v6 = vpack.c.bf16 %v4063_v3, %v4062_v5  ;;  %v13194_v18 = vld [vmem:[#allocation7 + $0x20] ss:$12 sps:$4 sm:$0xff]  }
 0x726   :  { %11555 = vmatmul.mubr.msk.bf16.vlgmr.msra.gmra.mrb[20].mxu0 %vm4169_vm5, %v4064_v62  ;;  %11559 = vmatmul.mubr.msk.bf16.vlgmr.msra.gmra.mrb[24].mxu1 %vm4169_vm5, %v4064_v62 }
 0x727   :  { %4261 = vmatpush1.bf16.msra.mxu0 %v13176_v60  ;;  %4249 = vmatprep.mubr.bf16.mxu0 %v14267_v24 }
 0x728   :  { %4355 = vmatprep.mubr.bf16.mxu1 %v14267_v24  ;;  %4262 = vmatprep.subr.bf16.mxu0 %v4190_v0 }
 0x729   :  { %12347 = vmatpush3.bf16.msra.mxu1 %v13182_v47 }
 0x72a   :  { %12348 = vmatprep.subr.bf16.mxu1 %v4205_v1 }
 0x72b   :  { %4263 = vmatpush1.bf16.msra.mxu0 %v4187_v2 }
 0x72c   :  { %4366 = vmatprep.subr.bf16.mxu0 %v13186_v9 }
 0x72d   :  { %12349 = vmatpush3.bf16.msra.mxu1 %v4205_v1 }
 0x72e   :  { %11556 = vmatmul.mubr.msk.bf16.gmra.mrb[24].mxu0 %vm4169_vm5, %v4065_v6  ;;  %11560 = vmatmul.mubr.msk.bf16.gmra.mrb[28].mxu1 %vm4169_vm5, %v4065_v6 }
 0x72f   :  { %12350 = vmatprep.mubr.msk.bf16.mxu1 %vm4169_vm5, %v4064_v62  ;;  %4292 = vmatprep.mubr.bf16.mxu0 %v14267_v24 }
 0x736   :  { %11557 = vmatmul.mubr.msk.bf16.vlgmr.msra.gmra.mrb[28].mxu0 %vm4169_vm5, %v4064_v62  ;;  %12351 = vmatmul.mubr.msk.bf16.vlgmr.msra.gmra.mrb[32].mxu1 %vm4169_vm5, %v4065_v6 }
 0x737   :  { %4367 = vmatpush1.bf16.msra.mxu0 %v13184_v8  ;;  %4302 = vmatprep.mubr.bf16.mxu0 %v14267_v24 }
 0x738   :  { %4368 = vmatprep.subr.bf16.mxu0 %v4202_v11  ;;  %12358 = vmatprep.mubr.msk.bf16.mxu1 %vm4524_vm6, %v13193_v29  ;;  %v13195_v11 = vld [vmem:[#allocation7 + $0x1c] ss:$12 sps:$4 sm:$0xff]  }
 0x73b   :  { %4369 = vmatpush1.bf16.msra.mxu0 %v4199_v12  ;;  %v13197_v12 = vld [vmem:[#allocation7 + $0x18] ss:$12 sps:$4 sm:$0xff]  }
 0x73e   :  { %11558 = vmatmul.mubr.msk.bf16.gmra.mrb[32].mxu0 %vm4169_vm5, %v4065_v6 }
 0x73f   :  { %4398 = vmatprep.mubr.bf16.mxu0 %v14267_v24 }
 0x746   :  { %11561 = vmatmul.mubr.msk.bf16.vlgmr.msra.gmra.mrb[36].mxu0 %vm4169_vm5, %v4064_v62 }
 0x747   :  { %4408 = vmatprep.mubr.bf16.mxu0 %v14267_v24 }
 0x74e   :  { %11562 = vmatmul.mubr.msk.bf16.gmra.mrb[40].mxu0 %vm4169_vm5, %v4065_v6 }
 0x74f   :  { %4563 = vmatprep.mubr.bf16.mxu0 %v13192_v13 }
 0x7f9   :  { %v4241_v15 = vpop.f32.mrb[20].mxu0  ;;  %v4347_v37 = vpop.f32.mrb[24].mxu1 }
 0x7fa   :  { %v4243_v17 = vpop.f32.mrb[21].mxu0  ;;  %v4349_v19 = vpop.f32.mrb[25].mxu1 }
 0x7fb   :  { %v4245_v20 = vpop.f32.mrb[22].mxu0  ;;  %v4351_v4 = vpop.f32.mrb[26].mxu1 }
 0x7fc   :  { %v4468_v7 = vpack.c.bf16 %v4245_v20, %v4241_v15  ;;  %v4472_v16 = vpack.c.bf16 %v4351_v4, %v4347_v37  ;;  %v4247_v21 = vpop.f32.mrb[23].mxu0  ;;  %v4353_v23 = vpop.f32.mrb[27].mxu1 }
 0x7fd   :  { %v4469_v25 = vpack.c.bf16 %v4247_v21, %v4243_v17  ;;  %v4473_v26 = vpack.c.bf16 %v4353_v23, %v4349_v19  ;;  %v4636_v23 = vpop.permute.xlu0 %4635 }
 0x7fe   :  { %12268 = vmatprep.subr.bf16.mxu0 %v4472_v16 }
 0x7ff   :  { %12269 = vmatpush3.bf16.msra.mxu0 %v4468_v7 }
 0x801   :  { %v4251_v28 = vpop.f32.mrb[24].mxu0  ;;  %v4357_v30 = vpop.f32.mrb[28].mxu1 }
 0x802   :  { %v4253_v31 = vpop.f32.mrb[25].mxu0  ;;  %v4359_v32 = vpop.f32.mrb[29].mxu1 }
 0x803   :  { %v4255_v33 = vpop.f32.mrb[26].mxu0  ;;  %v4361_v34 = vpop.f32.mrb[30].mxu1 }
 0x804   :  { %v4477_v35 = vpack.c.bf16 %v4255_v33, %v4251_v28  ;;  %v4481_v36 = vpack.c.bf16 %v4361_v34, %v4357_v30  ;;  %v4257_v38 = vpop.f32.mrb[27].mxu0  ;;  %v4363_v39 = vpop.f32.mrb[31].mxu1 }
 0x805   :  { %v4478_v40 = vpack.c.bf16 %v4257_v38, %v4253_v31  ;;  %v4482_v42 = vpack.c.bf16 %v4363_v39, %v4359_v32  ;;  %v4641_v28 = vpop.permute.xlu1 %4640 }
 0x806   :  { %12270 = vmatprep.subr.bf16.mxu0 %v4481_v36 }
 0x807   :  { %12271 = vmatpush3.bf16.msra.mxu0 %v4477_v35 }
 0x808   :  { %12272 = vmatprep.subr.bf16.mxu0 %v4473_v26 }
 0x809   :  { %v4294_v43 = vpop.f32.mrb[28].mxu0  ;;  %v12352_v44 = vpop.f32.mrb[32].mxu1 }
 0x80a   :  { %v4296_v45 = vpop.f32.mrb[29].mxu0  ;;  %v4453_v46 = vpop.f32.mrb[33].mxu1 }
 0x80b   :  { %v4298_v47 = vpop.f32.mrb[30].mxu0  ;;  %v12353_v48 = vpop.f32.mrb[34].mxu1  ;;  %12273 = vmatpush3.bf16.msra.mxu0 %v4469_v25 }
 0x80c   :  { %v4470_v49 = vpack.c.bf16 %v4298_v47, %v4294_v43  ;;  %v4485_v50 = vpack.c.bf16 %v12353_v48, %v12352_v44  ;;  %v4300_v52 = vpop.f32.mrb[31].mxu0  ;;  %v4456_v53 = vpop.f32.mrb[35].mxu1  ;;  %12274 = vmatprep.subr.bf16.mxu0 %v4482_v42 }
 0x80d   :  { %v4471_v54 = vpack.c.bf16 %v4300_v52, %v4296_v45  ;;  %v4476_v55 = vpack.c.bf16 %v4456_v53, %v4453_v46  ;;  %v4646_v44 = vpop.permute.xlu0 %4645  ;;  %v4651_v47 = vpop.permute.xlu1 %4650 }
 0x80f   :  { %12275 = vmatpush3.bf16.msra.mxu0 %v4478_v40  ;;  %12354 = vmatprep.subr.bf16.mxu1 %v4476_v55 }
 0x810   :  { %12355 = vmatpush3.bf16.msra.mxu1 %v4476_v55 }
 0x811   :  { %v4304_v56 = vpop.f32.mrb[32].mxu0  ;;  %12356 = vmatprep.subr.bf16.mxu1 %v4485_v50 }
 0x812   :  { %v4306_v57 = vpop.f32.mrb[33].mxu0 }
 0x813   :  { %v4308_v58 = vpop.f32.mrb[34].mxu0 }
 0x814   :  { %v4479_v59 = vpack.c.bf16 %v4308_v58, %v4304_v56  ;;  %v4310_v60 = vpop.f32.mrb[35].mxu0  ;;  %12357 = vmatpush3.bf16.msra.mxu1 %v4485_v50 }
 0x815   :  { %v4480_v61 = vpack.c.bf16 %v4310_v60, %v4306_v57 }
 0x817   :  { %12359 = vmatmul.mubr.msk.bf16.vlgmr.msra.gmra.mrb[36].mxu1 %vm4524_vm6, %v13194_v18 }
 0x818   :  { %4888 = vmatprep.mubr.bf16.mxu1 %v14267_v24 }
 0x819   :  { %v4400_v62 = vpop.f32.mrb[36].mxu0 }
 0x81a   :  { %v4402_v41 = vpop.f32.mrb[37].mxu0 }
 0x81b   :  { %v4404_v63 = vpop.f32.mrb[38].mxu0 }
 0x81c   :  { %v4474_v0 = vpack.c.bf16 %v4404_v63, %v4400_v62  ;;  %v4406_v1 = vpop.f32.mrb[39].mxu0 }
 0x81d   :  { %v4475_v2 = vpack.c.bf16 %v4406_v1, %v4402_v41 }
 0x81e   :  { %12276 = vmatprep.subr.bf16.mxu0 %v4474_v0 }
 0x81f   :  { %12277 = vmatpush3.bf16.msra.mxu0 %v4470_v49 }
 0x821   :  { %v4410_v3 = vpop.f32.mrb[40].mxu0 }
 0x822   :  { %v4412_v5 = vpop.f32.mrb[41].mxu0 }
 0x823   :  { %v4414_v9 = vpop.f32.mrb[42].mxu0 }
 0x824   :  { %v4483_v6 = vpack.c.bf16 %v4414_v9, %v4410_v3  ;;  %v4416_v27 = vpop.f32.mrb[43].mxu0 }
 0x825   :  { %v4484_v8 = vpack.c.bf16 %v4416_v27, %v4412_v5 }
 0x826   :  { %12278 = vmatprep.subr.bf16.mxu0 %v4483_v6 }
 0x827   :  { %12279 = vmatpush3.bf16.msra.mxu0 %v4479_v59 }
 0x828   :  { %12280 = vmatprep.subr.bf16.mxu0 %v4475_v2 }
 0x82b   :  { %12281 = vmatpush3.bf16.msra.mxu0 %v4471_v54 }
 0x82c   :  { %12282 = vmatprep.subr.bf16.mxu0 %v4484_v8 }
 0x82f   :  { %12283 = vmatpush3.bf16.msra.mxu0 %v4480_v61 }
 0x832   :  { %4564 = vmatmul.mubr.bf16.vlgmr.msra.gmra.mrb[44].mxu0 %v13190_v10 }
 0x833   :  { %4571 = vmatprep.mubr.bf16.mxu0 %v13195_v11 }
 0x83a   :  { %4572 = vmatmul.mubr.bf16.gmra.mrb[48].mxu0 %v13197_v12 }
 0x83b   :  { %4994 = vmatprep.mubr.bf16.mxu0 %v14267_v24 }
 0x8ea   :  { %v12360_v13 = vpop.f32.mrb[36].mxu1 }
 0x8eb   :  { %v4614_v29 = vpop.f32.mrb[37].mxu1 }
 0x8ec   :  { %v12361_v15 = vpop.f32.mrb[38].mxu1 }
 0x8ed   :  { %v4617_v37 = vpop.f32.mrb[39].mxu1 }
 0x905   :  { %v12284_v17 = vpop.f32.mrb[44].mxu0 }
 0x906   :  { %v12285_v19 = vpop.f32.mrb[45].mxu0 }
 0x907   :  { %v12286_v20 = vadd.f32 %v12285_v19, %v12284_v17  ;;  %v12287_v4 = vpop.f32.mrb[46].mxu0 }
 0x908   :  { %v12288_v7 = vpop.f32.mrb[47].mxu0 }
 0x909   :  { %v12289_v16 = vadd.f32 %v12288_v7, %v12287_v4  ;;  %v4615_v21 = vadd.f32 %v12286_v20, %v4614_v29  ;;  %v4706_v20 = vld [vmem:[%s15503_s9] sm:$0xff] }
 0x90b   :  { %v4653_v25 = vadd.f32 %v4636_v23, %v4615_v21  ;;  %v4618_v26 = vadd.f32 %v12289_v16, %v4617_v37  ;;  %v4714_v16 = vld [vmem:[%s15504_s10] sm:$0xff]  ;;  %v4707_v21 = vld [vmem:[%s15503_s9 + $0x8] sm:$0xff]  ;;  %s14273_s9 = smov 127  }
 0x90d   :  { %v14722_v30 = vmax.f32 %v4653_v25, 0.0  ;;  %v4654_v31 = vadd.f32 %v4641_v28, %v4618_v26  ;;  %v12290_v32 = vpop.f32.mrb[48].mxu0 }
 0x90e   :  { %v12291_v33 = vpop.f32.mrb[49].mxu0 }
 0x90f   :  { %v14724_v34 = vmax.f32 %v4654_v31, 0.0  ;;  %v12292_v35 = vadd.f32 %v12291_v33, %v12290_v32  ;;  %v12293_v36 = vpop.f32.mrb[50].mxu0  ;;  %v4662_v38 = vsel %vm4661_vm7, %v14722_v30, 0.0  ;;  %v4715_v31 = vld [vmem:[%s15504_s10 + $0x8] sm:$0xff]  ;;  %s14274_s10 = smov 125  }
 0x910   :  { %v12294_v39 = vpop.f32.mrb[51].mxu0  ;;  %4663 = vadd.xlane.f32.xlu0 %v4662_v38 }
 0x911   :  { %v4623_v40 = vadd.f32 %v12360_v13, %v12292_v35  ;;  %v12295_v42 = vadd.f32 %v12294_v39, %v12293_v36  ;;  %v4665_v43 = vsel %vm4661_vm7, %v14724_v34, 0.0 }
 0x912   :  { %4666 = vadd.xlane.f32.xlu1 %v4665_v43 }
 0x913   :  { %v4655_v45 = vadd.f32 %v4646_v44, %v4623_v40  ;;  %v4626_v46 = vadd.f32 %v12361_v15, %v12295_v42 }
 0x915   :  { %v4656_v48 = vadd.f32 %v4651_v47, %v4626_v46  ;;  %v4659_v49 = vmax.f32 %v4655_v45, 0.0 }
 0x917   :  { %v4670_v50 = vsel %vm4661_vm7, %v4659_v49, 0.0  ;;  %v4660_v52 = vmax.f32 %v4656_v48, 0.0 }
 0x918   :  { %4671 = vadd.xlane.f32.xlu0 %v4670_v50 }
 0x919   :  { %v4673_v53 = vsel %vm4661_vm7, %v4660_v52, 0.0 }
 0x91c   :  { %4674 = vadd.xlane.f32.xlu0 %v4673_v53 }
 0x99d   :  { %v4664_v54 = vpop.xlane.xlu0 %4663 }
 0x99f   :  { %v4667_v58 = vpop.xlane.xlu1 %4666 }
 0x9a5   :  { %v4672_v55 = vpop.xlane.xlu0 %4671 }
 0x9a6   :  { %v4676_v56 = vadd.f32 %v4672_v55, %v4664_v54  ;;  %v4790_v54 = vld [vmem:[#allocation9] sm:$0x77] }
 0x9a7   :  { %v11573_v55 = vcombine.low %v4790_v54, %v4790_v54 }
 0x9a8   :  { %v4678_v57 = vmul.f32 0.055555556, %v4676_v56  ;;  %v11574_v56 = vcombine.high %v4790_v54, %v4790_v54 }
 0x9a9   :  { %v4675_v18 = vpop.xlane.xlu0 %4674 }
 0x9aa   :  { %v4677_v59 = vadd.f32 %v4675_v18, %v4667_v58  ;;  %v4680_v60 = vsub.f32 %v14722_v30, %v4678_v57  ;;  %v4692_v61 = vsub.f32 %v4659_v49, %v4678_v57 }
 0x9ac   :  { %v4679_v62 = vmul.f32 0.055555556, %v4677_v59  ;;  %v4682_v41 = vmul.f32 %v4680_v60, %v4680_v60  ;;  %v4694_v0 = vmul.f32 %v4692_v61, %v4692_v61 }
 0x9ae   :  { %v4684_v63 = vsel %vm4661_vm7, %v4682_v41, 0.0  ;;  %v4681_v1 = vsub.f32 %v14724_v34, %v4679_v62  ;;  %v4693_v2 = vsub.f32 %v4660_v52, %v4679_v62  ;;  %v4696_v5 = vsel %vm4661_vm7, %v4694_v0, 0.0 }
 0x9af   :  { %4685 = vadd.xlane.f32.xlu1 %v4684_v63 }
 0x9b0   :  { %v4683_v3 = vmul.f32 %v4681_v1, %v4681_v1  ;;  %v4695_v6 = vmul.f32 %v4693_v2, %v4693_v2 }
 0x9b2   :  { %v4687_v9 = vsel %vm4661_vm7, %v4683_v3, 0.0  ;;  %v4699_v27 = vsel %vm4661_vm7, %v4695_v6, 0.0 }
 0x9b3   :  { %4697 = vadd.xlane.f32.xlu1 %v4696_v5  ;;  %4688 = vadd.xlane.f32.xlu0 %v4687_v9 }
 0x9b7   :  { %4700 = vadd.xlane.f32.xlu0 %v4699_v27 }
 0xa3c   :  { %v4686_v8 = vpop.xlane.xlu1 %4685 }
 0xa40   :  { %v4698_v10 = vpop.xlane.xlu1 %4697  ;;  %v4689_v11 = vpop.xlane.xlu0 %4688 }
 0xa41   :  { %v4702_v12 = vadd.f32 %v4698_v10, %v4686_v8 }
 0xa43   :  { %v4704_v13 = vmul.f32 0.055555556, %v4702_v12  ;;  %v5278_v12 = vld [vmem:[%s15507_s13 + $0x8] sm:$0xff] }
 0xa44   :  { %v4701_v29 = vpop.xlane.xlu0 %4700 }
 0xa45   :  { %v4708_v15 = vadd.f32 1e-05, %v4704_v13  ;;  %v4703_v37 = vadd.f32 %v4701_v29, %v4689_v11  ;;  %v5277_v11 = vld [vmem:[%s15507_s13] sm:$0xff]  ;;  %v13204_v13 = vld [vmem:[#allocation9 + $0x20] ss:$0 sps:$4 sm:$0x77]  }
 0xa47   :  { %13995 = vrsqrt.f32 %v4708_v15  ;;  %v4705_v17 = vmul.f32 0.055555556, %v4703_v37  ;;  %v5279_v15 = vld [vmem:[%s15507_s13 + $0x10] sm:$0xff]  ;;  %v5280_v37 = vld [vmem:[%s15507_s13 + $0x18] sm:$0xff] }
 0xa49   :  { %v4709_v19 = vadd.f32 1e-05, %v4705_v17  ;;  %v7660_v17 = vld [vmem:[%s15510_s16] sm:$0xff] }
 0xa4b   :  { %13997 = vrsqrt.f32 %v4709_v19  ;;  %v7661_v19 = vld [vmem:[%s15510_s16 + $0x8] sm:$0xff] }
 0xa51   :  { %v13996_v4 = vpop.eup %13995 }
 0xa52   :  { %v4712_v7 = vmul.f32 %v13996_v4, %v4706_v20  ;;  %v11007_v20 = vld [vmem:[%s15513_s19] sm:$0x3]  ;;  %s15533_s19 = sld [smem:[#allocation29_spill]] }
 0xa53   :  { %v4793_v4 = vld [vmem:[#allocation9 + $0x18] sm:$0x77] }
 0xa54   :  { %4722 = vperm.xlu1 %12480, %v4712_v7   ;;  %v4716_v23 = vmul.f32 %v4712_v7, %v4678_v57  ;;  %v4792_v57 = vld [vmem:[#allocation9 + $0x10] sm:$0x77] }
 0xa55   :  { %v13998_v25 = vpop.eup %13997  ;;  %v11578_v58 = vcombine.high %v4792_v57, %v4792_v57  ;;  %v11577_v18 = vcombine.low %v4792_v57, %v4792_v57 }
 0xa56   :  { %v4718_v26 = vsub.f32 %v4714_v16, %v4716_v23  ;;  %v4713_v28 = vmul.f32 %v13998_v25, %v4707_v21 }
 0xa58   :  { %4734 = vperm.xlu1 %12480, %v4718_v26   ;;  %4727 = vperm.xlu0 %12479, %v4713_v28   ;;  %v4717_v32 = vmul.f32 %v4713_v28, %v4679_v62  ;;  %v11580_v26 = vcombine.high %v4793_v4, %v4793_v4 }
 0xa5a   :  { %v4719_v33 = vsub.f32 %v4715_v31, %v4717_v32 }
 0xa5c   :  { %4739 = vperm.xlu1 %12480, %v4719_v33  }
 0xad3   :  { %v4723_v35 = vpop.permute.xlu1 %4722 }
 0xad4   :  { %v4730_v39 = vmul.f32 %v4723_v35, %v14722_v30  ;;  %v4744_v40 = vmul.f32 %v4723_v35, %v4659_v49  ;;  %v4827_v30 = vsel %vm4825_vm8, 4294967295, %v14271_v14  ;;  %v4791_v14 = vld [vmem:[#allocation9 + $0x8] sm:$0x77] }
 0xad5   :  { %v11576_v2 = vcombine.high %v4791_v14, %v4791_v14  ;;  %v11575_v16 = vcombine.low %v4791_v14, %v4791_v14 }
 0xad7   :  { %v4735_v36 = vpop.permute.xlu1 %4734  ;;  %v4728_v38 = vpop.permute.xlu0 %4727 }
 0xad8   :  { %v4731_v42 = vmul.f32 %v4728_v38, %v14724_v34  ;;  %v4745_v43 = vmul.f32 %v4728_v38, %v4660_v52  ;;  %v4742_v45 = vadd.f32 %v4735_v36, %v4730_v39  ;;  %v4746_v46 = vadd.f32 %v4744_v40, %v4735_v36 }
 0xad9   :  { %v14754_v34 = vsel %vm4826_vm9, %v4827_v30, 0 }
 0xada   :  { %v4833_v49 = vand.u32 %v11574_v56, %v14754_v34  ;;  %v4830_v52 = vand.u32 %v11573_v55, %v14754_v34  ;;  %v4845_v59 = vand.u32 %v11578_v58, %v14754_v34  ;;  %v4842_v60 = vand.u32 %v11577_v18, %v14754_v34 }
 0xadb   :  { %v4740_v44 = vpop.permute.xlu1 %4739  ;;  %v4839_v27 = vand.u32 %v11576_v2, %v14754_v34  ;;  %v4854_v29 = vand.u32 %v13204_v13, %v14754_v34  ;;  %v4836_v32 = vand.u32 %v11575_v16, %v14754_v34  ;;  %v4851_v38 = vand.u32 %v11580_v26, %v14754_v34 }
 0xadc   :  { %v4743_v47 = vadd.f32 %v4740_v44, %v4731_v42  ;;  %v4747_v48 = vadd.f32 %v4745_v43, %v4740_v44  ;;  %4856 = vmatprep.subr.bf16.mxu1 %v4833_v49  ;;  %4962 = vmatprep.subr.bf16.mxu0 %v4845_v59  ;;  %v11579_v43 = vcombine.low %v4793_v4, %v4793_v4 }
 0xadd   :  { %4857 = vmatpush1.bf16.msra.mxu1 %v4830_v52  ;;  %4963 = vmatpush1.bf16.msra.mxu0 %v4842_v60 }
 0xade   :  { %v12501_v50 = vpack.i.bf16 %v4743_v47, %v4742_v45  ;;  %v12506_v53 = vpack.i.bf16 %v4747_v48, %v4746_v46  ;;  %4909 = vmatprep.subr.bf16.mxu1 %v4839_v27  ;;  %12362 = vmatprep.subr.bf16.mxu0 %v4854_v29  ;;  %v4848_v44 = vand.u32 %v11579_v43, %v14754_v34  ;;  %v13214_v43 = vld [vmem:[#allocation10 + $0x18] ss:$12 sps:$4 sm:$0xff]  }
 0xae0   :  { %12502 = vrot.lane.b32.xlu0 %v12501_v50, %s14273_s9  ;;  %12507 = vrot.lane.b32.xlu1 %v12506_v53, %s14273_s9 }
 0xb52   :  { %v12503_v61 = vpop.permute.xlu0 %12502  ;;  %v12508_v62 = vpop.permute.xlu1 %12507 }
 0xb53   :  { %v12505_v41 = vunpack.i.h.bf16 %v12503_v61  ;;  %v12504_v63 = vunpack.i.l.bf16 %v12503_v61  ;;  %v12510_v0 = vunpack.i.h.bf16 %v12508_v62  ;;  %v12509_v1 = vunpack.i.l.bf16 %v12508_v62 }
 0xb55   :  { %v4765_v3 = vmax.f32 %v4743_v47, %v12505_v41  ;;  %v4764_v5 = vmax.f32 %v4742_v45, %v12504_v63  ;;  %v4767_v9 = vmax.f32 %v4747_v48, %v12510_v0  ;;  %v4766_v6 = vmax.f32 %v4746_v46, %v12509_v1  ;;  %v13207_v45 = vld [vmem:[#allocation10 + $0x8] ss:$12 sps:$4 sm:$0xff]   ;;  %v13210_v46 = vld [vmem:[#allocation10 + $0x4] ss:$12 sps:$4 sm:$0xff]  }
 0xb57   :  { %v12511_v8 = vpack.i.bf16 %v4765_v3, %v4764_v5  ;;  %v12516_v10 = vpack.i.bf16 %v4767_v9, %v4766_v6 }
 0xb59   :  { %12512 = vrot.lane.b32.xlu0 %v12511_v8, %s14274_s10  ;;  %12517 = vrot.lane.b32.xlu1 %v12516_v10, %s14274_s10 }
 0xb5d   :  { %5283 = vperm.xlu0 %12479, %v5277_v11   ;;  %5288 = vperm.xlu1 %12480, %v5278_v12  }
 0xb61   :  { %5293 = vperm.xlu0 %12479, %v5279_v15   ;;  %5298 = vperm.xlu1 %12480, %v5280_v37  }
 0xb65   :  { %7664 = vperm.xlu0 %12479, %v7660_v17   ;;  %7669 = vperm.xlu1 %12480, %v7661_v19  }
 0xb69   :  { %11010 = vperm.xlu0 %12479, %v11007_v20   ;;  %v13211_v20 = vld [vmem:[#allocation10 + $0x20] ss:$12 sps:$4 sm:$0xff]  }
 0xbcb   :  { %v12513_v7 = vpop.permute.xlu0 %12512  ;;  %v12518_v25 = vpop.permute.xlu1 %12517 }
 0xbcc   :  { %v12515_v21 = vunpack.i.h.bf16 %v12513_v7  ;;  %v12514_v23 = vunpack.i.l.bf16 %v12513_v7  ;;  %v12520_v35 = vunpack.i.h.bf16 %v12518_v25  ;;  %v12519_v36 = vunpack.i.l.bf16 %v12518_v25 }
 0xbce   :  { %v4785_v28 = vmax.f32 %v4765_v3, %v12515_v21  ;;  %v4784_v31 = vmax.f32 %v4764_v5, %v12514_v23  ;;  %v4787_v39 = vmax.f32 %v4767_v9, %v12520_v35  ;;  %v4786_v40 = vmax.f32 %v4766_v6, %v12519_v36 }
 0xbd0   :  { %v4788_v33 = vpack.c.bf16 %v4785_v28, %v4784_v31  ;;  %v4789_v42 = vpack.c.bf16 %v4787_v39, %v4786_v40  ;;  %v13208_v40 = vld [vmem:[#allocation10] ss:$12 sps:$4 sm:$0xff]  }
 0xbd2   :  { %11582 = vmatmul.mubr.msk.bf16.vlgmr.msra.gmra.mrb[40].mxu1 %vm4818_vm10, %v4788_v33  ;;  %11586 = vmatmul.mubr.msk.bf16.vlgmr.msra.gmra.mrb[52].mxu0 %vm4818_vm10, %v4788_v33 }
 0xbd3   :  { %4910 = vmatpush1.bf16.msra.mxu1 %v4836_v32  ;;  %4898 = vmatprep.mubr.bf16.mxu1 %v14267_v24 }
 0xbd4   :  { %5004 = vmatprep.mubr.bf16.mxu0 %v14267_v24  ;;  %12363 = vmatpush3.bf16.msra.mxu0 %v4854_v29 }
 0xbd5   :  { %5015 = vmatprep.subr.bf16.mxu1 %v4851_v38 }
 0xbda   :  { %11583 = vmatmul.mubr.msk.bf16.gmra.mrb[44].mxu1 %vm4818_vm10, %v4789_v42  ;;  %11587 = vmatmul.mubr.msk.bf16.gmra.mrb[56].mxu0 %vm4818_vm10, %v4789_v42 }
 0xbdb   :  { %12364 = vmatprep.mubr.msk.bf16.mxu0 %vm4818_vm10, %v4788_v33  ;;  %4941 = vmatprep.mubr.bf16.mxu1 %v14267_v24 }
 0xbe2   :  { %11584 = vmatmul.mubr.msk.bf16.vlgmr.msra.gmra.mrb[48].mxu1 %vm4818_vm10, %v4788_v33  ;;  %12365 = vmatmul.mubr.msk.bf16.vlgmr.msra.gmra.mrb[60].mxu0 %vm4818_vm10, %v4789_v42 }
 0xbe3   :  { %5016 = vmatpush1.bf16.msra.mxu1 %v4848_v44  ;;  %4951 = vmatprep.mubr.bf16.mxu1 %v14267_v24  ;;  %v13217_v44 = vld [vmem:[#allocation12 + $0x4] ss:$200 sps:$4 sm:$0xff]  }
 0xbe4   :  { %12372 = vmatprep.mubr.msk.bf16.mxu0 %vm4524_vm6, %v13207_v45  ;;  %v13220_v45 = vld [vmem:[#allocation12 + $0x14] ss:$200 sps:$4 sm:$0xff]  }
 0xbea   :  { %11585 = vmatmul.mubr.msk.bf16.gmra.mrb[52].mxu1 %vm4818_vm10, %v4789_v42 }
 0xbeb   :  { %5047 = vmatprep.mubr.bf16.mxu1 %v14267_v24 }
 0xbf2   :  { %11588 = vmatmul.mubr.msk.bf16.vlgmr.msra.gmra.mrb[56].mxu1 %vm4818_vm10, %v4788_v33 }
 0xbf3   :  { %5057 = vmatprep.mubr.bf16.mxu1 %v14267_v24 }
 0xbfa   :  { %11589 = vmatmul.mubr.msk.bf16.gmra.mrb[60].mxu1 %vm4818_vm10, %v4789_v42  ;;  %v13212_v42 = vld [vmem:[#allocation10 + $0x1c] ss:$12 sps:$4 sm:$0xff]  }
 0xbfb   :  { %5211 = vmatprep.mubr.bf16.mxu1 %v13210_v46  ;;  %v13215_v46 = vld [vmem:[#allocation12] ss:$200 sps:$4 sm:$0xff]  }
 0xca5   :  { %v4890_v47 = vpop.f32.mrb[40].mxu1  ;;  %v4996_v48 = vpop.f32.mrb[52].mxu0 }
 0xca6   :  { %v4892_v50 = vpop.f32.mrb[41].mxu1  ;;  %v4998_v53 = vpop.f32.mrb[53].mxu0 }
 0xca7   :  { %v4894_v54 = vpop.f32.mrb[42].mxu1  ;;  %v5000_v55 = vpop.f32.mrb[54].mxu0 }
 0xca8   :  { %v5117_v56 = vpack.c.bf16 %v4894_v54, %v4890_v47  ;;  %v5121_v30 = vpack.c.bf16 %v5000_v55, %v4996_v48  ;;  %v4896_v34 = vpop.f32.mrb[43].mxu1  ;;  %v5002_v49 = vpop.f32.mrb[55].mxu0  ;;  %v13218_v47 = vld [vmem:[#allocation12 + $0x10] ss:$200 sps:$4 sm:$0xff]  }
 0xca9   :  { %v5118_v52 = vpack.c.bf16 %v4896_v34, %v4892_v50  ;;  %v5122_v57 = vpack.c.bf16 %v5002_v49, %v4998_v53  ;;  %v13223_v48 = vld [vmem:[#allocation12 + $0x194] ss:$200 sps:$4 sm:$0x1f]   ;;  %v13226_v50 = vld [vmem:[#allocation12 + $0x1a4] ss:$200 sps:$4 sm:$0x1f]  }
 0xcaa   :  { %12303 = vmatprep.subr.bf16.mxu1 %v5121_v30  ;;  %v13221_v53 = vld [vmem:[#allocation12 + $0x190] ss:$200 sps:$4 sm:$0x1f]   ;;  %v13224_v54 = vld [vmem:[#allocation12 + $0x1a0] ss:$200 sps:$4 sm:$0x1f]   ;;  %v5871_v55 = vand.u32 %v13223_v48, %v14679_v22 }
 0xcab   :  { %12304 = vmatpush3.bf16.msra.mxu1 %v5117_v56  ;;  %v5883_v56 = vand.u32 %v13226_v50, %v14679_v22  ;;  %v5868_v30 = vand.u32 %v13221_v53, %v14679_v22  ;;  %v5880_v34 = vand.u32 %v13224_v54, %v14679_v22  ;;  %v13229_v49 = vld [vmem:[#allocation12 + $0xc] ss:$200 sps:$4 sm:$0xff]   ;;  %v13245_v48 = vld [vmem:[#allocation12 + $0x30] ss:$200 sps:$4 sm:$0xff]  }
 0xcac   :  { %v13248_v50 = vld [vmem:[#allocation12 + $0x1c0] ss:$200 sps:$4 sm:$0x1f]  }
 0xcad   :  { %v4900_v58 = vpop.f32.mrb[44].mxu1  ;;  %v5006_v18 = vpop.f32.mrb[56].mxu0 }
 0xcae   :  { %v4902_v59 = vpop.f32.mrb[45].mxu1  ;;  %v5008_v60 = vpop.f32.mrb[57].mxu0 }
 0xcaf   :  { %v4904_v61 = vpop.f32.mrb[46].mxu1  ;;  %v5010_v62 = vpop.f32.mrb[58].mxu0 }
 0xcb0   :  { %v5126_v14 = vpack.c.bf16 %v4904_v61, %v4900_v58  ;;  %v5130_v41 = vpack.c.bf16 %v5010_v62, %v5006_v18  ;;  %v4906_v63 = vpop.f32.mrb[47].mxu1  ;;  %v5012_v0 = vpop.f32.mrb[59].mxu0 }
 0xcb1   :  { %v5127_v1 = vpack.c.bf16 %v4906_v63, %v4902_v59  ;;  %v5131_v2 = vpack.c.bf16 %v5012_v0, %v5008_v60 }
 0xcb2   :  { %12305 = vmatprep.subr.bf16.mxu1 %v5130_v41 }
 0xcb3   :  { %12306 = vmatpush3.bf16.msra.mxu1 %v5126_v14 }
 0xcb4   :  { %12307 = vmatprep.subr.bf16.mxu1 %v5122_v57 }
 0xcb5   :  { %v4943_v3 = vpop.f32.mrb[48].mxu1  ;;  %v12366_v5 = vpop.f32.mrb[60].mxu0 }
 0xcb6   :  { %v4945_v9 = vpop.f32.mrb[49].mxu1  ;;  %v5102_v6 = vpop.f32.mrb[61].mxu0 }
 0xcb7   :  { %v4947_v27 = vpop.f32.mrb[50].mxu1  ;;  %v12367_v8 = vpop.f32.mrb[62].mxu0  ;;  %12308 = vmatpush3.bf16.msra.mxu1 %v5118_v52  ;;  %v13235_v52 = vld [vmem:[#allocation12 + $0x24] ss:$200 sps:$4 sm:$0xff]  }
 0xcb8   :  { %v5119_v10 = vpack.c.bf16 %v4947_v27, %v4943_v3  ;;  %v5134_v11 = vpack.c.bf16 %v12367_v8, %v12366_v5  ;;  %v4949_v12 = vpop.f32.mrb[51].mxu1  ;;  %v5105_v13 = vpop.f32.mrb[63].mxu0  ;;  %12309 = vmatprep.subr.bf16.mxu1 %v5131_v2  ;;  %v13232_v27 = vld [vmem:[#allocation12 + $0x19c] ss:$200 sps:$4 sm:$0x1f]  }
 0xcb9   :  { %v5120_v29 = vpack.c.bf16 %v4949_v12, %v4945_v9  ;;  %v5125_v15 = vpack.c.bf16 %v5105_v13, %v5102_v6  ;;  %v5289_v5 = vpop.permute.xlu1 %5288 }
 0xcbb   :  { %12310 = vmatpush3.bf16.msra.mxu1 %v5127_v1  ;;  %12368 = vmatprep.subr.bf16.mxu0 %v5125_v15  ;;  %v5284_v1 = vpop.permute.xlu0 %5283 }
 0xcbc   :  { %12369 = vmatpush3.bf16.msra.mxu0 %v5125_v15 }
 0xcbd   :  { %v4953_v37 = vpop.f32.mrb[52].mxu1  ;;  %12370 = vmatprep.subr.bf16.mxu0 %v5134_v11 }
 0xcbe   :  { %v4955_v17 = vpop.f32.mrb[53].mxu1 }
 0xcbf   :  { %v4957_v19 = vpop.f32.mrb[54].mxu1 }
 0xcc0   :  { %v5128_v4 = vpack.c.bf16 %v4957_v19, %v4953_v37  ;;  %v4959_v7 = vpop.f32.mrb[55].mxu1  ;;  %12371 = vmatpush3.bf16.msra.mxu0 %v5134_v11  ;;  %v13227_v37 = vld [vmem:[#allocation12 + $0x8] ss:$200 sps:$4 sm:$0xff]  }
 0xcc1   :  { %v5129_v16 = vpack.c.bf16 %v4959_v7, %v4955_v17  ;;  %6017 = vmatprep.subr.bf16.mxu0 %v13217_v44  ;;  %v13230_v17 = vld [vmem:[#allocation12 + $0x198] ss:$200 sps:$4 sm:$0x1f]   ;;  %v5877_v7 = vand.u32 %v13232_v27, %v14679_v22  ;;  %v13250_v44 = vld [vmem:[#allocation12 + $0x1c4] ss:$200 sps:$4 sm:$0x1f]  }
 0xcc2   :  { %v5907_v53 = vand.u32 %v13250_v44, %v14679_v22  ;;  %v13304_v44 = vld [vmem:[#allocation12 + $0x1fc] ss:$200 sps:$4 sm:$0x1f]  }
 0xcc3   :  { %12373 = vmatmul.mubr.msk.bf16.vlgmr.msra.gmra.mrb[64].mxu0 %vm4524_vm6, %v13211_v20 }
 0xcc4   :  { %6049 = vmatprep.mubr.bf16.mxu0 %v14267_v24  ;;  %6018 = vmatpush1.bf16.msra.mxu0 %v13215_v46  ;;  %v13242_v46 = vld [vmem:[#allocation12 + $0x1a8] ss:$200 sps:$4 sm:$0x1f]  }
 0xcc5   :  { %v5049_v21 = vpop.f32.mrb[56].mxu1  ;;  %6019 = vmatprep.subr.bf16.mxu0 %v5871_v55  ;;  %v5886_v54 = vand.u32 %v13242_v46, %v14679_v22  ;;  %v13253_v55 = vld [vmem:[#allocation12 + $0x2c] ss:$200 sps:$4 sm:$0xff]   ;;  %v13299_v46 = vld [vmem:[#allocation12 + $0x68] ss:$200 sps:$4 sm:$0xff]  }
 0xcc6   :  { %v5051_v23 = vpop.f32.mrb[57].mxu1 }
 0xcc7   :  { %v5053_v25 = vpop.f32.mrb[58].mxu1 }
 0xcc8   :  { %v5123_v26 = vpack.c.bf16 %v5053_v25, %v5049_v21  ;;  %v5055_v28 = vpop.f32.mrb[59].mxu1  ;;  %6020 = vmatpush1.bf16.msra.mxu0 %v5868_v30  ;;  %v13233_v21 = vld [vmem:[#allocation12 + $0x20] ss:$200 sps:$4 sm:$0xff]   ;;  %v13259_v30 = vld [vmem:[#allocation12 + $0x44] ss:$200 sps:$4 sm:$0xff]  }
 0xcc9   :  { %v5124_v31 = vpack.c.bf16 %v5055_v28, %v5051_v23  ;;  %6070 = vmatprep.subr.bf16.mxu0 %v13229_v49  ;;  %v13236_v23 = vld [vmem:[#allocation12 + $0x1b0] ss:$200 sps:$4 sm:$0x1f]   ;;  %v13262_v49 = vld [vmem:[#allocation12 + $0x1d4] ss:$200 sps:$4 sm:$0x1f]  }
 0xcca   :  { %12311 = vmatprep.subr.bf16.mxu1 %v5123_v26 }
 0xccb   :  { %12312 = vmatpush3.bf16.msra.mxu1 %v5119_v10 }
 0xccd   :  { %v5059_v32 = vpop.f32.mrb[60].mxu1 }
 0xcce   :  { %v5061_v33 = vpop.f32.mrb[61].mxu1 }
 0xccf   :  { %v5063_v35 = vpop.f32.mrb[62].mxu1 }
 0xcd0   :  { %v5132_v36 = vpack.c.bf16 %v5063_v35, %v5059_v32  ;;  %v5065_v38 = vpop.f32.mrb[63].mxu1  ;;  %v5874_v32 = vand.u32 %v13230_v17, %v14679_v22  ;;  %v13241_v35 = vld [vmem:[#allocation12 + $0x1c] ss:$200 sps:$4 sm:$0xff]   ;;  %v13281_v17 = vld [vmem:[#allocation12 + $0x60] ss:$200 sps:$4 sm:$0xff]  }
 0xcd1   :  { %v5133_v39 = vpack.c.bf16 %v5065_v38, %v5061_v33 }
 0xcd2   :  { %12313 = vmatprep.subr.bf16.mxu1 %v5132_v36  ;;  %v5892_v36 = vand.u32 %v13236_v23, %v14679_v22  ;;  %v13295_v23 = vld [vmem:[#allocation12 + $0x74] ss:$200 sps:$4 sm:$0xff]  }
 0xcd3   :  { %12314 = vmatpush3.bf16.msra.mxu1 %v5128_v4 }
 0xcd4   :  { %12315 = vmatprep.subr.bf16.mxu1 %v5124_v31  ;;  %v5299_v31 = vpop.permute.xlu1 %5298 }
 0xcd7   :  { %12316 = vmatpush3.bf16.msra.mxu1 %v5120_v29  ;;  %v13238_v29 = vld [vmem:[#allocation12 + $0x1b4] ss:$200 sps:$4 sm:$0x1f]  }
 0xcd8   :  { %12317 = vmatprep.subr.bf16.mxu1 %v5133_v39  ;;  %v5895_v28 = vand.u32 %v13238_v29, %v14679_v22  ;;  %v13275_v29 = vld [vmem:[#allocation12 + $0x48] ss:$200 sps:$4 sm:$0xff]  }
 0xcdb   :  { %12318 = vmatpush3.bf16.msra.mxu1 %v5129_v16  ;;  %v5294_v16 = vpop.permute.xlu0 %5293 }
 0xcdc   :  { %6123 = vmatprep.subr.bf16.mxu1 %v13220_v45  ;;  %v13239_v45 = vld [vmem:[#allocation12 + $0x18] ss:$200 sps:$4 sm:$0xff]  }
 0xcde   :  { %5212 = vmatmul.mubr.bf16.vlgmr.msra.gmra.mrb[64].mxu1 %v13208_v40 }
 0xcdf   :  { %5219 = vmatprep.mubr.bf16.mxu1 %v13212_v42  ;;  %6124 = vmatpush1.bf16.msra.mxu1 %v13218_v47  ;;  %v13247_v42 = vld [vmem:[#allocation12 + $0x34] ss:$200 sps:$4 sm:$0xff]  }
 0xce0   :  { %6125 = vmatprep.subr.bf16.mxu1 %v5883_v56  ;;  %v5904_v56 = vand.u32 %v13248_v50, %v14679_v22  ;;  %v13305_v50 = vld [vmem:[#allocation12 + $0x80] ss:$200 sps:$4 sm:$0xff]  }
 0xce3   :  { %6126 = vmatpush1.bf16.msra.mxu1 %v5880_v34  ;;  %v13256_v34 = vld [vmem:[#allocation12 + $0x1bc] ss:$200 sps:$4 sm:$0x1f]  }
 0xce4   :  { %6229 = vmatprep.subr.bf16.mxu1 %v13235_v52  ;;  %v13251_v52 = vld [vmem:[#allocation12 + $0x28] ss:$200 sps:$4 sm:$0xff]  }
 0xce6   :  { %5220 = vmatmul.mubr.bf16.gmra.mrb[68].mxu1 %v13214_v43  ;;  %v13244_v43 = vld [vmem:[#allocation12 + $0x1ac] ss:$200 sps:$4 sm:$0x1f]  }
 0xce7   :  { %6155 = vmatprep.mubr.bf16.mxu1 %v14267_v24  ;;  %v5889_v47 = vand.u32 %v13244_v43, %v14679_v22  ;;  %v13307_v43 = vld [vmem:[#allocation12 + $0x84] ss:$200 sps:$4 sm:$0xff]  }
 0xd96   :  { %v12374_v57 = vpop.f32.mrb[64].mxu0 }
 0xd97   :  { %v5262_v58 = vpop.f32.mrb[65].mxu0 }
 0xd98   :  { %v12375_v18 = vpop.f32.mrb[66].mxu0 }
 0xd99   :  { %v5265_v59 = vpop.f32.mrb[67].mxu0 }
 0xdb1   :  { %v12319_v60 = vpop.f32.mrb[64].mxu1 }
 0xdb2   :  { %v12320_v61 = vpop.f32.mrb[65].mxu1 }
 0xdb3   :  { %v12321_v62 = vadd.f32 %v12320_v61, %v12319_v60  ;;  %v12322_v14 = vpop.f32.mrb[66].mxu1  ;;  %v5919_v60 = vand.u32 %v13262_v49, %v14679_v22  ;;  %v13316_v49 = vld [vmem:[#allocation12 + $0x20c] ss:$200 sps:$4 sm:$0x1f]  }
 0xdb4   :  { %v12323_v41 = vpop.f32.mrb[67].mxu1 }
 0xdb5   :  { %v5263_v63 = vadd.f32 %v12321_v62, %v5262_v58  ;;  %v12324_v0 = vadd.f32 %v12323_v41, %v12322_v14  ;;  %v5901_v58 = vand.u32 %v13256_v34, %v14679_v22  ;;  %v13265_v62 = vld [vmem:[#allocation12 + $0x3c] ss:$200 sps:$4 sm:$0xff]  }
 0xdb6   :  { %v13271_v41 = vld [vmem:[#allocation12 + $0x54] ss:$200 sps:$4 sm:$0xff]  }
 0xdb7   :  { %v5301_v2 = vadd.f32 %v5284_v1, %v5263_v63  ;;  %v5266_v3 = vadd.f32 %v12324_v0, %v5265_v59  ;;  %v13260_v59 = vld [vmem:[#allocation12 + $0x1d0] ss:$200 sps:$4 sm:$0x1f]   ;;  %v13268_v63 = vld [vmem:[#allocation12 + $0x1cc] ss:$200 sps:$4 sm:$0x1f]  }
 0xdb8   :  { %v5916_v14 = vand.u32 %v13260_v59, %v14679_v22  ;;  %v13274_v0 = vld [vmem:[#allocation12 + $0x1e4] ss:$200 sps:$4 sm:$0x1f]   ;;  %v13263_v1 = vld [vmem:[#allocation12 + $0x38] ss:$200 sps:$4 sm:$0xff]  }
 0xdb9   :  { %v5302_v9 = vadd.f32 %v5289_v5, %v5266_v3  ;;  %v12325_v6 = vpop.f32.mrb[68].mxu1  ;;  %v5305_v10 = vmax.f32 %v5301_v2, 0.0  ;;  %v13266_v2 = vld [vmem:[#allocation12 + $0x1c8] ss:$200 sps:$4 sm:$0x1f]   ;;  %v5913_v3 = vand.u32 %v13268_v63, %v14679_v22 }
 0xdba   :  { %v12326_v8 = vpop.f32.mrb[69].mxu1  ;;  %v13269_v5 = vld [vmem:[#allocation12 + $0x50] ss:$200 sps:$4 sm:$0xff]   ;;  %v5910_v27 = vand.u32 %v13266_v2, %v14679_v22  ;;  %v13319_v34 = vld [vmem:[#allocation12 + $0x94] ss:$200 sps:$4 sm:$0xff]  }
 0xdbb   :  { %v5306_v11 = vmax.f32 %v5302_v9, 0.0  ;;  %v12327_v12 = vadd.f32 %v12326_v8, %v12325_v6  ;;  %v12328_v13 = vpop.f32.mrb[70].mxu1  ;;  %v13272_v9 = vld [vmem:[#allocation12 + $0x1e0] ss:$200 sps:$4 sm:$0x1f]   ;;  %v5931_v6 = vand.u32 %v13274_v0, %v14679_v22 }
 0xdbc   :  { %v12329_v15 = vpop.f32.mrb[71].mxu1  ;;  %v13277_v8 = vld [vmem:[#allocation12 + $0x4c] ss:$200 sps:$4 sm:$0xff]   ;;  %v13317_v59 = vld [vmem:[#allocation12 + $0x90] ss:$200 sps:$4 sm:$0xff]  }
 0xdbd   :  { %v14810_v19 = vpack.c.bf16 %v5306_v11, %v5305_v10  ;;  %v5271_v20 = vadd.f32 %v12374_v57, %v12327_v12  ;;  %v12330_v4 = vadd.f32 %v12329_v15, %v12328_v13  ;;  %v13254_v57 = vld [vmem:[#allocation12 + $0x1b8] ss:$200 sps:$4 sm:$0x1f]   ;;  %v5928_v10 = vand.u32 %v13272_v9, %v14679_v22  ;;  %v13283_v11 = vld [vmem:[#allocation12 + $0x64] ss:$200 sps:$4 sm:$0xff]  }
 0xdbe   :  { %v5898_v61 = vand.u32 %v13254_v57, %v14679_v22  ;;  %v13280_v12 = vld [vmem:[#allocation12 + $0x1dc] ss:$200 sps:$4 sm:$0x1f]   ;;  %v13278_v15 = vld [vmem:[#allocation12 + $0x1d8] ss:$200 sps:$4 sm:$0x1f]  }
 0xdbf   :  { %v5303_v25 = vadd.f32 %v5294_v16, %v5271_v20  ;;  %v5274_v26 = vadd.f32 %v12375_v18, %v12330_v4  ;;  %11700 = vmatmul.mubr.msk.bf16.vlgmr.msra.gmra.mrb[68].mxu0 %vm4169_vm5, %v14810_v19  ;;  %11704 = vmatmul.mubr.msk.bf16.vlgmr.msra.gmra.mrb[72].mxu1 %vm4169_vm5, %v14810_v19  ;;  %v13257_v18 = vld [vmem:[#allocation12 + $0x40] ss:$200 sps:$4 sm:$0xff]   ;;  %v13286_v13 = vld [vmem:[#allocation12 + $0x1f4] ss:$200 sps:$4 sm:$0x1f]  }
 0xdc0   :  { %6071 = vmatpush1.bf16.msra.mxu0 %v13227_v37  ;;  %6059 = vmatprep.mubr.bf16.mxu0 %v14267_v24  ;;  %v5925_v37 = vand.u32 %v13280_v12, %v14679_v22  ;;  %v13284_v20 = vld [vmem:[#allocation12 + $0x1f0] ss:$200 sps:$4 sm:$0x1f]   ;;  %v5943_v4 = vand.u32 %v13286_v13, %v14679_v22  ;;  %v13289_v16 = vld [vmem:[#allocation12 + $0x5c] ss:$200 sps:$4 sm:$0xff]  }
 0xdc1   :  { %v5304_v33 = vadd.f32 %v5299_v31, %v5274_v26  ;;  %6165 = vmatprep.mubr.bf16.mxu1 %v14267_v24  ;;  %6072 = vmatprep.subr.bf16.mxu0 %v5877_v7  ;;  %v5307_v38 = vmax.f32 %v5303_v25, 0.0  ;;  %v5922_v7 = vand.u32 %v13278_v15, %v14679_v22  ;;  %v13292_v25 = vld [vmem:[#allocation12 + $0x1ec] ss:$200 sps:$4 sm:$0x1f]   ;;  %v13311_v57 = vld [vmem:[#allocation12 + $0x78] ss:$200 sps:$4 sm:$0xff]  }
 0xdc2   :  { %6230 = vmatpush1.bf16.msra.mxu1 %v13233_v21  ;;  %v5940_v21 = vand.u32 %v13284_v20, %v14679_v22  ;;  %v13298_v26 = vld [vmem:[#allocation12 + $0x204] ss:$200 sps:$4 sm:$0x1f]   ;;  %v13290_v31 = vld [vmem:[#allocation12 + $0x1e8] ss:$200 sps:$4 sm:$0x1f]  }
 0xdc3   :  { %v5308_v39 = vmax.f32 %v5304_v33, 0.0  ;;  %6231 = vmatprep.subr.bf16.mxu1 %v5895_v28  ;;  %v13287_v28 = vld [vmem:[#allocation12 + $0x58] ss:$200 sps:$4 sm:$0xff]   ;;  %v13331_v63 = vld [vmem:[#allocation12 + $0xa4] ss:$200 sps:$4 sm:$0xff]  }
 0xdc4   :  { %6073 = vmatpush1.bf16.msra.mxu0 %v5874_v32  ;;  %v5937_v32 = vand.u32 %v13292_v25, %v14679_v22  ;;  %v13293_v33 = vld [vmem:[#allocation12 + $0x70] ss:$200 sps:$4 sm:$0xff]   ;;  %v13328_v0 = vld [vmem:[#allocation12 + $0x21c] ss:$200 sps:$4 sm:$0x1f]  }
 0xdc5   :  { %v14822_v40 = vpack.c.bf16 %v5308_v39, %v5307_v38  ;;  %6176 = vmatprep.subr.bf16.mxu0 %v13241_v35  ;;  %v13296_v35 = vld [vmem:[#allocation12 + $0x200] ss:$200 sps:$4 sm:$0x1f]   ;;  %v5934_v38 = vand.u32 %v13290_v31, %v14679_v22  ;;  %v13301_v39 = vld [vmem:[#allocation12 + $0x6c] ss:$200 sps:$4 sm:$0xff]  }
 0xdc6   :  { %6232 = vmatpush1.bf16.msra.mxu1 %v5892_v36  ;;  %v5955_v36 = vand.u32 %v13298_v26, %v14679_v22  ;;  %v13323_v2 = vld [vmem:[#allocation12 + $0x88] ss:$200 sps:$4 sm:$0xff]   ;;  %v13343_v12 = vld [vmem:[#allocation12 + $0xb4] ss:$200 sps:$4 sm:$0xff]   ;;  %v13335_v15 = vld [vmem:[#allocation12 + $0x98] ss:$200 sps:$4 sm:$0xff]  }
 0xdc7   :  { %11701 = vmatmul.mubr.msk.bf16.gmra.mrb[72].mxu0 %vm4169_vm5, %v14822_v40  ;;  %11705 = vmatmul.mubr.msk.bf16.gmra.mrb[76].mxu1 %vm4169_vm5, %v14822_v40  ;;  %v13329_v9 = vld [vmem:[#allocation12 + $0xa0] ss:$200 sps:$4 sm:$0xff]   ;;  %v13340_v13 = vld [vmem:[#allocation12 + $0x22c] ss:$200 sps:$4 sm:$0x1f]  }
 0xdc8   :  { %6102 = vmatprep.mubr.bf16.mxu0 %v14267_v24  ;;  %6261 = vmatprep.mubr.bf16.mxu1 %v14267_v24  ;;  %v13341_v20 = vld [vmem:[#allocation12 + $0xb0] ss:$200 sps:$4 sm:$0xff]   ;;  %v13355_v25 = vld [vmem:[#allocation12 + $0xc4] ss:$200 sps:$4 sm:$0xff]  }
 0xdc9   :  { %6335 = vmatprep.subr.bf16.mxu1 %v13247_v42  ;;  %v5952_v42 = vand.u32 %v13296_v35, %v14679_v22  ;;  %v13352_v26 = vld [vmem:[#allocation12 + $0x23c] ss:$200 sps:$4 sm:$0x1f]   ;;  %v13347_v31 = vld [vmem:[#allocation12 + $0xa8] ss:$200 sps:$4 sm:$0xff]  }
 0xdca   :  { %v13353_v35 = vld [vmem:[#allocation12 + $0xc0] ss:$200 sps:$4 sm:$0xff]  }
 0xdcf   :  { %11702 = vmatmul.mubr.msk.bf16.vlgmr.msra.gmra.mrb[76].mxu0 %vm4169_vm5, %v14810_v19  ;;  %11708 = vmatmul.mubr.msk.bf16.vlgmr.msra.gmra.mrb[80].mxu1 %vm4169_vm5, %v14810_v19 }
 0xdd0   :  { %6177 = vmatpush1.bf16.msra.mxu0 %v13239_v45  ;;  %6112 = vmatprep.mubr.bf16.mxu0 %v14267_v24  ;;  %v13310_v45 = vld [vmem:[#allocation12 + $0x214] ss:$200 sps:$4 sm:$0x1f]  }
 0xdd1   :  { %6271 = vmatprep.mubr.bf16.mxu1 %v14267_v24  ;;  %6178 = vmatprep.subr.bf16.mxu0 %v5889_v47  ;;  %v13302_v47 = vld [vmem:[#allocation12 + $0x1f8] ss:$200 sps:$4 sm:$0x1f]  }
 0xdd2   :  { %6336 = vmatpush1.bf16.msra.mxu1 %v13245_v48  ;;  %v5949_v48 = vand.u32 %v13304_v44, %v14679_v22  ;;  %v13364_v44 = vld [vmem:[#allocation12 + $0x24c] ss:$200 sps:$4 sm:$0x1f]  }
 0xdd3   :  { %6337 = vmatprep.subr.bf16.mxu1 %v5907_v53  ;;  %v13308_v53 = vld [vmem:[#allocation12 + $0x210] ss:$200 sps:$4 sm:$0x1f]  }
 0xdd4   :  { %6179 = vmatpush1.bf16.msra.mxu0 %v5886_v54  ;;  %v5967_v54 = vand.u32 %v13310_v45, %v14679_v22  ;;  %v13359_v45 = vld [vmem:[#allocation12 + $0xb8] ss:$200 sps:$4 sm:$0xff]  }
 0xdd5   :  { %6282 = vmatprep.subr.bf16.mxu0 %v13253_v55  ;;  %v5946_v55 = vand.u32 %v13302_v47, %v14679_v22  ;;  %v6009_v47 = vand.u32 %v13364_v44, %v14679_v22 }
 0xdd6   :  { %6338 = vmatpush1.bf16.msra.mxu1 %v5904_v56  ;;  %v13313_v56 = vld [vmem:[#allocation12 + $0x7c] ss:$200 sps:$4 sm:$0xff]  }
 0xdd7   :  { %11703 = vmatmul.mubr.msk.bf16.gmra.mrb[80].mxu0 %vm4169_vm5, %v14822_v40  ;;  %11709 = vmatmul.mubr.msk.bf16.gmra.mrb[84].mxu1 %vm4169_vm5, %v14822_v40 }
 0xdd8   :  { %6208 = vmatprep.mubr.bf16.mxu0 %v14267_v24  ;;  %6367 = vmatprep.mubr.bf16.mxu1 %v14267_v24 }
 0xdd9   :  { %6441 = vmatprep.subr.bf16.mxu1 %v13259_v30  ;;  %v5964_v30 = vand.u32 %v13308_v53, %v14679_v22 }
 0xddf   :  { %11706 = vmatmul.mubr.msk.bf16.vlgmr.msra.gmra.mrb[84].mxu0 %vm4169_vm5, %v14810_v19  ;;  %11712 = vmatmul.mubr.msk.bf16.vlgmr.msra.gmra.mrb[88].mxu1 %vm4169_vm5, %v14810_v19 }
 0xde0   :  { %6283 = vmatpush1.bf16.msra.mxu0 %v13251_v52  ;;  %6218 = vmatprep.mubr.bf16.mxu0 %v14267_v24  ;;  %v13322_v52 = vld [vmem:[#allocation12 + $0x224] ss:$200 sps:$4 sm:$0x1f]  }
 0xde1   :  { %6377 = vmatprep.mubr.bf16.mxu1 %v14267_v24  ;;  %6284 = vmatprep.subr.bf16.mxu0 %v5901_v58  ;;  %v13314_v58 = vld [vmem:[#allocation12 + $0x208] ss:$200 sps:$4 sm:$0x1f]  }
 0xde2   :  { %6442 = vmatpush1.bf16.msra.mxu1 %v13257_v18  ;;  %v5961_v18 = vand.u32 %v13316_v49, %v14679_v22 }
 0xde3   :  { %6443 = vmatprep.subr.bf16.mxu1 %v5919_v60  ;;  %v13320_v60 = vld [vmem:[#allocation12 + $0x220] ss:$200 sps:$4 sm:$0x1f]  }
 0xde4   :  { %6285 = vmatpush1.bf16.msra.mxu0 %v5898_v61  ;;  %v5979_v61 = vand.u32 %v13322_v52, %v14679_v22 }
 0xde5   :  { %6388 = vmatprep.subr.bf16.mxu0 %v13265_v62  ;;  %v5958_v62 = vand.u32 %v13314_v58, %v14679_v22 }
 0xde6   :  { %6444 = vmatpush1.bf16.msra.mxu1 %v5916_v14  ;;  %v13325_v14 = vld [vmem:[#allocation12 + $0x8c] ss:$200 sps:$4 sm:$0xff]  }
 0xde7   :  { %11707 = vmatmul.mubr.msk.bf16.gmra.mrb[88].mxu0 %vm4169_vm5, %v14822_v40  ;;  %11713 = vmatmul.mubr.msk.bf16.gmra.mrb[92].mxu1 %vm4169_vm5, %v14822_v40 }
 0xde8   :  { %6314 = vmatprep.mubr.bf16.mxu0 %v14267_v24  ;;  %6473 = vmatprep.mubr.bf16.mxu1 %v14267_v24 }
 0xde9   :  { %6547 = vmatprep.subr.bf16.mxu1 %v13271_v41  ;;  %v5976_v41 = vand.u32 %v13320_v60, %v14679_v22 }
 0xdef   :  { %11710 = vmatmul.mubr.msk.bf16.vlgmr.msra.gmra.mrb[92].mxu0 %vm4169_vm5, %v14810_v19  ;;  %11716 = vmatmul.mubr.msk.bf16.vlgmr.msra.gmra.mrb[96].mxu1 %vm4169_vm5, %v14810_v19 }
 0xdf0   :  { %6389 = vmatpush1.bf16.msra.mxu0 %v13263_v1  ;;  %6324 = vmatprep.mubr.bf16.mxu0 %v14267_v24  ;;  %v13334_v1 = vld [vmem:[#allocation12 + $0x234] ss:$200 sps:$4 sm:$0x1f]  }
 0xdf1   :  { %6483 = vmatprep.mubr.bf16.mxu1 %v14267_v24  ;;  %6390 = vmatprep.subr.bf16.mxu0 %v5913_v3  ;;  %v13326_v3 = vld [vmem:[#allocation12 + $0x218] ss:$200 sps:$4 sm:$0x1f]  }
 0xdf2   :  { %6548 = vmatpush1.bf16.msra.mxu1 %v13269_v5  ;;  %v5973_v5 = vand.u32 %v13328_v0, %v14679_v22 }
 0xdf3   :  { %6549 = vmatprep.subr.bf16.mxu1 %v5931_v6  ;;  %v13332_v6 = vld [vmem:[#allocation12 + $0x230] ss:$200 sps:$4 sm:$0x1f]  }
 0xdf4   :  { %6391 = vmatpush1.bf16.msra.mxu0 %v5910_v27  ;;  %v5991_v27 = vand.u32 %v13334_v1, %v14679_v22 }
 0xdf5   :  { %6494 = vmatprep.subr.bf16.mxu0 %v13277_v8  ;;  %v5970_v8 = vand.u32 %v13326_v3, %v14679_v22 }
 0xdf6   :  { %6550 = vmatpush1.bf16.msra.mxu1 %v5928_v10  ;;  %v13337_v10 = vld [vmem:[#allocation12 + $0x9c] ss:$200 sps:$4 sm:$0xff]  }
 0xdf7   :  { %11711 = vmatmul.mubr.msk.bf16.gmra.mrb[96].mxu0 %vm4169_vm5, %v14822_v40  ;;  %11717 = vmatmul.mubr.msk.bf16.gmra.mrb[100].mxu1 %vm4169_vm5, %v14822_v40 }
 0xdf8   :  { %6420 = vmatprep.mubr.bf16.mxu0 %v14267_v24  ;;  %6579 = vmatprep.mubr.bf16.mxu1 %v14267_v24 }
 0xdf9   :  { %6653 = vmatprep.subr.bf16.mxu1 %v13283_v11  ;;  %v5988_v11 = vand.u32 %v13332_v6, %v14679_v22 }
 0xdff   :  { %11714 = vmatmul.mubr.msk.bf16.vlgmr.msra.gmra.mrb[100].mxu0 %vm4169_vm5, %v14810_v19  ;;  %11720 = vmatmul.mubr.msk.bf16.vlgmr.msra.gmra.mrb[104].mxu1 %vm4169_vm5, %v14810_v19 }
 0xe00   :  { %6495 = vmatpush1.bf16.msra.mxu0 %v13275_v29  ;;  %6430 = vmatprep.mubr.bf16.mxu0 %v14267_v24  ;;  %v13346_v29 = vld [vmem:[#allocation12 + $0x244] ss:$200 sps:$4 sm:$0x1f]  }
 0xe01   :  { %6589 = vmatprep.mubr.bf16.mxu1 %v14267_v24  ;;  %6496 = vmatprep.subr.bf16.mxu0 %v5925_v37  ;;  %v13338_v37 = vld [vmem:[#allocation12 + $0x228] ss:$200 sps:$4 sm:$0x1f]  }
 0xe02   :  { %6654 = vmatpush1.bf16.msra.mxu1 %v13281_v17  ;;  %v5985_v17 = vand.u32 %v13340_v13, %v14679_v22 }
 0xe03   :  { %6655 = vmatprep.subr.bf16.mxu1 %v5943_v4  ;;  %v13344_v4 = vld [vmem:[#allocation12 + $0x240] ss:$200 sps:$4 sm:$0x1f]  }
 0xe04   :  { %6497 = vmatpush1.bf16.msra.mxu0 %v5922_v7  ;;  %v6003_v7 = vand.u32 %v13346_v29, %v14679_v22 }
 0xe05   :  { %6600 = vmatprep.subr.bf16.mxu0 %v13289_v16  ;;  %v5982_v16 = vand.u32 %v13338_v37, %v14679_v22 }
 0xe06   :  { %6656 = vmatpush1.bf16.msra.mxu1 %v5940_v21  ;;  %v13349_v21 = vld [vmem:[#allocation12 + $0xac] ss:$200 sps:$4 sm:$0xff]  }
 0xe07   :  { %11715 = vmatmul.mubr.msk.bf16.gmra.mrb[104].mxu0 %vm4169_vm5, %v14822_v40  ;;  %11721 = vmatmul.mubr.msk.bf16.gmra.mrb[108].mxu1 %vm4169_vm5, %v14822_v40 }
 0xe08   :  { %6526 = vmatprep.mubr.bf16.mxu0 %v14267_v24  ;;  %6685 = vmatprep.mubr.bf16.mxu1 %v14267_v24 }
 0xe09   :  { %6759 = vmatprep.subr.bf16.mxu1 %v13295_v23  ;;  %v6000_v23 = vand.u32 %v13344_v4, %v14679_v22 }
 0xe0f   :  { %11718 = vmatmul.mubr.msk.bf16.vlgmr.msra.gmra.mrb[108].mxu0 %vm4169_vm5, %v14810_v19  ;;  %11724 = vmatmul.mubr.msk.bf16.vlgmr.msra.gmra.mrb[112].mxu1 %vm4169_vm5, %v14810_v19 }
 0xe10   :  { %6601 = vmatpush1.bf16.msra.mxu0 %v13287_v28  ;;  %6536 = vmatprep.mubr.bf16.mxu0 %v14267_v24  ;;  %v13358_v28 = vld [vmem:[#allocation12 + $0x254] ss:$200 sps:$4 sm:$0x1f]  }
 0xe11   :  { %6695 = vmatprep.mubr.bf16.mxu1 %v14267_v24  ;;  %6602 = vmatprep.subr.bf16.mxu0 %v5937_v32  ;;  %v13350_v32 = vld [vmem:[#allocation12 + $0x238] ss:$200 sps:$4 sm:$0x1f]  }
 0xe12   :  { %6760 = vmatpush1.bf16.msra.mxu1 %v13293_v33  ;;  %v5997_v33 = vand.u32 %v13352_v26, %v14679_v22 }
 0xe13   :  { %6761 = vmatprep.subr.bf16.mxu1 %v5955_v36  ;;  %v13356_v36 = vld [vmem:[#allocation12 + $0x250] ss:$200 sps:$4 sm:$0x1f]  }
 0xe14   :  { %6603 = vmatpush1.bf16.msra.mxu0 %v5934_v38  ;;  %v6015_v38 = vand.u32 %v13358_v28, %v14679_v22 }
 0xe15   :  { %6706 = vmatprep.subr.bf16.mxu0 %v13301_v39  ;;  %v5994_v39 = vand.u32 %v13350_v32, %v14679_v22 }
 0xe16   :  { %6762 = vmatpush1.bf16.msra.mxu1 %v5952_v42  ;;  %v13361_v42 = vld [vmem:[#allocation12 + $0xbc] ss:$200 sps:$4 sm:$0xff]  }
 0xe17   :  { %11719 = vmatmul.mubr.msk.bf16.gmra.mrb[112].mxu0 %vm4169_vm5, %v14822_v40  ;;  %11725 = vmatmul.mubr.msk.bf16.gmra.mrb[116].mxu1 %vm4169_vm5, %v14822_v40 }
 0xe18   :  { %6632 = vmatprep.mubr.bf16.mxu0 %v14267_v24  ;;  %6791 = vmatprep.mubr.bf16.mxu1 %v14267_v24 }
 0xe19   :  { %6865 = vmatprep.subr.bf16.mxu1 %v13307_v43  ;;  %v6012_v43 = vand.u32 %v13356_v36, %v14679_v22 }
 0xe1f   :  { %11722 = vmatmul.mubr.msk.bf16.vlgmr.msra.gmra.mrb[116].mxu0 %vm4169_vm5, %v14810_v19  ;;  %11728 = vmatmul.mubr.msk.bf16.vlgmr.msra.gmra.mrb[120].mxu1 %vm4169_vm5, %v14810_v19 }
 0xe20   :  { %6707 = vmatpush1.bf16.msra.mxu0 %v13299_v46  ;;  %6642 = vmatprep.mubr.bf16.mxu0 %v14267_v24  ;;  %v13362_v46 = vld [vmem:[#allocation12 + $0x248] ss:$200 sps:$4 sm:$0x1f]  }
 0xe21   :  { %6801 = vmatprep.mubr.bf16.mxu1 %v14267_v24  ;;  %6708 = vmatprep.subr.bf16.mxu0 %v5949_v48  ;;  %v6006_v48 = vand.u32 %v13362_v46, %v14679_v22 }
 0xe22   :  { %6866 = vmatpush1.bf16.msra.mxu1 %v13305_v50  ;;  %v13367_v50 = vld [vmem:[#allocation13 + $0x4] ss:$28 sps:$4 sm:$0xff]  }
 0xe23   :  { %6867 = vmatprep.subr.bf16.mxu1 %v5967_v54 }
 0xe24   :  { %6709 = vmatpush1.bf16.msra.mxu0 %v5946_v55 }
 0xe25   :  { %6812 = vmatprep.subr.bf16.mxu0 %v13313_v56 }
 0xe26   :  { %6868 = vmatpush1.bf16.msra.mxu1 %v5964_v30 }
 0xe27   :  { %11723 = vmatmul.mubr.msk.bf16.gmra.mrb[120].mxu0 %vm4169_vm5, %v14822_v40  ;;  %11729 = vmatmul.mubr.msk.bf16.gmra.mrb[124].mxu1 %vm4169_vm5, %v14822_v40 }
 0xe28   :  { %6738 = vmatprep.mubr.bf16.mxu0 %v14267_v24  ;;  %6897 = vmatprep.mubr.bf16.mxu1 %v14267_v24 }
 0xe29   :  { %6971 = vmatprep.subr.bf16.mxu1 %v13319_v34 }
 0xe2f   :  { %11726 = vmatmul.mubr.msk.bf16.vlgmr.msra.gmra.mrb[124].mxu0 %vm4169_vm5, %v14810_v19  ;;  %11732 = vmatmul.mubr.msk.bf16.vlgmr.msra.gmra.mrb[128].mxu1 %vm4169_vm5, %v14810_v19 }
 0xe30   :  { %6813 = vmatpush1.bf16.msra.mxu0 %v13311_v57  ;;  %6748 = vmatprep.mubr.bf16.mxu0 %v14267_v24 }
 0xe31   :  { %6907 = vmatprep.mubr.bf16.mxu1 %v14267_v24  ;;  %6814 = vmatprep.subr.bf16.mxu0 %v5961_v18 }
 0xe32   :  { %6972 = vmatpush1.bf16.msra.mxu1 %v13317_v59 }
 0xe33   :  { %6973 = vmatprep.subr.bf16.mxu1 %v5979_v61 }
 0xe34   :  { %6815 = vmatpush1.bf16.msra.mxu0 %v5958_v62 }
 0xe35   :  { %6918 = vmatprep.subr.bf16.mxu0 %v13325_v14 }
 0xe36   :  { %6974 = vmatpush1.bf16.msra.mxu1 %v5976_v41 }
 0xe37   :  { %11727 = vmatmul.mubr.msk.bf16.gmra.mrb[128].mxu0 %vm4169_vm5, %v14822_v40  ;;  %11733 = vmatmul.mubr.msk.bf16.gmra.mrb[132].mxu1 %vm4169_vm5, %v14822_v40 }
 0xe38   :  { %6844 = vmatprep.mubr.bf16.mxu0 %v14267_v24  ;;  %7003 = vmatprep.mubr.bf16.mxu1 %v14267_v24 }
 0xe39   :  { %7077 = vmatprep.subr.bf16.mxu1 %v13331_v63 }
 0xe3f   :  { %11730 = vmatmul.mubr.msk.bf16.vlgmr.msra.gmra.mrb[132].mxu0 %vm4169_vm5, %v14810_v19  ;;  %11736 = vmatmul.mubr.msk.bf16.vlgmr.msra.gmra.mrb[136].mxu1 %vm4169_vm5, %v14810_v19 }
 0xe40   :  { %6919 = vmatpush1.bf16.msra.mxu0 %v13323_v2  ;;  %6854 = vmatprep.mubr.bf16.mxu0 %v14267_v24 }
 0xe41   :  { %7013 = vmatprep.mubr.bf16.mxu1 %v14267_v24  ;;  %6920 = vmatprep.subr.bf16.mxu0 %v5973_v5 }
 0xe42   :  { %7078 = vmatpush1.bf16.msra.mxu1 %v13329_v9 }
 0xe43   :  { %7079 = vmatprep.subr.bf16.mxu1 %v5991_v27 }
 0xe44   :  { %6921 = vmatpush1.bf16.msra.mxu0 %v5970_v8 }
 0xe45   :  { %7024 = vmatprep.subr.bf16.mxu0 %v13337_v10 }
 0xe46   :  { %7080 = vmatpush1.bf16.msra.mxu1 %v5988_v11 }
 0xe47   :  { %11731 = vmatmul.mubr.msk.bf16.gmra.mrb[136].mxu0 %vm4169_vm5, %v14822_v40  ;;  %11737 = vmatmul.mubr.msk.bf16.gmra.mrb[140].mxu1 %vm4169_vm5, %v14822_v40 }
 0xe48   :  { %6950 = vmatprep.mubr.bf16.mxu0 %v14267_v24  ;;  %7109 = vmatprep.mubr.bf16.mxu1 %v14267_v24 }
 0xe49   :  { %7183 = vmatprep.subr.bf16.mxu1 %v13343_v12 }
 0xe4f   :  { %11734 = vmatmul.mubr.msk.bf16.vlgmr.msra.gmra.mrb[140].mxu0 %vm4169_vm5, %v14810_v19  ;;  %11740 = vmatmul.mubr.msk.bf16.vlgmr.msra.gmra.mrb[144].mxu1 %vm4169_vm5, %v14810_v19 }
 0xe50   :  { %7025 = vmatpush1.bf16.msra.mxu0 %v13335_v15  ;;  %6960 = vmatprep.mubr.bf16.mxu0 %v14267_v24 }
 0xe51   :  { %7119 = vmatprep.mubr.bf16.mxu1 %v14267_v24  ;;  %7026 = vmatprep.subr.bf16.mxu0 %v5985_v17 }
 0xe52   :  { %7184 = vmatpush1.bf16.msra.mxu1 %v13341_v20 }
 0xe53   :  { %7185 = vmatprep.subr.bf16.mxu1 %v6003_v7 }
 0xe54   :  { %7027 = vmatpush1.bf16.msra.mxu0 %v5982_v16 }
 0xe55   :  { %7130 = vmatprep.subr.bf16.mxu0 %v13349_v21 }
 0xe56   :  { %7186 = vmatpush1.bf16.msra.mxu1 %v6000_v23 }
 0xe57   :  { %11735 = vmatmul.mubr.msk.bf16.gmra.mrb[144].mxu0 %vm4169_vm5, %v14822_v40  ;;  %11741 = vmatmul.mubr.msk.bf16.gmra.mrb[148].mxu1 %vm4169_vm5, %v14822_v40 }
 0xe58   :  { %7056 = vmatprep.mubr.bf16.mxu0 %v14267_v24  ;;  %7215 = vmatprep.mubr.bf16.mxu1 %v14267_v24 }
 0xe59   :  { %7289 = vmatprep.subr.bf16.mxu1 %v13355_v25 }
 0xe5f   :  { %11738 = vmatmul.mubr.msk.bf16.vlgmr.msra.gmra.mrb[148].mxu0 %vm4169_vm5, %v14810_v19  ;;  %11744 = vmatmul.mubr.msk.bf16.vlgmr.msra.gmra.mrb[152].mxu1 %vm4169_vm5, %v14810_v19 }
 0xe60   :  { %7131 = vmatpush1.bf16.msra.mxu0 %v13347_v31  ;;  %7066 = vmatprep.mubr.bf16.mxu0 %v14267_v24 }
 0xe61   :  { %7225 = vmatprep.mubr.bf16.mxu1 %v14267_v24  ;;  %7132 = vmatprep.subr.bf16.mxu0 %v5997_v33 }
 0xe62   :  { %7290 = vmatpush1.bf16.msra.mxu1 %v13353_v35 }
 0xe63   :  { %7291 = vmatprep.subr.bf16.mxu1 %v6015_v38 }
 0xe64   :  { %7133 = vmatpush1.bf16.msra.mxu0 %v5994_v39 }
 0xe65   :  { %7236 = vmatprep.subr.bf16.mxu0 %v13361_v42 }
 0xe66   :  { %7292 = vmatpush1.bf16.msra.mxu1 %v6012_v43 }
 0xe67   :  { %11739 = vmatmul.mubr.msk.bf16.gmra.mrb[152].mxu0 %vm4169_vm5, %v14822_v40  ;;  %11745 = vmatmul.mubr.msk.bf16.gmra.mrb[156].mxu1 %vm4169_vm5, %v14822_v40 }
 0xe68   :  { %7162 = vmatprep.mubr.bf16.mxu0 %v14267_v24  ;;  %7321 = vmatprep.mubr.bf16.mxu1 %v14267_v24 }
 0xe6f   :  { %11742 = vmatmul.mubr.msk.bf16.vlgmr.msra.gmra.mrb[156].mxu0 %vm4169_vm5, %v14810_v19  ;;  %11748 = vmatmul.mubr.msk.bf16.vlgmr.msra.gmra.mrb[160].mxu1 %vm4169_vm5, %v14810_v19 }
 0xe70   :  { %7237 = vmatpush1.bf16.msra.mxu0 %v13359_v45  ;;  %7172 = vmatprep.mubr.bf16.mxu0 %v14267_v24 }
 0xe71   :  { %7331 = vmatprep.mubr.bf16.mxu1 %v14267_v24  ;;  %7238 = vmatprep.subr.bf16.mxu0 %v6009_v47 }
 0xe74   :  { %7239 = vmatpush1.bf16.msra.mxu0 %v6006_v48 }
 0xe77   :  { %11743 = vmatmul.mubr.msk.bf16.gmra.mrb[160].mxu0 %vm4169_vm5, %v14822_v40  ;;  %11749 = vmatmul.mubr.msk.bf16.gmra.mrb[164].mxu1 %vm4169_vm5, %v14822_v40 }
 0xe78   :  { %7268 = vmatprep.mubr.bf16.mxu0 %v14267_v24 }
 0xe7f   :  { %11746 = vmatmul.mubr.msk.bf16.vlgmr.msra.gmra.mrb[164].mxu0 %vm4169_vm5, %v14810_v19 }
 0xe80   :  { %7278 = vmatprep.mubr.bf16.mxu0 %v14267_v24 }
 0xe87   :  { %11747 = vmatmul.mubr.msk.bf16.gmra.mrb[168].mxu0 %vm4169_vm5, %v14822_v40 }
 0xe88   :  { %7520 = vmatprep.mubr.bf16.mxu0 %v13367_v50 }
 0xe92   :  { %v6051_v22 = vpop.f32.mrb[68].mxu0  ;;  %v15008_v53 = vpop.f32.mrb[72].mxu1 }
 0xe93   :  { %v6053_v54 = vpop.f32.mrb[69].mxu0  ;;  %v6159_v55 = vpop.f32.mrb[73].mxu1 }
 0xe94   :  { %v6055_v56 = vpop.f32.mrb[70].mxu0  ;;  %v6161_v30 = vpop.f32.mrb[74].mxu1 }
 0xe95   :  { %v7342_v34 = vpack.c.bf16 %v6055_v56, %v6051_v22  ;;  %v7346_v49 = vpack.c.bf16 %v6161_v30, %v15008_v53  ;;  %v6057_v52 = vpop.f32.mrb[71].mxu0  ;;  %v6163_v57 = vpop.f32.mrb[75].mxu1 }
 0xe96   :  { %v7343_v19 = vpack.c.bf16 %v6057_v52, %v6053_v54  ;;  %v7347_v58 = vpack.c.bf16 %v6163_v57, %v6159_v55 }
 0xe98   :  { %7488 = vmatprep.subr.bf16.mxu0 %v7343_v19 }
 0xe99   :  { %7489 = vmatpush1.bf16.msra.mxu0 %v7342_v34 }
 0xe9a   :  { %v6061_v18 = vpop.f32.mrb[72].mxu0  ;;  %v6167_v59 = vpop.f32.mrb[76].mxu1 }
 0xe9b   :  { %v6063_v40 = vpop.f32.mrb[73].mxu0  ;;  %v6169_v60 = vpop.f32.mrb[77].mxu1 }
 0xe9c   :  { %v6065_v61 = vpop.f32.mrb[74].mxu0  ;;  %v6171_v62 = vpop.f32.mrb[78].mxu1 }
 0xe9d   :  { %v7392_v14 = vpack.c.bf16 %v6065_v61, %v6061_v18  ;;  %v7396_v41 = vpack.c.bf16 %v6171_v62, %v6167_v59  ;;  %v6067_v63 = vpop.f32.mrb[75].mxu0  ;;  %v6173_v0 = vpop.f32.mrb[79].mxu1 }
 0xe9e   :  { %v7393_v1 = vpack.c.bf16 %v6067_v63, %v6063_v40  ;;  %v7397_v2 = vpack.c.bf16 %v6173_v0, %v6169_v60 }
 0xea0   :  { %7490 = vmatprep.subr.bf16.mxu0 %v7393_v1 }
 0xea1   :  { %7491 = vmatpush1.bf16.msra.mxu0 %v7392_v14 }
 0xea2   :  { %v6104_v3 = vpop.f32.mrb[76].mxu0  ;;  %v15011_v5 = vpop.f32.mrb[80].mxu1 }
 0xea3   :  { %v6106_v9 = vpop.f32.mrb[77].mxu0  ;;  %v6265_v6 = vpop.f32.mrb[81].mxu1 }
 0xea4   :  { %v6108_v27 = vpop.f32.mrb[78].mxu0  ;;  %v15013_v8 = vpop.f32.mrb[82].mxu1 }
 0xea5   :  { %v7344_v10 = vpack.c.bf16 %v6108_v27, %v6104_v3  ;;  %v7350_v11 = vpack.c.bf16 %v15013_v8, %v15011_v5  ;;  %v6110_v12 = vpop.f32.mrb[79].mxu0  ;;  %v6269_v13 = vpop.f32.mrb[83].mxu1 }
 0xea6   :  { %v7345_v29 = vpack.c.bf16 %v6110_v12, %v6106_v9  ;;  %v7351_v15 = vpack.c.bf16 %v6269_v13, %v6265_v6 }
 0xea8   :  { %7492 = vmatprep.subr.bf16.mxu0 %v7345_v29 }
 0xea9   :  { %7493 = vmatpush1.bf16.msra.mxu0 %v7344_v10 }
 0xeaa   :  { %v6114_v37 = vpop.f32.mrb[80].mxu0  ;;  %v6273_v17 = vpop.f32.mrb[84].mxu1 }
 0xeab   :  { %v6116_v20 = vpop.f32.mrb[81].mxu0  ;;  %v6275_v4 = vpop.f32.mrb[85].mxu1 }
 0xeac   :  { %v6118_v7 = vpop.f32.mrb[82].mxu0  ;;  %v6277_v16 = vpop.f32.mrb[86].mxu1 }
 0xead   :  { %v7394_v21 = vpack.c.bf16 %v6118_v7, %v6114_v37  ;;  %v7400_v23 = vpack.c.bf16 %v6277_v16, %v6273_v17  ;;  %v6120_v25 = vpop.f32.mrb[83].mxu0  ;;  %v6279_v26 = vpop.f32.mrb[87].mxu1 }
 0xeae   :  { %v7395_v28 = vpack.c.bf16 %v6120_v25, %v6116_v20  ;;  %v7401_v31 = vpack.c.bf16 %v6279_v26, %v6275_v4 }
 0xeb0   :  { %7494 = vmatprep.subr.bf16.mxu0 %v7395_v28 }
 0xeb1   :  { %7495 = vmatpush1.bf16.msra.mxu0 %v7394_v21 }
 0xeb2   :  { %v6210_v32 = vpop.f32.mrb[84].mxu0  ;;  %v15017_v33 = vpop.f32.mrb[88].mxu1  ;;  %7496 = vmatprep.subr.bf16.mxu0 %v7347_v58 }
 0xeb3   :  { %v6212_v35 = vpop.f32.mrb[85].mxu0  ;;  %v6371_v36 = vpop.f32.mrb[89].mxu1 }
 0xeb4   :  { %v6214_v38 = vpop.f32.mrb[86].mxu0  ;;  %v15019_v39 = vpop.f32.mrb[90].mxu1 }
 0xeb5   :  { %v7348_v42 = vpack.c.bf16 %v6214_v38, %v6210_v32  ;;  %v7354_v43 = vpack.c.bf16 %v15019_v39, %v15017_v33  ;;  %v6216_v44 = vpop.f32.mrb[87].mxu0  ;;  %v6375_v45 = vpop.f32.mrb[91].mxu1  ;;  %7497 = vmatpush1.bf16.msra.mxu0 %v7346_v49 }
 0xeb6   :  { %v7349_v46 = vpack.c.bf16 %v6216_v44, %v6212_v35  ;;  %v7355_v47 = vpack.c.bf16 %v6375_v45, %v6371_v36  ;;  %7498 = vmatprep.subr.bf16.mxu0 %v7397_v2 }
 0xeb9   :  { %7499 = vmatpush1.bf16.msra.mxu0 %v7396_v41 }
 0xeba   :  { %v6220_v48 = vpop.f32.mrb[88].mxu0  ;;  %v6379_v50 = vpop.f32.mrb[92].mxu1  ;;  %7500 = vmatprep.subr.bf16.mxu0 %v7349_v46  ;;  %v13365_v46 = vld [vmem:[#allocation13] ss:$28 sps:$4 sm:$0xff]  }
 0xebb   :  { %v6222_v22 = vpop.f32.mrb[89].mxu0  ;;  %v6381_v53 = vpop.f32.mrb[93].mxu1 }
 0xebc   :  { %v6224_v54 = vpop.f32.mrb[90].mxu0  ;;  %v6383_v55 = vpop.f32.mrb[94].mxu1 }
 0xebd   :  { %v7398_v56 = vpack.c.bf16 %v6224_v54, %v6220_v48  ;;  %v7404_v30 = vpack.c.bf16 %v6383_v55, %v6379_v50  ;;  %v6226_v34 = vpop.f32.mrb[91].mxu0  ;;  %v6385_v52 = vpop.f32.mrb[95].mxu1  ;;  %7501 = vmatpush1.bf16.msra.mxu0 %v7348_v42 }
 0xebe   :  { %v7399_v57 = vpack.c.bf16 %v6226_v34, %v6222_v22  ;;  %v7405_v19 = vpack.c.bf16 %v6385_v52, %v6381_v53 }
 0xec0   :  { %7502 = vmatprep.subr.bf16.mxu0 %v7399_v57 }
 0xec1   :  { %7503 = vmatpush1.bf16.msra.mxu0 %v7398_v56 }
 0xec2   :  { %v6316_v49 = vpop.f32.mrb[92].mxu0  ;;  %v15023_v58 = vpop.f32.mrb[96].mxu1  ;;  %7504 = vmatprep.subr.bf16.mxu0 %v7351_v15 }
 0xec3   :  { %v6318_v18 = vpop.f32.mrb[93].mxu0  ;;  %v15025_v59 = vpop.f32.mrb[97].mxu1 }
 0xec4   :  { %v6320_v40 = vpop.f32.mrb[94].mxu0  ;;  %v15027_v60 = vpop.f32.mrb[98].mxu1 }
 0xec5   :  { %v7352_v61 = vpack.c.bf16 %v6320_v40, %v6316_v49  ;;  %v7358_v62 = vpack.c.bf16 %v15027_v60, %v15023_v58  ;;  %v6322_v14 = vpop.f32.mrb[95].mxu0  ;;  %v6481_v41 = vpop.f32.mrb[99].mxu1  ;;  %7505 = vmatpush1.bf16.msra.mxu0 %v7350_v11 }
 0xec6   :  { %v7353_v63 = vpack.c.bf16 %v6322_v14, %v6318_v18  ;;  %v7359_v0 = vpack.c.bf16 %v6481_v41, %v15025_v59  ;;  %7506 = vmatprep.subr.bf16.mxu0 %v7401_v31 }
 0xec9   :  { %7507 = vmatpush1.bf16.msra.mxu0 %v7400_v23 }
 0xeca   :  { %v6326_v1 = vpop.f32.mrb[96].mxu0  ;;  %v15035_v2 = vpop.f32.mrb[100].mxu1  ;;  %7508 = vmatprep.subr.bf16.mxu0 %v7353_v63 }
 0xecb   :  { %v6328_v3 = vpop.f32.mrb[97].mxu0  ;;  %v6487_v9 = vpop.f32.mrb[101].mxu1 }
 0xecc   :  { %v6330_v6 = vpop.f32.mrb[98].mxu0  ;;  %v6489_v27 = vpop.f32.mrb[102].mxu1 }
 0xecd   :  { %v7402_v10 = vpack.c.bf16 %v6330_v6, %v6326_v1  ;;  %v7408_v12 = vpack.c.bf16 %v6489_v27, %v15035_v2  ;;  %v6332_v13 = vpop.f32.mrb[99].mxu0  ;;  %v6491_v29 = vpop.f32.mrb[103].mxu1  ;;  %7509 = vmatpush1.bf16.msra.mxu0 %v7352_v61  ;;  %v13375_v1 = vld [vmem:[#allocation15] ss:$112 sps:$4 sm:$0xff]   ;;  %v13377_v2 = vld [vmem:[#allocation15 + $0x4] ss:$112 sps:$4 sm:$0xff]  }
 0xece   :  { %v7403_v5 = vpack.c.bf16 %v6332_v13, %v6328_v3  ;;  %v7409_v8 = vpack.c.bf16 %v6491_v29, %v6487_v9  ;;  %v13383_v3 = vld [vmem:[#allocation15 + $0xe4] ss:$112 sps:$4 sm:$0xff]   ;;  %10209 = vmatprep.subr.bf16.mxu1 %v13377_v2 }
 0xecf   :  { %10210 = vmatpush1.bf16.msra.mxu1 %v13375_v1 }
 0xed0   :  { %7510 = vmatprep.subr.bf16.mxu0 %v7403_v5  ;;  %10211 = vmatprep.subr.bf16.mxu1 %v13383_v3 }
 0xed1   :  { %7511 = vmatpush1.bf16.msra.mxu0 %v7402_v10 }
 0xed2   :  { %v6422_v11 = vpop.f32.mrb[100].mxu0  ;;  %v15038_v15 = vpop.f32.mrb[104].mxu1  ;;  %7512 = vmatprep.subr.bf16.mxu0 %v7355_v47  ;;  %v13370_v47 = vld [vmem:[#allocation13 + $0xc] ss:$28 sps:$4 sm:$0xff]  }
 0xed3   :  { %v6424_v37 = vpop.f32.mrb[101].mxu0  ;;  %v15040_v17 = vpop.f32.mrb[105].mxu1 }
 0xed4   :  { %v6426_v20 = vpop.f32.mrb[102].mxu0  ;;  %v15042_v4 = vpop.f32.mrb[106].mxu1 }
 0xed5   :  { %v7356_v7 = vpack.c.bf16 %v6426_v20, %v6422_v11  ;;  %v7362_v16 = vpack.c.bf16 %v15042_v4, %v15038_v15  ;;  %v6428_v21 = vpop.f32.mrb[103].mxu0  ;;  %v15046_v23 = vpop.f32.mrb[107].mxu1  ;;  %7513 = vmatpush1.bf16.msra.mxu0 %v7354_v43 }
 0xed6   :  { %v7357_v25 = vpack.c.bf16 %v6428_v21, %v6424_v37  ;;  %v7363_v26 = vpack.c.bf16 %v15046_v23, %v15040_v17  ;;  %7514 = vmatprep.subr.bf16.mxu0 %v7405_v19  ;;  %v13389_v17 = vld [vmem:[#allocation15 + $0x1c4] ss:$112 sps:$4 sm:$0xff]   ;;  %v13387_v21 = vld [vmem:[#allocation15 + $0x1c0] ss:$112 sps:$4 sm:$0xff]  }
 0xed7   :  { %v13395_v23 = vld [vmem:[#allocation15 + $0x2a4] ss:$112 sps:$4 sm:$0xff]  }
 0xed9   :  { %7515 = vmatpush1.bf16.msra.mxu0 %v7404_v30 }
 0xeda   :  { %v6432_v28 = vpop.f32.mrb[104].mxu0  ;;  %v15053_v31 = vpop.f32.mrb[108].mxu1  ;;  %7516 = vmatprep.subr.bf16.mxu0 %v7357_v25 }
 0xedb   :  { %v6434_v32 = vpop.f32.mrb[105].mxu0  ;;  %v15055_v35 = vpop.f32.mrb[109].mxu1 }
 0xedc   :  { %v6436_v36 = vpop.f32.mrb[106].mxu0  ;;  %v15057_v38 = vpop.f32.mrb[110].mxu1 }
 0xedd   :  { %v7406_v42 = vpack.c.bf16 %v6436_v36, %v6432_v28  ;;  %v7412_v33 = vpack.c.bf16 %v15057_v38, %v15053_v31  ;;  %v6438_v39 = vpop.f32.mrb[107].mxu0  ;;  %v15061_v43 = vpop.f32.mrb[111].mxu1  ;;  %7517 = vmatpush1.bf16.msra.mxu0 %v7356_v7 }
 0xede   :  { %v7407_v44 = vpack.c.bf16 %v6438_v39, %v6434_v32  ;;  %v7413_v45 = vpack.c.bf16 %v15061_v43, %v15055_v35  ;;  %v13399_v43 = vld [vmem:[#allocation15 + $0x380] ss:$112 sps:$4 sm:$0xff]  }
 0xee0   :  { %7518 = vmatprep.subr.bf16.mxu0 %v7407_v44  ;;  %v13407_v44 = vld [vmem:[#allocation15 + $0x464] ss:$112 sps:$4 sm:$0xff]  }
 0xee1   :  { %7519 = vmatpush1.bf16.msra.mxu0 %v7406_v42  ;;  %v13401_v42 = vld [vmem:[#allocation15 + $0x384] ss:$112 sps:$4 sm:$0xff]  }
 0xee2   :  { %v6528_v48 = vpop.f32.mrb[108].mxu0  ;;  %v15065_v50 = vpop.f32.mrb[112].mxu1  ;;  %7531 = vmatprep.subr.bf16.mxu0 %v7359_v0 }
 0xee3   :  { %v6530_v22 = vpop.f32.mrb[109].mxu0  ;;  %v15067_v53 = vpop.f32.mrb[113].mxu1 }
 0xee4   :  { %v6532_v54 = vpop.f32.mrb[110].mxu0  ;;  %v15069_v55 = vpop.f32.mrb[114].mxu1  ;;  %7521 = vmatmul.mubr.bf16.vlgmr.msra.gmra.mrb[172].mxu0 %v13365_v46 }
 0xee5   :  { %v7360_v56 = vpack.c.bf16 %v6532_v54, %v6528_v48  ;;  %v7366_v30 = vpack.c.bf16 %v15069_v55, %v15065_v50  ;;  %v6534_v34 = vpop.f32.mrb[111].mxu0  ;;  %v15073_v52 = vpop.f32.mrb[115].mxu1  ;;  %7532 = vmatpush1.bf16.msra.mxu0 %v7358_v62  ;;  %7563 = vmatprep.mubr.bf16.mxu0 %v13370_v47 }
 0xee6   :  { %v7361_v57 = vpack.c.bf16 %v6534_v34, %v6530_v22  ;;  %v7367_v19 = vpack.c.bf16 %v15073_v52, %v15067_v53  ;;  %7533 = vmatprep.subr.bf16.mxu0 %v7409_v8  ;;  %v13405_v22 = vld [vmem:[#allocation15 + $0x460] ss:$112 sps:$4 sm:$0xff]   ;;  %v13413_v53 = vld [vmem:[#allocation15 + $0x544] ss:$112 sps:$4 sm:$0xff]  }
 0xee9   :  { %7534 = vmatpush1.bf16.msra.mxu0 %v7408_v12  ;;  %v13381_v12 = vld [vmem:[#allocation15 + $0xe0] ss:$112 sps:$4 sm:$0xff]  }
 0xeea   :  { %v6538_v49 = vpop.f32.mrb[112].mxu0  ;;  %v15080_v18 = vpop.f32.mrb[116].mxu1  ;;  %7535 = vmatprep.subr.bf16.mxu0 %v7361_v57  ;;  %10212 = vmatpush1.bf16.msra.mxu1 %v13381_v12 }
 0xeeb   :  { %v6540_v59 = vpop.f32.mrb[113].mxu0  ;;  %v15082_v40 = vpop.f32.mrb[117].mxu1  ;;  %10213 = vmatprep.subr.bf16.mxu1 %v13389_v17  ;;  %v13429_v17 = vld [vmem:[#allocation15 + $0x7e0] ss:$112 sps:$4 sm:$0xff]  }
 0xeec   :  { %v6542_v61 = vpop.f32.mrb[114].mxu0  ;;  %v15084_v14 = vpop.f32.mrb[118].mxu1 }
 0xeed   :  { %v7410_v41 = vpack.c.bf16 %v6542_v61, %v6538_v49  ;;  %v7416_v58 = vpack.c.bf16 %v15084_v14, %v15080_v18  ;;  %v6544_v60 = vpop.f32.mrb[115].mxu0  ;;  %v15088_v62 = vpop.f32.mrb[119].mxu1  ;;  %7536 = vmatpush1.bf16.msra.mxu0 %v7360_v56  ;;  %v13411_v61 = vld [vmem:[#allocation15 + $0x540] ss:$112 sps:$4 sm:$0xff]  }
 0xeee   :  { %v7411_v63 = vpack.c.bf16 %v6544_v60, %v6540_v59  ;;  %v7417_v0 = vpack.c.bf16 %v15088_v62, %v15082_v40  ;;  %10214 = vmatpush1.bf16.msra.mxu1 %v13387_v21 }
 0xeef   :  { %10215 = vmatprep.subr.bf16.mxu1 %v13395_v23 }
 0xef0   :  { %7537 = vmatprep.subr.bf16.mxu0 %v7411_v63  ;;  %v13417_v63 = vld [vmem:[#allocation15 + $0x620] ss:$112 sps:$4 sm:$0xff]  }
 0xef1   :  { %7538 = vmatpush1.bf16.msra.mxu0 %v7410_v41  ;;  %v13419_v41 = vld [vmem:[#allocation15 + $0x624] ss:$112 sps:$4 sm:$0xff]  }
 0xef2   :  { %v6634_v9 = vpop.f32.mrb[116].mxu0  ;;  %v15092_v6 = vpop.f32.mrb[120].mxu1  ;;  %7539 = vmatprep.subr.bf16.mxu0 %v7363_v26 }
 0xef3   :  { %v6636_v27 = vpop.f32.mrb[117].mxu0  ;;  %v15094_v10 = vpop.f32.mrb[121].mxu1 }
 0xef4   :  { %v6638_v13 = vpop.f32.mrb[118].mxu0  ;;  %v15096_v29 = vpop.f32.mrb[122].mxu1 }
 0xef5   :  { %v7364_v5 = vpack.c.bf16 %v6638_v13, %v6634_v9  ;;  %v7370_v8 = vpack.c.bf16 %v15096_v29, %v15092_v6  ;;  %v6640_v11 = vpop.f32.mrb[119].mxu0  ;;  %v15100_v37 = vpop.f32.mrb[123].mxu1  ;;  %7540 = vmatpush1.bf16.msra.mxu0 %v7362_v16  ;;  %v13393_v16 = vld [vmem:[#allocation15 + $0x2a0] ss:$112 sps:$4 sm:$0xff]  }
 0xef6   :  { %v7365_v20 = vpack.c.bf16 %v6640_v11, %v6636_v27  ;;  %v7371_v7 = vpack.c.bf16 %v15100_v37, %v15094_v10  ;;  %7541 = vmatprep.subr.bf16.mxu0 %v7413_v45  ;;  %10216 = vmatpush1.bf16.msra.mxu1 %v13393_v16  ;;  %v13423_v9 = vld [vmem:[#allocation15 + $0x700] ss:$112 sps:$4 sm:$0xff]   ;;  %v13431_v27 = vld [vmem:[#allocation15 + $0x7e4] ss:$112 sps:$4 sm:$0xff]  }
 0xef7   :  { %10217 = vmatprep.subr.bf16.mxu1 %v13401_v42  ;;  %v13437_v10 = vld [vmem:[#allocation15 + $0x8c4] ss:$112 sps:$4 sm:$0xff]   ;;  %v13441_v42 = vld [vmem:[#allocation15 + $0x9a0] ss:$112 sps:$4 sm:$0xff]  }
 0xef9   :  { %7542 = vmatpush1.bf16.msra.mxu0 %v7412_v33 }
 0xefa   :  { %v6644_v25 = vpop.f32.mrb[120].mxu0  ;;  %v15110_v26 = vpop.f32.mrb[124].mxu1  ;;  %7543 = vmatprep.subr.bf16.mxu0 %v7365_v20  ;;  %10218 = vmatpush1.bf16.msra.mxu1 %v13399_v43 }
 0xefb   :  { %v6646_v15 = vpop.f32.mrb[121].mxu0  ;;  %v15112_v4 = vpop.f32.mrb[125].mxu1  ;;  %10219 = vmatprep.subr.bf16.mxu1 %v13407_v44 }
 0xefc   :  { %v6648_v28 = vpop.f32.mrb[122].mxu0  ;;  %v15114_v32 = vpop.f32.mrb[126].mxu1 }
 0xefd   :  { %v7414_v35 = vpack.c.bf16 %v6648_v28, %v6644_v25  ;;  %v7420_v36 = vpack.c.bf16 %v15114_v32, %v15110_v26  ;;  %v6650_v31 = vpop.f32.mrb[123].mxu0  ;;  %v15118_v38 = vpop.f32.mrb[127].mxu1  ;;  %7544 = vmatpush1.bf16.msra.mxu0 %v7364_v5  ;;  %v13435_v28 = vld [vmem:[#allocation15 + $0x8c0] ss:$112 sps:$4 sm:$0xff]  }
 0xefe   :  { %v7415_v33 = vpack.c.bf16 %v6650_v31, %v6646_v15  ;;  %v7421_v39 = vpack.c.bf16 %v15118_v38, %v15112_v4  ;;  %10220 = vmatpush1.bf16.msra.mxu1 %v13405_v22  ;;  %v13373_v22 = vld [vmem:[#allocation13 + $0x14] ss:$28 sps:$4 sm:$0xff]  }
 0xeff   :  { %10221 = vmatprep.subr.bf16.mxu1 %v13413_v53 }
 0xf00   :  { %7545 = vmatprep.subr.bf16.mxu0 %v7415_v33 }
 0xf01   :  { %7546 = vmatpush1.bf16.msra.mxu0 %v7414_v35  ;;  %v13443_v35 = vld [vmem:[#allocation15 + $0x9a4] ss:$112 sps:$4 sm:$0xff]  }
 0xf02   :  { %v6740_v45 = vpop.f32.mrb[124].mxu0  ;;  %v15122_v46 = vpop.f32.mrb[128].mxu1  ;;  %7547 = vmatprep.subr.bf16.mxu0 %v7367_v19  ;;  %10222 = vmatpush1.bf16.msra.mxu1 %v13411_v61 }
 0xf03   :  { %v6742_v47 = vpop.f32.mrb[125].mxu0  ;;  %v15127_v48 = vpop.f32.mrb[129].mxu1  ;;  %10223 = vmatprep.subr.bf16.mxu1 %v13419_v41 }
 0xf04   :  { %v6744_v54 = vpop.f32.mrb[126].mxu0  ;;  %v15129_v56 = vpop.f32.mrb[130].mxu1 }
 0xf05   :  { %v7368_v34 = vpack.c.bf16 %v6744_v54, %v6740_v45  ;;  %v7374_v57 = vpack.c.bf16 %v15129_v56, %v15122_v46  ;;  %v6746_v49 = vpop.f32.mrb[127].mxu0  ;;  %v15133_v59 = vpop.f32.mrb[131].mxu1  ;;  %7548 = vmatpush1.bf16.msra.mxu0 %v7366_v30  ;;  %v13447_v45 = vld [vmem:[#allocation15 + $0xa80] ss:$112 sps:$4 sm:$0xff]  }
 0xf06   :  { %v7369_v52 = vpack.c.bf16 %v6746_v49, %v6742_v47  ;;  %v7375_v19 = vpack.c.bf16 %v15133_v59, %v15127_v48  ;;  %7549 = vmatprep.subr.bf16.mxu0 %v7417_v0  ;;  %10224 = vmatpush1.bf16.msra.mxu1 %v13417_v63  ;;  %v13368_v47 = vld [vmem:[#allocation13 + $0x8] ss:$28 sps:$4 sm:$0xff]  }
 0xf09   :  { %7550 = vmatpush1.bf16.msra.mxu0 %v7416_v58  ;;  %v13425_v58 = vld [vmem:[#allocation15 + $0x704] ss:$112 sps:$4 sm:$0xff]  }
 0xf0a   :  { %v6750_v60 = vpop.f32.mrb[128].mxu0  ;;  %v15146_v50 = vpop.f32.mrb[132].mxu1  ;;  %7551 = vmatprep.subr.bf16.mxu0 %v7369_v52  ;;  %10225 = vmatprep.subr.bf16.mxu1 %v13425_v58 }
 0xf0b   :  { %v6752_v55 = vpop.f32.mrb[129].mxu0  ;;  %v15148_v30 = vpop.f32.mrb[133].mxu1  ;;  %10226 = vmatpush1.bf16.msra.mxu1 %v13423_v9 }
 0xf0c   :  { %v6754_v1 = vpop.f32.mrb[130].mxu0  ;;  %v15150_v40 = vpop.f32.mrb[134].mxu1  ;;  %10227 = vmatprep.subr.bf16.mxu1 %v13431_v27 }
 0xf0d   :  { %v7418_v62 = vpack.c.bf16 %v6754_v1, %v6750_v60  ;;  %v7424_v0 = vpack.c.bf16 %v15150_v40, %v15146_v50  ;;  %v6756_v18 = vpop.f32.mrb[131].mxu0  ;;  %v15154_v14 = vpop.f32.mrb[135].mxu1  ;;  %7552 = vmatpush1.bf16.msra.mxu0 %v7368_v34 }
 0xf0e   :  { %v7419_v2 = vpack.c.bf16 %v6756_v18, %v6752_v55  ;;  %v7425_v3 = vpack.c.bf16 %v15154_v14, %v15148_v30 }
 0xf0f   :  { %10228 = vmatpush1.bf16.msra.mxu1 %v13429_v17 }
 0xf10   :  { %7553 = vmatprep.subr.bf16.mxu0 %v7419_v2  ;;  %10229 = vmatprep.subr.bf16.mxu1 %v13437_v10 }
 0xf11   :  { %7554 = vmatpush1.bf16.msra.mxu0 %v7418_v62 }
 0xf12   :  { %v6846_v12 = vpop.f32.mrb[132].mxu0  ;;  %v15158_v13 = vpop.f32.mrb[136].mxu1  ;;  %7555 = vmatprep.subr.bf16.mxu0 %v7371_v7 }
 0xf13   :  { %v6848_v5 = vpop.f32.mrb[133].mxu0  ;;  %v15163_v11 = vpop.f32.mrb[137].mxu1  ;;  %10230 = vmatpush1.bf16.msra.mxu1 %v13435_v28 }
 0xf14   :  { %v6850_v20 = vpop.f32.mrb[134].mxu0  ;;  %v15165_v21 = vpop.f32.mrb[138].mxu1  ;;  %10231 = vmatprep.subr.bf16.mxu1 %v13443_v35 }
 0xf15   :  { %v7372_v23 = vpack.c.bf16 %v6850_v20, %v6846_v12  ;;  %v7378_v25 = vpack.c.bf16 %v15165_v21, %v15158_v13  ;;  %v6852_v15 = vpop.f32.mrb[135].mxu0  ;;  %v15169_v16 = vpop.f32.mrb[139].mxu1  ;;  %7556 = vmatpush1.bf16.msra.mxu0 %v7370_v8 }
 0xf16   :  { %v7373_v37 = vpack.c.bf16 %v6852_v15, %v6848_v5  ;;  %v7379_v7 = vpack.c.bf16 %v15169_v16, %v15163_v11  ;;  %7557 = vmatprep.subr.bf16.mxu0 %v7421_v39 }
 0xf17   :  { %10232 = vmatpush1.bf16.msra.mxu1 %v13441_v42 }
 0xf19   :  { %7558 = vmatpush1.bf16.msra.mxu0 %v7420_v36  ;;  %v13449_v36 = vld [vmem:[#allocation15 + $0xa84] ss:$112 sps:$4 sm:$0xff]  }
 0xf1a   :  { %v6856_v31 = vpop.f32.mrb[136].mxu0  ;;  %v15182_v6 = vpop.f32.mrb[140].mxu1  ;;  %7559 = vmatprep.subr.bf16.mxu0 %v7373_v37  ;;  %10233 = vmatprep.subr.bf16.mxu1 %v13449_v36 }
 0xf1b   :  { %v6858_v29 = vpop.f32.mrb[137].mxu0  ;;  %v15184_v8 = vpop.f32.mrb[141].mxu1  ;;  %10234 = vmatpush1.bf16.msra.mxu1 %v13447_v45 }
 0xf1c   :  { %v6860_v33 = vpop.f32.mrb[138].mxu0  ;;  %v15186_v4 = vpop.f32.mrb[142].mxu1 }
 0xf1d   :  { %v7422_v38 = vpack.c.bf16 %v6860_v33, %v6856_v31  ;;  %v7428_v39 = vpack.c.bf16 %v15186_v4, %v15182_v6  ;;  %v6862_v26 = vpop.f32.mrb[139].mxu0  ;;  %v7021_v32 = vpop.f32.mrb[143].mxu1  ;;  %7560 = vmatpush1.bf16.msra.mxu0 %v7372_v23 }
 0xf1e   :  { %v7423_v43 = vpack.c.bf16 %v6862_v26, %v6858_v29  ;;  %v7429_v44 = vpack.c.bf16 %v7021_v32, %v15184_v8 }
 0xf20   :  { %7561 = vmatprep.subr.bf16.mxu0 %v7423_v43 }
 0xf21   :  { %7562 = vmatpush1.bf16.msra.mxu0 %v7422_v38 }
 0xf22   :  { %v6952_v54 = vpop.f32.mrb[140].mxu0  ;;  %v15191_v34 = vpop.f32.mrb[144].mxu1  ;;  %7574 = vmatprep.subr.bf16.mxu0 %v7375_v19 }
 0xf23   :  { %v6954_v49 = vpop.f32.mrb[141].mxu0  ;;  %v15196_v53 = vpop.f32.mrb[145].mxu1 }
 0xf24   :  { %v6956_v52 = vpop.f32.mrb[142].mxu0  ;;  %v15198_v61 = vpop.f32.mrb[146].mxu1  ;;  %7564 = vmatmul.mubr.bf16.vlgmr.msra.gmra.mrb[172].mxu0 %v13368_v47 }
 0xf25   :  { %v7376_v41 = vpack.c.bf16 %v6956_v52, %v6952_v54  ;;  %v7382_v60 = vpack.c.bf16 %v15198_v61, %v15191_v34  ;;  %v6958_v55 = vpop.f32.mrb[143].mxu0  ;;  %v7117_v63 = vpop.f32.mrb[147].mxu1  ;;  %7575 = vmatpush1.bf16.msra.mxu0 %v7374_v57  ;;  %7606 = vmatprep.mubr.bf16.mxu0 %v13373_v22 }
 0xf26   :  { %v7377_v48 = vpack.c.bf16 %v6958_v55, %v6954_v49  ;;  %v7383_v59 = vpack.c.bf16 %v7117_v63, %v15196_v53  ;;  %7576 = vmatprep.subr.bf16.mxu0 %v7425_v3 }
 0xf29   :  { %7577 = vmatpush1.bf16.msra.mxu0 %v7424_v0 }
 0xf2a   :  { %v6962_v19 = vpop.f32.mrb[144].mxu0  ;;  %v7121_v1 = vpop.f32.mrb[148].mxu1  ;;  %7578 = vmatprep.subr.bf16.mxu0 %v7377_v48 }
 0xf2b   :  { %v6964_v62 = vpop.f32.mrb[145].mxu0  ;;  %v7123_v18 = vpop.f32.mrb[149].mxu1 }
 0xf2c   :  { %v6966_v58 = vpop.f32.mrb[146].mxu0  ;;  %v7125_v46 = vpop.f32.mrb[150].mxu1 }
 0xf2d   :  { %v7426_v56 = vpack.c.bf16 %v6966_v58, %v6962_v19  ;;  %v7432_v57 = vpack.c.bf16 %v7125_v46, %v7121_v1  ;;  %v6968_v2 = vpop.f32.mrb[147].mxu0  ;;  %v7127_v9 = vpop.f32.mrb[151].mxu1  ;;  %7579 = vmatpush1.bf16.msra.mxu0 %v7376_v41 }
 0xf2e   :  { %v7427_v27 = vpack.c.bf16 %v6968_v2, %v6964_v62  ;;  %v7433_v12 = vpack.c.bf16 %v7127_v9, %v7123_v18 }
 0xf30   :  { %7580 = vmatprep.subr.bf16.mxu0 %v7427_v27  ;;  %v13371_v27 = vld [vmem:[#allocation13 + $0x10] ss:$28 sps:$4 sm:$0xff]  }
 0xf31   :  { %7581 = vmatpush1.bf16.msra.mxu0 %v7426_v56 }
 0xf32   :  { %v7058_v30 = vpop.f32.mrb[148].mxu0  ;;  %v15212_v14 = vpop.f32.mrb[152].mxu1  ;;  %7582 = vmatprep.subr.bf16.mxu0 %v7379_v7 }
 0xf33   :  { %v7060_v50 = vpop.f32.mrb[149].mxu0  ;;  %v7219_v40 = vpop.f32.mrb[153].mxu1 }
 0xf34   :  { %v7062_v0 = vpop.f32.mrb[150].mxu0  ;;  %v15217_v3 = vpop.f32.mrb[154].mxu1 }
 0xf35   :  { %v7380_v5 = vpack.c.bf16 %v7062_v0, %v7058_v30  ;;  %v7386_v17 = vpack.c.bf16 %v15217_v3, %v15212_v14  ;;  %v7064_v20 = vpop.f32.mrb[151].mxu0  ;;  %v7223_v23 = vpop.f32.mrb[155].mxu1  ;;  %7583 = vmatpush1.bf16.msra.mxu0 %v7378_v25  ;;  %v13374_v30 = vld [vmem:[#allocation13 + $0x18] ss:$28 sps:$4 sm:$0xff]   ;;  %v13392_v0 = vld [vmem:[#allocation15 + $0x1e4] ss:$112 sps:$4 sm:$0xff]  }
 0xf36   :  { %v7381_v15 = vpack.c.bf16 %v7064_v20, %v7060_v50  ;;  %v7387_v10 = vpack.c.bf16 %v7223_v23, %v7219_v40  ;;  %7584 = vmatprep.subr.bf16.mxu0 %v7429_v44  ;;  %v13378_v14 = vld [vmem:[#allocation15 + $0x20] ss:$112 sps:$4 sm:$0xff]   ;;  %v13386_v50 = vld [vmem:[#allocation15 + $0x104] ss:$112 sps:$4 sm:$0xff]  }
 0xf37   :  { %v13384_v40 = vld [vmem:[#allocation15 + $0x100] ss:$112 sps:$4 sm:$0xff]   ;;  %v13404_v20 = vld [vmem:[#allocation15 + $0x3a4] ss:$112 sps:$4 sm:$0xff]  }
 0xf38   :  { %v13390_v3 = vld [vmem:[#allocation15 + $0x1e0] ss:$112 sps:$4 sm:$0xff]  }
 0xf39   :  { %7585 = vmatpush1.bf16.msra.mxu0 %v7428_v39  ;;  %v13402_v23 = vld [vmem:[#allocation15 + $0x3a0] ss:$112 sps:$4 sm:$0xff]  }
 0xf3a   :  { %v7068_v11 = vpop.f32.mrb[152].mxu0  ;;  %v7227_v16 = vpop.f32.mrb[156].mxu1  ;;  %7586 = vmatprep.subr.bf16.mxu0 %v7381_v15  ;;  %v13410_v15 = vld [vmem:[#allocation15 + $0x484] ss:$112 sps:$4 sm:$0xff]  }
 0xf3b   :  { %v7070_v37 = vpop.f32.mrb[153].mxu0  ;;  %v7229_v7 = vpop.f32.mrb[157].mxu1 }
 0xf3c   :  { %v7072_v28 = vpop.f32.mrb[154].mxu0  ;;  %v7231_v35 = vpop.f32.mrb[158].mxu1 }
 0xf3d   :  { %v7430_v31 = vpack.c.bf16 %v7072_v28, %v7068_v11  ;;  %v7436_v29 = vpack.c.bf16 %v7231_v35, %v7227_v16  ;;  %v7074_v8 = vpop.f32.mrb[155].mxu0  ;;  %v7233_v42 = vpop.f32.mrb[159].mxu1  ;;  %7587 = vmatpush1.bf16.msra.mxu0 %v7380_v5  ;;  %v13398_v5 = vld [vmem:[#allocation15 + $0x2c4] ss:$112 sps:$4 sm:$0xff]   ;;  %v13414_v16 = vld [vmem:[#allocation15 + $0x560] ss:$112 sps:$4 sm:$0xff]  }
 0xf3e   :  { %v7431_v13 = vpack.c.bf16 %v7074_v8, %v7070_v37  ;;  %v7437_v21 = vpack.c.bf16 %v7233_v42, %v7229_v7  ;;  %v13416_v11 = vld [vmem:[#allocation15 + $0x564] ss:$112 sps:$4 sm:$0xff]   ;;  %v13420_v7 = vld [vmem:[#allocation15 + $0x640] ss:$112 sps:$4 sm:$0xff]  }
 0xf3f   :  { %v13422_v37 = vld [vmem:[#allocation15 + $0x644] ss:$112 sps:$4 sm:$0xff]   ;;  %v13426_v35 = vld [vmem:[#allocation15 + $0x720] ss:$112 sps:$4 sm:$0xff]  }
 0xf40   :  { %7588 = vmatprep.subr.bf16.mxu0 %v7431_v13  ;;  %v13428_v28 = vld [vmem:[#allocation15 + $0x724] ss:$112 sps:$4 sm:$0xff]   ;;  %v13438_v42 = vld [vmem:[#allocation15 + $0x8e0] ss:$112 sps:$4 sm:$0xff]  }
 0xf41   :  { %7589 = vmatpush1.bf16.msra.mxu0 %v7430_v31  ;;  %v13434_v31 = vld [vmem:[#allocation15 + $0x804] ss:$112 sps:$4 sm:$0xff]  }
 0xf42   :  { %v7164_v25 = vpop.f32.mrb[156].mxu0  ;;  %v7323_v33 = vpop.f32.mrb[160].mxu1  ;;  %7590 = vmatprep.subr.bf16.mxu0 %v7383_v59  ;;  %v13440_v8 = vld [vmem:[#allocation15 + $0x8e4] ss:$112 sps:$4 sm:$0xff]  }
 0xf43   :  { %v7166_v6 = vpop.f32.mrb[157].mxu0  ;;  %v7325_v4 = vpop.f32.mrb[161].mxu1  ;;  %v13446_v13 = vld [vmem:[#allocation15 + $0x9c4] ss:$112 sps:$4 sm:$0xff]  }
 0xf44   :  { %v7168_v38 = vpop.f32.mrb[158].mxu0  ;;  %v7327_v39 = vpop.f32.mrb[162].mxu1 }
 0xf45   :  { %v7384_v26 = vpack.c.bf16 %v7168_v38, %v7164_v25  ;;  %v7390_v32 = vpack.c.bf16 %v7327_v39, %v7323_v33  ;;  %v7170_v36 = vpop.f32.mrb[159].mxu0  ;;  %v7329_v43 = vpop.f32.mrb[163].mxu1  ;;  %7591 = vmatpush1.bf16.msra.mxu0 %v7382_v60  ;;  %v13452_v25 = vld [vmem:[#allocation15 + $0xaa4] ss:$112 sps:$4 sm:$0xff]   ;;  %v13450_v33 = vld [vmem:[#allocation15 + $0xaa0] ss:$112 sps:$4 sm:$0xff]  }
 0xf46   :  { %v7385_v44 = vpack.c.bf16 %v7170_v36, %v7166_v6  ;;  %v7391_v45 = vpack.c.bf16 %v7329_v43, %v7325_v4  ;;  %7592 = vmatprep.subr.bf16.mxu0 %v7433_v12  ;;  %v13380_v12 = vld [vmem:[#allocation15 + $0x24] ss:$112 sps:$4 sm:$0xff]   ;;  %v13453_v38 = vld [vmem:[#allocation15 + $0xb60] ss:$112 sps:$4 sm:$0xff]  }
 0xf47   :  { %v13455_v6 = vld [vmem:[#allocation15 + $0xb64] ss:$112 sps:$4 sm:$0xff]   ;;  %v13456_v39 = vld [vmem:[#allocation15 + $0xb80] ss:$112 sps:$4 sm:$0xff]  }
 0xf48   :  { %v13458_v4 = vld [vmem:[#allocation15 + $0xb84] ss:$112 sps:$4 sm:$0xff]   ;;  %10235 = vmatprep.subr.bf16.mxu1 %v13455_v6  ;;  %v13508_v6 = vld [vmem:[#allocation15 + $0x650] ss:$112 sps:$4 sm:$0xff]  }
 0xf49   :  { %7593 = vmatpush1.bf16.msra.mxu0 %v7432_v57  ;;  %v8078_v36 = vld [vmem:[#allocation15 + $0xc60] sm:$0x11]  ;;  %10236 = vmatpush1.bf16.msra.mxu1 %v13453_v38 }
 0xf4a   :  { %v7174_v47 = vpop.f32.mrb[160].mxu0  ;;  %v7333_v22 = vpop.f32.mrb[164].mxu1  ;;  %7594 = vmatprep.subr.bf16.mxu0 %v7385_v44  ;;  %v15233_v44 = vsel %vm10122_vm11, 65535, %v14267_v24  ;;  %v13516_v38 = vld [vmem:[#allocation15 + $0x734] ss:$112 sps:$4 sm:$0xff]  }
 0xf4b   :  { %v7176_v54 = vpop.f32.mrb[161].mxu0  ;;  %v7335_v49 = vpop.f32.mrb[165].mxu1 }
 0xf4c   :  { %v7178_v53 = vpop.f32.mrb[162].mxu0  ;;  %v7337_v52 = vpop.f32.mrb[166].mxu1 }
 0xf4d   :  { %v7434_v41 = vpack.c.bf16 %v7178_v53, %v7174_v47  ;;  %v7440_v55 = vpack.c.bf16 %v7337_v52, %v7333_v22  ;;  %v7180_v63 = vpop.f32.mrb[163].mxu0  ;;  %v7339_v48 = vpop.f32.mrb[167].mxu1  ;;  %7595 = vmatpush1.bf16.msra.mxu0 %v7384_v26  ;;  %v8074_v26 = vld [vmem:[#allocation15 + $0xc40] sm:$0x11]  ;;  %v12159_v47 = vcombine.high %v8078_v36, %v8078_v36  ;;  %v13465_v52 = vld [vmem:[#allocation15 + $0xc] ss:$112 sps:$4 sm:$0xff]  }
 0xf4e   :  { %v7435_v59 = vpack.c.bf16 %v7180_v63, %v7176_v54  ;;  %v7441_v19 = vpack.c.bf16 %v7339_v48, %v7335_v49  ;;  %v12150_v43 = vcombine.low %v8074_v26, %v8074_v26 }
 0xf4f   :  { %v10153_v54 = vand.u32 %v12159_v47, %v15233_v44  ;;  %v13525_v47 = vld [vmem:[#allocation15 + $0x8cc] ss:$112 sps:$4 sm:$0xff]  }
 0xf50   :  { %7596 = vmatprep.subr.bf16.mxu0 %v7435_v59  ;;  %v10126_v49 = vand.u32 %v12150_v43, %v15233_v44  ;;  %v13517_v43 = vld [vmem:[#allocation15 + $0x7e8] ss:$112 sps:$4 sm:$0xff]  }
 0xf51   :  { %7597 = vmatpush1.bf16.msra.mxu0 %v7434_v41  ;;  %v13468_v41 = vld [vmem:[#allocation15 + $0x34] ss:$112 sps:$4 sm:$0xff]  }
 0xf52   :  { %v7270_v34 = vpop.f32.mrb[164].mxu0  ;;  %7598 = vmatprep.subr.bf16.mxu0 %v7387_v10  ;;  %v13408_v10 = vld [vmem:[#allocation15 + $0x480] ss:$112 sps:$4 sm:$0xff]  }
 0xf53   :  { %v7272_v61 = vpop.f32.mrb[165].mxu0 }
 0xf54   :  { %v7274_v60 = vpop.f32.mrb[166].mxu0 }
 0xf55   :  { %v7388_v1 = vpack.c.bf16 %v7274_v60, %v7270_v34  ;;  %v7276_v62 = vpop.f32.mrb[167].mxu0  ;;  %7599 = vmatpush1.bf16.msra.mxu0 %v7386_v17  ;;  %v13396_v17 = vld [vmem:[#allocation15 + $0x2c0] ss:$112 sps:$4 sm:$0xff]  }
 0xf56   :  { %v7389_v18 = vpack.c.bf16 %v7276_v62, %v7272_v61  ;;  %7600 = vmatprep.subr.bf16.mxu0 %v7437_v21  ;;  %v13444_v21 = vld [vmem:[#allocation15 + $0x9c0] ss:$112 sps:$4 sm:$0xff]  }
 0xf59   :  { %7601 = vmatpush1.bf16.msra.mxu0 %v7436_v29  ;;  %v13432_v29 = vld [vmem:[#allocation15 + $0x800] ss:$112 sps:$4 sm:$0xff]  }
 0xf5a   :  { %v7280_v58 = vpop.f32.mrb[168].mxu0  ;;  %7602 = vmatprep.subr.bf16.mxu0 %v7389_v18 }
 0xf5b   :  { %v7282_v46 = vpop.f32.mrb[169].mxu0 }
 0xf5c   :  { %v7284_v56 = vpop.f32.mrb[170].mxu0 }
 0xf5d   :  { %v7438_v57 = vpack.c.bf16 %v7284_v56, %v7280_v58  ;;  %v7286_v2 = vpop.f32.mrb[171].mxu0  ;;  %7603 = vmatpush1.bf16.msra.mxu0 %v7388_v1 }
 0xf5e   :  { %v7439_v9 = vpack.c.bf16 %v7286_v2, %v7282_v46 }
 0xf60   :  { %7604 = vmatprep.subr.bf16.mxu0 %v7439_v9  ;;  %v13463_v9 = vld [vmem:[#allocation15 + $0x8] ss:$112 sps:$4 sm:$0xff]  }
 0xf61   :  { %7605 = vmatpush1.bf16.msra.mxu0 %v7438_v57 }
 0xf62   :  { %7617 = vmatprep.subr.bf16.mxu0 %v7391_v45  ;;  %v12158_v45 = vcombine.low %v8078_v36, %v8078_v36  ;;  %v13522_v36 = vld [vmem:[#allocation15 + $0x814] ss:$112 sps:$4 sm:$0xff]  }
 0xf64   :  { %7607 = vmatmul.mubr.bf16.vlgmr.msra.gmra.mrb[172].mxu0 %v13371_v27  ;;  %v10150_v53 = vand.u32 %v12158_v45, %v15233_v44  ;;  %v13466_v27 = vld [vmem:[#allocation15 + $0x30] ss:$112 sps:$4 sm:$0xff]  }
 0xf65   :  { %7618 = vmatpush1.bf16.msra.mxu0 %v7390_v32  ;;  %7649 = vmatprep.mubr.bf16.mxu0 %v14267_v24  ;;  %v12151_v32 = vcombine.high %v8074_v26, %v8074_v26  ;;  %v13514_v26 = vld [vmem:[#allocation15 + $0x730] ss:$112 sps:$4 sm:$0xff]  }
 0xf66   :  { %7619 = vmatprep.subr.bf16.mxu0 %v7441_v19  ;;  %v7670_v19 = vpop.permute.xlu1 %7669  ;;  %v13520_v45 = vld [vmem:[#allocation15 + $0x810] ss:$112 sps:$4 sm:$0xff]  }
 0xf67   :  { %v10129_v22 = vand.u32 %v12151_v32, %v15233_v44  ;;  %v13519_v32 = vld [vmem:[#allocation15 + $0x7ec] ss:$112 sps:$4 sm:$0xff]  }
 0xf69   :  { %7620 = vmatpush1.bf16.msra.mxu0 %v7440_v55  ;;  %10237 = vmatprep.subr.bf16.mxu1 %v10129_v22  ;;  %v7665_v55 = vpop.permute.xlu0 %7664  ;;  %v13528_v22 = vld [vmem:[#allocation15 + $0x8f4] ss:$112 sps:$4 sm:$0xff]  }
 0xf6a   :  { %10381 = vmatprep.subr.bf16.mxu0 %v13380_v12  ;;  %10238 = vmatpush1.bf16.msra.mxu1 %v10126_v49  ;;  %v13471_v12 = vld [vmem:[#allocation15 + $0xec] ss:$112 sps:$4 sm:$0xff]   ;;  %v13526_v49 = vld [vmem:[#allocation15 + $0x8f0] ss:$112 sps:$4 sm:$0xff]  }
 0xf6b   :  { %10252 = vmatprep.subr.bf16.mxu1 %v13465_v52  ;;  %v13534_v52 = vld [vmem:[#allocation15 + $0x9d4] ss:$112 sps:$4 sm:$0xff]  }
 0xf70   :  { %11757 = vmatmul.mubr.msk.bf16.vlgmr.msra.gmra.mrb[172].mxu0 %vm4524_vm6, %v13374_v30  ;;  %v13474_v30 = vld [vmem:[#allocation15 + $0x114] ss:$112 sps:$4 sm:$0xff]  }
 0xf71   :  { %10382 = vmatpush1.bf16.msra.mxu0 %v13378_v14  ;;  %v13469_v14 = vld [vmem:[#allocation15 + $0xe8] ss:$112 sps:$4 sm:$0xff]  }
 0xf72   :  { %10383 = vmatprep.subr.bf16.mxu0 %v13386_v50  ;;  %v13472_v50 = vld [vmem:[#allocation15 + $0x110] ss:$112 sps:$4 sm:$0xff]  }
 0xf75   :  { %10384 = vmatpush1.bf16.msra.mxu0 %v13384_v40  ;;  %v13477_v40 = vld [vmem:[#allocation15 + $0x1cc] ss:$112 sps:$4 sm:$0xff]  }
 0xf76   :  { %10385 = vmatprep.subr.bf16.mxu0 %v13392_v0  ;;  %v13480_v0 = vld [vmem:[#allocation15 + $0x1f4] ss:$112 sps:$4 sm:$0xff]  }
 0xf79   :  { %10386 = vmatpush1.bf16.msra.mxu0 %v13390_v3  ;;  %v13475_v3 = vld [vmem:[#allocation15 + $0x1c8] ss:$112 sps:$4 sm:$0xff]  }
 0xf7a   :  { %10387 = vmatprep.subr.bf16.mxu0 %v13398_v5  ;;  %v13478_v5 = vld [vmem:[#allocation15 + $0x1f0] ss:$112 sps:$4 sm:$0xff]  }
 0xf7d   :  { %10388 = vmatpush1.bf16.msra.mxu0 %v13396_v17  ;;  %v13483_v17 = vld [vmem:[#allocation15 + $0x2ac] ss:$112 sps:$4 sm:$0xff]  }
 0xf7e   :  { %10389 = vmatprep.subr.bf16.mxu0 %v13404_v20  ;;  %v13486_v20 = vld [vmem:[#allocation15 + $0x2d4] ss:$112 sps:$4 sm:$0xff]  }
 0xf81   :  { %10390 = vmatpush1.bf16.msra.mxu0 %v13402_v23  ;;  %v13481_v23 = vld [vmem:[#allocation15 + $0x2a8] ss:$112 sps:$4 sm:$0xff]  }
 0xf82   :  { %10391 = vmatprep.subr.bf16.mxu0 %v13410_v15  ;;  %v13484_v15 = vld [vmem:[#allocation15 + $0x2d0] ss:$112 sps:$4 sm:$0xff]  }
 0xf85   :  { %10392 = vmatpush1.bf16.msra.mxu0 %v13408_v10  ;;  %v13489_v10 = vld [vmem:[#allocation15 + $0x38c] ss:$112 sps:$4 sm:$0xff]  }
 0xf86   :  { %10393 = vmatprep.subr.bf16.mxu0 %v13416_v11  ;;  %v13492_v11 = vld [vmem:[#allocation15 + $0x3b4] ss:$112 sps:$4 sm:$0xff]  }
 0xf89   :  { %10394 = vmatpush1.bf16.msra.mxu0 %v13414_v16  ;;  %v13487_v16 = vld [vmem:[#allocation15 + $0x388] ss:$112 sps:$4 sm:$0xff]  }
 0xf8a   :  { %10395 = vmatprep.subr.bf16.mxu0 %v13422_v37  ;;  %v13490_v37 = vld [vmem:[#allocation15 + $0x3b0] ss:$112 sps:$4 sm:$0xff]  }
 0xf8d   :  { %10396 = vmatpush1.bf16.msra.mxu0 %v13420_v7  ;;  %v13495_v7 = vld [vmem:[#allocation15 + $0x46c] ss:$112 sps:$4 sm:$0xff]  }
 0xf8e   :  { %10397 = vmatprep.subr.bf16.mxu0 %v13428_v28  ;;  %v13498_v28 = vld [vmem:[#allocation15 + $0x494] ss:$112 sps:$4 sm:$0xff]  }
 0xf91   :  { %10398 = vmatpush1.bf16.msra.mxu0 %v13426_v35  ;;  %v13493_v35 = vld [vmem:[#allocation15 + $0x468] ss:$112 sps:$4 sm:$0xff]  }
 0xf92   :  { %10399 = vmatprep.subr.bf16.mxu0 %v13434_v31  ;;  %v13496_v31 = vld [vmem:[#allocation15 + $0x490] ss:$112 sps:$4 sm:$0xff]  }
 0xf95   :  { %10400 = vmatpush1.bf16.msra.mxu0 %v13432_v29  ;;  %v13501_v29 = vld [vmem:[#allocation15 + $0x54c] ss:$112 sps:$4 sm:$0xff]  }
 0xf96   :  { %10401 = vmatprep.subr.bf16.mxu0 %v13440_v8  ;;  %v13504_v8 = vld [vmem:[#allocation15 + $0x574] ss:$112 sps:$4 sm:$0xff]  }
 0xf99   :  { %10402 = vmatpush1.bf16.msra.mxu0 %v13438_v42  ;;  %v13499_v42 = vld [vmem:[#allocation15 + $0x548] ss:$112 sps:$4 sm:$0xff]  }
 0xf9a   :  { %10403 = vmatprep.subr.bf16.mxu0 %v13446_v13  ;;  %v13502_v13 = vld [vmem:[#allocation15 + $0x570] ss:$112 sps:$4 sm:$0xff]  }
 0xf9d   :  { %10404 = vmatpush1.bf16.msra.mxu0 %v13444_v21  ;;  %v13507_v21 = vld [vmem:[#allocation15 + $0x62c] ss:$112 sps:$4 sm:$0xff]  }
 0xf9e   :  { %10405 = vmatprep.subr.bf16.mxu0 %v13452_v25  ;;  %v13510_v25 = vld [vmem:[#allocation15 + $0x654] ss:$112 sps:$4 sm:$0xff]  }
 0xfa1   :  { %10406 = vmatpush1.bf16.msra.mxu0 %v13450_v33  ;;  %v13505_v33 = vld [vmem:[#allocation15 + $0x628] ss:$112 sps:$4 sm:$0xff]  }
 0xfa2   :  { %10407 = vmatprep.subr.bf16.mxu0 %v13458_v4  ;;  %v13513_v4 = vld [vmem:[#allocation15 + $0x70c] ss:$112 sps:$4 sm:$0xff]  }
 0xfa5   :  { %10408 = vmatpush1.bf16.msra.mxu0 %v13456_v39  ;;  %v13511_v39 = vld [vmem:[#allocation15 + $0x708] ss:$112 sps:$4 sm:$0xff]  }
 0xfa6   :  { %10409 = vmatprep.subr.bf16.mxu0 %v10153_v54  ;;  %v13523_v54 = vld [vmem:[#allocation15 + $0x8c8] ss:$112 sps:$4 sm:$0xff]  }
 0xfa9   :  { %10410 = vmatpush1.bf16.msra.mxu0 %v10150_v53  ;;  %v13531_v53 = vld [vmem:[#allocation15 + $0x9ac] ss:$112 sps:$4 sm:$0xff]  }
 0xfaa   :  { %10467 = vmatprep.subr.bf16.mxu0 %v13468_v41  ;;  %v13529_v41 = vld [vmem:[#allocation15 + $0x9a8] ss:$112 sps:$4 sm:$0xff]  }
0x1043   :  { %v7651_v63 = vpop.f32.mrb[172].mxu0 }
0x1044   :  { %v7672_v48 = vadd.f32 %v7665_v55, %v7651_v63  ;;  %v7653_v59 = vpop.f32.mrb[173].mxu0  ;;  %v13537_v63 = vld [vmem:[#allocation15 + $0xa8c] ss:$112 sps:$4 sm:$0xff]  }
0x1045   :  { %v7673_v34 = vadd.f32 %v7665_v55, %v7653_v59  ;;  %v7655_v61 = vpop.f32.mrb[174].mxu0  ;;  %v13532_v55 = vld [vmem:[#allocation15 + $0x9d0] ss:$112 sps:$4 sm:$0xff]   ;;  %v8075_v59 = vld [vmem:[#allocation15 + $0xc48] sm:$0x11] }
0x1046   :  { %v7674_v60 = vadd.f32 %v7670_v19, %v7655_v61  ;;  %v7657_v1 = vpop.f32.mrb[175].mxu0  ;;  %v7676_v18 = vmax.f32 %v7672_v48, 0.0  ;;  %v13540_v48 = vld [vmem:[#allocation15 + $0xab4] ss:$112 sps:$4 sm:$0xff]   ;;  %v13538_v61 = vld [vmem:[#allocation15 + $0xab0] ss:$112 sps:$4 sm:$0xff]  }
0x1047   :  { %v7675_v62 = vadd.f32 %v7670_v19, %v7657_v1  ;;  %v7677_v46 = vmax.f32 %v7673_v34, 0.0  ;;  %v8080_v19 = vld [vmem:[#allocation15 + $0xc70] sm:$0x11]  ;;  %v13535_v34 = vld [vmem:[#allocation15 + $0xa88] ss:$112 sps:$4 sm:$0xff]  }
0x1048   :  { %v7678_v58 = vmax.f32 %v7674_v60, 0.0  ;;  %v13543_v60 = vld [vmem:[#allocation15 + $0xb6c] ss:$112 sps:$4 sm:$0xff]   ;;  %v13546_v1 = vld [vmem:[#allocation15 + $0xb94] ss:$112 sps:$4 sm:$0xff]  }
0x1049   :  { %v7679_v56 = vmax.f32 %v7675_v62, 0.0  ;;  %v12153_v62 = vcombine.high %v8075_v59, %v8075_v59 }
0x104a   :  { %v15239_v57 = vpack.c.bf16 %v7678_v58, %v7676_v18  ;;  %v12163_v18 = vcombine.high %v8080_v19, %v8080_v19  ;;  %v13541_v58 = vld [vmem:[#allocation15 + $0xb68] ss:$112 sps:$4 sm:$0xff]  }
0x104b   :  { %v15241_v2 = vpack.c.bf16 %v7679_v56, %v7677_v46  ;;  %v13544_v46 = vld [vmem:[#allocation15 + $0xb90] ss:$112 sps:$4 sm:$0xff]   ;;  %v12152_v56 = vcombine.low %v8075_v59, %v8075_v59 }
0x104c   :  { %v13614_v59 = vld [vmem:[#allocation15 + $0x900] ss:$112 sps:$4 sm:$0xff]  }
0x104d   :  { %12178 = vmatprep.mubr.msk.bf16.mxu1 %vm10118_vm12, %v15241_v2  ;;  %12182 = vmatprep.mubr.msk.bf16.mxu0 %vm10118_vm12, %v15241_v2 }
0x104e   :  { %10242 = vmatmul.mubr.bf16.vlgmr.msra.gmra.mrb[168].mxu1 %v15239_v57  ;;  %10414 = vmatmul.mubr.bf16.vlgmr.msra.gmra.mrb[176].mxu0 %v15239_v57 }
0x104f   :  { %10253 = vmatpush1.bf16.msra.mxu1 %v13463_v9  ;;  %10468 = vmatpush1.bf16.msra.mxu0 %v13466_v27  ;;  %v12162_v9 = vcombine.low %v8080_v19, %v8080_v19  ;;  %v10135_v27 = vand.u32 %v12153_v62, %v15233_v44  ;;  %v13619_v19 = vld [vmem:[#allocation15 + $0x9b4] ss:$112 sps:$4 sm:$0xff]  }
0x1050   :  { %12179 = vmatprep.mubr.msk.bf16.mxu1 %vm10118_vm12, %v15241_v2  ;;  %12184 = vmatprep.mubr.msk.bf16.mxu0 %vm10118_vm12, %v15241_v2  ;;  %v13628_v62 = vld [vmem:[#allocation15 + $0xac4] ss:$112 sps:$4 sm:$0xff]  }
0x1051   :  { %10254 = vmatprep.subr.bf16.mxu1 %v13471_v12  ;;  %10469 = vmatprep.subr.bf16.mxu0 %v13474_v30  ;;  %v10165_v12 = vand.u32 %v12163_v18, %v15233_v44  ;;  %v10132_v30 = vand.u32 %v12152_v56, %v15233_v44  ;;  %v8076_v18 = vld [vmem:[#allocation15 + $0xc50] sm:$0x11] }
0x1052   :  { %v13626_v56 = vld [vmem:[#allocation15 + $0xac0] ss:$112 sps:$4 sm:$0xff]  }
0x1053   :  { %10255 = vmatpush1.bf16.msra.mxu1 %v13469_v14  ;;  %10470 = vmatpush1.bf16.msra.mxu0 %v13472_v50  ;;  %v10162_v14 = vand.u32 %v12162_v9, %v15233_v44  ;;  %v13553_v50 = vld [vmem:[#allocation15 + $0x14] ss:$112 sps:$4 sm:$0xff]  }
0x1054   :  { %10256 = vmatprep.subr.bf16.mxu1 %v13477_v40  ;;  %10471 = vmatprep.subr.bf16.mxu0 %v13480_v0  ;;  %v13556_v40 = vld [vmem:[#allocation15 + $0x44] ss:$112 sps:$4 sm:$0xff]   ;;  %v13551_v0 = vld [vmem:[#allocation15 + $0x10] ss:$112 sps:$4 sm:$0xff]  }
0x1055   :  { %v13631_v9 = vld [vmem:[#allocation15 + $0xb74] ss:$112 sps:$4 sm:$0xff]  }
0x1057   :  { %10257 = vmatpush1.bf16.msra.mxu1 %v13475_v3  ;;  %10472 = vmatpush1.bf16.msra.mxu0 %v13478_v5  ;;  %v13554_v3 = vld [vmem:[#allocation15 + $0x40] ss:$112 sps:$4 sm:$0xff]   ;;  %v13559_v5 = vld [vmem:[#allocation15 + $0xf4] ss:$112 sps:$4 sm:$0xff]  }
0x1058   :  { %10258 = vmatprep.subr.bf16.mxu1 %v13483_v17  ;;  %10473 = vmatprep.subr.bf16.mxu0 %v13486_v20  ;;  %v13562_v17 = vld [vmem:[#allocation15 + $0x124] ss:$112 sps:$4 sm:$0xff]   ;;  %v13557_v20 = vld [vmem:[#allocation15 + $0xf0] ss:$112 sps:$4 sm:$0xff]  }
0x105b   :  { %10259 = vmatpush1.bf16.msra.mxu1 %v13481_v23  ;;  %10474 = vmatpush1.bf16.msra.mxu0 %v13484_v15  ;;  %v13560_v23 = vld [vmem:[#allocation15 + $0x120] ss:$112 sps:$4 sm:$0xff]   ;;  %v13565_v15 = vld [vmem:[#allocation15 + $0x1d4] ss:$112 sps:$4 sm:$0xff]  }
0x105c   :  { %10260 = vmatprep.subr.bf16.mxu1 %v13489_v10  ;;  %10475 = vmatprep.subr.bf16.mxu0 %v13492_v11  ;;  %v13568_v10 = vld [vmem:[#allocation15 + $0x204] ss:$112 sps:$4 sm:$0xff]   ;;  %v13563_v11 = vld [vmem:[#allocation15 + $0x1d0] ss:$112 sps:$4 sm:$0xff]  }
0x105f   :  { %10261 = vmatpush1.bf16.msra.mxu1 %v13487_v16  ;;  %10476 = vmatpush1.bf16.msra.mxu0 %v13490_v37  ;;  %v13566_v16 = vld [vmem:[#allocation15 + $0x200] ss:$112 sps:$4 sm:$0xff]   ;;  %v13571_v37 = vld [vmem:[#allocation15 + $0x2b4] ss:$112 sps:$4 sm:$0xff]  }
0x1060   :  { %10262 = vmatprep.subr.bf16.mxu1 %v13495_v7  ;;  %10477 = vmatprep.subr.bf16.mxu0 %v13498_v28  ;;  %v13574_v7 = vld [vmem:[#allocation15 + $0x2e4] ss:$112 sps:$4 sm:$0xff]   ;;  %v13569_v28 = vld [vmem:[#allocation15 + $0x2b0] ss:$112 sps:$4 sm:$0xff]  }
0x1063   :  { %10263 = vmatpush1.bf16.msra.mxu1 %v13493_v35  ;;  %10478 = vmatpush1.bf16.msra.mxu0 %v13496_v31  ;;  %v13572_v35 = vld [vmem:[#allocation15 + $0x2e0] ss:$112 sps:$4 sm:$0xff]   ;;  %v13577_v31 = vld [vmem:[#allocation15 + $0x394] ss:$112 sps:$4 sm:$0xff]  }
0x1064   :  { %10264 = vmatprep.subr.bf16.mxu1 %v13501_v29  ;;  %10479 = vmatprep.subr.bf16.mxu0 %v13504_v8  ;;  %v13580_v29 = vld [vmem:[#allocation15 + $0x3c4] ss:$112 sps:$4 sm:$0xff]   ;;  %v13575_v8 = vld [vmem:[#allocation15 + $0x390] ss:$112 sps:$4 sm:$0xff]  }
0x1067   :  { %10265 = vmatpush1.bf16.msra.mxu1 %v13499_v42  ;;  %10480 = vmatpush1.bf16.msra.mxu0 %v13502_v13  ;;  %v13578_v42 = vld [vmem:[#allocation15 + $0x3c0] ss:$112 sps:$4 sm:$0xff]   ;;  %v13583_v13 = vld [vmem:[#allocation15 + $0x474] ss:$112 sps:$4 sm:$0xff]  }
0x1068   :  { %10266 = vmatprep.subr.bf16.mxu1 %v13507_v21  ;;  %10481 = vmatprep.subr.bf16.mxu0 %v13510_v25  ;;  %v13586_v21 = vld [vmem:[#allocation15 + $0x4a4] ss:$112 sps:$4 sm:$0xff]   ;;  %v13581_v25 = vld [vmem:[#allocation15 + $0x470] ss:$112 sps:$4 sm:$0xff]  }
0x106b   :  { %10267 = vmatpush1.bf16.msra.mxu1 %v13505_v33  ;;  %10482 = vmatpush1.bf16.msra.mxu0 %v13508_v6  ;;  %v13584_v33 = vld [vmem:[#allocation15 + $0x4a0] ss:$112 sps:$4 sm:$0xff]   ;;  %v13589_v6 = vld [vmem:[#allocation15 + $0x554] ss:$112 sps:$4 sm:$0xff]  }
0x106c   :  { %10268 = vmatprep.subr.bf16.mxu1 %v13513_v4  ;;  %10483 = vmatprep.subr.bf16.mxu0 %v13516_v38  ;;  %v13592_v4 = vld [vmem:[#allocation15 + $0x584] ss:$112 sps:$4 sm:$0xff]   ;;  %v13587_v38 = vld [vmem:[#allocation15 + $0x550] ss:$112 sps:$4 sm:$0xff]  }
0x106f   :  { %10269 = vmatpush1.bf16.msra.mxu1 %v13511_v39  ;;  %10484 = vmatpush1.bf16.msra.mxu0 %v13514_v26  ;;  %v13590_v39 = vld [vmem:[#allocation15 + $0x580] ss:$112 sps:$4 sm:$0xff]   ;;  %v13595_v26 = vld [vmem:[#allocation15 + $0x634] ss:$112 sps:$4 sm:$0xff]  }
0x1070   :  { %10270 = vmatprep.subr.bf16.mxu1 %v13519_v32  ;;  %10485 = vmatprep.subr.bf16.mxu0 %v13522_v36  ;;  %v13598_v32 = vld [vmem:[#allocation15 + $0x664] ss:$112 sps:$4 sm:$0xff]   ;;  %v13593_v36 = vld [vmem:[#allocation15 + $0x630] ss:$112 sps:$4 sm:$0xff]  }
0x1073   :  { %10271 = vmatpush1.bf16.msra.mxu1 %v13517_v43  ;;  %10486 = vmatpush1.bf16.msra.mxu0 %v13520_v45  ;;  %v13596_v43 = vld [vmem:[#allocation15 + $0x660] ss:$112 sps:$4 sm:$0xff]   ;;  %v13601_v45 = vld [vmem:[#allocation15 + $0x714] ss:$112 sps:$4 sm:$0xff]  }
0x1074   :  { %10272 = vmatprep.subr.bf16.mxu1 %v13525_v47  ;;  %10487 = vmatprep.subr.bf16.mxu0 %v13528_v22  ;;  %v13604_v47 = vld [vmem:[#allocation15 + $0x744] ss:$112 sps:$4 sm:$0xff]   ;;  %v13599_v22 = vld [vmem:[#allocation15 + $0x710] ss:$112 sps:$4 sm:$0xff]  }
0x1077   :  { %10273 = vmatpush1.bf16.msra.mxu1 %v13523_v54  ;;  %10488 = vmatpush1.bf16.msra.mxu0 %v13526_v49  ;;  %v13602_v54 = vld [vmem:[#allocation15 + $0x740] ss:$112 sps:$4 sm:$0xff]   ;;  %v13607_v49 = vld [vmem:[#allocation15 + $0x7f4] ss:$112 sps:$4 sm:$0xff]  }
0x1078   :  { %10274 = vmatprep.subr.bf16.mxu1 %v13531_v53  ;;  %10489 = vmatprep.subr.bf16.mxu0 %v13534_v52  ;;  %v13610_v53 = vld [vmem:[#allocation15 + $0x824] ss:$112 sps:$4 sm:$0xff]   ;;  %v13605_v52 = vld [vmem:[#allocation15 + $0x7f0] ss:$112 sps:$4 sm:$0xff]  }
0x107b   :  { %10275 = vmatpush1.bf16.msra.mxu1 %v13529_v41  ;;  %10490 = vmatpush1.bf16.msra.mxu0 %v13532_v55  ;;  %v13608_v41 = vld [vmem:[#allocation15 + $0x820] ss:$112 sps:$4 sm:$0xff]   ;;  %v13613_v55 = vld [vmem:[#allocation15 + $0x8d4] ss:$112 sps:$4 sm:$0xff]  }
0x107c   :  { %10276 = vmatprep.subr.bf16.mxu1 %v13537_v63  ;;  %10491 = vmatprep.subr.bf16.mxu0 %v13540_v48  ;;  %v13616_v63 = vld [vmem:[#allocation15 + $0x904] ss:$112 sps:$4 sm:$0xff]   ;;  %v13611_v48 = vld [vmem:[#allocation15 + $0x8d0] ss:$112 sps:$4 sm:$0xff]  }
0x107f   :  { %10277 = vmatpush1.bf16.msra.mxu1 %v13535_v34  ;;  %10492 = vmatpush1.bf16.msra.mxu0 %v13538_v61  ;;  %v13622_v34 = vld [vmem:[#allocation15 + $0x9e4] ss:$112 sps:$4 sm:$0xff]   ;;  %v13617_v61 = vld [vmem:[#allocation15 + $0x9b0] ss:$112 sps:$4 sm:$0xff]  }
0x1080   :  { %10278 = vmatprep.subr.bf16.mxu1 %v13543_v60  ;;  %10493 = vmatprep.subr.bf16.mxu0 %v13546_v1  ;;  %v13620_v60 = vld [vmem:[#allocation15 + $0x9e0] ss:$112 sps:$4 sm:$0xff]   ;;  %v13625_v1 = vld [vmem:[#allocation15 + $0xa94] ss:$112 sps:$4 sm:$0xff]  }
0x1083   :  { %10279 = vmatpush1.bf16.msra.mxu1 %v13541_v58  ;;  %10494 = vmatpush1.bf16.msra.mxu0 %v13544_v46  ;;  %v8082_v58 = vld [vmem:[#allocation15 + $0xc80] sm:$0x11] }
0x1084   :  { %10280 = vmatprep.subr.bf16.mxu1 %v10135_v27  ;;  %10495 = vmatprep.subr.bf16.mxu0 %v10165_v12  ;;  %v13623_v46 = vld [vmem:[#allocation15 + $0xa90] ss:$112 sps:$4 sm:$0xff]   ;;  %v12155_v27 = vcombine.high %v8076_v18, %v8076_v18  ;;  %v13634_v12 = vld [vmem:[#allocation15 + $0xba4] ss:$112 sps:$4 sm:$0xff]  }
0x1087   :  { %10281 = vmatpush1.bf16.msra.mxu1 %v10132_v30  ;;  %10496 = vmatpush1.bf16.msra.mxu0 %v10162_v14  ;;  %v12167_v30 = vcombine.high %v8082_v58, %v8082_v58  ;;  %v13629_v14 = vld [vmem:[#allocation15 + $0xb70] ss:$112 sps:$4 sm:$0xff]  }
0x1088   :  { %10295 = vmatprep.subr.bf16.mxu1 %v13553_v50  ;;  %10553 = vmatprep.subr.bf16.mxu0 %v13556_v40  ;;  %v12154_v50 = vcombine.low %v8076_v18, %v8076_v18  ;;  %v13632_v40 = vld [vmem:[#allocation15 + $0xba0] ss:$112 sps:$4 sm:$0xff]  }
0x1089   :  { %v13702_v18 = vld [vmem:[#allocation15 + $0x910] ss:$112 sps:$4 sm:$0xff]  }
0x108a   :  { %10285 = vmatmul.mubr.bf16.vlgmr.msra.gmra.mrb[172].mxu1 %v15239_v57  ;;  %10500 = vmatmul.mubr.bf16.vlgmr.msra.gmra.mrb[180].mxu0 %v15239_v57 }
0x108b   :  { %10296 = vmatpush1.bf16.msra.mxu1 %v13551_v0  ;;  %12180 = vmatprep.mubr.msk.bf16.mxu1 %vm10118_vm12, %v15241_v2  ;;  %v10141_v0 = vand.u32 %v12155_v27, %v15233_v44  ;;  %v13713_v27 = vld [vmem:[#allocation15 + $0xa9c] ss:$112 sps:$4 sm:$0xff]  }
0x108c   :  { %10554 = vmatpush1.bf16.msra.mxu0 %v13554_v3  ;;  %12186 = vmatprep.mubr.msk.bf16.mxu0 %vm10118_vm12, %v15241_v2  ;;  %v12166_v3 = vcombine.low %v8082_v58, %v8082_v58  ;;  %v13707_v58 = vld [vmem:[#allocation15 + $0x9bc] ss:$112 sps:$4 sm:$0xff]  }
0x108d   :  { %10297 = vmatprep.subr.bf16.mxu1 %v13559_v5  ;;  %10555 = vmatprep.subr.bf16.mxu0 %v13562_v17  ;;  %v10177_v5 = vand.u32 %v12167_v30, %v15233_v44  ;;  %v10138_v17 = vand.u32 %v12154_v50, %v15233_v44  ;;  %v8077_v30 = vld [vmem:[#allocation15 + $0xc58] sm:$0x11] }
0x108e   :  { %v13711_v50 = vld [vmem:[#allocation15 + $0xa98] ss:$112 sps:$4 sm:$0xff]  }
0x108f   :  { %10298 = vmatpush1.bf16.msra.mxu1 %v13557_v20  ;;  %v10174_v20 = vand.u32 %v12166_v3, %v15233_v44  ;;  %v12157_v3 = vcombine.high %v8077_v30, %v8077_v30 }
0x1090   :  { %10556 = vmatpush1.bf16.msra.mxu0 %v13560_v23  ;;  %10299 = vmatprep.subr.bf16.mxu1 %v13565_v15  ;;  %v13641_v23 = vld [vmem:[#allocation15 + $0x1c] ss:$112 sps:$4 sm:$0xff]   ;;  %v13644_v15 = vld [vmem:[#allocation15 + $0x54] ss:$112 sps:$4 sm:$0xff]  }
0x1091   :  { %10557 = vmatprep.subr.bf16.mxu0 %v13568_v10  ;;  %v13639_v10 = vld [vmem:[#allocation15 + $0x18] ss:$112 sps:$4 sm:$0xff]  }
0x1093   :  { %10300 = vmatpush1.bf16.msra.mxu1 %v13563_v11  ;;  %v13642_v11 = vld [vmem:[#allocation15 + $0x50] ss:$112 sps:$4 sm:$0xff]  }
0x1094   :  { %10558 = vmatpush1.bf16.msra.mxu0 %v13566_v16  ;;  %10301 = vmatprep.subr.bf16.mxu1 %v13571_v37  ;;  %v13647_v16 = vld [vmem:[#allocation15 + $0xfc] ss:$112 sps:$4 sm:$0xff]   ;;  %v13650_v37 = vld [vmem:[#allocation15 + $0x134] ss:$112 sps:$4 sm:$0xff]  }
0x1095   :  { %10559 = vmatprep.subr.bf16.mxu0 %v13574_v7  ;;  %v13645_v7 = vld [vmem:[#allocation15 + $0xf8] ss:$112 sps:$4 sm:$0xff]  }
0x1097   :  { %10302 = vmatpush1.bf16.msra.mxu1 %v13569_v28  ;;  %v13648_v28 = vld [vmem:[#allocation15 + $0x130] ss:$112 sps:$4 sm:$0xff]  }
0x1098   :  { %10560 = vmatpush1.bf16.msra.mxu0 %v13572_v35  ;;  %10303 = vmatprep.subr.bf16.mxu1 %v13577_v31  ;;  %v13653_v35 = vld [vmem:[#allocation15 + $0x1dc] ss:$112 sps:$4 sm:$0xff]   ;;  %v13656_v31 = vld [vmem:[#allocation15 + $0x214] ss:$112 sps:$4 sm:$0xff]  }
0x1099   :  { %10561 = vmatprep.subr.bf16.mxu0 %v13580_v29  ;;  %v13651_v29 = vld [vmem:[#allocation15 + $0x1d8] ss:$112 sps:$4 sm:$0xff]  }
0x109b   :  { %10304 = vmatpush1.bf16.msra.mxu1 %v13575_v8  ;;  %v13654_v8 = vld [vmem:[#allocation15 + $0x210] ss:$112 sps:$4 sm:$0xff]  }
0x109c   :  { %10562 = vmatpush1.bf16.msra.mxu0 %v13578_v42  ;;  %10305 = vmatprep.subr.bf16.mxu1 %v13583_v13  ;;  %v13659_v42 = vld [vmem:[#allocation15 + $0x2bc] ss:$112 sps:$4 sm:$0xff]   ;;  %v13662_v13 = vld [vmem:[#allocation15 + $0x2f4] ss:$112 sps:$4 sm:$0xff]  }
0x109d   :  { %10563 = vmatprep.subr.bf16.mxu0 %v13586_v21  ;;  %v13657_v21 = vld [vmem:[#allocation15 + $0x2b8] ss:$112 sps:$4 sm:$0xff]  }
0x109f   :  { %10306 = vmatpush1.bf16.msra.mxu1 %v13581_v25  ;;  %v13660_v25 = vld [vmem:[#allocation15 + $0x2f0] ss:$112 sps:$4 sm:$0xff]  }
0x10a0   :  { %10564 = vmatpush1.bf16.msra.mxu0 %v13584_v33  ;;  %10307 = vmatprep.subr.bf16.mxu1 %v13589_v6  ;;  %v13665_v33 = vld [vmem:[#allocation15 + $0x39c] ss:$112 sps:$4 sm:$0xff]   ;;  %v13668_v6 = vld [vmem:[#allocation15 + $0x3d4] ss:$112 sps:$4 sm:$0xff]  }
0x10a1   :  { %10565 = vmatprep.subr.bf16.mxu0 %v13592_v4  ;;  %v13663_v4 = vld [vmem:[#allocation15 + $0x398] ss:$112 sps:$4 sm:$0xff]  }
0x10a3   :  { %10308 = vmatpush1.bf16.msra.mxu1 %v13587_v38  ;;  %v13666_v38 = vld [vmem:[#allocation15 + $0x3d0] ss:$112 sps:$4 sm:$0xff]  }
0x10a4   :  { %10566 = vmatpush1.bf16.msra.mxu0 %v13590_v39  ;;  %10309 = vmatprep.subr.bf16.mxu1 %v13595_v26  ;;  %v13671_v39 = vld [vmem:[#allocation15 + $0x47c] ss:$112 sps:$4 sm:$0xff]   ;;  %v13674_v26 = vld [vmem:[#allocation15 + $0x4b4] ss:$112 sps:$4 sm:$0xff]  }
0x10a5   :  { %10567 = vmatprep.subr.bf16.mxu0 %v13598_v32  ;;  %v13669_v32 = vld [vmem:[#allocation15 + $0x478] ss:$112 sps:$4 sm:$0xff]  }
0x10a7   :  { %10310 = vmatpush1.bf16.msra.mxu1 %v13593_v36  ;;  %v13672_v36 = vld [vmem:[#allocation15 + $0x4b0] ss:$112 sps:$4 sm:$0xff]  }
0x10a8   :  { %10568 = vmatpush1.bf16.msra.mxu0 %v13596_v43  ;;  %10311 = vmatprep.subr.bf16.mxu1 %v13601_v45  ;;  %v13677_v43 = vld [vmem:[#allocation15 + $0x55c] ss:$112 sps:$4 sm:$0xff]   ;;  %v13680_v45 = vld [vmem:[#allocation15 + $0x594] ss:$112 sps:$4 sm:$0xff]  }
0x10a9   :  { %10569 = vmatprep.subr.bf16.mxu0 %v13604_v47  ;;  %v13675_v47 = vld [vmem:[#allocation15 + $0x558] ss:$112 sps:$4 sm:$0xff]  }
0x10ab   :  { %10312 = vmatpush1.bf16.msra.mxu1 %v13599_v22  ;;  %v13678_v22 = vld [vmem:[#allocation15 + $0x590] ss:$112 sps:$4 sm:$0xff]  }
0x10ac   :  { %10570 = vmatpush1.bf16.msra.mxu0 %v13602_v54  ;;  %10313 = vmatprep.subr.bf16.mxu1 %v13607_v49  ;;  %v13683_v54 = vld [vmem:[#allocation15 + $0x63c] ss:$112 sps:$4 sm:$0xff]   ;;  %v13686_v49 = vld [vmem:[#allocation15 + $0x674] ss:$112 sps:$4 sm:$0xff]  }
0x10ad   :  { %10571 = vmatprep.subr.bf16.mxu0 %v13610_v53  ;;  %v13681_v53 = vld [vmem:[#allocation15 + $0x638] ss:$112 sps:$4 sm:$0xff]  }
0x10af   :  { %10314 = vmatpush1.bf16.msra.mxu1 %v13605_v52  ;;  %v13684_v52 = vld [vmem:[#allocation15 + $0x670] ss:$112 sps:$4 sm:$0xff]  }
0x10b0   :  { %10572 = vmatpush1.bf16.msra.mxu0 %v13608_v41  ;;  %10315 = vmatprep.subr.bf16.mxu1 %v13613_v55  ;;  %v13689_v41 = vld [vmem:[#allocation15 + $0x71c] ss:$112 sps:$4 sm:$0xff]   ;;  %v13692_v55 = vld [vmem:[#allocation15 + $0x754] ss:$112 sps:$4 sm:$0xff]  }
0x10b1   :  { %10573 = vmatprep.subr.bf16.mxu0 %v13616_v63  ;;  %v13687_v63 = vld [vmem:[#allocation15 + $0x718] ss:$112 sps:$4 sm:$0xff]  }
0x10b3   :  { %10316 = vmatpush1.bf16.msra.mxu1 %v13611_v48  ;;  %v13690_v48 = vld [vmem:[#allocation15 + $0x750] ss:$112 sps:$4 sm:$0xff]  }
0x10b4   :  { %10574 = vmatpush1.bf16.msra.mxu0 %v13614_v59  ;;  %10317 = vmatprep.subr.bf16.mxu1 %v13619_v19  ;;  %v13695_v59 = vld [vmem:[#allocation15 + $0x7fc] ss:$112 sps:$4 sm:$0xff]   ;;  %v13698_v19 = vld [vmem:[#allocation15 + $0x834] ss:$112 sps:$4 sm:$0xff]  }
0x10b5   :  { %10575 = vmatprep.subr.bf16.mxu0 %v13622_v34  ;;  %v13693_v34 = vld [vmem:[#allocation15 + $0x7f8] ss:$112 sps:$4 sm:$0xff]  }
0x10b7   :  { %10318 = vmatpush1.bf16.msra.mxu1 %v13617_v61  ;;  %v13696_v61 = vld [vmem:[#allocation15 + $0x830] ss:$112 sps:$4 sm:$0xff]  }
0x10b8   :  { %10576 = vmatpush1.bf16.msra.mxu0 %v13620_v60  ;;  %10319 = vmatprep.subr.bf16.mxu1 %v13625_v1  ;;  %v13701_v60 = vld [vmem:[#allocation15 + $0x8dc] ss:$112 sps:$4 sm:$0xff]   ;;  %v13704_v1 = vld [vmem:[#allocation15 + $0x914] ss:$112 sps:$4 sm:$0xff]  }
0x10b9   :  { %10577 = vmatprep.subr.bf16.mxu0 %v13628_v62  ;;  %v13699_v62 = vld [vmem:[#allocation15 + $0x8d8] ss:$112 sps:$4 sm:$0xff]  }
0x10bb   :  { %10320 = vmatpush1.bf16.msra.mxu1 %v13623_v46  ;;  %v13710_v46 = vld [vmem:[#allocation15 + $0x9f4] ss:$112 sps:$4 sm:$0xff]  }
0x10bc   :  { %10578 = vmatpush1.bf16.msra.mxu0 %v13626_v56  ;;  %10321 = vmatprep.subr.bf16.mxu1 %v13631_v9  ;;  %v13705_v56 = vld [vmem:[#allocation15 + $0x9b8] ss:$112 sps:$4 sm:$0xff]   ;;  %v13708_v9 = vld [vmem:[#allocation15 + $0x9f0] ss:$112 sps:$4 sm:$0xff]  }
0x10bd   :  { %10579 = vmatprep.subr.bf16.mxu0 %v13634_v12  ;;  %v13716_v12 = vld [vmem:[#allocation15 + $0xad4] ss:$112 sps:$4 sm:$0xff]  }
0x10bf   :  { %10322 = vmatpush1.bf16.msra.mxu1 %v13629_v14  ;;  %v8084_v14 = vld [vmem:[#allocation15 + $0xc90] sm:$0x11] }
0x10c0   :  { %10580 = vmatpush1.bf16.msra.mxu0 %v13632_v40  ;;  %10323 = vmatprep.subr.bf16.mxu1 %v10141_v0  ;;  %v13714_v40 = vld [vmem:[#allocation15 + $0xad0] ss:$112 sps:$4 sm:$0xff]   ;;  %v13719_v0 = vld [vmem:[#allocation15 + $0xb7c] ss:$112 sps:$4 sm:$0xff]  }
0x10c1   :  { %10581 = vmatprep.subr.bf16.mxu0 %v10177_v5  ;;  %v13722_v5 = vld [vmem:[#allocation15 + $0xbb4] ss:$112 sps:$4 sm:$0xff]  }
0x10c3   :  { %10324 = vmatpush1.bf16.msra.mxu1 %v10138_v17  ;;  %v12171_v17 = vcombine.high %v8084_v14, %v8084_v14 }
0x10c4   :  { %10582 = vmatpush1.bf16.msra.mxu0 %v10174_v20  ;;  %10338 = vmatprep.subr.bf16.mxu1 %v13641_v23  ;;  %v13717_v20 = vld [vmem:[#allocation15 + $0xb78] ss:$112 sps:$4 sm:$0xff]   ;;  %v12156_v23 = vcombine.low %v8077_v30, %v8077_v30 }
0x10c5   :  { %10639 = vmatprep.subr.bf16.mxu0 %v13644_v15  ;;  %v13720_v15 = vld [vmem:[#allocation15 + $0xbb0] ss:$112 sps:$4 sm:$0xff]  }
0x10c6   :  { %10328 = vmatmul.mubr.bf16.vlgmr.msra.gmra.mrb[176].mxu1 %v15239_v57 }
0x10c7   :  { %10586 = vmatmul.mubr.bf16.vlgmr.msra.gmra.mrb[184].mxu0 %v15239_v57  ;;  %10339 = vmatpush1.bf16.msra.mxu1 %v13639_v10  ;;  %v10147_v10 = vand.u32 %v12157_v3, %v15233_v44 }
0x10c8   :  { %12181 = vmatprep.mubr.msk.bf16.mxu1 %vm10118_vm12, %v15241_v2  ;;  %10640 = vmatpush1.bf16.msra.mxu0 %v13642_v11  ;;  %v12170_v11 = vcombine.low %v8084_v14, %v8084_v14  ;;  %v13781_v14 = vld [vmem:[#allocation15 + $0x808] ss:$112 sps:$4 sm:$0xff]  }
0x10c9   :  { %12188 = vmatprep.mubr.msk.bf16.mxu0 %vm10118_vm12, %v15241_v2  ;;  %10340 = vmatprep.subr.bf16.mxu1 %v13647_v16  ;;  %v10189_v16 = vand.u32 %v12171_v17, %v15233_v44  ;;  %v13789_v17 = vld [vmem:[#allocation15 + $0x8ec] ss:$112 sps:$4 sm:$0xff]  }
0x10ca   :  { %10641 = vmatprep.subr.bf16.mxu0 %v13650_v37  ;;  %v10144_v37 = vand.u32 %v12156_v23, %v15233_v44 }
0x10cb   :  { %10341 = vmatpush1.bf16.msra.mxu1 %v13645_v7  ;;  %v10186_v7 = vand.u32 %v12170_v11, %v15233_v44  ;;  %v13790_v11 = vld [vmem:[#allocation15 + $0x920] ss:$112 sps:$4 sm:$0xff]  }
0x10cc   :  { %10642 = vmatpush1.bf16.msra.mxu0 %v13648_v28  ;;  %10342 = vmatprep.subr.bf16.mxu1 %v13653_v35  ;;  %v13729_v28 = vld [vmem:[#allocation15 + $0x2c] ss:$112 sps:$4 sm:$0xff]   ;;  %v13732_v35 = vld [vmem:[#allocation15 + $0x64] ss:$112 sps:$4 sm:$0xff]  }
0x10cd   :  { %10643 = vmatprep.subr.bf16.mxu0 %v13656_v31  ;;  %v13727_v31 = vld [vmem:[#allocation15 + $0x28] ss:$112 sps:$4 sm:$0xff]  }
0x10cf   :  { %10343 = vmatpush1.bf16.msra.mxu1 %v13651_v29  ;;  %v13730_v29 = vld [vmem:[#allocation15 + $0x60] ss:$112 sps:$4 sm:$0xff]  }
0x10d0   :  { %10644 = vmatpush1.bf16.msra.mxu0 %v13654_v8  ;;  %10344 = vmatprep.subr.bf16.mxu1 %v13659_v42  ;;  %v13735_v8 = vld [vmem:[#allocation15 + $0x10c] ss:$112 sps:$4 sm:$0xff]   ;;  %v13738_v42 = vld [vmem:[#allocation15 + $0x144] ss:$112 sps:$4 sm:$0xff]  }
0x10d1   :  { %10645 = vmatprep.subr.bf16.mxu0 %v13662_v13  ;;  %v13733_v13 = vld [vmem:[#allocation15 + $0x108] ss:$112 sps:$4 sm:$0xff]  }
0x10d3   :  { %10345 = vmatpush1.bf16.msra.mxu1 %v13657_v21  ;;  %v13736_v21 = vld [vmem:[#allocation15 + $0x140] ss:$112 sps:$4 sm:$0xff]  }
0x10d4   :  { %10646 = vmatpush1.bf16.msra.mxu0 %v13660_v25  ;;  %10346 = vmatprep.subr.bf16.mxu1 %v13665_v33  ;;  %v13741_v25 = vld [vmem:[#allocation15 + $0x1ec] ss:$112 sps:$4 sm:$0xff]   ;;  %v13744_v33 = vld [vmem:[#allocation15 + $0x224] ss:$112 sps:$4 sm:$0xff]  }
0x10d5   :  { %10647 = vmatprep.subr.bf16.mxu0 %v13668_v6  ;;  %v13739_v6 = vld [vmem:[#allocation15 + $0x1e8] ss:$112 sps:$4 sm:$0xff]  }
0x10d7   :  { %10347 = vmatpush1.bf16.msra.mxu1 %v13663_v4  ;;  %v13742_v4 = vld [vmem:[#allocation15 + $0x220] ss:$112 sps:$4 sm:$0xff]  }
0x10d8   :  { %10648 = vmatpush1.bf16.msra.mxu0 %v13666_v38  ;;  %10348 = vmatprep.subr.bf16.mxu1 %v13671_v39  ;;  %v13747_v38 = vld [vmem:[#allocation15 + $0x2cc] ss:$112 sps:$4 sm:$0xff]   ;;  %v13750_v39 = vld [vmem:[#allocation15 + $0x304] ss:$112 sps:$4 sm:$0xff]  }
0x10d9   :  { %10649 = vmatprep.subr.bf16.mxu0 %v13674_v26  ;;  %v13745_v26 = vld [vmem:[#allocation15 + $0x2c8] ss:$112 sps:$4 sm:$0xff]  }
0x10db   :  { %10349 = vmatpush1.bf16.msra.mxu1 %v13669_v32  ;;  %v13748_v32 = vld [vmem:[#allocation15 + $0x300] ss:$112 sps:$4 sm:$0xff]  }
0x10dc   :  { %10650 = vmatpush1.bf16.msra.mxu0 %v13672_v36  ;;  %10350 = vmatprep.subr.bf16.mxu1 %v13677_v43  ;;  %v13753_v36 = vld [vmem:[#allocation15 + $0x3ac] ss:$112 sps:$4 sm:$0xff]   ;;  %v13756_v43 = vld [vmem:[#allocation15 + $0x3e4] ss:$112 sps:$4 sm:$0xff]  }
0x10dd   :  { %10651 = vmatprep.subr.bf16.mxu0 %v13680_v45  ;;  %v13751_v45 = vld [vmem:[#allocation15 + $0x3a8] ss:$112 sps:$4 sm:$0xff]  }
0x10df   :  { %10351 = vmatpush1.bf16.msra.mxu1 %v13675_v47  ;;  %v13754_v47 = vld [vmem:[#allocation15 + $0x3e0] ss:$112 sps:$4 sm:$0xff]  }
0x10e0   :  { %10652 = vmatpush1.bf16.msra.mxu0 %v13678_v22  ;;  %10352 = vmatprep.subr.bf16.mxu1 %v13683_v54  ;;  %v13759_v22 = vld [vmem:[#allocation15 + $0x48c] ss:$112 sps:$4 sm:$0xff]   ;;  %v13762_v54 = vld [vmem:[#allocation15 + $0x4c4] ss:$112 sps:$4 sm:$0xff]  }
0x10e1   :  { %10653 = vmatprep.subr.bf16.mxu0 %v13686_v49  ;;  %v13757_v49 = vld [vmem:[#allocation15 + $0x488] ss:$112 sps:$4 sm:$0xff]  }
0x10e3   :  { %10353 = vmatpush1.bf16.msra.mxu1 %v13681_v53  ;;  %v13760_v53 = vld [vmem:[#allocation15 + $0x4c0] ss:$112 sps:$4 sm:$0xff]  }
0x10e4   :  { %10654 = vmatpush1.bf16.msra.mxu0 %v13684_v52  ;;  %10354 = vmatprep.subr.bf16.mxu1 %v13689_v41  ;;  %v13765_v52 = vld [vmem:[#allocation15 + $0x56c] ss:$112 sps:$4 sm:$0xff]   ;;  %v13768_v41 = vld [vmem:[#allocation15 + $0x5a4] ss:$112 sps:$4 sm:$0xff]  }
0x10e5   :  { %10655 = vmatprep.subr.bf16.mxu0 %v13692_v55  ;;  %v13763_v55 = vld [vmem:[#allocation15 + $0x568] ss:$112 sps:$4 sm:$0xff]  }
0x10e7   :  { %10355 = vmatpush1.bf16.msra.mxu1 %v13687_v63  ;;  %v13766_v63 = vld [vmem:[#allocation15 + $0x5a0] ss:$112 sps:$4 sm:$0xff]  }
0x10e8   :  { %10656 = vmatpush1.bf16.msra.mxu0 %v13690_v48  ;;  %10356 = vmatprep.subr.bf16.mxu1 %v13695_v59  ;;  %v13771_v48 = vld [vmem:[#allocation15 + $0x64c] ss:$112 sps:$4 sm:$0xff]   ;;  %v13774_v59 = vld [vmem:[#allocation15 + $0x684] ss:$112 sps:$4 sm:$0xff]  }
0x10e9   :  { %10657 = vmatprep.subr.bf16.mxu0 %v13698_v19  ;;  %v13769_v19 = vld [vmem:[#allocation15 + $0x648] ss:$112 sps:$4 sm:$0xff]  }
0x10eb   :  { %10357 = vmatpush1.bf16.msra.mxu1 %v13693_v34  ;;  %v13772_v34 = vld [vmem:[#allocation15 + $0x680] ss:$112 sps:$4 sm:$0xff]  }
0x10ec   :  { %10658 = vmatpush1.bf16.msra.mxu0 %v13696_v61  ;;  %10358 = vmatprep.subr.bf16.mxu1 %v13701_v60  ;;  %v13777_v61 = vld [vmem:[#allocation15 + $0x72c] ss:$112 sps:$4 sm:$0xff]   ;;  %v13780_v60 = vld [vmem:[#allocation15 + $0x764] ss:$112 sps:$4 sm:$0xff]  }
0x10ed   :  { %10659 = vmatprep.subr.bf16.mxu0 %v13704_v1  ;;  %v13775_v1 = vld [vmem:[#allocation15 + $0x728] ss:$112 sps:$4 sm:$0xff]  }
0x10ef   :  { %10359 = vmatpush1.bf16.msra.mxu1 %v13699_v62  ;;  %v13778_v62 = vld [vmem:[#allocation15 + $0x760] ss:$112 sps:$4 sm:$0xff]  }
0x10f0   :  { %10660 = vmatpush1.bf16.msra.mxu0 %v13702_v18  ;;  %10360 = vmatprep.subr.bf16.mxu1 %v13707_v58  ;;  %v13783_v18 = vld [vmem:[#allocation15 + $0x80c] ss:$112 sps:$4 sm:$0xff]  }
0x10f1   :  { %10661 = vmatprep.subr.bf16.mxu0 %v13710_v46 }
0x10f3   :  { %10361 = vmatpush1.bf16.msra.mxu1 %v13705_v56  ;;  %v13786_v56 = vld [vmem:[#allocation15 + $0x844] ss:$112 sps:$4 sm:$0xff]  }
0x10f4   :  { %10662 = vmatpush1.bf16.msra.mxu0 %v13708_v9  ;;  %10362 = vmatprep.subr.bf16.mxu1 %v13713_v27 }
0x10f5   :  { %10663 = vmatprep.subr.bf16.mxu0 %v13716_v12 }
0x10f7   :  { %10363 = vmatpush1.bf16.msra.mxu1 %v13711_v50 }
0x10f8   :  { %10664 = vmatpush1.bf16.msra.mxu0 %v13714_v40  ;;  %10364 = vmatprep.subr.bf16.mxu1 %v13719_v0 }
0x10f9   :  { %10665 = vmatprep.subr.bf16.mxu0 %v13722_v5  ;;  %v13784_v5 = vld [vmem:[#allocation15 + $0x840] ss:$112 sps:$4 sm:$0xff]  }
0x10fb   :  { %10365 = vmatpush1.bf16.msra.mxu1 %v13717_v20 }
0x10fc   :  { %10666 = vmatpush1.bf16.msra.mxu0 %v13720_v15  ;;  %10366 = vmatprep.subr.bf16.mxu1 %v10147_v10  ;;  %v13792_v15 = vld [vmem:[#allocation15 + $0x924] ss:$112 sps:$4 sm:$0xff]   ;;  %v13787_v10 = vld [vmem:[#allocation15 + $0x8e8] ss:$112 sps:$4 sm:$0xff]  }
0x10fd   :  { %10667 = vmatprep.subr.bf16.mxu0 %v10189_v16  ;;  %v13795_v16 = vld [vmem:[#allocation15 + $0x9cc] ss:$112 sps:$4 sm:$0xff]  }
0x10ff   :  { %10367 = vmatpush1.bf16.msra.mxu1 %v10144_v37  ;;  %v13798_v37 = vld [vmem:[#allocation15 + $0xa04] ss:$112 sps:$4 sm:$0xff]  }
0x1100   :  { %10668 = vmatpush1.bf16.msra.mxu0 %v10186_v7  ;;  %10424 = vmatprep.subr.bf16.mxu1 %v13729_v28  ;;  %v13793_v7 = vld [vmem:[#allocation15 + $0x9c8] ss:$112 sps:$4 sm:$0xff]   ;;  %v13796_v28 = vld [vmem:[#allocation15 + $0xa00] ss:$112 sps:$4 sm:$0xff]  }
0x1101   :  { %10725 = vmatprep.subr.bf16.mxu0 %v13732_v35  ;;  %v13801_v35 = vld [vmem:[#allocation15 + $0xaac] ss:$112 sps:$4 sm:$0xff]  }
0x1102   :  { %10371 = vmatmul.mubr.bf16.vlgmr.msra.gmra.mrb[180].mxu1 %v15239_v57 }
0x1103   :  { %10672 = vmatmul.mubr.bf16.vlgmr.msra.gmra.mrb[188].mxu0 %v15239_v57  ;;  %10425 = vmatpush1.bf16.msra.mxu1 %v13727_v31  ;;  %v13804_v31 = vld [vmem:[#allocation15 + $0xae4] ss:$112 sps:$4 sm:$0xff]  }
0x1104   :  { %12183 = vmatprep.mubr.msk.bf16.mxu1 %vm10118_vm12, %v15241_v2  ;;  %10726 = vmatpush1.bf16.msra.mxu0 %v13730_v29  ;;  %v8079_v29 = vld [vmem:[#allocation15 + $0xc68] sm:$0x11] }
0x1105   :  { %12190 = vmatprep.mubr.msk.bf16.mxu0 %vm10118_vm12, %v15241_v2  ;;  %10426 = vmatprep.subr.bf16.mxu1 %v13735_v8  ;;  %v8086_v8 = vld [vmem:[#allocation15 + $0xca0] sm:$0x11] }
0x1106   :  { %10727 = vmatprep.subr.bf16.mxu0 %v13738_v42  ;;  %v13799_v42 = vld [vmem:[#allocation15 + $0xaa8] ss:$112 sps:$4 sm:$0xff]  }
0x1107   :  { %10427 = vmatpush1.bf16.msra.mxu1 %v13733_v13  ;;  %v13802_v13 = vld [vmem:[#allocation15 + $0xae0] ss:$112 sps:$4 sm:$0xff]  }
0x1108   :  { %10728 = vmatpush1.bf16.msra.mxu0 %v13736_v21  ;;  %10428 = vmatprep.subr.bf16.mxu1 %v13741_v25  ;;  %v13807_v21 = vld [vmem:[#allocation15 + $0xb8c] ss:$112 sps:$4 sm:$0xff]   ;;  %v12161_v25 = vcombine.high %v8079_v29, %v8079_v29 }
0x1109   :  { %10729 = vmatprep.subr.bf16.mxu0 %v13744_v33  ;;  %v13810_v33 = vld [vmem:[#allocation15 + $0xbc4] ss:$112 sps:$4 sm:$0xff]  }
0x110b   :  { %10429 = vmatpush1.bf16.msra.mxu1 %v13739_v6  ;;  %v12175_v6 = vcombine.high %v8086_v8, %v8086_v8 }
0x110c   :  { %10730 = vmatpush1.bf16.msra.mxu0 %v13742_v4  ;;  %10430 = vmatprep.subr.bf16.mxu1 %v13747_v38  ;;  %v13805_v4 = vld [vmem:[#allocation15 + $0xb88] ss:$112 sps:$4 sm:$0xff]   ;;  %v12160_v38 = vcombine.low %v8079_v29, %v8079_v29 }
0x110d   :  { %10731 = vmatprep.subr.bf16.mxu0 %v13750_v39  ;;  %v13808_v39 = vld [vmem:[#allocation15 + $0xbc0] ss:$112 sps:$4 sm:$0xff]  }
0x110f   :  { %10431 = vmatpush1.bf16.msra.mxu1 %v13745_v26  ;;  %v10159_v26 = vand.u32 %v12161_v25, %v15233_v44  ;;  %v13861_v25 = vld [vmem:[#allocation15 + $0x4c] ss:$112 sps:$4 sm:$0xff]  }
0x1110   :  { %10732 = vmatpush1.bf16.msra.mxu0 %v13748_v32  ;;  %10432 = vmatprep.subr.bf16.mxu1 %v13753_v36  ;;  %v12174_v32 = vcombine.low %v8086_v8, %v8086_v8  ;;  %v10201_v36 = vand.u32 %v12175_v6, %v15233_v44  ;;  %v13854_v8 = vld [vmem:[#allocation15 + $0xb98] ss:$112 sps:$4 sm:$0xff]   ;;  %v13864_v6 = vld [vmem:[#allocation15 + $0x12c] ss:$112 sps:$4 sm:$0xff]  }
0x1111   :  { %10733 = vmatprep.subr.bf16.mxu0 %v13756_v43  ;;  %v10156_v43 = vand.u32 %v12160_v38, %v15233_v44  ;;  %v13867_v38 = vld [vmem:[#allocation15 + $0x20c] ss:$112 sps:$4 sm:$0xff]  }
0x1113   :  { %10433 = vmatpush1.bf16.msra.mxu1 %v13751_v45  ;;  %v10198_v45 = vand.u32 %v12174_v32, %v15233_v44  ;;  %v13868_v32 = vld [vmem:[#allocation15 + $0x2e8] ss:$112 sps:$4 sm:$0xff]  }
0x1114   :  { %10734 = vmatpush1.bf16.msra.mxu0 %v13754_v47  ;;  %10434 = vmatprep.subr.bf16.mxu1 %v13759_v22  ;;  %v13817_v47 = vld [vmem:[#allocation15 + $0x3c] ss:$112 sps:$4 sm:$0xff]   ;;  %v13815_v22 = vld [vmem:[#allocation15 + $0x38] ss:$112 sps:$4 sm:$0xff]  }
0x1115   :  { %10735 = vmatprep.subr.bf16.mxu0 %v13762_v54  ;;  %v13820_v54 = vld [vmem:[#allocation15 + $0x11c] ss:$112 sps:$4 sm:$0xff]  }
0x1117   :  { %10435 = vmatpush1.bf16.msra.mxu1 %v13757_v49  ;;  %v13818_v49 = vld [vmem:[#allocation15 + $0x118] ss:$112 sps:$4 sm:$0xff]  }
0x1118   :  { %10736 = vmatpush1.bf16.msra.mxu0 %v13760_v53  ;;  %10436 = vmatprep.subr.bf16.mxu1 %v13765_v52  ;;  %v13823_v53 = vld [vmem:[#allocation15 + $0x1fc] ss:$112 sps:$4 sm:$0xff]   ;;  %v13821_v52 = vld [vmem:[#allocation15 + $0x1f8] ss:$112 sps:$4 sm:$0xff]  }
0x1119   :  { %10737 = vmatprep.subr.bf16.mxu0 %v13768_v41  ;;  %v13826_v41 = vld [vmem:[#allocation15 + $0x2dc] ss:$112 sps:$4 sm:$0xff]  }
0x111b   :  { %10437 = vmatpush1.bf16.msra.mxu1 %v13763_v55  ;;  %v13824_v55 = vld [vmem:[#allocation15 + $0x2d8] ss:$112 sps:$4 sm:$0xff]  }
0x111c   :  { %10738 = vmatpush1.bf16.msra.mxu0 %v13766_v63  ;;  %10438 = vmatprep.subr.bf16.mxu1 %v13771_v48  ;;  %v13829_v63 = vld [vmem:[#allocation15 + $0x3bc] ss:$112 sps:$4 sm:$0xff]   ;;  %v13827_v48 = vld [vmem:[#allocation15 + $0x3b8] ss:$112 sps:$4 sm:$0xff]  }
0x111d   :  { %10739 = vmatprep.subr.bf16.mxu0 %v13774_v59  ;;  %v13832_v59 = vld [vmem:[#allocation15 + $0x49c] ss:$112 sps:$4 sm:$0xff]  }
0x111f   :  { %10439 = vmatpush1.bf16.msra.mxu1 %v13769_v19  ;;  %v13830_v19 = vld [vmem:[#allocation15 + $0x498] ss:$112 sps:$4 sm:$0xff]  }
0x1120   :  { %10740 = vmatpush1.bf16.msra.mxu0 %v13772_v34  ;;  %10440 = vmatprep.subr.bf16.mxu1 %v13777_v61  ;;  %v13835_v34 = vld [vmem:[#allocation15 + $0x57c] ss:$112 sps:$4 sm:$0xff]   ;;  %v13833_v61 = vld [vmem:[#allocation15 + $0x578] ss:$112 sps:$4 sm:$0xff]  }
0x1121   :  { %v15283_v58 = vpop.f32.mrb[168].mxu1  ;;  %v15285_v46 = vpop.f32.mrb[176].mxu0  ;;  %10741 = vmatprep.subr.bf16.mxu0 %v13780_v60  ;;  %v13838_v60 = vld [vmem:[#allocation15 + $0x65c] ss:$112 sps:$4 sm:$0xff]  }
0x1122   :  { %v15287_v9 = vpop.f32.mrb[169].mxu1  ;;  %v15289_v27 = vpop.f32.mrb[177].mxu0 }
0x1123   :  { %10441 = vmatpush1.bf16.msra.mxu1 %v13775_v1  ;;  %v15291_v12 = vpop.f32.mrb[170].mxu1  ;;  %v15293_v30 = vpop.f32.mrb[178].mxu0  ;;  %v13836_v1 = vld [vmem:[#allocation15 + $0x658] ss:$112 sps:$4 sm:$0xff]  }
0x1124   :  { %10742 = vmatpush1.bf16.msra.mxu0 %v13778_v62  ;;  %v10811_v50 = vpack.c.bf16 %v15291_v12, %v15283_v58  ;;  %v10819_v40 = vpack.c.bf16 %v15293_v30, %v15285_v46  ;;  %v10249_v0 = vpop.f32.mrb[171].mxu1  ;;  %v15299_v3 = vpop.f32.mrb[179].mxu0  ;;  %10442 = vmatprep.subr.bf16.mxu1 %v13783_v18  ;;  %v13841_v62 = vld [vmem:[#allocation15 + $0x73c] ss:$112 sps:$4 sm:$0xff]   ;;  %v13839_v18 = vld [vmem:[#allocation15 + $0x738] ss:$112 sps:$4 sm:$0xff]  }
0x1125   :  { %v10812_v20 = vpack.c.bf16 %v10249_v0, %v15287_v9  ;;  %v10820_v23 = vpack.c.bf16 %v15299_v3, %v15289_v27  ;;  %10743 = vmatprep.subr.bf16.mxu0 %v13786_v56  ;;  %v13844_v58 = vld [vmem:[#allocation15 + $0x81c] ss:$112 sps:$4 sm:$0xff]  }
0x1127   :  { %10443 = vmatpush1.bf16.msra.mxu1 %v13781_v14 }
0x1128   :  { %10744 = vmatpush1.bf16.msra.mxu0 %v13784_v5  ;;  %10444 = vmatprep.subr.bf16.mxu1 %v13789_v17 }
0x1129   :  { %10745 = vmatprep.subr.bf16.mxu0 %v13792_v15 }
0x112b   :  { %10445 = vmatpush1.bf16.msra.mxu1 %v13787_v10 }
0x112c   :  { %10746 = vmatpush1.bf16.msra.mxu0 %v13790_v11  ;;  %10446 = vmatprep.subr.bf16.mxu1 %v13795_v16  ;;  %v13845_v11 = vld [vmem:[#allocation15 + $0x8f8] ss:$112 sps:$4 sm:$0xff]   ;;  %v13850_v16 = vld [vmem:[#allocation15 + $0x9dc] ss:$112 sps:$4 sm:$0xff]  }
0x112d   :  { %10747 = vmatprep.subr.bf16.mxu0 %v13798_v37  ;;  %v13848_v37 = vld [vmem:[#allocation15 + $0x9d8] ss:$112 sps:$4 sm:$0xff]  }
0x112f   :  { %10447 = vmatpush1.bf16.msra.mxu1 %v13793_v7  ;;  %v13853_v7 = vld [vmem:[#allocation15 + $0xabc] ss:$112 sps:$4 sm:$0xff]  }
0x1130   :  { %10748 = vmatpush1.bf16.msra.mxu0 %v13796_v28  ;;  %10448 = vmatprep.subr.bf16.mxu1 %v13801_v35  ;;  %v8081_v28 = vld [vmem:[#allocation15 + $0xc78] sm:$0x11] }
0x1131   :  { %10749 = vmatprep.subr.bf16.mxu0 %v13804_v31  ;;  %v13851_v35 = vld [vmem:[#allocation15 + $0xab8] ss:$112 sps:$4 sm:$0xff]   ;;  %v13856_v31 = vld [vmem:[#allocation15 + $0xb9c] ss:$112 sps:$4 sm:$0xff]   ;;  %v12165_v29 = vcombine.high %v8081_v28, %v8081_v28 }
0x1133   :  { %10449 = vmatpush1.bf16.msra.mxu1 %v13799_v42  ;;  %v12164_v42 = vcombine.low %v8081_v28, %v8081_v28  ;;  %v13897_v28 = vld [vmem:[#allocation15 + $0xacc] ss:$112 sps:$4 sm:$0xff]  }
0x1134   :  { %10750 = vmatpush1.bf16.msra.mxu0 %v13802_v13  ;;  %10450 = vmatprep.subr.bf16.mxu1 %v13807_v21  ;;  %v10171_v13 = vand.u32 %v12165_v29, %v15233_v44  ;;  %v13900_v29 = vld [vmem:[#allocation15 + $0xbac] ss:$112 sps:$4 sm:$0xff]  }
0x1135   :  { %10751 = vmatprep.subr.bf16.mxu0 %v13810_v33  ;;  %v10168_v21 = vand.u32 %v12164_v42, %v15233_v44  ;;  %v13859_v33 = vld [vmem:[#allocation15 + $0x48] ss:$112 sps:$4 sm:$0xff]  }
0x1136   :  { %v13898_v42 = vld [vmem:[#allocation15 + $0xba8] ss:$112 sps:$4 sm:$0xff]  }
0x1137   :  { %10451 = vmatpush1.bf16.msra.mxu1 %v13805_v4  ;;  %v13862_v4 = vld [vmem:[#allocation15 + $0x128] ss:$112 sps:$4 sm:$0xff]  }
0x1138   :  { %10752 = vmatpush1.bf16.msra.mxu0 %v13808_v39  ;;  %10452 = vmatprep.subr.bf16.mxu1 %v10159_v26  ;;  %v13865_v39 = vld [vmem:[#allocation15 + $0x208] ss:$112 sps:$4 sm:$0xff]   ;;  %v13870_v26 = vld [vmem:[#allocation15 + $0x2ec] ss:$112 sps:$4 sm:$0xff]  }
0x1139   :  { %10753 = vmatprep.subr.bf16.mxu0 %v10201_v36  ;;  %v13873_v36 = vld [vmem:[#allocation15 + $0x3cc] ss:$112 sps:$4 sm:$0xff]  }
0x113b   :  { %10453 = vmatpush1.bf16.msra.mxu1 %v10156_v43  ;;  %v13871_v43 = vld [vmem:[#allocation15 + $0x3c8] ss:$112 sps:$4 sm:$0xff]  }
0x113c   :  { %10754 = vmatpush1.bf16.msra.mxu0 %v10198_v45  ;;  %10510 = vmatprep.subr.bf16.mxu1 %v13817_v47  ;;  %v13876_v45 = vld [vmem:[#allocation15 + $0x4ac] ss:$112 sps:$4 sm:$0xff]   ;;  %v13874_v47 = vld [vmem:[#allocation15 + $0x4a8] ss:$112 sps:$4 sm:$0xff]  }
0x113d   :  { %10844 = vmatprep.subr.bf16.mxu0 %v10812_v20  ;;  %v13847_v20 = vld [vmem:[#allocation15 + $0x8fc] ss:$112 sps:$4 sm:$0xff]  }
0x113e   :  { %10457 = vmatmul.mubr.bf16.vlgmr.msra.gmra.mrb[184].mxu1 %v15239_v57 }
0x113f   :  { %10758 = vmatmul.mubr.bf16.vlgmr.msra.gmra.mrb[192].mxu0 %v15239_v57  ;;  %10511 = vmatpush1.bf16.msra.mxu1 %v13815_v22  ;;  %v13879_v22 = vld [vmem:[#allocation15 + $0x58c] ss:$112 sps:$4 sm:$0xff]  }
0x1140   :  { %12185 = vmatprep.mubr.msk.bf16.mxu1 %vm10118_vm12, %v15241_v2  ;;  %10845 = vmatpush1.bf16.msra.mxu0 %v10811_v50  ;;  %v13842_v50 = vld [vmem:[#allocation15 + $0x818] ss:$112 sps:$4 sm:$0xff]  }
0x1141   :  { %10846 = vmatprep.subr.bf16.mxu0 %v10819_v40  ;;  %10512 = vmatprep.subr.bf16.mxu1 %v13820_v54  ;;  %v13877_v54 = vld [vmem:[#allocation15 + $0x588] ss:$112 sps:$4 sm:$0xff]  }
0x1142   :  { %10876 = vmatprep.mubr.bf16.mxu0 %v14267_v24 }
0x1143   :  { %10513 = vmatpush1.bf16.msra.mxu1 %v13818_v49  ;;  %v13882_v49 = vld [vmem:[#allocation15 + $0x66c] ss:$112 sps:$4 sm:$0xff]  }
0x1144   :  { %10514 = vmatprep.subr.bf16.mxu1 %v13823_v53  ;;  %v13880_v53 = vld [vmem:[#allocation15 + $0x668] ss:$112 sps:$4 sm:$0xff]  }
0x1147   :  { %10515 = vmatpush1.bf16.msra.mxu1 %v13821_v52  ;;  %v13885_v52 = vld [vmem:[#allocation15 + $0x74c] ss:$112 sps:$4 sm:$0xff]  }
0x1148   :  { %10516 = vmatprep.subr.bf16.mxu1 %v13826_v41  ;;  %v13883_v41 = vld [vmem:[#allocation15 + $0x748] ss:$112 sps:$4 sm:$0xff]  }
0x114b   :  { %10517 = vmatpush1.bf16.msra.mxu1 %v13824_v55  ;;  %v13888_v55 = vld [vmem:[#allocation15 + $0x82c] ss:$112 sps:$4 sm:$0xff]  }
0x114c   :  { %10518 = vmatprep.subr.bf16.mxu1 %v13829_v63 }
0x114f   :  { %10519 = vmatpush1.bf16.msra.mxu1 %v13827_v48 }
0x1150   :  { %10520 = vmatprep.subr.bf16.mxu1 %v13832_v59 }
0x1153   :  { %10521 = vmatpush1.bf16.msra.mxu1 %v13830_v19 }
0x1154   :  { %10522 = vmatprep.subr.bf16.mxu1 %v13835_v34 }
0x1157   :  { %10523 = vmatpush1.bf16.msra.mxu1 %v13833_v61  ;;  %v13886_v61 = vld [vmem:[#allocation15 + $0x828] ss:$112 sps:$4 sm:$0xff]  }
0x1158   :  { %10524 = vmatprep.subr.bf16.mxu1 %v13838_v60 }
0x115b   :  { %10525 = vmatpush1.bf16.msra.mxu1 %v13836_v1 }
0x115c   :  { %10526 = vmatprep.subr.bf16.mxu1 %v13841_v62 }
0x115d   :  { %v15319_v46 = vpop.f32.mrb[172].mxu1  ;;  %v15321_v56 = vpop.f32.mrb[180].mxu0 }
0x115e   :  { %v15323_v9 = vpop.f32.mrb[173].mxu1  ;;  %v15325_v12 = vpop.f32.mrb[181].mxu0 }
0x115f   :  { %v15327_v30 = vpop.f32.mrb[174].mxu1  ;;  %v15329_v14 = vpop.f32.mrb[182].mxu0  ;;  %10527 = vmatpush1.bf16.msra.mxu1 %v13839_v18  ;;  %v13891_v18 = vld [vmem:[#allocation15 + $0x90c] ss:$112 sps:$4 sm:$0xff]  }
0x1160   :  { %v10813_v40 = vpack.c.bf16 %v15327_v30, %v15319_v46  ;;  %v10823_v0 = vpack.c.bf16 %v15329_v14, %v15321_v56  ;;  %v15335_v5 = vpop.f32.mrb[175].mxu1  ;;  %v15337_v17 = vpop.f32.mrb[183].mxu0  ;;  %10528 = vmatprep.subr.bf16.mxu1 %v13844_v58 }
0x1161   :  { %v10814_v15 = vpack.c.bf16 %v15335_v5, %v15323_v9  ;;  %v10824_v10 = vpack.c.bf16 %v15337_v17, %v15325_v12  ;;  %v11011_v56 = vpop.permute.xlu0 %11010 }
0x1163   :  { %10529 = vmatpush1.bf16.msra.mxu1 %v13842_v50 }
0x1164   :  { %10530 = vmatprep.subr.bf16.mxu1 %v13847_v20 }
0x1167   :  { %10531 = vmatpush1.bf16.msra.mxu1 %v13845_v11 }
0x1168   :  { %10532 = vmatprep.subr.bf16.mxu1 %v13850_v16  ;;  %v13889_v16 = vld [vmem:[#allocation15 + $0x908] ss:$112 sps:$4 sm:$0xff]  }
0x116b   :  { %10533 = vmatpush1.bf16.msra.mxu1 %v13848_v37  ;;  %v13894_v37 = vld [vmem:[#allocation15 + $0x9ec] ss:$112 sps:$4 sm:$0xff]  }
0x116c   :  { %10534 = vmatprep.subr.bf16.mxu1 %v13853_v7  ;;  %v13892_v7 = vld [vmem:[#allocation15 + $0x9e8] ss:$112 sps:$4 sm:$0xff]  }
0x116f   :  { %10535 = vmatpush1.bf16.msra.mxu1 %v13851_v35  ;;  %v8083_v35 = vld [vmem:[#allocation15 + $0xc88] sm:$0x11] }
0x1170   :  { %10536 = vmatprep.subr.bf16.mxu1 %v13856_v31  ;;  %v13895_v31 = vld [vmem:[#allocation15 + $0xac8] ss:$112 sps:$4 sm:$0xff]  }
0x1173   :  { %10537 = vmatpush1.bf16.msra.mxu1 %v13854_v8  ;;  %v12169_v8 = vcombine.high %v8083_v35, %v8083_v35 }
0x1174   :  { %10538 = vmatprep.subr.bf16.mxu1 %v10171_v13  ;;  %v12168_v13 = vcombine.low %v8083_v35, %v8083_v35  ;;  %v13930_v35 = vld [vmem:[#allocation15 + $0x838] ss:$112 sps:$4 sm:$0xff]  }
0x1177   :  { %10539 = vmatpush1.bf16.msra.mxu1 %v10168_v21  ;;  %v10183_v21 = vand.u32 %v12169_v8, %v15233_v44 }
0x1178   :  { %10596 = vmatprep.subr.bf16.mxu1 %v13861_v25  ;;  %v10180_v25 = vand.u32 %v12168_v13, %v15233_v44 }
0x117a   :  { %10543 = vmatmul.mubr.bf16.vlgmr.msra.gmra.mrb[188].mxu1 %v15239_v57 }
0x117b   :  { %10597 = vmatpush1.bf16.msra.mxu1 %v13859_v33  ;;  %12187 = vmatprep.mubr.msk.bf16.mxu1 %vm10118_vm12, %v15241_v2  ;;  %v13905_v33 = vld [vmem:[#allocation15 + $0x5c] ss:$112 sps:$4 sm:$0xff]  }
0x117c   :  { %10598 = vmatprep.subr.bf16.mxu1 %v13864_v6  ;;  %v13903_v6 = vld [vmem:[#allocation15 + $0x58] ss:$112 sps:$4 sm:$0xff]  }
0x117f   :  { %10599 = vmatpush1.bf16.msra.mxu1 %v13862_v4  ;;  %v13908_v4 = vld [vmem:[#allocation15 + $0x13c] ss:$112 sps:$4 sm:$0xff]  }
0x1180   :  { %10600 = vmatprep.subr.bf16.mxu1 %v13867_v38  ;;  %v13906_v38 = vld [vmem:[#allocation15 + $0x138] ss:$112 sps:$4 sm:$0xff]  }
0x1183   :  { %10601 = vmatpush1.bf16.msra.mxu1 %v13865_v39  ;;  %v13911_v39 = vld [vmem:[#allocation15 + $0x21c] ss:$112 sps:$4 sm:$0xff]  }
0x1184   :  { %10602 = vmatprep.subr.bf16.mxu1 %v13870_v26  ;;  %v13909_v26 = vld [vmem:[#allocation15 + $0x218] ss:$112 sps:$4 sm:$0xff]  }
0x1187   :  { %10603 = vmatpush1.bf16.msra.mxu1 %v13868_v32  ;;  %v13914_v32 = vld [vmem:[#allocation15 + $0x2fc] ss:$112 sps:$4 sm:$0xff]  }
0x1188   :  { %10604 = vmatprep.subr.bf16.mxu1 %v13873_v36  ;;  %v13912_v36 = vld [vmem:[#allocation15 + $0x2f8] ss:$112 sps:$4 sm:$0xff]  }
0x118b   :  { %10605 = vmatpush1.bf16.msra.mxu1 %v13871_v43  ;;  %v13917_v43 = vld [vmem:[#allocation15 + $0x3dc] ss:$112 sps:$4 sm:$0xff]  }
0x118c   :  { %10606 = vmatprep.subr.bf16.mxu1 %v13876_v45  ;;  %v13915_v45 = vld [vmem:[#allocation15 + $0x3d8] ss:$112 sps:$4 sm:$0xff]  }
0x118f   :  { %10607 = vmatpush1.bf16.msra.mxu1 %v13874_v47  ;;  %v13920_v47 = vld [vmem:[#allocation15 + $0x4bc] ss:$112 sps:$4 sm:$0xff]  }
0x1190   :  { %10608 = vmatprep.subr.bf16.mxu1 %v13879_v22  ;;  %v13918_v22 = vld [vmem:[#allocation15 + $0x4b8] ss:$112 sps:$4 sm:$0xff]  }
0x1193   :  { %10609 = vmatpush1.bf16.msra.mxu1 %v13877_v54  ;;  %v13923_v54 = vld [vmem:[#allocation15 + $0x59c] ss:$112 sps:$4 sm:$0xff]  }
0x1194   :  { %10610 = vmatprep.subr.bf16.mxu1 %v13882_v49  ;;  %v13921_v49 = vld [vmem:[#allocation15 + $0x598] ss:$112 sps:$4 sm:$0xff]  }
0x1197   :  { %10611 = vmatpush1.bf16.msra.mxu1 %v13880_v53  ;;  %v13926_v53 = vld [vmem:[#allocation15 + $0x67c] ss:$112 sps:$4 sm:$0xff]  }
0x1198   :  { %10612 = vmatprep.subr.bf16.mxu1 %v13885_v52  ;;  %v13924_v52 = vld [vmem:[#allocation15 + $0x678] ss:$112 sps:$4 sm:$0xff]  }
0x1199   :  { %v15348_v63 = vpop.f32.mrb[176].mxu1 }
0x119a   :  { %v15350_v48 = vpop.f32.mrb[184].mxu0  ;;  %v15352_v59 = vpop.f32.mrb[177].mxu1 }
0x119b   :  { %v15354_v19 = vpop.f32.mrb[185].mxu0  ;;  %v15356_v34 = vpop.f32.mrb[178].mxu1  ;;  %10613 = vmatpush1.bf16.msra.mxu1 %v13883_v41  ;;  %v13929_v41 = vld [vmem:[#allocation15 + $0x75c] ss:$112 sps:$4 sm:$0xff]  }
0x119c   :  { %v10815_v60 = vpack.c.bf16 %v15356_v34, %v15348_v63  ;;  %v15360_v1 = vpop.f32.mrb[186].mxu0  ;;  %v15362_v62 = vpop.f32.mrb[179].mxu1  ;;  %10614 = vmatprep.subr.bf16.mxu1 %v13888_v55  ;;  %v13927_v55 = vld [vmem:[#allocation15 + $0x758] ss:$112 sps:$4 sm:$0xff]  }
0x119d   :  { %v10827_v58 = vpack.c.bf16 %v15360_v1, %v15350_v48  ;;  %v10816_v50 = vpack.c.bf16 %v15362_v62, %v15352_v59  ;;  %v15368_v20 = vpop.f32.mrb[187].mxu0 }
0x119e   :  { %v10828_v11 = vpack.c.bf16 %v15368_v20, %v15354_v19  ;;  %v14275_v20 = vmov 1983009808  }
0x119f   :  { %10615 = vmatpush1.bf16.msra.mxu1 %v13886_v61  ;;  %v13932_v61 = vld [vmem:[#allocation15 + $0x83c] ss:$112 sps:$4 sm:$0xff]  }
0x11a0   :  { %10616 = vmatprep.subr.bf16.mxu1 %v13891_v18 }
0x11a3   :  { %10617 = vmatpush1.bf16.msra.mxu1 %v13889_v16 }
0x11a4   :  { %10618 = vmatprep.subr.bf16.mxu1 %v13894_v37 }
0x11a7   :  { %10619 = vmatpush1.bf16.msra.mxu1 %v13892_v7 }
0x11a8   :  { %10620 = vmatprep.subr.bf16.mxu1 %v13897_v28 }
0x11ab   :  { %10621 = vmatpush1.bf16.msra.mxu1 %v13895_v31 }
0x11ac   :  { %10622 = vmatprep.subr.bf16.mxu1 %v13900_v29 }
0x11af   :  { %10623 = vmatpush1.bf16.msra.mxu1 %v13898_v42  ;;  %v13935_v42 = vld [vmem:[#allocation15 + $0x91c] ss:$112 sps:$4 sm:$0xff]  }
0x11b0   :  { %10624 = vmatprep.subr.bf16.mxu1 %v10183_v21 }
0x11b3   :  { %10625 = vmatpush1.bf16.msra.mxu1 %v10180_v25 }
0x11b4   :  { %10682 = vmatprep.subr.bf16.mxu1 %v13905_v33 }
0x11b6   :  { %10629 = vmatmul.mubr.bf16.vlgmr.msra.gmra.mrb[192].mxu1 %v15239_v57 }
0x11b7   :  { %10683 = vmatpush1.bf16.msra.mxu1 %v13903_v6  ;;  %12189 = vmatprep.mubr.msk.bf16.mxu1 %vm10118_vm12, %v15241_v2  ;;  %v13933_v6 = vld [vmem:[#allocation15 + $0x918] ss:$112 sps:$4 sm:$0xff]  }
0x11b8   :  { %10684 = vmatprep.subr.bf16.mxu1 %v13908_v4  ;;  %v13938_v4 = vld [vmem:[#allocation15 + $0x9fc] ss:$112 sps:$4 sm:$0xff]  }
0x11bb   :  { %10685 = vmatpush1.bf16.msra.mxu1 %v13906_v38  ;;  %v13936_v38 = vld [vmem:[#allocation15 + $0x9f8] ss:$112 sps:$4 sm:$0xff]  }
0x11bc   :  { %10686 = vmatprep.subr.bf16.mxu1 %v13911_v39  ;;  %v13941_v39 = vld [vmem:[#allocation15 + $0xadc] ss:$112 sps:$4 sm:$0xff]  }
0x11bf   :  { %10687 = vmatpush1.bf16.msra.mxu1 %v13909_v26  ;;  %v8085_v26 = vld [vmem:[#allocation15 + $0xc98] sm:$0x11] }
0x11c0   :  { %10688 = vmatprep.subr.bf16.mxu1 %v13914_v32  ;;  %v13939_v32 = vld [vmem:[#allocation15 + $0xad8] ss:$112 sps:$4 sm:$0xff]  }
0x11c3   :  { %10689 = vmatpush1.bf16.msra.mxu1 %v13912_v36  ;;  %v13944_v36 = vld [vmem:[#allocation15 + $0xbbc] ss:$112 sps:$4 sm:$0xff]  }
0x11c4   :  { %10690 = vmatprep.subr.bf16.mxu1 %v13917_v43  ;;  %v12173_v43 = vcombine.high %v8085_v26, %v8085_v26 }
0x11c7   :  { %10691 = vmatpush1.bf16.msra.mxu1 %v13915_v45  ;;  %v13942_v45 = vld [vmem:[#allocation15 + $0xbb8] ss:$112 sps:$4 sm:$0xff]  }
0x11c8   :  { %10692 = vmatprep.subr.bf16.mxu1 %v13920_v47  ;;  %v12172_v47 = vcombine.low %v8085_v26, %v8085_v26  ;;  %v13973_v26 = vld [vmem:[#allocation15 + $0x76c] ss:$112 sps:$4 sm:$0xff]  }
0x11cb   :  { %10693 = vmatpush1.bf16.msra.mxu1 %v13918_v22  ;;  %v10195_v22 = vand.u32 %v12173_v43, %v15233_v44 }
0x11cc   :  { %10694 = vmatprep.subr.bf16.mxu1 %v13923_v54  ;;  %v10192_v54 = vand.u32 %v12172_v47, %v15233_v44 }
0x11cf   :  { %10695 = vmatpush1.bf16.msra.mxu1 %v13921_v49  ;;  %v13949_v49 = vld [vmem:[#allocation15 + $0x6c] ss:$112 sps:$4 sm:$0xff]  }
0x11d0   :  { %10696 = vmatprep.subr.bf16.mxu1 %v13926_v53  ;;  %v13947_v53 = vld [vmem:[#allocation15 + $0x68] ss:$112 sps:$4 sm:$0xff]  }
0x11d3   :  { %10697 = vmatpush1.bf16.msra.mxu1 %v13924_v52  ;;  %v13952_v52 = vld [vmem:[#allocation15 + $0x14c] ss:$112 sps:$4 sm:$0xff]  }
0x11d4   :  { %10698 = vmatprep.subr.bf16.mxu1 %v13929_v41  ;;  %v13950_v41 = vld [vmem:[#allocation15 + $0x148] ss:$112 sps:$4 sm:$0xff]  }
0x11d5   :  { %v15377_v18 = vpop.f32.mrb[180].mxu1 }
0x11d6   :  { %v15379_v16 = vpop.f32.mrb[188].mxu0  ;;  %v10374_v37 = vpop.f32.mrb[181].mxu1 }
0x11d7   :  { %v15381_v7 = vpop.f32.mrb[189].mxu0  ;;  %v15383_v28 = vpop.f32.mrb[182].mxu1  ;;  %10699 = vmatpush1.bf16.msra.mxu1 %v13927_v55  ;;  %v13955_v55 = vld [vmem:[#allocation15 + $0x22c] ss:$112 sps:$4 sm:$0xff]  }
0x11d8   :  { %v10817_v31 = vpack.c.bf16 %v15383_v28, %v15377_v18  ;;  %v15387_v29 = vpop.f32.mrb[190].mxu0  ;;  %v10378_v8 = vpop.f32.mrb[183].mxu1  ;;  %10700 = vmatprep.subr.bf16.mxu1 %v13932_v61  ;;  %v13953_v61 = vld [vmem:[#allocation15 + $0x228] ss:$112 sps:$4 sm:$0xff]  }
0x11d9   :  { %v10831_v13 = vpack.c.bf16 %v15387_v29, %v15379_v16  ;;  %v10818_v21 = vpack.c.bf16 %v10378_v8, %v10374_v37  ;;  %v15391_v25 = vpop.f32.mrb[191].mxu0  ;;  %v13958_v37 = vld [vmem:[#allocation15 + $0x30c] ss:$112 sps:$4 sm:$0xff]  }
0x11da   :  { %v10832_v33 = vpack.c.bf16 %v15391_v25, %v15381_v7  ;;  %v13961_v8 = vld [vmem:[#allocation15 + $0x3ec] ss:$112 sps:$4 sm:$0xff]   ;;  %v11039_v7 = vlaneseq }
0x11db   :  { %10701 = vmatpush1.bf16.msra.mxu1 %v13930_v35  ;;  %10847 = vmatpush1.bf16.msra.mxu0 %v10818_v21  ;;  %v13956_v35 = vld [vmem:[#allocation15 + $0x308] ss:$112 sps:$4 sm:$0xff]   ;;  %v13964_v21 = vld [vmem:[#allocation15 + $0x4cc] ss:$112 sps:$4 sm:$0xff]  }
0x11dc   :  { %10702 = vmatprep.subr.bf16.mxu1 %v13935_v42  ;;  %v13959_v42 = vld [vmem:[#allocation15 + $0x3e8] ss:$112 sps:$4 sm:$0xff]  }
0x11df   :  { %10703 = vmatpush1.bf16.msra.mxu1 %v13933_v6  ;;  %v13962_v6 = vld [vmem:[#allocation15 + $0x4c8] ss:$112 sps:$4 sm:$0xff]  }
0x11e0   :  { %10704 = vmatprep.subr.bf16.mxu1 %v13938_v4  ;;  %v13967_v4 = vld [vmem:[#allocation15 + $0x5ac] ss:$112 sps:$4 sm:$0xff]  }
0x11e3   :  { %10705 = vmatpush1.bf16.msra.mxu1 %v13936_v38  ;;  %v13970_v38 = vld [vmem:[#allocation15 + $0x68c] ss:$112 sps:$4 sm:$0xff]  }
0x11e4   :  { %10706 = vmatprep.subr.bf16.mxu1 %v13941_v39  ;;  %v13968_v39 = vld [vmem:[#allocation15 + $0x688] ss:$112 sps:$4 sm:$0xff]  }
0x11e7   :  { %10707 = vmatpush1.bf16.msra.mxu1 %v13939_v32  ;;  %v13971_v32 = vld [vmem:[#allocation15 + $0x768] ss:$112 sps:$4 sm:$0xff]  }
0x11e8   :  { %10708 = vmatprep.subr.bf16.mxu1 %v13944_v36  ;;  %v13976_v36 = vld [vmem:[#allocation15 + $0x84c] ss:$112 sps:$4 sm:$0xff]  }
0x11eb   :  { %10709 = vmatpush1.bf16.msra.mxu1 %v13942_v45 }
0x11ec   :  { %10710 = vmatprep.subr.bf16.mxu1 %v10195_v22 }
0x11ef   :  { %10711 = vmatpush1.bf16.msra.mxu1 %v10192_v54 }
0x11f0   :  { %10768 = vmatprep.subr.bf16.mxu1 %v13949_v49  ;;  %v13974_v49 = vld [vmem:[#allocation15 + $0x848] ss:$112 sps:$4 sm:$0xff]  }
0x11f2   :  { %10715 = vmatmul.mubr.bf16.vlgmr.msra.gmra.mrb[196].mxu1 %v15239_v57 }
0x11f3   :  { %10769 = vmatpush1.bf16.msra.mxu1 %v13947_v53  ;;  %12191 = vmatprep.mubr.msk.bf16.mxu1 %vm10118_vm12, %v15241_v2  ;;  %v13965_v2 = vld [vmem:[#allocation15 + $0x5a8] ss:$112 sps:$4 sm:$0xff]  }
0x11f4   :  { %10770 = vmatprep.subr.bf16.mxu1 %v13952_v52 }
0x11f7   :  { %10771 = vmatpush1.bf16.msra.mxu1 %v13950_v41 }
0x11f8   :  { %10772 = vmatprep.subr.bf16.mxu1 %v13955_v55  ;;  %v13979_v55 = vld [vmem:[#allocation15 + $0x92c] ss:$112 sps:$4 sm:$0xff]  }
0x11fb   :  { %10773 = vmatpush1.bf16.msra.mxu1 %v13953_v61 }
0x11fc   :  { %10774 = vmatprep.subr.bf16.mxu1 %v13958_v37 }
0x11ff   :  { %10775 = vmatpush1.bf16.msra.mxu1 %v13956_v35 }
0x1200   :  { %10776 = vmatprep.subr.bf16.mxu1 %v13961_v8 }
0x1203   :  { %10777 = vmatpush1.bf16.msra.mxu1 %v13959_v42  ;;  %v13977_v42 = vld [vmem:[#allocation15 + $0x928] ss:$112 sps:$4 sm:$0xff]  }
0x1204   :  { %10778 = vmatprep.subr.bf16.mxu1 %v13964_v21  ;;  %v13982_v21 = vld [vmem:[#allocation15 + $0xa0c] ss:$112 sps:$4 sm:$0xff]  }
0x1207   :  { %10779 = vmatpush1.bf16.msra.mxu1 %v13962_v6  ;;  %v13980_v6 = vld [vmem:[#allocation15 + $0xa08] ss:$112 sps:$4 sm:$0xff]  }
0x1208   :  { %10780 = vmatprep.subr.bf16.mxu1 %v13967_v4  ;;  %v13985_v4 = vld [vmem:[#allocation15 + $0xaec] ss:$112 sps:$4 sm:$0xff]  }
0x120b   :  { %10781 = vmatpush1.bf16.msra.mxu1 %v13965_v2  ;;  %v8087_v2 = vld [vmem:[#allocation15 + $0xca8] sm:$0x11] }
0x120c   :  { %10782 = vmatprep.subr.bf16.mxu1 %v13970_v38  ;;  %v13983_v38 = vld [vmem:[#allocation15 + $0xae8] ss:$112 sps:$4 sm:$0xff]  }
0x120f   :  { %10783 = vmatpush1.bf16.msra.mxu1 %v13968_v39  ;;  %v13988_v39 = vld [vmem:[#allocation15 + $0xbcc] ss:$112 sps:$4 sm:$0xff]  }
0x1210   :  { %10784 = vmatprep.subr.bf16.mxu1 %v13973_v26  ;;  %v12177_v26 = vcombine.high %v8087_v2, %v8087_v2 }
0x1211   :  { %v15400_v43 = vpop.f32.mrb[184].mxu1 }
0x1212   :  { %v15402_v45 = vpop.f32.mrb[192].mxu0  ;;  %v15404_v47 = vpop.f32.mrb[185].mxu1  ;;  %v10207_v8 = vand.u32 %v12177_v26, %v15233_v44 }
0x1213   :  { %v15406_v22 = vpop.f32.mrb[193].mxu0  ;;  %v15408_v54 = vpop.f32.mrb[186].mxu1  ;;  %10785 = vmatpush1.bf16.msra.mxu1 %v13971_v32  ;;  %v13986_v32 = vld [vmem:[#allocation15 + $0xbc8] ss:$112 sps:$4 sm:$0xff]  }
0x1214   :  { %v10821_v53 = vpack.c.bf16 %v15408_v54, %v15400_v43  ;;  %v15412_v52 = vpop.f32.mrb[194].mxu0  ;;  %v15414_v41 = vpop.f32.mrb[187].mxu1  ;;  %10786 = vmatprep.subr.bf16.mxu1 %v13976_v36  ;;  %v12176_v36 = vcombine.low %v8087_v2, %v8087_v2  ;;  %v10839_v2 = vld [vmem:[#allocation16] sm:$0x1] }
0x1215   :  { %v10835_v61 = vpack.c.bf16 %v15412_v52, %v15402_v45  ;;  %v10822_v37 = vpack.c.bf16 %v15414_v41, %v15404_v47  ;;  %v15420_v35 = vpop.f32.mrb[195].mxu0 }
0x1217   :  { %10787 = vmatpush1.bf16.msra.mxu1 %v13974_v49  ;;  %v10204_v49 = vand.u32 %v12176_v36, %v15233_v44 }
0x1218   :  { %10788 = vmatprep.subr.bf16.mxu1 %v13979_v55 }
0x121b   :  { %10789 = vmatpush1.bf16.msra.mxu1 %v13977_v42 }
0x121c   :  { %10790 = vmatprep.subr.bf16.mxu1 %v13982_v21 }
0x121f   :  { %10791 = vmatpush1.bf16.msra.mxu1 %v13980_v6 }
0x1220   :  { %10792 = vmatprep.subr.bf16.mxu1 %v13985_v4 }
0x1223   :  { %10793 = vmatpush1.bf16.msra.mxu1 %v13983_v38 }
0x1224   :  { %10794 = vmatprep.subr.bf16.mxu1 %v13988_v39 }
0x1227   :  { %10795 = vmatpush1.bf16.msra.mxu1 %v13986_v32 }
0x1228   :  { %10796 = vmatprep.subr.bf16.mxu1 %v10207_v8 }
0x122b   :  { %10797 = vmatpush1.bf16.msra.mxu1 %v10204_v49 }
0x122c   :  { %12376 = vmatprep.subr.bf16.mxu1 %v14268_v51 }
0x122e   :  { %10801 = vmatmul.mubr.bf16.vlgmr.msra.gmra.mrb[200].mxu1 %v15239_v57 }
0x122f   :  { %12377 = vmatpush3.bf16.msra.mxu1 %v10817_v31  ;;  %12384 = vmatprep.mubr.msk.bf16.mxu1 %vm14269_vm1, %v14268_v51  ;;  %vm11073_vm1 = vmor %vm11072_vm0, %vm11071_vm15 }
0x1230   :  { %12378 = vmatprep.subr.bf16.mxu1 %v14268_v51 }
0x1233   :  { %12379 = vmatpush3.bf16.msra.mxu1 %v10824_v10 }
0x1234   :  { %12380 = vmatprep.subr.bf16.mxu1 %v14268_v51 }
0x1237   :  { %12381 = vmatpush3.bf16.msra.mxu1 %v10831_v13 }
0x1238   :  { %12382 = vmatprep.subr.bf16.mxu1 %v14268_v51 }
0x124d   :  { %v10544_v44 = vpop.f32.mrb[188].mxu1 }
0x124e   :  { %v10546_v57 = vpop.f32.mrb[189].mxu1 }
0x124f   :  { %v10548_v18 = vpop.f32.mrb[190].mxu1 }
0x1250   :  { %v10825_v28 = vpack.c.bf16 %v10548_v18, %v10544_v44  ;;  %v10550_v31 = vpop.f32.mrb[191].mxu1 }
0x1251   :  { %v10826_v55 = vpack.c.bf16 %v10550_v31, %v10546_v57 }
0x1253   :  { %10848 = vmatprep.subr.bf16.mxu0 %v10826_v55 }
0x1254   :  { %10849 = vmatpush1.bf16.msra.mxu0 %v10825_v28 }
0x1289   :  { %v10630_v8 = vpop.f32.mrb[192].mxu1 }
0x128a   :  { %v10632_v42 = vpop.f32.mrb[193].mxu1 }
0x128b   :  { %v10634_v12 = vpop.f32.mrb[194].mxu1 }
0x128c   :  { %v10829_v17 = vpack.c.bf16 %v10634_v12, %v10630_v8  ;;  %v10636_v10 = vpop.f32.mrb[195].mxu1 }
0x128d   :  { %v10830_v21 = vpack.c.bf16 %v10636_v10, %v10632_v42 }
0x12c5   :  { %v10716_v6 = vpop.f32.mrb[196].mxu1 }
0x12c6   :  { %v10718_v4 = vpop.f32.mrb[197].mxu1 }
0x12c7   :  { %v10720_v16 = vpop.f32.mrb[198].mxu1 }
0x12c8   :  { %v10833_v29 = vpack.c.bf16 %v10720_v16, %v10716_v6  ;;  %v10722_v13 = vpop.f32.mrb[199].mxu1 }
0x12c9   :  { %v10834_v51 = vpack.c.bf16 %v10722_v13, %v10718_v4 }
0x12ca   :  { %10850 = vmatprep.subr.bf16.mxu0 %v10833_v29 }
0x12cb   :  { %10851 = vmatpush1.bf16.msra.mxu0 %v10832_v33  ;;  %v11040_v33 = vshrl.u32 %v11039_v7, 7 }
0x12cc   :  { %10885 = vmatprep.subr.bf16.mxu0 %v10814_v15 }
0x12ce   :  { %12192 = vmatmul.mubr.msk.bf16.vlgmr.msra.gmra.mrb[196].mxu0 %vm10840_vm13, %v10839_v2 }
0x12cf   :  { %10886 = vmatpush1.bf16.msra.mxu0 %v10813_v40  ;;  %10917 = vmatprep.mubr.bf16.mxu0 %v14267_v24 }
0x12d0   :  { %10887 = vmatprep.subr.bf16.mxu0 %v10821_v53 }
0x12d3   :  { %10888 = vmatpush1.bf16.msra.mxu0 %v10820_v23 }
0x12d4   :  { %10889 = vmatprep.subr.bf16.mxu0 %v10828_v11  ;;  %v11037_v11 = vunpack.c.l.s4 %v14275_v20 }
0x12d6   :  { %v11038_v25 = vunpack.c.0.s8 %v11037_v11 }
0x12d7   :  { %10890 = vmatpush1.bf16.msra.mxu0 %v10827_v58 }
0x12d8   :  { %10891 = vmatprep.subr.bf16.mxu0 %v10835_v61  ;;  %v11041_v45 = vsub.s32 %v11038_v25, %v11040_v33 }
0x12db   :  { %10892 = vmatpush1.bf16.msra.mxu0 %v10834_v51 }
0x12dc   :  { %10926 = vmatprep.subr.bf16.mxu0 %v10816_v50 }
0x12de   :  { %12193 = vmatmul.mubr.msk.bf16.vlgmr.msra.gmra.mrb[200].mxu0 %vm10840_vm13, %v10839_v2 }
0x12df   :  { %10927 = vmatpush1.bf16.msra.mxu0 %v10815_v60  ;;  %10958 = vmatprep.mubr.bf16.mxu0 %v14267_v24  ;;  %v15532_v24 = vpack.c.bf16 %v15420_v35, %v15406_v22 }
0x12e0   :  { %10928 = vmatprep.subr.bf16.mxu0 %v10823_v0 }
0x12e3   :  { %10929 = vmatpush1.bf16.msra.mxu0 %v10822_v37 }
0x12e4   :  { %10930 = vmatprep.subr.bf16.mxu0 %v10830_v21 }
0x12e7   :  { %10931 = vmatpush1.bf16.msra.mxu0 %v10829_v17 }
0x1301   :  { %v10802_v27 = vpop.f32.mrb[200].mxu1 }
0x1302   :  { %v10804_v3 = vpop.f32.mrb[201].mxu1 }
0x1303   :  { %v10806_v23 = vpop.f32.mrb[202].mxu1 }
0x1304   :  { %v10837_v46 = vpack.c.bf16 %v10806_v23, %v10802_v27  ;;  %v10808_v9 = vpop.f32.mrb[203].mxu1 }
0x1305   :  { %v10838_v30 = vpack.c.bf16 %v10808_v9, %v10804_v3 }
0x1306   :  { %10932 = vmatprep.subr.bf16.mxu0 %v10837_v46 }
0x1307   :  { %10933 = vmatpush1.bf16.msra.mxu0 %v15532_v24  ;;  %12383 = vmatpush3.bf16.msra.mxu1 %v10838_v30 }
0x130a   :  { %12194 = vmatmul.mubr.msk.bf16.vlgmr.msra.gmra.mrb[204].mxu0 %vm10840_vm13, %v10839_v2  ;;  %12385 = vmatmul.mubr.msk.bf16.vlgmr.msra.gmra.mrb[204].mxu1 %vm10840_vm13, %v10839_v2 }
0x13a1   :  { %v10878_v14 = vpop.f32.mrb[196].mxu0 }
0x13a2   :  { %v11013_v40 = vadd.f32 %v11011_v56, %v10878_v14  ;;  %v10880_v0 = vpop.f32.mrb[197].mxu0 }
0x13a3   :  { %v11014_v5 = vadd.f32 %v11011_v56, %v10880_v0  ;;  %v10882_v15 = vpop.f32.mrb[198].mxu0 }
0x13a4   :  { %13999 = vtanh.f32 %v11013_v40  ;;  %v10883_v63 = vpop.f32.mrb[199].mxu0 }
0x13a5   :  { %14001 = vtanh.f32 %v11014_v5 }
0x13ae   :  { %v14000_v48 = vpop.eup %13999 }
0x13af   :  { %v14002_v59 = vpop.eup %14001 }
0x13b0   :  { %v11034_v19 = vcombine.low %v14000_v48, %v14002_v59 }
0x13b1   :  { %v10919_v34 = vpop.f32.mrb[200].mxu0 }
0x13b2   :  { %v11015_v60 = vadd.f32 %v11011_v56, %v10919_v34  ;;  %v10921_v1 = vpop.f32.mrb[201].mxu0  ;;  %v11042_v54 = vrot.slane %v11034_v19, %v11041_v45 }
0x13b3   :  { %v11016_v62 = vadd.f32 %v11011_v56, %v10921_v1  ;;  %v10923_v58 = vpop.f32.mrb[202].mxu0 }
0x13b4   :  { %14003 = vtanh.f32 %v11015_v60  ;;  %v10924_v50 = vpop.f32.mrb[203].mxu0 }
0x13b5   :  { %14005 = vtanh.f32 %v11016_v62 }
0x13be   :  { %v14004_v43 = vpop.eup %14003 }
0x13bf   :  { %v14006_v47 = vpop.eup %14005 }
0x13c0   :  { %v11035_v22 = vcombine.low %v14004_v43, %v14006_v47 }
0x13c2   :  { %v11049_v53 = vrot.slane %v11035_v22, %v11041_v45 }
0x13c4   :  { %v11050_v52 = vcombine.low %v11042_v54, %v11049_v53 }
0x13c6   :  { %11069 = vst [vmem:[%s15533_s19] sm:$0xff] %v11050_v52 }
0x13dd   :  { %v10960_v41 = vpop.f32.mrb[204].mxu0  ;;  %v11001_v61 = vpop.f32.mrb[204].mxu1 }
0x13de   :  { %v11017_v37 = vadd.f32 %v11011_v56, %v10960_v41  ;;  %v11019_v35 = vadd.f32 %v11011_v56, %v11001_v61  ;;  %v10962_v38 = vpop.f32.mrb[205].mxu0  ;;  %v12386_v39 = vpop.f32.mrb[205].mxu1 }
0x13df   :  { %v11018_v26 = vadd.f32 %v11011_v56, %v10962_v38  ;;  %v10964_v32 = vpop.f32.mrb[206].mxu0  ;;  %v11004_v36 = vpop.f32.mrb[206].mxu1 }
0x13e0   :  { %14007 = vtanh.f32 %v11017_v37  ;;  %v10965_v49 = vpop.f32.mrb[207].mxu0  ;;  %v12387_v44 = vpop.f32.mrb[207].mxu1 }
0x13e1   :  { %14009 = vtanh.f32 %v11019_v35 }
0x13e2   :  { %14011 = vtanh.f32 %v11018_v26 }
0x13ea   :  { %v14008_v57 = vpop.eup %14007 }
0x13eb   :  { %v14010_v18 = vpop.eup %14009 }
0x13ec   :  { %v14012_v28 = vpop.eup %14011  ;;  %v11065_v55 = vrot.slane %v14010_v18, %v11041_v45 }
0x13ed   :  { %v11051_v31 = vcombine.low %v14008_v57, %v14012_v28 }
0x13ef   :  { %v11058_v8 = vrot.slane %v11051_v31, %v11041_v45 }
0x13f1   :  { %v11066_v42 = vcombine.low %v11058_v8, %v11065_v55 }
0x13f3   :  { %11074 = vst.msk [vmem:[%s15533_s19 + $0x8] sm:$0x3f] %vm11073_vm1, %v11066_v42 }
0x13f4   :  { %11079 = vsyncpa [#allocation3], 1 }
0x13f5   :  { %11080 = vsyncpa [#allocation5], 1 }
0x13f6   :  { %11081 = vsyncpa [#allocation8], 1 }
0x13f7   :  { %11082 = vsyncpa [#allocation11], 1 }
0x13f8   :  { %11083 = vsyncpa [#allocation14], 1 }
0x13f9   :  { %11084 = vsyncpa [#allocation17], 1 }

</bundles_post_ra>
